<compile_context>
chip_gen: v7x
topology: tpu7x:2x2x1
jax: 0.10.0
libtpu: 0.0.40
codegen_flags: <defaults>
</compile_context>

<pallas_src>
import jax
import jax.numpy as jnp
from jax import lax
from jax.experimental import pallas as pl
from jax.experimental.pallas import tpu as pltpu


BN = 128  # batch tile = one full lane width


# ---------------------------------------------------------------------------
# Fused Pallas kernel: conv1+ReLU -> maxpool2 -> conv2+ReLU -> flatten -> FC
#                      -> softmax, one 128-sample lane tile per grid step.
# ---------------------------------------------------------------------------
def _classicnet_kernel(x_ref, w1_ref, b1_ref, w2_ref, b2_ref, wf_ref, bf_ref,
                       o_ref):
    # x_ref : (9, 9, BN) f32 VMEM block -- (H, W, batch-on-lanes)
    # w1_ref: (96,) f32 SMEM, index = oc*16 + dy*4 + dx      (Conv2d(1,6,4))
    # b1_ref: (6,)  f32 SMEM
    # w2_ref: (72,) f32 SMEM, index = c*24 + ic*4 + ty*2 + tx (Conv2d(6,3,2))
    # b2_ref: (3,)  f32 SMEM
    # wf_ref: (24,) f32 SMEM, index = k*12 + j                (Linear(12,2))
    # bf_ref: (2,)  f32 SMEM
    # o_ref : (2, BN) f32 VMEM block -- (class, batch-on-lanes), lane-dense
    bn = x_ref.shape[-1]
    x = x_ref[...]                                            # (9, 9, bn)

    # ---- conv1 (1->6, k=4) + ReLU: 16 taps x 6 channels of lane-wide FMAs ---
    acc1 = [jnp.zeros((6, 6, bn), jnp.float32) for _ in range(6)]
    for dy in range(4):
        for dx in range(4):
            tap = x[dy:dy + 6, dx:dx + 6, :]                  # (6, 6, bn)
            for oc in range(6):
                acc1[oc] = acc1[oc] + tap * w1_ref[oc * 16 + dy * 4 + dx]
    h1 = [jnp.maximum(a + b1_ref[oc], 0.0) for oc, a in enumerate(acc1)]

    # ---- max_pool2d(2): (6,6,bn) -> 3x3 grid of (1, bn) lane vectors --------
    pool = []
    for ic in range(6):
        rows = []
        for py in range(3):
            rmax = jnp.maximum(h1[ic][2 * py], h1[ic][2 * py + 1])   # (6, bn)
            rows.append([jnp.maximum(rmax[2 * px:2 * px + 1, :],
                                     rmax[2 * px + 1:2 * px + 2, :])  # (1, bn)
                         for px in range(3)])
        pool.append(rows)

    # ---- conv2 (6->3, k=2) + ReLU, fully unrolled over the 2x2 output -------
    # feats[j], j = c*4 + qy*2 + qx  == PyTorch NCHW .view(N, -1) order.
    feats = []
    for c in range(3):
        for qy in range(2):
            for qx in range(2):
                acc = jnp.zeros((1, bn), jnp.float32) + b2_ref[c]
                for ic in range(6):
                    for ty in range(2):
                        for tx in range(2):
                            w = w2_ref[c * 24 + ic * 4 + ty * 2 + tx]
                            acc = acc + pool[ic][qy + ty][qx + tx] * w
                feats.append(jnp.maximum(acc, 0.0))

    # ---- fc1 (12 -> 2) + Softmax(dim=1) --------------------------------------
    logits = []
    for k in range(2):
        l = jnp.zeros((1, bn), jnp.float32) + bf_ref[k]
        for j in range(12):
            l = l + feats[j] * wf_ref[k * 12 + j]
        logits.append(l)

    m = jnp.maximum(logits[0], logits[1])
    e0 = jnp.exp(logits[0] - m)
    e1 = jnp.exp(logits[1] - m)
    inv = pl.reciprocal(e0 + e1, approx=True)                 # EUP slot, ~free
    o_ref[0:1, :] = e0 * inv
    o_ref[1:2, :] = e1 * inv


# ---------------------------------------------------------------------------
# Wrapper: weight pre-packing (done once, outside the forward) + pallas_call.
# ---------------------------------------------------------------------------
def pack_params(params):
    """Repack PyTorch-layout params into flat f32 arrays matching the kernel's
    unrolled indexing. Call once at init time, not per forward."""
    w1, b1, w2, b2, wf, bf = params
    return (jnp.asarray(w1, jnp.float32).reshape(-1),   # (96,)  oc*16+dy*4+dx
            jnp.asarray(b1, jnp.float32),               # (6,)
            jnp.asarray(w2, jnp.float32).reshape(-1),   # (72,)  c*24+ic*4+ty*2+tx
            jnp.asarray(b2, jnp.float32),               # (3,)
            jnp.asarray(wf, jnp.float32).reshape(-1),   # (24,)  k*12+j
            jnp.asarray(bf, jnp.float32))               # (2,)


_SMEM_SPEC = pl.BlockSpec(memory_space=pltpu.MemorySpace.SMEM)


@jax.jit
def classicnet_forward(x_nchw, packed_params):
    """x_nchw: (N, 1, 9, 9) float32 -> softmax probabilities (N, 2)."""
    n = x_nchw.shape[0]
    n_pad = ((n + BN - 1) // BN) * BN                    # pad batch to lane tile
    x = x_nchw.astype(jnp.float32).reshape(n, 9, 9)
    x = jnp.transpose(x, (1, 2, 0))                      # (9, 9, N): batch on lanes
    if n_pad != n:
        x = jnp.pad(x, ((0, 0), (0, 0), (0, n_pad - n)))

    out = pl.pallas_call(
        _classicnet_kernel,
        out_shape=jax.ShapeDtypeStruct((2, n_pad), jnp.float32),
        grid=(n_pad // BN,),
        in_specs=[pl.BlockSpec((9, 9, BN), lambda i: (0, 0, i)),
                  _SMEM_SPEC, _SMEM_SPEC, _SMEM_SPEC,
                  _SMEM_SPEC, _SMEM_SPEC, _SMEM_SPEC],
        out_specs=pl.BlockSpec((2, BN), lambda i: (0, i)),
        compiler_params=pltpu.CompilerParams(
            dimension_semantics=("parallel",)),          # v7x: split tiles over 2 TCs
    )(x, *packed_params)
    return out[:, :n].T                                  # (N, 2)


# ---------------------------------------------------------------------------
# Deterministic parameter init (PyTorch-like uniform(-1/sqrt(fan_in), ...))
# ---------------------------------------------------------------------------
def init_params(key):
    ks = jax.random.split(key, 6)

    def uni(k, shape, fan_in):
        bound = 1.0 / jnp.sqrt(jnp.float32(fan_in))
        return jax.random.uniform(k, shape, jnp.float32, -bound, bound)

    w1 = uni(ks[0], (6, 1, 4, 4), 1 * 4 * 4)
    b1 = uni(ks[1], (6,), 1 * 4 * 4)
    w2 = uni(ks[2], (3, 6, 2, 2), 6 * 2 * 2)
    b2 = uni(ks[3], (3,), 6 * 2 * 2)
    wf = uni(ks[4], (2, 12), 12)
    bf = uni(ks[5], (2,), 12)
    return (w1, b1, w2, b2, wf, bf)


# ---------------------------------------------------------------------------
# Pure-JAX reference (for correctness check)
# ---------------------------------------------------------------------------
def reference_forward(x_nchw, params):
    w1, b1, w2, b2, wf, bf = params
    dn1 = lax.conv_dimension_numbers(x_nchw.shape, w1.shape,
                                     ('NCHW', 'OIHW', 'NCHW'))
    h = lax.conv_general_dilated(x_nchw, w1, (1, 1), 'VALID',
                                 dimension_numbers=dn1)
    h = jax.nn.relu(h + b1[None, :, None, None])
    h = lax.reduce_window(h, -jnp.inf, lax.max, (1, 1, 2, 2), (1, 1, 2, 2),
                          'VALID')
    dn2 = lax.conv_dimension_numbers(h.shape, w2.shape,
                                     ('NCHW', 'OIHW', 'NCHW'))
    h = lax.conv_general_dilated(h, w2, (1, 1), 'VALID',
                                 dimension_numbers=dn2)
    h = jax.nn.relu(h + b2[None, :, None, None])
    h = h.reshape(h.shape[0], -1)
    logits = h @ wf.T + bf
    return jax.nn.softmax(logits, axis=1)


if __name__ == "__main__":
    key = jax.random.PRNGKey(0)
    k_param, k_x = jax.random.split(key)
    params = init_params(k_param)
    packed = pack_params(params)          # pre-packed once, outside the forward
    # Input must be (N, 1, 9, 9) so that flatten yields exactly 12 features.
    x = jax.random.normal(k_x, (2, 1, 9, 9), jnp.float32)

    out = jax.block_until_ready(classicnet_forward(x, packed))
    ref = jax.block_until_ready(reference_forward(x, params))

    assert out.shape == (2, 2), out.shape
    # Tolerance 1e-3: the softmax denominator uses the EUP approximate
    # reciprocal; everything else matches to ~1e-6.
    assert jnp.allclose(out, ref, atol=1e-3, rtol=1e-3), (out, ref)
    assert jnp.allclose(out.sum(axis=1), 1.0, atol=1e-3)

    print("KERNEL_OK")
</pallas_src>

<mosaic_0001>
module attributes {stable_mosaic.version = 11 : i64} {
  func.func @_classicnet_kernel(%arg0: i32, %arg1: memref<9x9x128xf32, #tpu.memory_space<vmem>>, %arg2: memref<96xf32, #tpu.memory_space<smem>>, %arg3: memref<6xf32, #tpu.memory_space<smem>>, %arg4: memref<72xf32, #tpu.memory_space<smem>>, %arg5: memref<3xf32, #tpu.memory_space<smem>>, %arg6: memref<24xf32, #tpu.memory_space<smem>>, %arg7: memref<2xf32, #tpu.memory_space<smem>>, %arg8: memref<2x128xf32, #tpu.memory_space<vmem>>) attributes {dimension_semantics = [#tpu.dimension_semantics<parallel>], iteration_bounds = array<i64: 1>, scalar_prefetch = 0 : i64, scratch_operands = 0 : i64, tpu.core_type = #tpu.core_type<tc>, window_params = [{transform_indices = @transform_0, window_bounds = array<i64: 9, 9, 128>}, {transform_indices = @transform_1, window_bounds = array<i64: 96>}, {transform_indices = @transform_2, window_bounds = array<i64: 6>}, {transform_indices = @transform_3, window_bounds = array<i64: 72>}, {transform_indices = @transform_4, window_bounds = array<i64: 3>}, {transform_indices = @transform_5, window_bounds = array<i64: 24>}, {transform_indices = @transform_6, window_bounds = array<i64: 2>}, {transform_indices = @transform_7, window_bounds = array<i64: 2, 128>}]} {
    %c0 = arith.constant 0 : index
    %c0_0 = arith.constant 0 : index
    %c0_1 = arith.constant 0 : index
    %0 = vector.load %arg1[%c0, %c0_0, %c0_1] : memref<9x9x128xf32, #tpu.memory_space<vmem>>, vector<9x9x128xf32>
    %cst = arith.constant 0.000000e+00 : f32
    %1 = vector.broadcast %cst : f32 to vector<6x6x128xf32>
    %cst_2 = arith.constant 0.000000e+00 : f32
    %2 = vector.broadcast %cst_2 : f32 to vector<6x6x128xf32>
    %cst_3 = arith.constant 0.000000e+00 : f32
    %3 = vector.broadcast %cst_3 : f32 to vector<6x6x128xf32>
    %cst_4 = arith.constant 0.000000e+00 : f32
    %4 = vector.broadcast %cst_4 : f32 to vector<6x6x128xf32>
    %cst_5 = arith.constant 0.000000e+00 : f32
    %5 = vector.broadcast %cst_5 : f32 to vector<6x6x128xf32>
    %cst_6 = arith.constant 0.000000e+00 : f32
    %6 = vector.broadcast %cst_6 : f32 to vector<6x6x128xf32>
    %7 = vector.extract_strided_slice %0 {offsets = [0, 0, 0], sizes = [6, 6, 128], strides = [1, 1, 1]} : vector<9x9x128xf32> to vector<6x6x128xf32>
    %c0_7 = arith.constant 0 : index
    %8 = memref.load %arg2[%c0_7] : memref<96xf32, #tpu.memory_space<smem>>
    %9 = vector.broadcast %8 : f32 to vector<6x6x128xf32>
    %10 = arith.mulf %7, %9 : vector<6x6x128xf32>
    %11 = arith.addf %1, %10 : vector<6x6x128xf32>
    %c16 = arith.constant 16 : index
    %12 = memref.load %arg2[%c16] : memref<96xf32, #tpu.memory_space<smem>>
    %13 = vector.broadcast %12 : f32 to vector<6x6x128xf32>
    %14 = arith.mulf %7, %13 : vector<6x6x128xf32>
    %15 = arith.addf %2, %14 : vector<6x6x128xf32>
    %c32 = arith.constant 32 : index
    %16 = memref.load %arg2[%c32] : memref<96xf32, #tpu.memory_space<smem>>
    %17 = vector.broadcast %16 : f32 to vector<6x6x128xf32>
    %18 = arith.mulf %7, %17 : vector<6x6x128xf32>
    %19 = arith.addf %3, %18 : vector<6x6x128xf32>
    %c48 = arith.constant 48 : index
    %20 = memref.load %arg2[%c48] : memref<96xf32, #tpu.memory_space<smem>>
    %21 = vector.broadcast %20 : f32 to vector<6x6x128xf32>
    %22 = arith.mulf %7, %21 : vector<6x6x128xf32>
    %23 = arith.addf %4, %22 : vector<6x6x128xf32>
    %c64 = arith.constant 64 : index
    %24 = memref.load %arg2[%c64] : memref<96xf32, #tpu.memory_space<smem>>
    %25 = vector.broadcast %24 : f32 to vector<6x6x128xf32>
    %26 = arith.mulf %7, %25 : vector<6x6x128xf32>
    %27 = arith.addf %5, %26 : vector<6x6x128xf32>
    %c80 = arith.constant 80 : index
    %28 = memref.load %arg2[%c80] : memref<96xf32, #tpu.memory_space<smem>>
    %29 = vector.broadcast %28 : f32 to vector<6x6x128xf32>
    %30 = arith.mulf %7, %29 : vector<6x6x128xf32>
    %31 = arith.addf %6, %30 : vector<6x6x128xf32>
    %32 = vector.extract_strided_slice %0 {offsets = [0, 1, 0], sizes = [6, 6, 128], strides = [1, 1, 1]} : vector<9x9x128xf32> to vector<6x6x128xf32>
    %c1 = arith.constant 1 : index
    %33 = memref.load %arg2[%c1] : memref<96xf32, #tpu.memory_space<smem>>
    %34 = vector.broadcast %33 : f32 to vector<6x6x128xf32>
    %35 = arith.mulf %32, %34 : vector<6x6x128xf32>
    %36 = arith.addf %11, %35 : vector<6x6x128xf32>
    %c17 = arith.constant 17 : index
    %37 = memref.load %arg2[%c17] : memref<96xf32, #tpu.memory_space<smem>>
    %38 = vector.broadcast %37 : f32 to vector<6x6x128xf32>
    %39 = arith.mulf %32, %38 : vector<6x6x128xf32>
    %40 = arith.addf %15, %39 : vector<6x6x128xf32>
    %c33 = arith.constant 33 : index
    %41 = memref.load %arg2[%c33] : memref<96xf32, #tpu.memory_space<smem>>
    %42 = vector.broadcast %41 : f32 to vector<6x6x128xf32>
    %43 = arith.mulf %32, %42 : vector<6x6x128xf32>
    %44 = arith.addf %19, %43 : vector<6x6x128xf32>
    %c49 = arith.constant 49 : index
    %45 = memref.load %arg2[%c49] : memref<96xf32, #tpu.memory_space<smem>>
    %46 = vector.broadcast %45 : f32 to vector<6x6x128xf32>
    %47 = arith.mulf %32, %46 : vector<6x6x128xf32>
    %48 = arith.addf %23, %47 : vector<6x6x128xf32>
    %c65 = arith.constant 65 : index
    %49 = memref.load %arg2[%c65] : memref<96xf32, #tpu.memory_space<smem>>
    %50 = vector.broadcast %49 : f32 to vector<6x6x128xf32>
    %51 = arith.mulf %32, %50 : vector<6x6x128xf32>
    %52 = arith.addf %27, %51 : vector<6x6x128xf32>
    %c81 = arith.constant 81 : index
    %53 = memref.load %arg2[%c81] : memref<96xf32, #tpu.memory_space<smem>>
    %54 = vector.broadcast %53 : f32 to vector<6x6x128xf32>
    %55 = arith.mulf %32, %54 : vector<6x6x128xf32>
    %56 = arith.addf %31, %55 : vector<6x6x128xf32>
    %57 = vector.extract_strided_slice %0 {offsets = [0, 2, 0], sizes = [6, 6, 128], strides = [1, 1, 1]} : vector<9x9x128xf32> to vector<6x6x128xf32>
    %c2 = arith.constant 2 : index
    %58 = memref.load %arg2[%c2] : memref<96xf32, #tpu.memory_space<smem>>
    %59 = vector.broadcast %58 : f32 to vector<6x6x128xf32>
    %60 = arith.mulf %57, %59 : vector<6x6x128xf32>
    %61 = arith.addf %36, %60 : vector<6x6x128xf32>
    %c18 = arith.constant 18 : index
    %62 = memref.load %arg2[%c18] : memref<96xf32, #tpu.memory_space<smem>>
    %63 = vector.broadcast %62 : f32 to vector<6x6x128xf32>
    %64 = arith.mulf %57, %63 : vector<6x6x128xf32>
    %65 = arith.addf %40, %64 : vector<6x6x128xf32>
    %c34 = arith.constant 34 : index
    %66 = memref.load %arg2[%c34] : memref<96xf32, #tpu.memory_space<smem>>
    %67 = vector.broadcast %66 : f32 to vector<6x6x128xf32>
    %68 = arith.mulf %57, %67 : vector<6x6x128xf32>
    %69 = arith.addf %44, %68 : vector<6x6x128xf32>
    %c50 = arith.constant 50 : index
    %70 = memref.load %arg2[%c50] : memref<96xf32, #tpu.memory_space<smem>>
    %71 = vector.broadcast %70 : f32 to vector<6x6x128xf32>
    %72 = arith.mulf %57, %71 : vector<6x6x128xf32>
    %73 = arith.addf %48, %72 : vector<6x6x128xf32>
    %c66 = arith.constant 66 : index
    %74 = memref.load %arg2[%c66] : memref<96xf32, #tpu.memory_space<smem>>
    %75 = vector.broadcast %74 : f32 to vector<6x6x128xf32>
    %76 = arith.mulf %57, %75 : vector<6x6x128xf32>
    %77 = arith.addf %52, %76 : vector<6x6x128xf32>
    %c82 = arith.constant 82 : index
    %78 = memref.load %arg2[%c82] : memref<96xf32, #tpu.memory_space<smem>>
    %79 = vector.broadcast %78 : f32 to vector<6x6x128xf32>
    %80 = arith.mulf %57, %79 : vector<6x6x128xf32>
    %81 = arith.addf %56, %80 : vector<6x6x128xf32>
    %82 = vector.extract_strided_slice %0 {offsets = [0, 3, 0], sizes = [6, 6, 128], strides = [1, 1, 1]} : vector<9x9x128xf32> to vector<6x6x128xf32>
    %c3 = arith.constant 3 : index
    %83 = memref.load %arg2[%c3] : memref<96xf32, #tpu.memory_space<smem>>
    %84 = vector.broadcast %83 : f32 to vector<6x6x128xf32>
    %85 = arith.mulf %82, %84 : vector<6x6x128xf32>
    %86 = arith.addf %61, %85 : vector<6x6x128xf32>
    %c19 = arith.constant 19 : index
    %87 = memref.load %arg2[%c19] : memref<96xf32, #tpu.memory_space<smem>>
    %88 = vector.broadcast %87 : f32 to vector<6x6x128xf32>
    %89 = arith.mulf %82, %88 : vector<6x6x128xf32>
    %90 = arith.addf %65, %89 : vector<6x6x128xf32>
    %c35 = arith.constant 35 : index
    %91 = memref.load %arg2[%c35] : memref<96xf32, #tpu.memory_space<smem>>
    %92 = vector.broadcast %91 : f32 to vector<6x6x128xf32>
    %93 = arith.mulf %82, %92 : vector<6x6x128xf32>
    %94 = arith.addf %69, %93 : vector<6x6x128xf32>
    %c51 = arith.constant 51 : index
    %95 = memref.load %arg2[%c51] : memref<96xf32, #tpu.memory_space<smem>>
    %96 = vector.broadcast %95 : f32 to vector<6x6x128xf32>
    %97 = arith.mulf %82, %96 : vector<6x6x128xf32>
    %98 = arith.addf %73, %97 : vector<6x6x128xf32>
    %c67 = arith.constant 67 : index
    %99 = memref.load %arg2[%c67] : memref<96xf32, #tpu.memory_space<smem>>
    %100 = vector.broadcast %99 : f32 to vector<6x6x128xf32>
    %101 = arith.mulf %82, %100 : vector<6x6x128xf32>
    %102 = arith.addf %77, %101 : vector<6x6x128xf32>
    %c83 = arith.constant 83 : index
    %103 = memref.load %arg2[%c83] : memref<96xf32, #tpu.memory_space<smem>>
    %104 = vector.broadcast %103 : f32 to vector<6x6x128xf32>
    %105 = arith.mulf %82, %104 : vector<6x6x128xf32>
    %106 = arith.addf %81, %105 : vector<6x6x128xf32>
    %107 = vector.extract_strided_slice %0 {offsets = [1, 0, 0], sizes = [6, 6, 128], strides = [1, 1, 1]} : vector<9x9x128xf32> to vector<6x6x128xf32>
    %c4 = arith.constant 4 : index
    %108 = memref.load %arg2[%c4] : memref<96xf32, #tpu.memory_space<smem>>
    %109 = vector.broadcast %108 : f32 to vector<6x6x128xf32>
    %110 = arith.mulf %107, %109 : vector<6x6x128xf32>
    %111 = arith.addf %86, %110 : vector<6x6x128xf32>
    %c20 = arith.constant 20 : index
    %112 = memref.load %arg2[%c20] : memref<96xf32, #tpu.memory_space<smem>>
    %113 = vector.broadcast %112 : f32 to vector<6x6x128xf32>
    %114 = arith.mulf %107, %113 : vector<6x6x128xf32>
    %115 = arith.addf %90, %114 : vector<6x6x128xf32>
    %c36 = arith.constant 36 : index
    %116 = memref.load %arg2[%c36] : memref<96xf32, #tpu.memory_space<smem>>
    %117 = vector.broadcast %116 : f32 to vector<6x6x128xf32>
    %118 = arith.mulf %107, %117 : vector<6x6x128xf32>
    %119 = arith.addf %94, %118 : vector<6x6x128xf32>
    %c52 = arith.constant 52 : index
    %120 = memref.load %arg2[%c52] : memref<96xf32, #tpu.memory_space<smem>>
    %121 = vector.broadcast %120 : f32 to vector<6x6x128xf32>
    %122 = arith.mulf %107, %121 : vector<6x6x128xf32>
    %123 = arith.addf %98, %122 : vector<6x6x128xf32>
    %c68 = arith.constant 68 : index
    %124 = memref.load %arg2[%c68] : memref<96xf32, #tpu.memory_space<smem>>
    %125 = vector.broadcast %124 : f32 to vector<6x6x128xf32>
    %126 = arith.mulf %107, %125 : vector<6x6x128xf32>
    %127 = arith.addf %102, %126 : vector<6x6x128xf32>
    %c84 = arith.constant 84 : index
    %128 = memref.load %arg2[%c84] : memref<96xf32, #tpu.memory_space<smem>>
    %129 = vector.broadcast %128 : f32 to vector<6x6x128xf32>
    %130 = arith.mulf %107, %129 : vector<6x6x128xf32>
    %131 = arith.addf %106, %130 : vector<6x6x128xf32>
    %132 = vector.extract_strided_slice %0 {offsets = [1, 1, 0], sizes = [6, 6, 128], strides = [1, 1, 1]} : vector<9x9x128xf32> to vector<6x6x128xf32>
    %c5 = arith.constant 5 : index
    %133 = memref.load %arg2[%c5] : memref<96xf32, #tpu.memory_space<smem>>
    %134 = vector.broadcast %133 : f32 to vector<6x6x128xf32>
    %135 = arith.mulf %132, %134 : vector<6x6x128xf32>
    %136 = arith.addf %111, %135 : vector<6x6x128xf32>
    %c21 = arith.constant 21 : index
    %137 = memref.load %arg2[%c21] : memref<96xf32, #tpu.memory_space<smem>>
    %138 = vector.broadcast %137 : f32 to vector<6x6x128xf32>
    %139 = arith.mulf %132, %138 : vector<6x6x128xf32>
    %140 = arith.addf %115, %139 : vector<6x6x128xf32>
    %c37 = arith.constant 37 : index
    %141 = memref.load %arg2[%c37] : memref<96xf32, #tpu.memory_space<smem>>
    %142 = vector.broadcast %141 : f32 to vector<6x6x128xf32>
    %143 = arith.mulf %132, %142 : vector<6x6x128xf32>
    %144 = arith.addf %119, %143 : vector<6x6x128xf32>
    %c53 = arith.constant 53 : index
    %145 = memref.load %arg2[%c53] : memref<96xf32, #tpu.memory_space<smem>>
    %146 = vector.broadcast %145 : f32 to vector<6x6x128xf32>
    %147 = arith.mulf %132, %146 : vector<6x6x128xf32>
    %148 = arith.addf %123, %147 : vector<6x6x128xf32>
    %c69 = arith.constant 69 : index
    %149 = memref.load %arg2[%c69] : memref<96xf32, #tpu.memory_space<smem>>
    %150 = vector.broadcast %149 : f32 to vector<6x6x128xf32>
    %151 = arith.mulf %132, %150 : vector<6x6x128xf32>
    %152 = arith.addf %127, %151 : vector<6x6x128xf32>
    %c85 = arith.constant 85 : index
    %153 = memref.load %arg2[%c85] : memref<96xf32, #tpu.memory_space<smem>>
    %154 = vector.broadcast %153 : f32 to vector<6x6x128xf32>
    %155 = arith.mulf %132, %154 : vector<6x6x128xf32>
    %156 = arith.addf %131, %155 : vector<6x6x128xf32>
    %157 = vector.extract_strided_slice %0 {offsets = [1, 2, 0], sizes = [6, 6, 128], strides = [1, 1, 1]} : vector<9x9x128xf32> to vector<6x6x128xf32>
    %c6 = arith.constant 6 : index
    %158 = memref.load %arg2[%c6] : memref<96xf32, #tpu.memory_space<smem>>
    %159 = vector.broadcast %158 : f32 to vector<6x6x128xf32>
    %160 = arith.mulf %157, %159 : vector<6x6x128xf32>
    %161 = arith.addf %136, %160 : vector<6x6x128xf32>
    %c22 = arith.constant 22 : index
    %162 = memref.load %arg2[%c22] : memref<96xf32, #tpu.memory_space<smem>>
    %163 = vector.broadcast %162 : f32 to vector<6x6x128xf32>
    %164 = arith.mulf %157, %163 : vector<6x6x128xf32>
    %165 = arith.addf %140, %164 : vector<6x6x128xf32>
    %c38 = arith.constant 38 : index
    %166 = memref.load %arg2[%c38] : memref<96xf32, #tpu.memory_space<smem>>
    %167 = vector.broadcast %166 : f32 to vector<6x6x128xf32>
    %168 = arith.mulf %157, %167 : vector<6x6x128xf32>
    %169 = arith.addf %144, %168 : vector<6x6x128xf32>
    %c54 = arith.constant 54 : index
    %170 = memref.load %arg2[%c54] : memref<96xf32, #tpu.memory_space<smem>>
    %171 = vector.broadcast %170 : f32 to vector<6x6x128xf32>
    %172 = arith.mulf %157, %171 : vector<6x6x128xf32>
    %173 = arith.addf %148, %172 : vector<6x6x128xf32>
    %c70 = arith.constant 70 : index
    %174 = memref.load %arg2[%c70] : memref<96xf32, #tpu.memory_space<smem>>
    %175 = vector.broadcast %174 : f32 to vector<6x6x128xf32>
    %176 = arith.mulf %157, %175 : vector<6x6x128xf32>
    %177 = arith.addf %152, %176 : vector<6x6x128xf32>
    %c86 = arith.constant 86 : index
    %178 = memref.load %arg2[%c86] : memref<96xf32, #tpu.memory_space<smem>>
    %179 = vector.broadcast %178 : f32 to vector<6x6x128xf32>
    %180 = arith.mulf %157, %179 : vector<6x6x128xf32>
    %181 = arith.addf %156, %180 : vector<6x6x128xf32>
    %182 = vector.extract_strided_slice %0 {offsets = [1, 3, 0], sizes = [6, 6, 128], strides = [1, 1, 1]} : vector<9x9x128xf32> to vector<6x6x128xf32>
    %c7 = arith.constant 7 : index
    %183 = memref.load %arg2[%c7] : memref<96xf32, #tpu.memory_space<smem>>
    %184 = vector.broadcast %183 : f32 to vector<6x6x128xf32>
    %185 = arith.mulf %182, %184 : vector<6x6x128xf32>
    %186 = arith.addf %161, %185 : vector<6x6x128xf32>
    %c23 = arith.constant 23 : index
    %187 = memref.load %arg2[%c23] : memref<96xf32, #tpu.memory_space<smem>>
    %188 = vector.broadcast %187 : f32 to vector<6x6x128xf32>
    %189 = arith.mulf %182, %188 : vector<6x6x128xf32>
    %190 = arith.addf %165, %189 : vector<6x6x128xf32>
    %c39 = arith.constant 39 : index
    %191 = memref.load %arg2[%c39] : memref<96xf32, #tpu.memory_space<smem>>
    %192 = vector.broadcast %191 : f32 to vector<6x6x128xf32>
    %193 = arith.mulf %182, %192 : vector<6x6x128xf32>
    %194 = arith.addf %169, %193 : vector<6x6x128xf32>
    %c55 = arith.constant 55 : index
    %195 = memref.load %arg2[%c55] : memref<96xf32, #tpu.memory_space<smem>>
    %196 = vector.broadcast %195 : f32 to vector<6x6x128xf32>
    %197 = arith.mulf %182, %196 : vector<6x6x128xf32>
    %198 = arith.addf %173, %197 : vector<6x6x128xf32>
    %c71 = arith.constant 71 : index
    %199 = memref.load %arg2[%c71] : memref<96xf32, #tpu.memory_space<smem>>
    %200 = vector.broadcast %199 : f32 to vector<6x6x128xf32>
    %201 = arith.mulf %182, %200 : vector<6x6x128xf32>
    %202 = arith.addf %177, %201 : vector<6x6x128xf32>
    %c87 = arith.constant 87 : index
    %203 = memref.load %arg2[%c87] : memref<96xf32, #tpu.memory_space<smem>>
    %204 = vector.broadcast %203 : f32 to vector<6x6x128xf32>
    %205 = arith.mulf %182, %204 : vector<6x6x128xf32>
    %206 = arith.addf %181, %205 : vector<6x6x128xf32>
    %207 = vector.extract_strided_slice %0 {offsets = [2, 0, 0], sizes = [6, 6, 128], strides = [1, 1, 1]} : vector<9x9x128xf32> to vector<6x6x128xf32>
    %c8 = arith.constant 8 : index
    %208 = memref.load %arg2[%c8] : memref<96xf32, #tpu.memory_space<smem>>
    %209 = vector.broadcast %208 : f32 to vector<6x6x128xf32>
    %210 = arith.mulf %207, %209 : vector<6x6x128xf32>
    %211 = arith.addf %186, %210 : vector<6x6x128xf32>
    %c24 = arith.constant 24 : index
    %212 = memref.load %arg2[%c24] : memref<96xf32, #tpu.memory_space<smem>>
    %213 = vector.broadcast %212 : f32 to vector<6x6x128xf32>
    %214 = arith.mulf %207, %213 : vector<6x6x128xf32>
    %215 = arith.addf %190, %214 : vector<6x6x128xf32>
    %c40 = arith.constant 40 : index
    %216 = memref.load %arg2[%c40] : memref<96xf32, #tpu.memory_space<smem>>
    %217 = vector.broadcast %216 : f32 to vector<6x6x128xf32>
    %218 = arith.mulf %207, %217 : vector<6x6x128xf32>
    %219 = arith.addf %194, %218 : vector<6x6x128xf32>
    %c56 = arith.constant 56 : index
    %220 = memref.load %arg2[%c56] : memref<96xf32, #tpu.memory_space<smem>>
    %221 = vector.broadcast %220 : f32 to vector<6x6x128xf32>
    %222 = arith.mulf %207, %221 : vector<6x6x128xf32>
    %223 = arith.addf %198, %222 : vector<6x6x128xf32>
    %c72 = arith.constant 72 : index
    %224 = memref.load %arg2[%c72] : memref<96xf32, #tpu.memory_space<smem>>
    %225 = vector.broadcast %224 : f32 to vector<6x6x128xf32>
    %226 = arith.mulf %207, %225 : vector<6x6x128xf32>
    %227 = arith.addf %202, %226 : vector<6x6x128xf32>
    %c88 = arith.constant 88 : index
    %228 = memref.load %arg2[%c88] : memref<96xf32, #tpu.memory_space<smem>>
    %229 = vector.broadcast %228 : f32 to vector<6x6x128xf32>
    %230 = arith.mulf %207, %229 : vector<6x6x128xf32>
    %231 = arith.addf %206, %230 : vector<6x6x128xf32>
    %232 = vector.extract_strided_slice %0 {offsets = [2, 1, 0], sizes = [6, 6, 128], strides = [1, 1, 1]} : vector<9x9x128xf32> to vector<6x6x128xf32>
    %c9 = arith.constant 9 : index
    %233 = memref.load %arg2[%c9] : memref<96xf32, #tpu.memory_space<smem>>
    %234 = vector.broadcast %233 : f32 to vector<6x6x128xf32>
    %235 = arith.mulf %232, %234 : vector<6x6x128xf32>
    %236 = arith.addf %211, %235 : vector<6x6x128xf32>
    %c25 = arith.constant 25 : index
    %237 = memref.load %arg2[%c25] : memref<96xf32, #tpu.memory_space<smem>>
    %238 = vector.broadcast %237 : f32 to vector<6x6x128xf32>
    %239 = arith.mulf %232, %238 : vector<6x6x128xf32>
    %240 = arith.addf %215, %239 : vector<6x6x128xf32>
    %c41 = arith.constant 41 : index
    %241 = memref.load %arg2[%c41] : memref<96xf32, #tpu.memory_space<smem>>
    %242 = vector.broadcast %241 : f32 to vector<6x6x128xf32>
    %243 = arith.mulf %232, %242 : vector<6x6x128xf32>
    %244 = arith.addf %219, %243 : vector<6x6x128xf32>
    %c57 = arith.constant 57 : index
    %245 = memref.load %arg2[%c57] : memref<96xf32, #tpu.memory_space<smem>>
    %246 = vector.broadcast %245 : f32 to vector<6x6x128xf32>
    %247 = arith.mulf %232, %246 : vector<6x6x128xf32>
    %248 = arith.addf %223, %247 : vector<6x6x128xf32>
    %c73 = arith.constant 73 : index
    %249 = memref.load %arg2[%c73] : memref<96xf32, #tpu.memory_space<smem>>
    %250 = vector.broadcast %249 : f32 to vector<6x6x128xf32>
    %251 = arith.mulf %232, %250 : vector<6x6x128xf32>
    %252 = arith.addf %227, %251 : vector<6x6x128xf32>
    %c89 = arith.constant 89 : index
    %253 = memref.load %arg2[%c89] : memref<96xf32, #tpu.memory_space<smem>>
    %254 = vector.broadcast %253 : f32 to vector<6x6x128xf32>
    %255 = arith.mulf %232, %254 : vector<6x6x128xf32>
    %256 = arith.addf %231, %255 : vector<6x6x128xf32>
    %257 = vector.extract_strided_slice %0 {offsets = [2, 2, 0], sizes = [6, 6, 128], strides = [1, 1, 1]} : vector<9x9x128xf32> to vector<6x6x128xf32>
    %c10 = arith.constant 10 : index
    %258 = memref.load %arg2[%c10] : memref<96xf32, #tpu.memory_space<smem>>
    %259 = vector.broadcast %258 : f32 to vector<6x6x128xf32>
    %260 = arith.mulf %257, %259 : vector<6x6x128xf32>
    %261 = arith.addf %236, %260 : vector<6x6x128xf32>
    %c26 = arith.constant 26 : index
    %262 = memref.load %arg2[%c26] : memref<96xf32, #tpu.memory_space<smem>>
    %263 = vector.broadcast %262 : f32 to vector<6x6x128xf32>
    %264 = arith.mulf %257, %263 : vector<6x6x128xf32>
    %265 = arith.addf %240, %264 : vector<6x6x128xf32>
    %c42 = arith.constant 42 : index
    %266 = memref.load %arg2[%c42] : memref<96xf32, #tpu.memory_space<smem>>
    %267 = vector.broadcast %266 : f32 to vector<6x6x128xf32>
    %268 = arith.mulf %257, %267 : vector<6x6x128xf32>
    %269 = arith.addf %244, %268 : vector<6x6x128xf32>
    %c58 = arith.constant 58 : index
    %270 = memref.load %arg2[%c58] : memref<96xf32, #tpu.memory_space<smem>>
    %271 = vector.broadcast %270 : f32 to vector<6x6x128xf32>
    %272 = arith.mulf %257, %271 : vector<6x6x128xf32>
    %273 = arith.addf %248, %272 : vector<6x6x128xf32>
    %c74 = arith.constant 74 : index
    %274 = memref.load %arg2[%c74] : memref<96xf32, #tpu.memory_space<smem>>
    %275 = vector.broadcast %274 : f32 to vector<6x6x128xf32>
    %276 = arith.mulf %257, %275 : vector<6x6x128xf32>
    %277 = arith.addf %252, %276 : vector<6x6x128xf32>
    %c90 = arith.constant 90 : index
    %278 = memref.load %arg2[%c90] : memref<96xf32, #tpu.memory_space<smem>>
    %279 = vector.broadcast %278 : f32 to vector<6x6x128xf32>
    %280 = arith.mulf %257, %279 : vector<6x6x128xf32>
    %281 = arith.addf %256, %280 : vector<6x6x128xf32>
    %282 = vector.extract_strided_slice %0 {offsets = [2, 3, 0], sizes = [6, 6, 128], strides = [1, 1, 1]} : vector<9x9x128xf32> to vector<6x6x128xf32>
    %c11 = arith.constant 11 : index
    %283 = memref.load %arg2[%c11] : memref<96xf32, #tpu.memory_space<smem>>
    %284 = vector.broadcast %283 : f32 to vector<6x6x128xf32>
    %285 = arith.mulf %282, %284 : vector<6x6x128xf32>
    %286 = arith.addf %261, %285 : vector<6x6x128xf32>
    %c27 = arith.constant 27 : index
    %287 = memref.load %arg2[%c27] : memref<96xf32, #tpu.memory_space<smem>>
    %288 = vector.broadcast %287 : f32 to vector<6x6x128xf32>
    %289 = arith.mulf %282, %288 : vector<6x6x128xf32>
    %290 = arith.addf %265, %289 : vector<6x6x128xf32>
    %c43 = arith.constant 43 : index
    %291 = memref.load %arg2[%c43] : memref<96xf32, #tpu.memory_space<smem>>
    %292 = vector.broadcast %291 : f32 to vector<6x6x128xf32>
    %293 = arith.mulf %282, %292 : vector<6x6x128xf32>
    %294 = arith.addf %269, %293 : vector<6x6x128xf32>
    %c59 = arith.constant 59 : index
    %295 = memref.load %arg2[%c59] : memref<96xf32, #tpu.memory_space<smem>>
    %296 = vector.broadcast %295 : f32 to vector<6x6x128xf32>
    %297 = arith.mulf %282, %296 : vector<6x6x128xf32>
    %298 = arith.addf %273, %297 : vector<6x6x128xf32>
    %c75 = arith.constant 75 : index
    %299 = memref.load %arg2[%c75] : memref<96xf32, #tpu.memory_space<smem>>
    %300 = vector.broadcast %299 : f32 to vector<6x6x128xf32>
    %301 = arith.mulf %282, %300 : vector<6x6x128xf32>
    %302 = arith.addf %277, %301 : vector<6x6x128xf32>
    %c91 = arith.constant 91 : index
    %303 = memref.load %arg2[%c91] : memref<96xf32, #tpu.memory_space<smem>>
    %304 = vector.broadcast %303 : f32 to vector<6x6x128xf32>
    %305 = arith.mulf %282, %304 : vector<6x6x128xf32>
    %306 = arith.addf %281, %305 : vector<6x6x128xf32>
    %307 = vector.extract_strided_slice %0 {offsets = [3, 0, 0], sizes = [6, 6, 128], strides = [1, 1, 1]} : vector<9x9x128xf32> to vector<6x6x128xf32>
    %c12 = arith.constant 12 : index
    %308 = memref.load %arg2[%c12] : memref<96xf32, #tpu.memory_space<smem>>
    %309 = vector.broadcast %308 : f32 to vector<6x6x128xf32>
    %310 = arith.mulf %307, %309 : vector<6x6x128xf32>
    %311 = arith.addf %286, %310 : vector<6x6x128xf32>
    %c28 = arith.constant 28 : index
    %312 = memref.load %arg2[%c28] : memref<96xf32, #tpu.memory_space<smem>>
    %313 = vector.broadcast %312 : f32 to vector<6x6x128xf32>
    %314 = arith.mulf %307, %313 : vector<6x6x128xf32>
    %315 = arith.addf %290, %314 : vector<6x6x128xf32>
    %c44 = arith.constant 44 : index
    %316 = memref.load %arg2[%c44] : memref<96xf32, #tpu.memory_space<smem>>
    %317 = vector.broadcast %316 : f32 to vector<6x6x128xf32>
    %318 = arith.mulf %307, %317 : vector<6x6x128xf32>
    %319 = arith.addf %294, %318 : vector<6x6x128xf32>
    %c60 = arith.constant 60 : index
    %320 = memref.load %arg2[%c60] : memref<96xf32, #tpu.memory_space<smem>>
    %321 = vector.broadcast %320 : f32 to vector<6x6x128xf32>
    %322 = arith.mulf %307, %321 : vector<6x6x128xf32>
    %323 = arith.addf %298, %322 : vector<6x6x128xf32>
    %c76 = arith.constant 76 : index
    %324 = memref.load %arg2[%c76] : memref<96xf32, #tpu.memory_space<smem>>
    %325 = vector.broadcast %324 : f32 to vector<6x6x128xf32>
    %326 = arith.mulf %307, %325 : vector<6x6x128xf32>
    %327 = arith.addf %302, %326 : vector<6x6x128xf32>
    %c92 = arith.constant 92 : index
    %328 = memref.load %arg2[%c92] : memref<96xf32, #tpu.memory_space<smem>>
    %329 = vector.broadcast %328 : f32 to vector<6x6x128xf32>
    %330 = arith.mulf %307, %329 : vector<6x6x128xf32>
    %331 = arith.addf %306, %330 : vector<6x6x128xf32>
    %332 = vector.extract_strided_slice %0 {offsets = [3, 1, 0], sizes = [6, 6, 128], strides = [1, 1, 1]} : vector<9x9x128xf32> to vector<6x6x128xf32>
    %c13 = arith.constant 13 : index
    %333 = memref.load %arg2[%c13] : memref<96xf32, #tpu.memory_space<smem>>
    %334 = vector.broadcast %333 : f32 to vector<6x6x128xf32>
    %335 = arith.mulf %332, %334 : vector<6x6x128xf32>
    %336 = arith.addf %311, %335 : vector<6x6x128xf32>
    %c29 = arith.constant 29 : index
    %337 = memref.load %arg2[%c29] : memref<96xf32, #tpu.memory_space<smem>>
    %338 = vector.broadcast %337 : f32 to vector<6x6x128xf32>
    %339 = arith.mulf %332, %338 : vector<6x6x128xf32>
    %340 = arith.addf %315, %339 : vector<6x6x128xf32>
    %c45 = arith.constant 45 : index
    %341 = memref.load %arg2[%c45] : memref<96xf32, #tpu.memory_space<smem>>
    %342 = vector.broadcast %341 : f32 to vector<6x6x128xf32>
    %343 = arith.mulf %332, %342 : vector<6x6x128xf32>
    %344 = arith.addf %319, %343 : vector<6x6x128xf32>
    %c61 = arith.constant 61 : index
    %345 = memref.load %arg2[%c61] : memref<96xf32, #tpu.memory_space<smem>>
    %346 = vector.broadcast %345 : f32 to vector<6x6x128xf32>
    %347 = arith.mulf %332, %346 : vector<6x6x128xf32>
    %348 = arith.addf %323, %347 : vector<6x6x128xf32>
    %c77 = arith.constant 77 : index
    %349 = memref.load %arg2[%c77] : memref<96xf32, #tpu.memory_space<smem>>
    %350 = vector.broadcast %349 : f32 to vector<6x6x128xf32>
    %351 = arith.mulf %332, %350 : vector<6x6x128xf32>
    %352 = arith.addf %327, %351 : vector<6x6x128xf32>
    %c93 = arith.constant 93 : index
    %353 = memref.load %arg2[%c93] : memref<96xf32, #tpu.memory_space<smem>>
    %354 = vector.broadcast %353 : f32 to vector<6x6x128xf32>
    %355 = arith.mulf %332, %354 : vector<6x6x128xf32>
    %356 = arith.addf %331, %355 : vector<6x6x128xf32>
    %357 = vector.extract_strided_slice %0 {offsets = [3, 2, 0], sizes = [6, 6, 128], strides = [1, 1, 1]} : vector<9x9x128xf32> to vector<6x6x128xf32>
    %c14 = arith.constant 14 : index
    %358 = memref.load %arg2[%c14] : memref<96xf32, #tpu.memory_space<smem>>
    %359 = vector.broadcast %358 : f32 to vector<6x6x128xf32>
    %360 = arith.mulf %357, %359 : vector<6x6x128xf32>
    %361 = arith.addf %336, %360 : vector<6x6x128xf32>
    %c30 = arith.constant 30 : index
    %362 = memref.load %arg2[%c30] : memref<96xf32, #tpu.memory_space<smem>>
    %363 = vector.broadcast %362 : f32 to vector<6x6x128xf32>
    %364 = arith.mulf %357, %363 : vector<6x6x128xf32>
    %365 = arith.addf %340, %364 : vector<6x6x128xf32>
    %c46 = arith.constant 46 : index
    %366 = memref.load %arg2[%c46] : memref<96xf32, #tpu.memory_space<smem>>
    %367 = vector.broadcast %366 : f32 to vector<6x6x128xf32>
    %368 = arith.mulf %357, %367 : vector<6x6x128xf32>
    %369 = arith.addf %344, %368 : vector<6x6x128xf32>
    %c62 = arith.constant 62 : index
    %370 = memref.load %arg2[%c62] : memref<96xf32, #tpu.memory_space<smem>>
    %371 = vector.broadcast %370 : f32 to vector<6x6x128xf32>
    %372 = arith.mulf %357, %371 : vector<6x6x128xf32>
    %373 = arith.addf %348, %372 : vector<6x6x128xf32>
    %c78 = arith.constant 78 : index
    %374 = memref.load %arg2[%c78] : memref<96xf32, #tpu.memory_space<smem>>
    %375 = vector.broadcast %374 : f32 to vector<6x6x128xf32>
    %376 = arith.mulf %357, %375 : vector<6x6x128xf32>
    %377 = arith.addf %352, %376 : vector<6x6x128xf32>
    %c94 = arith.constant 94 : index
    %378 = memref.load %arg2[%c94] : memref<96xf32, #tpu.memory_space<smem>>
    %379 = vector.broadcast %378 : f32 to vector<6x6x128xf32>
    %380 = arith.mulf %357, %379 : vector<6x6x128xf32>
    %381 = arith.addf %356, %380 : vector<6x6x128xf32>
    %382 = vector.extract_strided_slice %0 {offsets = [3, 3, 0], sizes = [6, 6, 128], strides = [1, 1, 1]} : vector<9x9x128xf32> to vector<6x6x128xf32>
    %c15 = arith.constant 15 : index
    %383 = memref.load %arg2[%c15] : memref<96xf32, #tpu.memory_space<smem>>
    %384 = vector.broadcast %383 : f32 to vector<6x6x128xf32>
    %385 = arith.mulf %382, %384 : vector<6x6x128xf32>
    %386 = arith.addf %361, %385 : vector<6x6x128xf32>
    %c31 = arith.constant 31 : index
    %387 = memref.load %arg2[%c31] : memref<96xf32, #tpu.memory_space<smem>>
    %388 = vector.broadcast %387 : f32 to vector<6x6x128xf32>
    %389 = arith.mulf %382, %388 : vector<6x6x128xf32>
    %390 = arith.addf %365, %389 : vector<6x6x128xf32>
    %c47 = arith.constant 47 : index
    %391 = memref.load %arg2[%c47] : memref<96xf32, #tpu.memory_space<smem>>
    %392 = vector.broadcast %391 : f32 to vector<6x6x128xf32>
    %393 = arith.mulf %382, %392 : vector<6x6x128xf32>
    %394 = arith.addf %369, %393 : vector<6x6x128xf32>
    %c63 = arith.constant 63 : index
    %395 = memref.load %arg2[%c63] : memref<96xf32, #tpu.memory_space<smem>>
    %396 = vector.broadcast %395 : f32 to vector<6x6x128xf32>
    %397 = arith.mulf %382, %396 : vector<6x6x128xf32>
    %398 = arith.addf %373, %397 : vector<6x6x128xf32>
    %c79 = arith.constant 79 : index
    %399 = memref.load %arg2[%c79] : memref<96xf32, #tpu.memory_space<smem>>
    %400 = vector.broadcast %399 : f32 to vector<6x6x128xf32>
    %401 = arith.mulf %382, %400 : vector<6x6x128xf32>
    %402 = arith.addf %377, %401 : vector<6x6x128xf32>
    %c95 = arith.constant 95 : index
    %403 = memref.load %arg2[%c95] : memref<96xf32, #tpu.memory_space<smem>>
    %404 = vector.broadcast %403 : f32 to vector<6x6x128xf32>
    %405 = arith.mulf %382, %404 : vector<6x6x128xf32>
    %406 = arith.addf %381, %405 : vector<6x6x128xf32>
    %c0_8 = arith.constant 0 : index
    %407 = memref.load %arg3[%c0_8] : memref<6xf32, #tpu.memory_space<smem>>
    %408 = vector.broadcast %407 : f32 to vector<6x6x128xf32>
    %409 = arith.addf %386, %408 : vector<6x6x128xf32>
    %cst_9 = arith.constant 0.000000e+00 : f32
    %410 = vector.broadcast %cst_9 : f32 to vector<6x6x128xf32>
    %411 = arith.maximumf %409, %410 : vector<6x6x128xf32>
    %c1_10 = arith.constant 1 : index
    %412 = memref.load %arg3[%c1_10] : memref<6xf32, #tpu.memory_space<smem>>
    %413 = vector.broadcast %412 : f32 to vector<6x6x128xf32>
    %414 = arith.addf %390, %413 : vector<6x6x128xf32>
    %cst_11 = arith.constant 0.000000e+00 : f32
    %415 = vector.broadcast %cst_11 : f32 to vector<6x6x128xf32>
    %416 = arith.maximumf %414, %415 : vector<6x6x128xf32>
    %c2_12 = arith.constant 2 : index
    %417 = memref.load %arg3[%c2_12] : memref<6xf32, #tpu.memory_space<smem>>
    %418 = vector.broadcast %417 : f32 to vector<6x6x128xf32>
    %419 = arith.addf %394, %418 : vector<6x6x128xf32>
    %cst_13 = arith.constant 0.000000e+00 : f32
    %420 = vector.broadcast %cst_13 : f32 to vector<6x6x128xf32>
    %421 = arith.maximumf %419, %420 : vector<6x6x128xf32>
    %c3_14 = arith.constant 3 : index
    %422 = memref.load %arg3[%c3_14] : memref<6xf32, #tpu.memory_space<smem>>
    %423 = vector.broadcast %422 : f32 to vector<6x6x128xf32>
    %424 = arith.addf %398, %423 : vector<6x6x128xf32>
    %cst_15 = arith.constant 0.000000e+00 : f32
    %425 = vector.broadcast %cst_15 : f32 to vector<6x6x128xf32>
    %426 = arith.maximumf %424, %425 : vector<6x6x128xf32>
    %c4_16 = arith.constant 4 : index
    %427 = memref.load %arg3[%c4_16] : memref<6xf32, #tpu.memory_space<smem>>
    %428 = vector.broadcast %427 : f32 to vector<6x6x128xf32>
    %429 = arith.addf %402, %428 : vector<6x6x128xf32>
    %cst_17 = arith.constant 0.000000e+00 : f32
    %430 = vector.broadcast %cst_17 : f32 to vector<6x6x128xf32>
    %431 = arith.maximumf %429, %430 : vector<6x6x128xf32>
    %c5_18 = arith.constant 5 : index
    %432 = memref.load %arg3[%c5_18] : memref<6xf32, #tpu.memory_space<smem>>
    %433 = vector.broadcast %432 : f32 to vector<6x6x128xf32>
    %434 = arith.addf %406, %433 : vector<6x6x128xf32>
    %cst_19 = arith.constant 0.000000e+00 : f32
    %435 = vector.broadcast %cst_19 : f32 to vector<6x6x128xf32>
    %436 = arith.maximumf %434, %435 : vector<6x6x128xf32>
    %437 = vector.extract_strided_slice %411 {offsets = [0, 0, 0], sizes = [1, 6, 128], strides = [1, 1, 1]} : vector<6x6x128xf32> to vector<1x6x128xf32>
    %438 = vector.shape_cast %437 : vector<1x6x128xf32> to vector<6x128xf32>
    %439 = vector.extract_strided_slice %411 {offsets = [1, 0, 0], sizes = [1, 6, 128], strides = [1, 1, 1]} : vector<6x6x128xf32> to vector<1x6x128xf32>
    %440 = vector.shape_cast %439 : vector<1x6x128xf32> to vector<6x128xf32>
    %441 = arith.maximumf %438, %440 : vector<6x128xf32>
    %442 = vector.extract_strided_slice %441 {offsets = [0, 0], sizes = [1, 128], strides = [1, 1]} : vector<6x128xf32> to vector<1x128xf32>
    %443 = vector.extract_strided_slice %441 {offsets = [1, 0], sizes = [1, 128], strides = [1, 1]} : vector<6x128xf32> to vector<1x128xf32>
    %444 = arith.maximumf %442, %443 : vector<1x128xf32>
    %445 = vector.extract_strided_slice %441 {offsets = [2, 0], sizes = [1, 128], strides = [1, 1]} : vector<6x128xf32> to vector<1x128xf32>
    %446 = vector.extract_strided_slice %441 {offsets = [3, 0], sizes = [1, 128], strides = [1, 1]} : vector<6x128xf32> to vector<1x128xf32>
    %447 = arith.maximumf %445, %446 : vector<1x128xf32>
    %448 = vector.extract_strided_slice %441 {offsets = [4, 0], sizes = [1, 128], strides = [1, 1]} : vector<6x128xf32> to vector<1x128xf32>
    %449 = vector.extract_strided_slice %441 {offsets = [5, 0], sizes = [1, 128], strides = [1, 1]} : vector<6x128xf32> to vector<1x128xf32>
    %450 = arith.maximumf %448, %449 : vector<1x128xf32>
    %451 = vector.extract_strided_slice %411 {offsets = [2, 0, 0], sizes = [1, 6, 128], strides = [1, 1, 1]} : vector<6x6x128xf32> to vector<1x6x128xf32>
    %452 = vector.shape_cast %451 : vector<1x6x128xf32> to vector<6x128xf32>
    %453 = vector.extract_strided_slice %411 {offsets = [3, 0, 0], sizes = [1, 6, 128], strides = [1, 1, 1]} : vector<6x6x128xf32> to vector<1x6x128xf32>
    %454 = vector.shape_cast %453 : vector<1x6x128xf32> to vector<6x128xf32>
    %455 = arith.maximumf %452, %454 : vector<6x128xf32>
    %456 = vector.extract_strided_slice %455 {offsets = [0, 0], sizes = [1, 128], strides = [1, 1]} : vector<6x128xf32> to vector<1x128xf32>
    %457 = vector.extract_strided_slice %455 {offsets = [1, 0], sizes = [1, 128], strides = [1, 1]} : vector<6x128xf32> to vector<1x128xf32>
    %458 = arith.maximumf %456, %457 : vector<1x128xf32>
    %459 = vector.extract_strided_slice %455 {offsets = [2, 0], sizes = [1, 128], strides = [1, 1]} : vector<6x128xf32> to vector<1x128xf32>
    %460 = vector.extract_strided_slice %455 {offsets = [3, 0], sizes = [1, 128], strides = [1, 1]} : vector<6x128xf32> to vector<1x128xf32>
    %461 = arith.maximumf %459, %460 : vector<1x128xf32>
    %462 = vector.extract_strided_slice %455 {offsets = [4, 0], sizes = [1, 128], strides = [1, 1]} : vector<6x128xf32> to vector<1x128xf32>
    %463 = vector.extract_strided_slice %455 {offsets = [5, 0], sizes = [1, 128], strides = [1, 1]} : vector<6x128xf32> to vector<1x128xf32>
    %464 = arith.maximumf %462, %463 : vector<1x128xf32>
    %465 = vector.extract_strided_slice %411 {offsets = [4, 0, 0], sizes = [1, 6, 128], strides = [1, 1, 1]} : vector<6x6x128xf32> to vector<1x6x128xf32>
    %466 = vector.shape_cast %465 : vector<1x6x128xf32> to vector<6x128xf32>
    %467 = vector.extract_strided_slice %411 {offsets = [5, 0, 0], sizes = [1, 6, 128], strides = [1, 1, 1]} : vector<6x6x128xf32> to vector<1x6x128xf32>
    %468 = vector.shape_cast %467 : vector<1x6x128xf32> to vector<6x128xf32>
    %469 = arith.maximumf %466, %468 : vector<6x128xf32>
    %470 = vector.extract_strided_slice %469 {offsets = [0, 0], sizes = [1, 128], strides = [1, 1]} : vector<6x128xf32> to vector<1x128xf32>
    %471 = vector.extract_strided_slice %469 {offsets = [1, 0], sizes = [1, 128], strides = [1, 1]} : vector<6x128xf32> to vector<1x128xf32>
    %472 = arith.maximumf %470, %471 : vector<1x128xf32>
    %473 = vector.extract_strided_slice %469 {offsets = [2, 0], sizes = [1, 128], strides = [1, 1]} : vector<6x128xf32> to vector<1x128xf32>
    %474 = vector.extract_strided_slice %469 {offsets = [3, 0], sizes = [1, 128], strides = [1, 1]} : vector<6x128xf32> to vector<1x128xf32>
    %475 = arith.maximumf %473, %474 : vector<1x128xf32>
    %476 = vector.extract_strided_slice %469 {offsets = [4, 0], sizes = [1, 128], strides = [1, 1]} : vector<6x128xf32> to vector<1x128xf32>
    %477 = vector.extract_strided_slice %469 {offsets = [5, 0], sizes = [1, 128], strides = [1, 1]} : vector<6x128xf32> to vector<1x128xf32>
    %478 = arith.maximumf %476, %477 : vector<1x128xf32>
    %479 = vector.extract_strided_slice %416 {offsets = [0, 0, 0], sizes = [1, 6, 128], strides = [1, 1, 1]} : vector<6x6x128xf32> to vector<1x6x128xf32>
    %480 = vector.shape_cast %479 : vector<1x6x128xf32> to vector<6x128xf32>
    %481 = vector.extract_strided_slice %416 {offsets = [1, 0, 0], sizes = [1, 6, 128], strides = [1, 1, 1]} : vector<6x6x128xf32> to vector<1x6x128xf32>
    %482 = vector.shape_cast %481 : vector<1x6x128xf32> to vector<6x128xf32>
    %483 = arith.maximumf %480, %482 : vector<6x128xf32>
    %484 = vector.extract_strided_slice %483 {offsets = [0, 0], sizes = [1, 128], strides = [1, 1]} : vector<6x128xf32> to vector<1x128xf32>
    %485 = vector.extract_strided_slice %483 {offsets = [1, 0], sizes = [1, 128], strides = [1, 1]} : vector<6x128xf32> to vector<1x128xf32>
    %486 = arith.maximumf %484, %485 : vector<1x128xf32>
    %487 = vector.extract_strided_slice %483 {offsets = [2, 0], sizes = [1, 128], strides = [1, 1]} : vector<6x128xf32> to vector<1x128xf32>
    %488 = vector.extract_strided_slice %483 {offsets = [3, 0], sizes = [1, 128], strides = [1, 1]} : vector<6x128xf32> to vector<1x128xf32>
    %489 = arith.maximumf %487, %488 : vector<1x128xf32>
    %490 = vector.extract_strided_slice %483 {offsets = [4, 0], sizes = [1, 128], strides = [1, 1]} : vector<6x128xf32> to vector<1x128xf32>
    %491 = vector.extract_strided_slice %483 {offsets = [5, 0], sizes = [1, 128], strides = [1, 1]} : vector<6x128xf32> to vector<1x128xf32>
    %492 = arith.maximumf %490, %491 : vector<1x128xf32>
    %493 = vector.extract_strided_slice %416 {offsets = [2, 0, 0], sizes = [1, 6, 128], strides = [1, 1, 1]} : vector<6x6x128xf32> to vector<1x6x128xf32>
    %494 = vector.shape_cast %493 : vector<1x6x128xf32> to vector<6x128xf32>
    %495 = vector.extract_strided_slice %416 {offsets = [3, 0, 0], sizes = [1, 6, 128], strides = [1, 1, 1]} : vector<6x6x128xf32> to vector<1x6x128xf32>
    %496 = vector.shape_cast %495 : vector<1x6x128xf32> to vector<6x128xf32>
    %497 = arith.maximumf %494, %496 : vector<6x128xf32>
    %498 = vector.extract_strided_slice %497 {offsets = [0, 0], sizes = [1, 128], strides = [1, 1]} : vector<6x128xf32> to vector<1x128xf32>
    %499 = vector.extract_strided_slice %497 {offsets = [1, 0], sizes = [1, 128], strides = [1, 1]} : vector<6x128xf32> to vector<1x128xf32>
    %500 = arith.maximumf %498, %499 : vector<1x128xf32>
    %501 = vector.extract_strided_slice %497 {offsets = [2, 0], sizes = [1, 128], strides = [1, 1]} : vector<6x128xf32> to vector<1x128xf32>
    %502 = vector.extract_strided_slice %497 {offsets = [3, 0], sizes = [1, 128], strides = [1, 1]} : vector<6x128xf32> to vector<1x128xf32>
    %503 = arith.maximumf %501, %502 : vector<1x128xf32>
    %504 = vector.extract_strided_slice %497 {offsets = [4, 0], sizes = [1, 128], strides = [1, 1]} : vector<6x128xf32> to vector<1x128xf32>
    %505 = vector.extract_strided_slice %497 {offsets = [5, 0], sizes = [1, 128], strides = [1, 1]} : vector<6x128xf32> to vector<1x128xf32>
    %506 = arith.maximumf %504, %505 : vector<1x128xf32>
    %507 = vector.extract_strided_slice %416 {offsets = [4, 0, 0], sizes = [1, 6, 128], strides = [1, 1, 1]} : vector<6x6x128xf32> to vector<1x6x128xf32>
    %508 = vector.shape_cast %507 : vector<1x6x128xf32> to vector<6x128xf32>
    %509 = vector.extract_strided_slice %416 {offsets = [5, 0, 0], sizes = [1, 6, 128], strides = [1, 1, 1]} : vector<6x6x128xf32> to vector<1x6x128xf32>
    %510 = vector.shape_cast %509 : vector<1x6x128xf32> to vector<6x128xf32>
    %511 = arith.maximumf %508, %510 : vector<6x128xf32>
    %512 = vector.extract_strided_slice %511 {offsets = [0, 0], sizes = [1, 128], strides = [1, 1]} : vector<6x128xf32> to vector<1x128xf32>
    %513 = vector.extract_strided_slice %511 {offsets = [1, 0], sizes = [1, 128], strides = [1, 1]} : vector<6x128xf32> to vector<1x128xf32>
    %514 = arith.maximumf %512, %513 : vector<1x128xf32>
    %515 = vector.extract_strided_slice %511 {offsets = [2, 0], sizes = [1, 128], strides = [1, 1]} : vector<6x128xf32> to vector<1x128xf32>
    %516 = vector.extract_strided_slice %511 {offsets = [3, 0], sizes = [1, 128], strides = [1, 1]} : vector<6x128xf32> to vector<1x128xf32>
    %517 = arith.maximumf %515, %516 : vector<1x128xf32>
    %518 = vector.extract_strided_slice %511 {offsets = [4, 0], sizes = [1, 128], strides = [1, 1]} : vector<6x128xf32> to vector<1x128xf32>
    %519 = vector.extract_strided_slice %511 {offsets = [5, 0], sizes = [1, 128], strides = [1, 1]} : vector<6x128xf32> to vector<1x128xf32>
    %520 = arith.maximumf %518, %519 : vector<1x128xf32>
    %521 = vector.extract_strided_slice %421 {offsets = [0, 0, 0], sizes = [1, 6, 128], strides = [1, 1, 1]} : vector<6x6x128xf32> to vector<1x6x128xf32>
    %522 = vector.shape_cast %521 : vector<1x6x128xf32> to vector<6x128xf32>
    %523 = vector.extract_strided_slice %421 {offsets = [1, 0, 0], sizes = [1, 6, 128], strides = [1, 1, 1]} : vector<6x6x128xf32> to vector<1x6x128xf32>
    %524 = vector.shape_cast %523 : vector<1x6x128xf32> to vector<6x128xf32>
    %525 = arith.maximumf %522, %524 : vector<6x128xf32>
    %526 = vector.extract_strided_slice %525 {offsets = [0, 0], sizes = [1, 128], strides = [1, 1]} : vector<6x128xf32> to vector<1x128xf32>
    %527 = vector.extract_strided_slice %525 {offsets = [1, 0], sizes = [1, 128], strides = [1, 1]} : vector<6x128xf32> to vector<1x128xf32>
    %528 = arith.maximumf %526, %527 : vector<1x128xf32>
    %529 = vector.extract_strided_slice %525 {offsets = [2, 0], sizes = [1, 128], strides = [1, 1]} : vector<6x128xf32> to vector<1x128xf32>
    %530 = vector.extract_strided_slice %525 {offsets = [3, 0], sizes = [1, 128], strides = [1, 1]} : vector<6x128xf32> to vector<1x128xf32>
    %531 = arith.maximumf %529, %530 : vector<1x128xf32>
    %532 = vector.extract_strided_slice %525 {offsets = [4, 0], sizes = [1, 128], strides = [1, 1]} : vector<6x128xf32> to vector<1x128xf32>
    %533 = vector.extract_strided_slice %525 {offsets = [5, 0], sizes = [1, 128], strides = [1, 1]} : vector<6x128xf32> to vector<1x128xf32>
    %534 = arith.maximumf %532, %533 : vector<1x128xf32>
    %535 = vector.extract_strided_slice %421 {offsets = [2, 0, 0], sizes = [1, 6, 128], strides = [1, 1, 1]} : vector<6x6x128xf32> to vector<1x6x128xf32>
    %536 = vector.shape_cast %535 : vector<1x6x128xf32> to vector<6x128xf32>
    %537 = vector.extract_strided_slice %421 {offsets = [3, 0, 0], sizes = [1, 6, 128], strides = [1, 1, 1]} : vector<6x6x128xf32> to vector<1x6x128xf32>
    %538 = vector.shape_cast %537 : vector<1x6x128xf32> to vector<6x128xf32>
    %539 = arith.maximumf %536, %538 : vector<6x128xf32>
    %540 = vector.extract_strided_slice %539 {offsets = [0, 0], sizes = [1, 128], strides = [1, 1]} : vector<6x128xf32> to vector<1x128xf32>
    %541 = vector.extract_strided_slice %539 {offsets = [1, 0], sizes = [1, 128], strides = [1, 1]} : vector<6x128xf32> to vector<1x128xf32>
    %542 = arith.maximumf %540, %541 : vector<1x128xf32>
    %543 = vector.extract_strided_slice %539 {offsets = [2, 0], sizes = [1, 128], strides = [1, 1]} : vector<6x128xf32> to vector<1x128xf32>
    %544 = vector.extract_strided_slice %539 {offsets = [3, 0], sizes = [1, 128], strides = [1, 1]} : vector<6x128xf32> to vector<1x128xf32>
    %545 = arith.maximumf %543, %544 : vector<1x128xf32>
    %546 = vector.extract_strided_slice %539 {offsets = [4, 0], sizes = [1, 128], strides = [1, 1]} : vector<6x128xf32> to vector<1x128xf32>
    %547 = vector.extract_strided_slice %539 {offsets = [5, 0], sizes = [1, 128], strides = [1, 1]} : vector<6x128xf32> to vector<1x128xf32>
    %548 = arith.maximumf %546, %547 : vector<1x128xf32>
    %549 = vector.extract_strided_slice %421 {offsets = [4, 0, 0], sizes = [1, 6, 128], strides = [1, 1, 1]} : vector<6x6x128xf32> to vector<1x6x128xf32>
    %550 = vector.shape_cast %549 : vector<1x6x128xf32> to vector<6x128xf32>
    %551 = vector.extract_strided_slice %421 {offsets = [5, 0, 0], sizes = [1, 6, 128], strides = [1, 1, 1]} : vector<6x6x128xf32> to vector<1x6x128xf32>
    %552 = vector.shape_cast %551 : vector<1x6x128xf32> to vector<6x128xf32>
    %553 = arith.maximumf %550, %552 : vector<6x128xf32>
    %554 = vector.extract_strided_slice %553 {offsets = [0, 0], sizes = [1, 128], strides = [1, 1]} : vector<6x128xf32> to vector<1x128xf32>
    %555 = vector.extract_strided_slice %553 {offsets = [1, 0], sizes = [1, 128], strides = [1, 1]} : vector<6x128xf32> to vector<1x128xf32>
    %556 = arith.maximumf %554, %555 : vector<1x128xf32>
    %557 = vector.extract_strided_slice %553 {offsets = [2, 0], sizes = [1, 128], strides = [1, 1]} : vector<6x128xf32> to vector<1x128xf32>
    %558 = vector.extract_strided_slice %553 {offsets = [3, 0], sizes = [1, 128], strides = [1, 1]} : vector<6x128xf32> to vector<1x128xf32>
    %559 = arith.maximumf %557, %558 : vector<1x128xf32>
    %560 = vector.extract_strided_slice %553 {offsets = [4, 0], sizes = [1, 128], strides = [1, 1]} : vector<6x128xf32> to vector<1x128xf32>
    %561 = vector.extract_strided_slice %553 {offsets = [5, 0], sizes = [1, 128], strides = [1, 1]} : vector<6x128xf32> to vector<1x128xf32>
    %562 = arith.maximumf %560, %561 : vector<1x128xf32>
    %563 = vector.extract_strided_slice %426 {offsets = [0, 0, 0], sizes = [1, 6, 128], strides = [1, 1, 1]} : vector<6x6x128xf32> to vector<1x6x128xf32>
    %564 = vector.shape_cast %563 : vector<1x6x128xf32> to vector<6x128xf32>
    %565 = vector.extract_strided_slice %426 {offsets = [1, 0, 0], sizes = [1, 6, 128], strides = [1, 1, 1]} : vector<6x6x128xf32> to vector<1x6x128xf32>
    %566 = vector.shape_cast %565 : vector<1x6x128xf32> to vector<6x128xf32>
    %567 = arith.maximumf %564, %566 : vector<6x128xf32>
    %568 = vector.extract_strided_slice %567 {offsets = [0, 0], sizes = [1, 128], strides = [1, 1]} : vector<6x128xf32> to vector<1x128xf32>
    %569 = vector.extract_strided_slice %567 {offsets = [1, 0], sizes = [1, 128], strides = [1, 1]} : vector<6x128xf32> to vector<1x128xf32>
    %570 = arith.maximumf %568, %569 : vector<1x128xf32>
    %571 = vector.extract_strided_slice %567 {offsets = [2, 0], sizes = [1, 128], strides = [1, 1]} : vector<6x128xf32> to vector<1x128xf32>
    %572 = vector.extract_strided_slice %567 {offsets = [3, 0], sizes = [1, 128], strides = [1, 1]} : vector<6x128xf32> to vector<1x128xf32>
    %573 = arith.maximumf %571, %572 : vector<1x128xf32>
    %574 = vector.extract_strided_slice %567 {offsets = [4, 0], sizes = [1, 128], strides = [1, 1]} : vector<6x128xf32> to vector<1x128xf32>
    %575 = vector.extract_strided_slice %567 {offsets = [5, 0], sizes = [1, 128], strides = [1, 1]} : vector<6x128xf32> to vector<1x128xf32>
    %576 = arith.maximumf %574, %575 : vector<1x128xf32>
    %577 = vector.extract_strided_slice %426 {offsets = [2, 0, 0], sizes = [1, 6, 128], strides = [1, 1, 1]} : vector<6x6x128xf32> to vector<1x6x128xf32>
    %578 = vector.shape_cast %577 : vector<1x6x128xf32> to vector<6x128xf32>
    %579 = vector.extract_strided_slice %426 {offsets = [3, 0, 0], sizes = [1, 6, 128], strides = [1, 1, 1]} : vector<6x6x128xf32> to vector<1x6x128xf32>
    %580 = vector.shape_cast %579 : vector<1x6x128xf32> to vector<6x128xf32>
    %581 = arith.maximumf %578, %580 : vector<6x128xf32>
    %582 = vector.extract_strided_slice %581 {offsets = [0, 0], sizes = [1, 128], strides = [1, 1]} : vector<6x128xf32> to vector<1x128xf32>
    %583 = vector.extract_strided_slice %581 {offsets = [1, 0], sizes = [1, 128], strides = [1, 1]} : vector<6x128xf32> to vector<1x128xf32>
    %584 = arith.maximumf %582, %583 : vector<1x128xf32>
    %585 = vector.extract_strided_slice %581 {offsets = [2, 0], sizes = [1, 128], strides = [1, 1]} : vector<6x128xf32> to vector<1x128xf32>
    %586 = vector.extract_strided_slice %581 {offsets = [3, 0], sizes = [1, 128], strides = [1, 1]} : vector<6x128xf32> to vector<1x128xf32>
    %587 = arith.maximumf %585, %586 : vector<1x128xf32>
    %588 = vector.extract_strided_slice %581 {offsets = [4, 0], sizes = [1, 128], strides = [1, 1]} : vector<6x128xf32> to vector<1x128xf32>
    %589 = vector.extract_strided_slice %581 {offsets = [5, 0], sizes = [1, 128], strides = [1, 1]} : vector<6x128xf32> to vector<1x128xf32>
    %590 = arith.maximumf %588, %589 : vector<1x128xf32>
    %591 = vector.extract_strided_slice %426 {offsets = [4, 0, 0], sizes = [1, 6, 128], strides = [1, 1, 1]} : vector<6x6x128xf32> to vector<1x6x128xf32>
    %592 = vector.shape_cast %591 : vector<1x6x128xf32> to vector<6x128xf32>
    %593 = vector.extract_strided_slice %426 {offsets = [5, 0, 0], sizes = [1, 6, 128], strides = [1, 1, 1]} : vector<6x6x128xf32> to vector<1x6x128xf32>
    %594 = vector.shape_cast %593 : vector<1x6x128xf32> to vector<6x128xf32>
    %595 = arith.maximumf %592, %594 : vector<6x128xf32>
    %596 = vector.extract_strided_slice %595 {offsets = [0, 0], sizes = [1, 128], strides = [1, 1]} : vector<6x128xf32> to vector<1x128xf32>
    %597 = vector.extract_strided_slice %595 {offsets = [1, 0], sizes = [1, 128], strides = [1, 1]} : vector<6x128xf32> to vector<1x128xf32>
    %598 = arith.maximumf %596, %597 : vector<1x128xf32>
    %599 = vector.extract_strided_slice %595 {offsets = [2, 0], sizes = [1, 128], strides = [1, 1]} : vector<6x128xf32> to vector<1x128xf32>
    %600 = vector.extract_strided_slice %595 {offsets = [3, 0], sizes = [1, 128], strides = [1, 1]} : vector<6x128xf32> to vector<1x128xf32>
    %601 = arith.maximumf %599, %600 : vector<1x128xf32>
    %602 = vector.extract_strided_slice %595 {offsets = [4, 0], sizes = [1, 128], strides = [1, 1]} : vector<6x128xf32> to vector<1x128xf32>
    %603 = vector.extract_strided_slice %595 {offsets = [5, 0], sizes = [1, 128], strides = [1, 1]} : vector<6x128xf32> to vector<1x128xf32>
    %604 = arith.maximumf %602, %603 : vector<1x128xf32>
    %605 = vector.extract_strided_slice %431 {offsets = [0, 0, 0], sizes = [1, 6, 128], strides = [1, 1, 1]} : vector<6x6x128xf32> to vector<1x6x128xf32>
    %606 = vector.shape_cast %605 : vector<1x6x128xf32> to vector<6x128xf32>
    %607 = vector.extract_strided_slice %431 {offsets = [1, 0, 0], sizes = [1, 6, 128], strides = [1, 1, 1]} : vector<6x6x128xf32> to vector<1x6x128xf32>
    %608 = vector.shape_cast %607 : vector<1x6x128xf32> to vector<6x128xf32>
    %609 = arith.maximumf %606, %608 : vector<6x128xf32>
    %610 = vector.extract_strided_slice %609 {offsets = [0, 0], sizes = [1, 128], strides = [1, 1]} : vector<6x128xf32> to vector<1x128xf32>
    %611 = vector.extract_strided_slice %609 {offsets = [1, 0], sizes = [1, 128], strides = [1, 1]} : vector<6x128xf32> to vector<1x128xf32>
    %612 = arith.maximumf %610, %611 : vector<1x128xf32>
    %613 = vector.extract_strided_slice %609 {offsets = [2, 0], sizes = [1, 128], strides = [1, 1]} : vector<6x128xf32> to vector<1x128xf32>
    %614 = vector.extract_strided_slice %609 {offsets = [3, 0], sizes = [1, 128], strides = [1, 1]} : vector<6x128xf32> to vector<1x128xf32>
    %615 = arith.maximumf %613, %614 : vector<1x128xf32>
    %616 = vector.extract_strided_slice %609 {offsets = [4, 0], sizes = [1, 128], strides = [1, 1]} : vector<6x128xf32> to vector<1x128xf32>
    %617 = vector.extract_strided_slice %609 {offsets = [5, 0], sizes = [1, 128], strides = [1, 1]} : vector<6x128xf32> to vector<1x128xf32>
    %618 = arith.maximumf %616, %617 : vector<1x128xf32>
    %619 = vector.extract_strided_slice %431 {offsets = [2, 0, 0], sizes = [1, 6, 128], strides = [1, 1, 1]} : vector<6x6x128xf32> to vector<1x6x128xf32>
    %620 = vector.shape_cast %619 : vector<1x6x128xf32> to vector<6x128xf32>
    %621 = vector.extract_strided_slice %431 {offsets = [3, 0, 0], sizes = [1, 6, 128], strides = [1, 1, 1]} : vector<6x6x128xf32> to vector<1x6x128xf32>
    %622 = vector.shape_cast %621 : vector<1x6x128xf32> to vector<6x128xf32>
    %623 = arith.maximumf %620, %622 : vector<6x128xf32>
    %624 = vector.extract_strided_slice %623 {offsets = [0, 0], sizes = [1, 128], strides = [1, 1]} : vector<6x128xf32> to vector<1x128xf32>
    %625 = vector.extract_strided_slice %623 {offsets = [1, 0], sizes = [1, 128], strides = [1, 1]} : vector<6x128xf32> to vector<1x128xf32>
    %626 = arith.maximumf %624, %625 : vector<1x128xf32>
    %627 = vector.extract_strided_slice %623 {offsets = [2, 0], sizes = [1, 128], strides = [1, 1]} : vector<6x128xf32> to vector<1x128xf32>
    %628 = vector.extract_strided_slice %623 {offsets = [3, 0], sizes = [1, 128], strides = [1, 1]} : vector<6x128xf32> to vector<1x128xf32>
    %629 = arith.maximumf %627, %628 : vector<1x128xf32>
    %630 = vector.extract_strided_slice %623 {offsets = [4, 0], sizes = [1, 128], strides = [1, 1]} : vector<6x128xf32> to vector<1x128xf32>
    %631 = vector.extract_strided_slice %623 {offsets = [5, 0], sizes = [1, 128], strides = [1, 1]} : vector<6x128xf32> to vector<1x128xf32>
    %632 = arith.maximumf %630, %631 : vector<1x128xf32>
    %633 = vector.extract_strided_slice %431 {offsets = [4, 0, 0], sizes = [1, 6, 128], strides = [1, 1, 1]} : vector<6x6x128xf32> to vector<1x6x128xf32>
    %634 = vector.shape_cast %633 : vector<1x6x128xf32> to vector<6x128xf32>
    %635 = vector.extract_strided_slice %431 {offsets = [5, 0, 0], sizes = [1, 6, 128], strides = [1, 1, 1]} : vector<6x6x128xf32> to vector<1x6x128xf32>
    %636 = vector.shape_cast %635 : vector<1x6x128xf32> to vector<6x128xf32>
    %637 = arith.maximumf %634, %636 : vector<6x128xf32>
    %638 = vector.extract_strided_slice %637 {offsets = [0, 0], sizes = [1, 128], strides = [1, 1]} : vector<6x128xf32> to vector<1x128xf32>
    %639 = vector.extract_strided_slice %637 {offsets = [1, 0], sizes = [1, 128], strides = [1, 1]} : vector<6x128xf32> to vector<1x128xf32>
    %640 = arith.maximumf %638, %639 : vector<1x128xf32>
    %641 = vector.extract_strided_slice %637 {offsets = [2, 0], sizes = [1, 128], strides = [1, 1]} : vector<6x128xf32> to vector<1x128xf32>
    %642 = vector.extract_strided_slice %637 {offsets = [3, 0], sizes = [1, 128], strides = [1, 1]} : vector<6x128xf32> to vector<1x128xf32>
    %643 = arith.maximumf %641, %642 : vector<1x128xf32>
    %644 = vector.extract_strided_slice %637 {offsets = [4, 0], sizes = [1, 128], strides = [1, 1]} : vector<6x128xf32> to vector<1x128xf32>
    %645 = vector.extract_strided_slice %637 {offsets = [5, 0], sizes = [1, 128], strides = [1, 1]} : vector<6x128xf32> to vector<1x128xf32>
    %646 = arith.maximumf %644, %645 : vector<1x128xf32>
    %647 = vector.extract_strided_slice %436 {offsets = [0, 0, 0], sizes = [1, 6, 128], strides = [1, 1, 1]} : vector<6x6x128xf32> to vector<1x6x128xf32>
    %648 = vector.shape_cast %647 : vector<1x6x128xf32> to vector<6x128xf32>
    %649 = vector.extract_strided_slice %436 {offsets = [1, 0, 0], sizes = [1, 6, 128], strides = [1, 1, 1]} : vector<6x6x128xf32> to vector<1x6x128xf32>
    %650 = vector.shape_cast %649 : vector<1x6x128xf32> to vector<6x128xf32>
    %651 = arith.maximumf %648, %650 : vector<6x128xf32>
    %652 = vector.extract_strided_slice %651 {offsets = [0, 0], sizes = [1, 128], strides = [1, 1]} : vector<6x128xf32> to vector<1x128xf32>
    %653 = vector.extract_strided_slice %651 {offsets = [1, 0], sizes = [1, 128], strides = [1, 1]} : vector<6x128xf32> to vector<1x128xf32>
    %654 = arith.maximumf %652, %653 : vector<1x128xf32>
    %655 = vector.extract_strided_slice %651 {offsets = [2, 0], sizes = [1, 128], strides = [1, 1]} : vector<6x128xf32> to vector<1x128xf32>
    %656 = vector.extract_strided_slice %651 {offsets = [3, 0], sizes = [1, 128], strides = [1, 1]} : vector<6x128xf32> to vector<1x128xf32>
    %657 = arith.maximumf %655, %656 : vector<1x128xf32>
    %658 = vector.extract_strided_slice %651 {offsets = [4, 0], sizes = [1, 128], strides = [1, 1]} : vector<6x128xf32> to vector<1x128xf32>
    %659 = vector.extract_strided_slice %651 {offsets = [5, 0], sizes = [1, 128], strides = [1, 1]} : vector<6x128xf32> to vector<1x128xf32>
    %660 = arith.maximumf %658, %659 : vector<1x128xf32>
    %661 = vector.extract_strided_slice %436 {offsets = [2, 0, 0], sizes = [1, 6, 128], strides = [1, 1, 1]} : vector<6x6x128xf32> to vector<1x6x128xf32>
    %662 = vector.shape_cast %661 : vector<1x6x128xf32> to vector<6x128xf32>
    %663 = vector.extract_strided_slice %436 {offsets = [3, 0, 0], sizes = [1, 6, 128], strides = [1, 1, 1]} : vector<6x6x128xf32> to vector<1x6x128xf32>
    %664 = vector.shape_cast %663 : vector<1x6x128xf32> to vector<6x128xf32>
    %665 = arith.maximumf %662, %664 : vector<6x128xf32>
    %666 = vector.extract_strided_slice %665 {offsets = [0, 0], sizes = [1, 128], strides = [1, 1]} : vector<6x128xf32> to vector<1x128xf32>
    %667 = vector.extract_strided_slice %665 {offsets = [1, 0], sizes = [1, 128], strides = [1, 1]} : vector<6x128xf32> to vector<1x128xf32>
    %668 = arith.maximumf %666, %667 : vector<1x128xf32>
    %669 = vector.extract_strided_slice %665 {offsets = [2, 0], sizes = [1, 128], strides = [1, 1]} : vector<6x128xf32> to vector<1x128xf32>
    %670 = vector.extract_strided_slice %665 {offsets = [3, 0], sizes = [1, 128], strides = [1, 1]} : vector<6x128xf32> to vector<1x128xf32>
    %671 = arith.maximumf %669, %670 : vector<1x128xf32>
    %672 = vector.extract_strided_slice %665 {offsets = [4, 0], sizes = [1, 128], strides = [1, 1]} : vector<6x128xf32> to vector<1x128xf32>
    %673 = vector.extract_strided_slice %665 {offsets = [5, 0], sizes = [1, 128], strides = [1, 1]} : vector<6x128xf32> to vector<1x128xf32>
    %674 = arith.maximumf %672, %673 : vector<1x128xf32>
    %675 = vector.extract_strided_slice %436 {offsets = [4, 0, 0], sizes = [1, 6, 128], strides = [1, 1, 1]} : vector<6x6x128xf32> to vector<1x6x128xf32>
    %676 = vector.shape_cast %675 : vector<1x6x128xf32> to vector<6x128xf32>
    %677 = vector.extract_strided_slice %436 {offsets = [5, 0, 0], sizes = [1, 6, 128], strides = [1, 1, 1]} : vector<6x6x128xf32> to vector<1x6x128xf32>
    %678 = vector.shape_cast %677 : vector<1x6x128xf32> to vector<6x128xf32>
    %679 = arith.maximumf %676, %678 : vector<6x128xf32>
    %680 = vector.extract_strided_slice %679 {offsets = [0, 0], sizes = [1, 128], strides = [1, 1]} : vector<6x128xf32> to vector<1x128xf32>
    %681 = vector.extract_strided_slice %679 {offsets = [1, 0], sizes = [1, 128], strides = [1, 1]} : vector<6x128xf32> to vector<1x128xf32>
    %682 = arith.maximumf %680, %681 : vector<1x128xf32>
    %683 = vector.extract_strided_slice %679 {offsets = [2, 0], sizes = [1, 128], strides = [1, 1]} : vector<6x128xf32> to vector<1x128xf32>
    %684 = vector.extract_strided_slice %679 {offsets = [3, 0], sizes = [1, 128], strides = [1, 1]} : vector<6x128xf32> to vector<1x128xf32>
    %685 = arith.maximumf %683, %684 : vector<1x128xf32>
    %686 = vector.extract_strided_slice %679 {offsets = [4, 0], sizes = [1, 128], strides = [1, 1]} : vector<6x128xf32> to vector<1x128xf32>
    %687 = vector.extract_strided_slice %679 {offsets = [5, 0], sizes = [1, 128], strides = [1, 1]} : vector<6x128xf32> to vector<1x128xf32>
    %688 = arith.maximumf %686, %687 : vector<1x128xf32>
    %cst_20 = arith.constant 0.000000e+00 : f32
    %689 = vector.broadcast %cst_20 : f32 to vector<1x128xf32>
    %c0_21 = arith.constant 0 : index
    %690 = memref.load %arg5[%c0_21] : memref<3xf32, #tpu.memory_space<smem>>
    %691 = vector.broadcast %690 : f32 to vector<1x128xf32>
    %692 = arith.addf %689, %691 : vector<1x128xf32>
    %c0_22 = arith.constant 0 : index
    %693 = memref.load %arg4[%c0_22] : memref<72xf32, #tpu.memory_space<smem>>
    %694 = vector.broadcast %693 : f32 to vector<1x128xf32>
    %695 = arith.mulf %444, %694 : vector<1x128xf32>
    %696 = arith.addf %692, %695 : vector<1x128xf32>
    %c1_23 = arith.constant 1 : index
    %697 = memref.load %arg4[%c1_23] : memref<72xf32, #tpu.memory_space<smem>>
    %698 = vector.broadcast %697 : f32 to vector<1x128xf32>
    %699 = arith.mulf %447, %698 : vector<1x128xf32>
    %700 = arith.addf %696, %699 : vector<1x128xf32>
    %c2_24 = arith.constant 2 : index
    %701 = memref.load %arg4[%c2_24] : memref<72xf32, #tpu.memory_space<smem>>
    %702 = vector.broadcast %701 : f32 to vector<1x128xf32>
    %703 = arith.mulf %458, %702 : vector<1x128xf32>
    %704 = arith.addf %700, %703 : vector<1x128xf32>
    %c3_25 = arith.constant 3 : index
    %705 = memref.load %arg4[%c3_25] : memref<72xf32, #tpu.memory_space<smem>>
    %706 = vector.broadcast %705 : f32 to vector<1x128xf32>
    %707 = arith.mulf %461, %706 : vector<1x128xf32>
    %708 = arith.addf %704, %707 : vector<1x128xf32>
    %c4_26 = arith.constant 4 : index
    %709 = memref.load %arg4[%c4_26] : memref<72xf32, #tpu.memory_space<smem>>
    %710 = vector.broadcast %709 : f32 to vector<1x128xf32>
    %711 = arith.mulf %486, %710 : vector<1x128xf32>
    %712 = arith.addf %708, %711 : vector<1x128xf32>
    %c5_27 = arith.constant 5 : index
    %713 = memref.load %arg4[%c5_27] : memref<72xf32, #tpu.memory_space<smem>>
    %714 = vector.broadcast %713 : f32 to vector<1x128xf32>
    %715 = arith.mulf %489, %714 : vector<1x128xf32>
    %716 = arith.addf %712, %715 : vector<1x128xf32>
    %c6_28 = arith.constant 6 : index
    %717 = memref.load %arg4[%c6_28] : memref<72xf32, #tpu.memory_space<smem>>
    %718 = vector.broadcast %717 : f32 to vector<1x128xf32>
    %719 = arith.mulf %500, %718 : vector<1x128xf32>
    %720 = arith.addf %716, %719 : vector<1x128xf32>
    %c7_29 = arith.constant 7 : index
    %721 = memref.load %arg4[%c7_29] : memref<72xf32, #tpu.memory_space<smem>>
    %722 = vector.broadcast %721 : f32 to vector<1x128xf32>
    %723 = arith.mulf %503, %722 : vector<1x128xf32>
    %724 = arith.addf %720, %723 : vector<1x128xf32>
    %c8_30 = arith.constant 8 : index
    %725 = memref.load %arg4[%c8_30] : memref<72xf32, #tpu.memory_space<smem>>
    %726 = vector.broadcast %725 : f32 to vector<1x128xf32>
    %727 = arith.mulf %528, %726 : vector<1x128xf32>
    %728 = arith.addf %724, %727 : vector<1x128xf32>
    %c9_31 = arith.constant 9 : index
    %729 = memref.load %arg4[%c9_31] : memref<72xf32, #tpu.memory_space<smem>>
    %730 = vector.broadcast %729 : f32 to vector<1x128xf32>
    %731 = arith.mulf %531, %730 : vector<1x128xf32>
    %732 = arith.addf %728, %731 : vector<1x128xf32>
    %c10_32 = arith.constant 10 : index
    %733 = memref.load %arg4[%c10_32] : memref<72xf32, #tpu.memory_space<smem>>
    %734 = vector.broadcast %733 : f32 to vector<1x128xf32>
    %735 = arith.mulf %542, %734 : vector<1x128xf32>
    %736 = arith.addf %732, %735 : vector<1x128xf32>
    %c11_33 = arith.constant 11 : index
    %737 = memref.load %arg4[%c11_33] : memref<72xf32, #tpu.memory_space<smem>>
    %738 = vector.broadcast %737 : f32 to vector<1x128xf32>
    %739 = arith.mulf %545, %738 : vector<1x128xf32>
    %740 = arith.addf %736, %739 : vector<1x128xf32>
    %c12_34 = arith.constant 12 : index
    %741 = memref.load %arg4[%c12_34] : memref<72xf32, #tpu.memory_space<smem>>
    %742 = vector.broadcast %741 : f32 to vector<1x128xf32>
    %743 = arith.mulf %570, %742 : vector<1x128xf32>
    %744 = arith.addf %740, %743 : vector<1x128xf32>
    %c13_35 = arith.constant 13 : index
    %745 = memref.load %arg4[%c13_35] : memref<72xf32, #tpu.memory_space<smem>>
    %746 = vector.broadcast %745 : f32 to vector<1x128xf32>
    %747 = arith.mulf %573, %746 : vector<1x128xf32>
    %748 = arith.addf %744, %747 : vector<1x128xf32>
    %c14_36 = arith.constant 14 : index
    %749 = memref.load %arg4[%c14_36] : memref<72xf32, #tpu.memory_space<smem>>
    %750 = vector.broadcast %749 : f32 to vector<1x128xf32>
    %751 = arith.mulf %584, %750 : vector<1x128xf32>
    %752 = arith.addf %748, %751 : vector<1x128xf32>
    %c15_37 = arith.constant 15 : index
    %753 = memref.load %arg4[%c15_37] : memref<72xf32, #tpu.memory_space<smem>>
    %754 = vector.broadcast %753 : f32 to vector<1x128xf32>
    %755 = arith.mulf %587, %754 : vector<1x128xf32>
    %756 = arith.addf %752, %755 : vector<1x128xf32>
    %c16_38 = arith.constant 16 : index
    %757 = memref.load %arg4[%c16_38] : memref<72xf32, #tpu.memory_space<smem>>
    %758 = vector.broadcast %757 : f32 to vector<1x128xf32>
    %759 = arith.mulf %612, %758 : vector<1x128xf32>
    %760 = arith.addf %756, %759 : vector<1x128xf32>
    %c17_39 = arith.constant 17 : index
    %761 = memref.load %arg4[%c17_39] : memref<72xf32, #tpu.memory_space<smem>>
    %762 = vector.broadcast %761 : f32 to vector<1x128xf32>
    %763 = arith.mulf %615, %762 : vector<1x128xf32>
    %764 = arith.addf %760, %763 : vector<1x128xf32>
    %c18_40 = arith.constant 18 : index
    %765 = memref.load %arg4[%c18_40] : memref<72xf32, #tpu.memory_space<smem>>
    %766 = vector.broadcast %765 : f32 to vector<1x128xf32>
    %767 = arith.mulf %626, %766 : vector<1x128xf32>
    %768 = arith.addf %764, %767 : vector<1x128xf32>
    %c19_41 = arith.constant 19 : index
    %769 = memref.load %arg4[%c19_41] : memref<72xf32, #tpu.memory_space<smem>>
    %770 = vector.broadcast %769 : f32 to vector<1x128xf32>
    %771 = arith.mulf %629, %770 : vector<1x128xf32>
    %772 = arith.addf %768, %771 : vector<1x128xf32>
    %c20_42 = arith.constant 20 : index
    %773 = memref.load %arg4[%c20_42] : memref<72xf32, #tpu.memory_space<smem>>
    %774 = vector.broadcast %773 : f32 to vector<1x128xf32>
    %775 = arith.mulf %654, %774 : vector<1x128xf32>
    %776 = arith.addf %772, %775 : vector<1x128xf32>
    %c21_43 = arith.constant 21 : index
    %777 = memref.load %arg4[%c21_43] : memref<72xf32, #tpu.memory_space<smem>>
    %778 = vector.broadcast %777 : f32 to vector<1x128xf32>
    %779 = arith.mulf %657, %778 : vector<1x128xf32>
    %780 = arith.addf %776, %779 : vector<1x128xf32>
    %c22_44 = arith.constant 22 : index
    %781 = memref.load %arg4[%c22_44] : memref<72xf32, #tpu.memory_space<smem>>
    %782 = vector.broadcast %781 : f32 to vector<1x128xf32>
    %783 = arith.mulf %668, %782 : vector<1x128xf32>
    %784 = arith.addf %780, %783 : vector<1x128xf32>
    %c23_45 = arith.constant 23 : index
    %785 = memref.load %arg4[%c23_45] : memref<72xf32, #tpu.memory_space<smem>>
    %786 = vector.broadcast %785 : f32 to vector<1x128xf32>
    %787 = arith.mulf %671, %786 : vector<1x128xf32>
    %788 = arith.addf %784, %787 : vector<1x128xf32>
    %cst_46 = arith.constant 0.000000e+00 : f32
    %789 = vector.broadcast %cst_46 : f32 to vector<1x128xf32>
    %790 = arith.maximumf %788, %789 : vector<1x128xf32>
    %cst_47 = arith.constant 0.000000e+00 : f32
    %791 = vector.broadcast %cst_47 : f32 to vector<1x128xf32>
    %c0_48 = arith.constant 0 : index
    %792 = memref.load %arg5[%c0_48] : memref<3xf32, #tpu.memory_space<smem>>
    %793 = vector.broadcast %792 : f32 to vector<1x128xf32>
    %794 = arith.addf %791, %793 : vector<1x128xf32>
    %c0_49 = arith.constant 0 : index
    %795 = memref.load %arg4[%c0_49] : memref<72xf32, #tpu.memory_space<smem>>
    %796 = vector.broadcast %795 : f32 to vector<1x128xf32>
    %797 = arith.mulf %447, %796 : vector<1x128xf32>
    %798 = arith.addf %794, %797 : vector<1x128xf32>
    %c1_50 = arith.constant 1 : index
    %799 = memref.load %arg4[%c1_50] : memref<72xf32, #tpu.memory_space<smem>>
    %800 = vector.broadcast %799 : f32 to vector<1x128xf32>
    %801 = arith.mulf %450, %800 : vector<1x128xf32>
    %802 = arith.addf %798, %801 : vector<1x128xf32>
    %c2_51 = arith.constant 2 : index
    %803 = memref.load %arg4[%c2_51] : memref<72xf32, #tpu.memory_space<smem>>
    %804 = vector.broadcast %803 : f32 to vector<1x128xf32>
    %805 = arith.mulf %461, %804 : vector<1x128xf32>
    %806 = arith.addf %802, %805 : vector<1x128xf32>
    %c3_52 = arith.constant 3 : index
    %807 = memref.load %arg4[%c3_52] : memref<72xf32, #tpu.memory_space<smem>>
    %808 = vector.broadcast %807 : f32 to vector<1x128xf32>
    %809 = arith.mulf %464, %808 : vector<1x128xf32>
    %810 = arith.addf %806, %809 : vector<1x128xf32>
    %c4_53 = arith.constant 4 : index
    %811 = memref.load %arg4[%c4_53] : memref<72xf32, #tpu.memory_space<smem>>
    %812 = vector.broadcast %811 : f32 to vector<1x128xf32>
    %813 = arith.mulf %489, %812 : vector<1x128xf32>
    %814 = arith.addf %810, %813 : vector<1x128xf32>
    %c5_54 = arith.constant 5 : index
    %815 = memref.load %arg4[%c5_54] : memref<72xf32, #tpu.memory_space<smem>>
    %816 = vector.broadcast %815 : f32 to vector<1x128xf32>
    %817 = arith.mulf %492, %816 : vector<1x128xf32>
    %818 = arith.addf %814, %817 : vector<1x128xf32>
    %c6_55 = arith.constant 6 : index
    %819 = memref.load %arg4[%c6_55] : memref<72xf32, #tpu.memory_space<smem>>
    %820 = vector.broadcast %819 : f32 to vector<1x128xf32>
    %821 = arith.mulf %503, %820 : vector<1x128xf32>
    %822 = arith.addf %818, %821 : vector<1x128xf32>
    %c7_56 = arith.constant 7 : index
    %823 = memref.load %arg4[%c7_56] : memref<72xf32, #tpu.memory_space<smem>>
    %824 = vector.broadcast %823 : f32 to vector<1x128xf32>
    %825 = arith.mulf %506, %824 : vector<1x128xf32>
    %826 = arith.addf %822, %825 : vector<1x128xf32>
    %c8_57 = arith.constant 8 : index
    %827 = memref.load %arg4[%c8_57] : memref<72xf32, #tpu.memory_space<smem>>
    %828 = vector.broadcast %827 : f32 to vector<1x128xf32>
    %829 = arith.mulf %531, %828 : vector<1x128xf32>
    %830 = arith.addf %826, %829 : vector<1x128xf32>
    %c9_58 = arith.constant 9 : index
    %831 = memref.load %arg4[%c9_58] : memref<72xf32, #tpu.memory_space<smem>>
    %832 = vector.broadcast %831 : f32 to vector<1x128xf32>
    %833 = arith.mulf %534, %832 : vector<1x128xf32>
    %834 = arith.addf %830, %833 : vector<1x128xf32>
    %c10_59 = arith.constant 10 : index
    %835 = memref.load %arg4[%c10_59] : memref<72xf32, #tpu.memory_space<smem>>
    %836 = vector.broadcast %835 : f32 to vector<1x128xf32>
    %837 = arith.mulf %545, %836 : vector<1x128xf32>
    %838 = arith.addf %834, %837 : vector<1x128xf32>
    %c11_60 = arith.constant 11 : index
    %839 = memref.load %arg4[%c11_60] : memref<72xf32, #tpu.memory_space<smem>>
    %840 = vector.broadcast %839 : f32 to vector<1x128xf32>
    %841 = arith.mulf %548, %840 : vector<1x128xf32>
    %842 = arith.addf %838, %841 : vector<1x128xf32>
    %c12_61 = arith.constant 12 : index
    %843 = memref.load %arg4[%c12_61] : memref<72xf32, #tpu.memory_space<smem>>
    %844 = vector.broadcast %843 : f32 to vector<1x128xf32>
    %845 = arith.mulf %573, %844 : vector<1x128xf32>
    %846 = arith.addf %842, %845 : vector<1x128xf32>
    %c13_62 = arith.constant 13 : index
    %847 = memref.load %arg4[%c13_62] : memref<72xf32, #tpu.memory_space<smem>>
    %848 = vector.broadcast %847 : f32 to vector<1x128xf32>
    %849 = arith.mulf %576, %848 : vector<1x128xf32>
    %850 = arith.addf %846, %849 : vector<1x128xf32>
    %c14_63 = arith.constant 14 : index
    %851 = memref.load %arg4[%c14_63] : memref<72xf32, #tpu.memory_space<smem>>
    %852 = vector.broadcast %851 : f32 to vector<1x128xf32>
    %853 = arith.mulf %587, %852 : vector<1x128xf32>
    %854 = arith.addf %850, %853 : vector<1x128xf32>
    %c15_64 = arith.constant 15 : index
    %855 = memref.load %arg4[%c15_64] : memref<72xf32, #tpu.memory_space<smem>>
    %856 = vector.broadcast %855 : f32 to vector<1x128xf32>
    %857 = arith.mulf %590, %856 : vector<1x128xf32>
    %858 = arith.addf %854, %857 : vector<1x128xf32>
    %c16_65 = arith.constant 16 : index
    %859 = memref.load %arg4[%c16_65] : memref<72xf32, #tpu.memory_space<smem>>
    %860 = vector.broadcast %859 : f32 to vector<1x128xf32>
    %861 = arith.mulf %615, %860 : vector<1x128xf32>
    %862 = arith.addf %858, %861 : vector<1x128xf32>
    %c17_66 = arith.constant 17 : index
    %863 = memref.load %arg4[%c17_66] : memref<72xf32, #tpu.memory_space<smem>>
    %864 = vector.broadcast %863 : f32 to vector<1x128xf32>
    %865 = arith.mulf %618, %864 : vector<1x128xf32>
    %866 = arith.addf %862, %865 : vector<1x128xf32>
    %c18_67 = arith.constant 18 : index
    %867 = memref.load %arg4[%c18_67] : memref<72xf32, #tpu.memory_space<smem>>
    %868 = vector.broadcast %867 : f32 to vector<1x128xf32>
    %869 = arith.mulf %629, %868 : vector<1x128xf32>
    %870 = arith.addf %866, %869 : vector<1x128xf32>
    %c19_68 = arith.constant 19 : index
    %871 = memref.load %arg4[%c19_68] : memref<72xf32, #tpu.memory_space<smem>>
    %872 = vector.broadcast %871 : f32 to vector<1x128xf32>
    %873 = arith.mulf %632, %872 : vector<1x128xf32>
    %874 = arith.addf %870, %873 : vector<1x128xf32>
    %c20_69 = arith.constant 20 : index
    %875 = memref.load %arg4[%c20_69] : memref<72xf32, #tpu.memory_space<smem>>
    %876 = vector.broadcast %875 : f32 to vector<1x128xf32>
    %877 = arith.mulf %657, %876 : vector<1x128xf32>
    %878 = arith.addf %874, %877 : vector<1x128xf32>
    %c21_70 = arith.constant 21 : index
    %879 = memref.load %arg4[%c21_70] : memref<72xf32, #tpu.memory_space<smem>>
    %880 = vector.broadcast %879 : f32 to vector<1x128xf32>
    %881 = arith.mulf %660, %880 : vector<1x128xf32>
    %882 = arith.addf %878, %881 : vector<1x128xf32>
    %c22_71 = arith.constant 22 : index
    %883 = memref.load %arg4[%c22_71] : memref<72xf32, #tpu.memory_space<smem>>
    %884 = vector.broadcast %883 : f32 to vector<1x128xf32>
    %885 = arith.mulf %671, %884 : vector<1x128xf32>
    %886 = arith.addf %882, %885 : vector<1x128xf32>
    %c23_72 = arith.constant 23 : index
    %887 = memref.load %arg4[%c23_72] : memref<72xf32, #tpu.memory_space<smem>>
    %888 = vector.broadcast %887 : f32 to vector<1x128xf32>
    %889 = arith.mulf %674, %888 : vector<1x128xf32>
    %890 = arith.addf %886, %889 : vector<1x128xf32>
    %cst_73 = arith.constant 0.000000e+00 : f32
    %891 = vector.broadcast %cst_73 : f32 to vector<1x128xf32>
    %892 = arith.maximumf %890, %891 : vector<1x128xf32>
    %cst_74 = arith.constant 0.000000e+00 : f32
    %893 = vector.broadcast %cst_74 : f32 to vector<1x128xf32>
    %c0_75 = arith.constant 0 : index
    %894 = memref.load %arg5[%c0_75] : memref<3xf32, #tpu.memory_space<smem>>
    %895 = vector.broadcast %894 : f32 to vector<1x128xf32>
    %896 = arith.addf %893, %895 : vector<1x128xf32>
    %c0_76 = arith.constant 0 : index
    %897 = memref.load %arg4[%c0_76] : memref<72xf32, #tpu.memory_space<smem>>
    %898 = vector.broadcast %897 : f32 to vector<1x128xf32>
    %899 = arith.mulf %458, %898 : vector<1x128xf32>
    %900 = arith.addf %896, %899 : vector<1x128xf32>
    %c1_77 = arith.constant 1 : index
    %901 = memref.load %arg4[%c1_77] : memref<72xf32, #tpu.memory_space<smem>>
    %902 = vector.broadcast %901 : f32 to vector<1x128xf32>
    %903 = arith.mulf %461, %902 : vector<1x128xf32>
    %904 = arith.addf %900, %903 : vector<1x128xf32>
    %c2_78 = arith.constant 2 : index
    %905 = memref.load %arg4[%c2_78] : memref<72xf32, #tpu.memory_space<smem>>
    %906 = vector.broadcast %905 : f32 to vector<1x128xf32>
    %907 = arith.mulf %472, %906 : vector<1x128xf32>
    %908 = arith.addf %904, %907 : vector<1x128xf32>
    %c3_79 = arith.constant 3 : index
    %909 = memref.load %arg4[%c3_79] : memref<72xf32, #tpu.memory_space<smem>>
    %910 = vector.broadcast %909 : f32 to vector<1x128xf32>
    %911 = arith.mulf %475, %910 : vector<1x128xf32>
    %912 = arith.addf %908, %911 : vector<1x128xf32>
    %c4_80 = arith.constant 4 : index
    %913 = memref.load %arg4[%c4_80] : memref<72xf32, #tpu.memory_space<smem>>
    %914 = vector.broadcast %913 : f32 to vector<1x128xf32>
    %915 = arith.mulf %500, %914 : vector<1x128xf32>
    %916 = arith.addf %912, %915 : vector<1x128xf32>
    %c5_81 = arith.constant 5 : index
    %917 = memref.load %arg4[%c5_81] : memref<72xf32, #tpu.memory_space<smem>>
    %918 = vector.broadcast %917 : f32 to vector<1x128xf32>
    %919 = arith.mulf %503, %918 : vector<1x128xf32>
    %920 = arith.addf %916, %919 : vector<1x128xf32>
    %c6_82 = arith.constant 6 : index
    %921 = memref.load %arg4[%c6_82] : memref<72xf32, #tpu.memory_space<smem>>
    %922 = vector.broadcast %921 : f32 to vector<1x128xf32>
    %923 = arith.mulf %514, %922 : vector<1x128xf32>
    %924 = arith.addf %920, %923 : vector<1x128xf32>
    %c7_83 = arith.constant 7 : index
    %925 = memref.load %arg4[%c7_83] : memref<72xf32, #tpu.memory_space<smem>>
    %926 = vector.broadcast %925 : f32 to vector<1x128xf32>
    %927 = arith.mulf %517, %926 : vector<1x128xf32>
    %928 = arith.addf %924, %927 : vector<1x128xf32>
    %c8_84 = arith.constant 8 : index
    %929 = memref.load %arg4[%c8_84] : memref<72xf32, #tpu.memory_space<smem>>
    %930 = vector.broadcast %929 : f32 to vector<1x128xf32>
    %931 = arith.mulf %542, %930 : vector<1x128xf32>
    %932 = arith.addf %928, %931 : vector<1x128xf32>
    %c9_85 = arith.constant 9 : index
    %933 = memref.load %arg4[%c9_85] : memref<72xf32, #tpu.memory_space<smem>>
    %934 = vector.broadcast %933 : f32 to vector<1x128xf32>
    %935 = arith.mulf %545, %934 : vector<1x128xf32>
    %936 = arith.addf %932, %935 : vector<1x128xf32>
    %c10_86 = arith.constant 10 : index
    %937 = memref.load %arg4[%c10_86] : memref<72xf32, #tpu.memory_space<smem>>
    %938 = vector.broadcast %937 : f32 to vector<1x128xf32>
    %939 = arith.mulf %556, %938 : vector<1x128xf32>
    %940 = arith.addf %936, %939 : vector<1x128xf32>
    %c11_87 = arith.constant 11 : index
    %941 = memref.load %arg4[%c11_87] : memref<72xf32, #tpu.memory_space<smem>>
    %942 = vector.broadcast %941 : f32 to vector<1x128xf32>
    %943 = arith.mulf %559, %942 : vector<1x128xf32>
    %944 = arith.addf %940, %943 : vector<1x128xf32>
    %c12_88 = arith.constant 12 : index
    %945 = memref.load %arg4[%c12_88] : memref<72xf32, #tpu.memory_space<smem>>
    %946 = vector.broadcast %945 : f32 to vector<1x128xf32>
    %947 = arith.mulf %584, %946 : vector<1x128xf32>
    %948 = arith.addf %944, %947 : vector<1x128xf32>
    %c13_89 = arith.constant 13 : index
    %949 = memref.load %arg4[%c13_89] : memref<72xf32, #tpu.memory_space<smem>>
    %950 = vector.broadcast %949 : f32 to vector<1x128xf32>
    %951 = arith.mulf %587, %950 : vector<1x128xf32>
    %952 = arith.addf %948, %951 : vector<1x128xf32>
    %c14_90 = arith.constant 14 : index
    %953 = memref.load %arg4[%c14_90] : memref<72xf32, #tpu.memory_space<smem>>
    %954 = vector.broadcast %953 : f32 to vector<1x128xf32>
    %955 = arith.mulf %598, %954 : vector<1x128xf32>
    %956 = arith.addf %952, %955 : vector<1x128xf32>
    %c15_91 = arith.constant 15 : index
    %957 = memref.load %arg4[%c15_91] : memref<72xf32, #tpu.memory_space<smem>>
    %958 = vector.broadcast %957 : f32 to vector<1x128xf32>
    %959 = arith.mulf %601, %958 : vector<1x128xf32>
    %960 = arith.addf %956, %959 : vector<1x128xf32>
    %c16_92 = arith.constant 16 : index
    %961 = memref.load %arg4[%c16_92] : memref<72xf32, #tpu.memory_space<smem>>
    %962 = vector.broadcast %961 : f32 to vector<1x128xf32>
    %963 = arith.mulf %626, %962 : vector<1x128xf32>
    %964 = arith.addf %960, %963 : vector<1x128xf32>
    %c17_93 = arith.constant 17 : index
    %965 = memref.load %arg4[%c17_93] : memref<72xf32, #tpu.memory_space<smem>>
    %966 = vector.broadcast %965 : f32 to vector<1x128xf32>
    %967 = arith.mulf %629, %966 : vector<1x128xf32>
    %968 = arith.addf %964, %967 : vector<1x128xf32>
    %c18_94 = arith.constant 18 : index
    %969 = memref.load %arg4[%c18_94] : memref<72xf32, #tpu.memory_space<smem>>
    %970 = vector.broadcast %969 : f32 to vector<1x128xf32>
    %971 = arith.mulf %640, %970 : vector<1x128xf32>
    %972 = arith.addf %968, %971 : vector<1x128xf32>
    %c19_95 = arith.constant 19 : index
    %973 = memref.load %arg4[%c19_95] : memref<72xf32, #tpu.memory_space<smem>>
    %974 = vector.broadcast %973 : f32 to vector<1x128xf32>
    %975 = arith.mulf %643, %974 : vector<1x128xf32>
    %976 = arith.addf %972, %975 : vector<1x128xf32>
    %c20_96 = arith.constant 20 : index
    %977 = memref.load %arg4[%c20_96] : memref<72xf32, #tpu.memory_space<smem>>
    %978 = vector.broadcast %977 : f32 to vector<1x128xf32>
    %979 = arith.mulf %668, %978 : vector<1x128xf32>
    %980 = arith.addf %976, %979 : vector<1x128xf32>
    %c21_97 = arith.constant 21 : index
    %981 = memref.load %arg4[%c21_97] : memref<72xf32, #tpu.memory_space<smem>>
    %982 = vector.broadcast %981 : f32 to vector<1x128xf32>
    %983 = arith.mulf %671, %982 : vector<1x128xf32>
    %984 = arith.addf %980, %983 : vector<1x128xf32>
    %c22_98 = arith.constant 22 : index
    %985 = memref.load %arg4[%c22_98] : memref<72xf32, #tpu.memory_space<smem>>
    %986 = vector.broadcast %985 : f32 to vector<1x128xf32>
    %987 = arith.mulf %682, %986 : vector<1x128xf32>
    %988 = arith.addf %984, %987 : vector<1x128xf32>
    %c23_99 = arith.constant 23 : index
    %989 = memref.load %arg4[%c23_99] : memref<72xf32, #tpu.memory_space<smem>>
    %990 = vector.broadcast %989 : f32 to vector<1x128xf32>
    %991 = arith.mulf %685, %990 : vector<1x128xf32>
    %992 = arith.addf %988, %991 : vector<1x128xf32>
    %cst_100 = arith.constant 0.000000e+00 : f32
    %993 = vector.broadcast %cst_100 : f32 to vector<1x128xf32>
    %994 = arith.maximumf %992, %993 : vector<1x128xf32>
    %cst_101 = arith.constant 0.000000e+00 : f32
    %995 = vector.broadcast %cst_101 : f32 to vector<1x128xf32>
    %c0_102 = arith.constant 0 : index
    %996 = memref.load %arg5[%c0_102] : memref<3xf32, #tpu.memory_space<smem>>
    %997 = vector.broadcast %996 : f32 to vector<1x128xf32>
    %998 = arith.addf %995, %997 : vector<1x128xf32>
    %c0_103 = arith.constant 0 : index
    %999 = memref.load %arg4[%c0_103] : memref<72xf32, #tpu.memory_space<smem>>
    %1000 = vector.broadcast %999 : f32 to vector<1x128xf32>
    %1001 = arith.mulf %461, %1000 : vector<1x128xf32>
    %1002 = arith.addf %998, %1001 : vector<1x128xf32>
    %c1_104 = arith.constant 1 : index
    %1003 = memref.load %arg4[%c1_104] : memref<72xf32, #tpu.memory_space<smem>>
    %1004 = vector.broadcast %1003 : f32 to vector<1x128xf32>
    %1005 = arith.mulf %464, %1004 : vector<1x128xf32>
    %1006 = arith.addf %1002, %1005 : vector<1x128xf32>
    %c2_105 = arith.constant 2 : index
    %1007 = memref.load %arg4[%c2_105] : memref<72xf32, #tpu.memory_space<smem>>
    %1008 = vector.broadcast %1007 : f32 to vector<1x128xf32>
    %1009 = arith.mulf %475, %1008 : vector<1x128xf32>
    %1010 = arith.addf %1006, %1009 : vector<1x128xf32>
    %c3_106 = arith.constant 3 : index
    %1011 = memref.load %arg4[%c3_106] : memref<72xf32, #tpu.memory_space<smem>>
    %1012 = vector.broadcast %1011 : f32 to vector<1x128xf32>
    %1013 = arith.mulf %478, %1012 : vector<1x128xf32>
    %1014 = arith.addf %1010, %1013 : vector<1x128xf32>
    %c4_107 = arith.constant 4 : index
    %1015 = memref.load %arg4[%c4_107] : memref<72xf32, #tpu.memory_space<smem>>
    %1016 = vector.broadcast %1015 : f32 to vector<1x128xf32>
    %1017 = arith.mulf %503, %1016 : vector<1x128xf32>
    %1018 = arith.addf %1014, %1017 : vector<1x128xf32>
    %c5_108 = arith.constant 5 : index
    %1019 = memref.load %arg4[%c5_108] : memref<72xf32, #tpu.memory_space<smem>>
    %1020 = vector.broadcast %1019 : f32 to vector<1x128xf32>
    %1021 = arith.mulf %506, %1020 : vector<1x128xf32>
    %1022 = arith.addf %1018, %1021 : vector<1x128xf32>
    %c6_109 = arith.constant 6 : index
    %1023 = memref.load %arg4[%c6_109] : memref<72xf32, #tpu.memory_space<smem>>
    %1024 = vector.broadcast %1023 : f32 to vector<1x128xf32>
    %1025 = arith.mulf %517, %1024 : vector<1x128xf32>
    %1026 = arith.addf %1022, %1025 : vector<1x128xf32>
    %c7_110 = arith.constant 7 : index
    %1027 = memref.load %arg4[%c7_110] : memref<72xf32, #tpu.memory_space<smem>>
    %1028 = vector.broadcast %1027 : f32 to vector<1x128xf32>
    %1029 = arith.mulf %520, %1028 : vector<1x128xf32>
    %1030 = arith.addf %1026, %1029 : vector<1x128xf32>
    %c8_111 = arith.constant 8 : index
    %1031 = memref.load %arg4[%c8_111] : memref<72xf32, #tpu.memory_space<smem>>
    %1032 = vector.broadcast %1031 : f32 to vector<1x128xf32>
    %1033 = arith.mulf %545, %1032 : vector<1x128xf32>
    %1034 = arith.addf %1030, %1033 : vector<1x128xf32>
    %c9_112 = arith.constant 9 : index
    %1035 = memref.load %arg4[%c9_112] : memref<72xf32, #tpu.memory_space<smem>>
    %1036 = vector.broadcast %1035 : f32 to vector<1x128xf32>
    %1037 = arith.mulf %548, %1036 : vector<1x128xf32>
    %1038 = arith.addf %1034, %1037 : vector<1x128xf32>
    %c10_113 = arith.constant 10 : index
    %1039 = memref.load %arg4[%c10_113] : memref<72xf32, #tpu.memory_space<smem>>
    %1040 = vector.broadcast %1039 : f32 to vector<1x128xf32>
    %1041 = arith.mulf %559, %1040 : vector<1x128xf32>
    %1042 = arith.addf %1038, %1041 : vector<1x128xf32>
    %c11_114 = arith.constant 11 : index
    %1043 = memref.load %arg4[%c11_114] : memref<72xf32, #tpu.memory_space<smem>>
    %1044 = vector.broadcast %1043 : f32 to vector<1x128xf32>
    %1045 = arith.mulf %562, %1044 : vector<1x128xf32>
    %1046 = arith.addf %1042, %1045 : vector<1x128xf32>
    %c12_115 = arith.constant 12 : index
    %1047 = memref.load %arg4[%c12_115] : memref<72xf32, #tpu.memory_space<smem>>
    %1048 = vector.broadcast %1047 : f32 to vector<1x128xf32>
    %1049 = arith.mulf %587, %1048 : vector<1x128xf32>
    %1050 = arith.addf %1046, %1049 : vector<1x128xf32>
    %c13_116 = arith.constant 13 : index
    %1051 = memref.load %arg4[%c13_116] : memref<72xf32, #tpu.memory_space<smem>>
    %1052 = vector.broadcast %1051 : f32 to vector<1x128xf32>
    %1053 = arith.mulf %590, %1052 : vector<1x128xf32>
    %1054 = arith.addf %1050, %1053 : vector<1x128xf32>
    %c14_117 = arith.constant 14 : index
    %1055 = memref.load %arg4[%c14_117] : memref<72xf32, #tpu.memory_space<smem>>
    %1056 = vector.broadcast %1055 : f32 to vector<1x128xf32>
    %1057 = arith.mulf %601, %1056 : vector<1x128xf32>
    %1058 = arith.addf %1054, %1057 : vector<1x128xf32>
    %c15_118 = arith.constant 15 : index
    %1059 = memref.load %arg4[%c15_118] : memref<72xf32, #tpu.memory_space<smem>>
    %1060 = vector.broadcast %1059 : f32 to vector<1x128xf32>
    %1061 = arith.mulf %604, %1060 : vector<1x128xf32>
    %1062 = arith.addf %1058, %1061 : vector<1x128xf32>
    %c16_119 = arith.constant 16 : index
    %1063 = memref.load %arg4[%c16_119] : memref<72xf32, #tpu.memory_space<smem>>
    %1064 = vector.broadcast %1063 : f32 to vector<1x128xf32>
    %1065 = arith.mulf %629, %1064 : vector<1x128xf32>
    %1066 = arith.addf %1062, %1065 : vector<1x128xf32>
    %c17_120 = arith.constant 17 : index
    %1067 = memref.load %arg4[%c17_120] : memref<72xf32, #tpu.memory_space<smem>>
    %1068 = vector.broadcast %1067 : f32 to vector<1x128xf32>
    %1069 = arith.mulf %632, %1068 : vector<1x128xf32>
    %1070 = arith.addf %1066, %1069 : vector<1x128xf32>
    %c18_121 = arith.constant 18 : index
    %1071 = memref.load %arg4[%c18_121] : memref<72xf32, #tpu.memory_space<smem>>
    %1072 = vector.broadcast %1071 : f32 to vector<1x128xf32>
    %1073 = arith.mulf %643, %1072 : vector<1x128xf32>
    %1074 = arith.addf %1070, %1073 : vector<1x128xf32>
    %c19_122 = arith.constant 19 : index
    %1075 = memref.load %arg4[%c19_122] : memref<72xf32, #tpu.memory_space<smem>>
    %1076 = vector.broadcast %1075 : f32 to vector<1x128xf32>
    %1077 = arith.mulf %646, %1076 : vector<1x128xf32>
    %1078 = arith.addf %1074, %1077 : vector<1x128xf32>
    %c20_123 = arith.constant 20 : index
    %1079 = memref.load %arg4[%c20_123] : memref<72xf32, #tpu.memory_space<smem>>
    %1080 = vector.broadcast %1079 : f32 to vector<1x128xf32>
    %1081 = arith.mulf %671, %1080 : vector<1x128xf32>
    %1082 = arith.addf %1078, %1081 : vector<1x128xf32>
    %c21_124 = arith.constant 21 : index
    %1083 = memref.load %arg4[%c21_124] : memref<72xf32, #tpu.memory_space<smem>>
    %1084 = vector.broadcast %1083 : f32 to vector<1x128xf32>
    %1085 = arith.mulf %674, %1084 : vector<1x128xf32>
    %1086 = arith.addf %1082, %1085 : vector<1x128xf32>
    %c22_125 = arith.constant 22 : index
    %1087 = memref.load %arg4[%c22_125] : memref<72xf32, #tpu.memory_space<smem>>
    %1088 = vector.broadcast %1087 : f32 to vector<1x128xf32>
    %1089 = arith.mulf %685, %1088 : vector<1x128xf32>
    %1090 = arith.addf %1086, %1089 : vector<1x128xf32>
    %c23_126 = arith.constant 23 : index
    %1091 = memref.load %arg4[%c23_126] : memref<72xf32, #tpu.memory_space<smem>>
    %1092 = vector.broadcast %1091 : f32 to vector<1x128xf32>
    %1093 = arith.mulf %688, %1092 : vector<1x128xf32>
    %1094 = arith.addf %1090, %1093 : vector<1x128xf32>
    %cst_127 = arith.constant 0.000000e+00 : f32
    %1095 = vector.broadcast %cst_127 : f32 to vector<1x128xf32>
    %1096 = arith.maximumf %1094, %1095 : vector<1x128xf32>
    %cst_128 = arith.constant 0.000000e+00 : f32
    %1097 = vector.broadcast %cst_128 : f32 to vector<1x128xf32>
    %c1_129 = arith.constant 1 : index
    %1098 = memref.load %arg5[%c1_129] : memref<3xf32, #tpu.memory_space<smem>>
    %1099 = vector.broadcast %1098 : f32 to vector<1x128xf32>
    %1100 = arith.addf %1097, %1099 : vector<1x128xf32>
    %c24_130 = arith.constant 24 : index
    %1101 = memref.load %arg4[%c24_130] : memref<72xf32, #tpu.memory_space<smem>>
    %1102 = vector.broadcast %1101 : f32 to vector<1x128xf32>
    %1103 = arith.mulf %444, %1102 : vector<1x128xf32>
    %1104 = arith.addf %1100, %1103 : vector<1x128xf32>
    %c25_131 = arith.constant 25 : index
    %1105 = memref.load %arg4[%c25_131] : memref<72xf32, #tpu.memory_space<smem>>
    %1106 = vector.broadcast %1105 : f32 to vector<1x128xf32>
    %1107 = arith.mulf %447, %1106 : vector<1x128xf32>
    %1108 = arith.addf %1104, %1107 : vector<1x128xf32>
    %c26_132 = arith.constant 26 : index
    %1109 = memref.load %arg4[%c26_132] : memref<72xf32, #tpu.memory_space<smem>>
    %1110 = vector.broadcast %1109 : f32 to vector<1x128xf32>
    %1111 = arith.mulf %458, %1110 : vector<1x128xf32>
    %1112 = arith.addf %1108, %1111 : vector<1x128xf32>
    %c27_133 = arith.constant 27 : index
    %1113 = memref.load %arg4[%c27_133] : memref<72xf32, #tpu.memory_space<smem>>
    %1114 = vector.broadcast %1113 : f32 to vector<1x128xf32>
    %1115 = arith.mulf %461, %1114 : vector<1x128xf32>
    %1116 = arith.addf %1112, %1115 : vector<1x128xf32>
    %c28_134 = arith.constant 28 : index
    %1117 = memref.load %arg4[%c28_134] : memref<72xf32, #tpu.memory_space<smem>>
    %1118 = vector.broadcast %1117 : f32 to vector<1x128xf32>
    %1119 = arith.mulf %486, %1118 : vector<1x128xf32>
    %1120 = arith.addf %1116, %1119 : vector<1x128xf32>
    %c29_135 = arith.constant 29 : index
    %1121 = memref.load %arg4[%c29_135] : memref<72xf32, #tpu.memory_space<smem>>
    %1122 = vector.broadcast %1121 : f32 to vector<1x128xf32>
    %1123 = arith.mulf %489, %1122 : vector<1x128xf32>
    %1124 = arith.addf %1120, %1123 : vector<1x128xf32>
    %c30_136 = arith.constant 30 : index
    %1125 = memref.load %arg4[%c30_136] : memref<72xf32, #tpu.memory_space<smem>>
    %1126 = vector.broadcast %1125 : f32 to vector<1x128xf32>
    %1127 = arith.mulf %500, %1126 : vector<1x128xf32>
    %1128 = arith.addf %1124, %1127 : vector<1x128xf32>
    %c31_137 = arith.constant 31 : index
    %1129 = memref.load %arg4[%c31_137] : memref<72xf32, #tpu.memory_space<smem>>
    %1130 = vector.broadcast %1129 : f32 to vector<1x128xf32>
    %1131 = arith.mulf %503, %1130 : vector<1x128xf32>
    %1132 = arith.addf %1128, %1131 : vector<1x128xf32>
    %c32_138 = arith.constant 32 : index
    %1133 = memref.load %arg4[%c32_138] : memref<72xf32, #tpu.memory_space<smem>>
    %1134 = vector.broadcast %1133 : f32 to vector<1x128xf32>
    %1135 = arith.mulf %528, %1134 : vector<1x128xf32>
    %1136 = arith.addf %1132, %1135 : vector<1x128xf32>
    %c33_139 = arith.constant 33 : index
    %1137 = memref.load %arg4[%c33_139] : memref<72xf32, #tpu.memory_space<smem>>
    %1138 = vector.broadcast %1137 : f32 to vector<1x128xf32>
    %1139 = arith.mulf %531, %1138 : vector<1x128xf32>
    %1140 = arith.addf %1136, %1139 : vector<1x128xf32>
    %c34_140 = arith.constant 34 : index
    %1141 = memref.load %arg4[%c34_140] : memref<72xf32, #tpu.memory_space<smem>>
    %1142 = vector.broadcast %1141 : f32 to vector<1x128xf32>
    %1143 = arith.mulf %542, %1142 : vector<1x128xf32>
    %1144 = arith.addf %1140, %1143 : vector<1x128xf32>
    %c35_141 = arith.constant 35 : index
    %1145 = memref.load %arg4[%c35_141] : memref<72xf32, #tpu.memory_space<smem>>
    %1146 = vector.broadcast %1145 : f32 to vector<1x128xf32>
    %1147 = arith.mulf %545, %1146 : vector<1x128xf32>
    %1148 = arith.addf %1144, %1147 : vector<1x128xf32>
    %c36_142 = arith.constant 36 : index
    %1149 = memref.load %arg4[%c36_142] : memref<72xf32, #tpu.memory_space<smem>>
    %1150 = vector.broadcast %1149 : f32 to vector<1x128xf32>
    %1151 = arith.mulf %570, %1150 : vector<1x128xf32>
    %1152 = arith.addf %1148, %1151 : vector<1x128xf32>
    %c37_143 = arith.constant 37 : index
    %1153 = memref.load %arg4[%c37_143] : memref<72xf32, #tpu.memory_space<smem>>
    %1154 = vector.broadcast %1153 : f32 to vector<1x128xf32>
    %1155 = arith.mulf %573, %1154 : vector<1x128xf32>
    %1156 = arith.addf %1152, %1155 : vector<1x128xf32>
    %c38_144 = arith.constant 38 : index
    %1157 = memref.load %arg4[%c38_144] : memref<72xf32, #tpu.memory_space<smem>>
    %1158 = vector.broadcast %1157 : f32 to vector<1x128xf32>
    %1159 = arith.mulf %584, %1158 : vector<1x128xf32>
    %1160 = arith.addf %1156, %1159 : vector<1x128xf32>
    %c39_145 = arith.constant 39 : index
    %1161 = memref.load %arg4[%c39_145] : memref<72xf32, #tpu.memory_space<smem>>
    %1162 = vector.broadcast %1161 : f32 to vector<1x128xf32>
    %1163 = arith.mulf %587, %1162 : vector<1x128xf32>
    %1164 = arith.addf %1160, %1163 : vector<1x128xf32>
    %c40_146 = arith.constant 40 : index
    %1165 = memref.load %arg4[%c40_146] : memref<72xf32, #tpu.memory_space<smem>>
    %1166 = vector.broadcast %1165 : f32 to vector<1x128xf32>
    %1167 = arith.mulf %612, %1166 : vector<1x128xf32>
    %1168 = arith.addf %1164, %1167 : vector<1x128xf32>
    %c41_147 = arith.constant 41 : index
    %1169 = memref.load %arg4[%c41_147] : memref<72xf32, #tpu.memory_space<smem>>
    %1170 = vector.broadcast %1169 : f32 to vector<1x128xf32>
    %1171 = arith.mulf %615, %1170 : vector<1x128xf32>
    %1172 = arith.addf %1168, %1171 : vector<1x128xf32>
    %c42_148 = arith.constant 42 : index
    %1173 = memref.load %arg4[%c42_148] : memref<72xf32, #tpu.memory_space<smem>>
    %1174 = vector.broadcast %1173 : f32 to vector<1x128xf32>
    %1175 = arith.mulf %626, %1174 : vector<1x128xf32>
    %1176 = arith.addf %1172, %1175 : vector<1x128xf32>
    %c43_149 = arith.constant 43 : index
    %1177 = memref.load %arg4[%c43_149] : memref<72xf32, #tpu.memory_space<smem>>
    %1178 = vector.broadcast %1177 : f32 to vector<1x128xf32>
    %1179 = arith.mulf %629, %1178 : vector<1x128xf32>
    %1180 = arith.addf %1176, %1179 : vector<1x128xf32>
    %c44_150 = arith.constant 44 : index
    %1181 = memref.load %arg4[%c44_150] : memref<72xf32, #tpu.memory_space<smem>>
    %1182 = vector.broadcast %1181 : f32 to vector<1x128xf32>
    %1183 = arith.mulf %654, %1182 : vector<1x128xf32>
    %1184 = arith.addf %1180, %1183 : vector<1x128xf32>
    %c45_151 = arith.constant 45 : index
    %1185 = memref.load %arg4[%c45_151] : memref<72xf32, #tpu.memory_space<smem>>
    %1186 = vector.broadcast %1185 : f32 to vector<1x128xf32>
    %1187 = arith.mulf %657, %1186 : vector<1x128xf32>
    %1188 = arith.addf %1184, %1187 : vector<1x128xf32>
    %c46_152 = arith.constant 46 : index
    %1189 = memref.load %arg4[%c46_152] : memref<72xf32, #tpu.memory_space<smem>>
    %1190 = vector.broadcast %1189 : f32 to vector<1x128xf32>
    %1191 = arith.mulf %668, %1190 : vector<1x128xf32>
    %1192 = arith.addf %1188, %1191 : vector<1x128xf32>
    %c47_153 = arith.constant 47 : index
    %1193 = memref.load %arg4[%c47_153] : memref<72xf32, #tpu.memory_space<smem>>
    %1194 = vector.broadcast %1193 : f32 to vector<1x128xf32>
    %1195 = arith.mulf %671, %1194 : vector<1x128xf32>
    %1196 = arith.addf %1192, %1195 : vector<1x128xf32>
    %cst_154 = arith.constant 0.000000e+00 : f32
    %1197 = vector.broadcast %cst_154 : f32 to vector<1x128xf32>
    %1198 = arith.maximumf %1196, %1197 : vector<1x128xf32>
    %cst_155 = arith.constant 0.000000e+00 : f32
    %1199 = vector.broadcast %cst_155 : f32 to vector<1x128xf32>
    %c1_156 = arith.constant 1 : index
    %1200 = memref.load %arg5[%c1_156] : memref<3xf32, #tpu.memory_space<smem>>
    %1201 = vector.broadcast %1200 : f32 to vector<1x128xf32>
    %1202 = arith.addf %1199, %1201 : vector<1x128xf32>
    %c24_157 = arith.constant 24 : index
    %1203 = memref.load %arg4[%c24_157] : memref<72xf32, #tpu.memory_space<smem>>
    %1204 = vector.broadcast %1203 : f32 to vector<1x128xf32>
    %1205 = arith.mulf %447, %1204 : vector<1x128xf32>
    %1206 = arith.addf %1202, %1205 : vector<1x128xf32>
    %c25_158 = arith.constant 25 : index
    %1207 = memref.load %arg4[%c25_158] : memref<72xf32, #tpu.memory_space<smem>>
    %1208 = vector.broadcast %1207 : f32 to vector<1x128xf32>
    %1209 = arith.mulf %450, %1208 : vector<1x128xf32>
    %1210 = arith.addf %1206, %1209 : vector<1x128xf32>
    %c26_159 = arith.constant 26 : index
    %1211 = memref.load %arg4[%c26_159] : memref<72xf32, #tpu.memory_space<smem>>
    %1212 = vector.broadcast %1211 : f32 to vector<1x128xf32>
    %1213 = arith.mulf %461, %1212 : vector<1x128xf32>
    %1214 = arith.addf %1210, %1213 : vector<1x128xf32>
    %c27_160 = arith.constant 27 : index
    %1215 = memref.load %arg4[%c27_160] : memref<72xf32, #tpu.memory_space<smem>>
    %1216 = vector.broadcast %1215 : f32 to vector<1x128xf32>
    %1217 = arith.mulf %464, %1216 : vector<1x128xf32>
    %1218 = arith.addf %1214, %1217 : vector<1x128xf32>
    %c28_161 = arith.constant 28 : index
    %1219 = memref.load %arg4[%c28_161] : memref<72xf32, #tpu.memory_space<smem>>
    %1220 = vector.broadcast %1219 : f32 to vector<1x128xf32>
    %1221 = arith.mulf %489, %1220 : vector<1x128xf32>
    %1222 = arith.addf %1218, %1221 : vector<1x128xf32>
    %c29_162 = arith.constant 29 : index
    %1223 = memref.load %arg4[%c29_162] : memref<72xf32, #tpu.memory_space<smem>>
    %1224 = vector.broadcast %1223 : f32 to vector<1x128xf32>
    %1225 = arith.mulf %492, %1224 : vector<1x128xf32>
    %1226 = arith.addf %1222, %1225 : vector<1x128xf32>
    %c30_163 = arith.constant 30 : index
    %1227 = memref.load %arg4[%c30_163] : memref<72xf32, #tpu.memory_space<smem>>
    %1228 = vector.broadcast %1227 : f32 to vector<1x128xf32>
    %1229 = arith.mulf %503, %1228 : vector<1x128xf32>
    %1230 = arith.addf %1226, %1229 : vector<1x128xf32>
    %c31_164 = arith.constant 31 : index
    %1231 = memref.load %arg4[%c31_164] : memref<72xf32, #tpu.memory_space<smem>>
    %1232 = vector.broadcast %1231 : f32 to vector<1x128xf32>
    %1233 = arith.mulf %506, %1232 : vector<1x128xf32>
    %1234 = arith.addf %1230, %1233 : vector<1x128xf32>
    %c32_165 = arith.constant 32 : index
    %1235 = memref.load %arg4[%c32_165] : memref<72xf32, #tpu.memory_space<smem>>
    %1236 = vector.broadcast %1235 : f32 to vector<1x128xf32>
    %1237 = arith.mulf %531, %1236 : vector<1x128xf32>
    %1238 = arith.addf %1234, %1237 : vector<1x128xf32>
    %c33_166 = arith.constant 33 : index
    %1239 = memref.load %arg4[%c33_166] : memref<72xf32, #tpu.memory_space<smem>>
    %1240 = vector.broadcast %1239 : f32 to vector<1x128xf32>
    %1241 = arith.mulf %534, %1240 : vector<1x128xf32>
    %1242 = arith.addf %1238, %1241 : vector<1x128xf32>
    %c34_167 = arith.constant 34 : index
    %1243 = memref.load %arg4[%c34_167] : memref<72xf32, #tpu.memory_space<smem>>
    %1244 = vector.broadcast %1243 : f32 to vector<1x128xf32>
    %1245 = arith.mulf %545, %1244 : vector<1x128xf32>
    %1246 = arith.addf %1242, %1245 : vector<1x128xf32>
    %c35_168 = arith.constant 35 : index
    %1247 = memref.load %arg4[%c35_168] : memref<72xf32, #tpu.memory_space<smem>>
    %1248 = vector.broadcast %1247 : f32 to vector<1x128xf32>
    %1249 = arith.mulf %548, %1248 : vector<1x128xf32>
    %1250 = arith.addf %1246, %1249 : vector<1x128xf32>
    %c36_169 = arith.constant 36 : index
    %1251 = memref.load %arg4[%c36_169] : memref<72xf32, #tpu.memory_space<smem>>
    %1252 = vector.broadcast %1251 : f32 to vector<1x128xf32>
    %1253 = arith.mulf %573, %1252 : vector<1x128xf32>
    %1254 = arith.addf %1250, %1253 : vector<1x128xf32>
    %c37_170 = arith.constant 37 : index
    %1255 = memref.load %arg4[%c37_170] : memref<72xf32, #tpu.memory_space<smem>>
    %1256 = vector.broadcast %1255 : f32 to vector<1x128xf32>
    %1257 = arith.mulf %576, %1256 : vector<1x128xf32>
    %1258 = arith.addf %1254, %1257 : vector<1x128xf32>
    %c38_171 = arith.constant 38 : index
    %1259 = memref.load %arg4[%c38_171] : memref<72xf32, #tpu.memory_space<smem>>
    %1260 = vector.broadcast %1259 : f32 to vector<1x128xf32>
    %1261 = arith.mulf %587, %1260 : vector<1x128xf32>
    %1262 = arith.addf %1258, %1261 : vector<1x128xf32>
    %c39_172 = arith.constant 39 : index
    %1263 = memref.load %arg4[%c39_172] : memref<72xf32, #tpu.memory_space<smem>>
    %1264 = vector.broadcast %1263 : f32 to vector<1x128xf32>
    %1265 = arith.mulf %590, %1264 : vector<1x128xf32>
    %1266 = arith.addf %1262, %1265 : vector<1x128xf32>
    %c40_173 = arith.constant 40 : index
    %1267 = memref.load %arg4[%c40_173] : memref<72xf32, #tpu.memory_space<smem>>
    %1268 = vector.broadcast %1267 : f32 to vector<1x128xf32>
    %1269 = arith.mulf %615, %1268 : vector<1x128xf32>
    %1270 = arith.addf %1266, %1269 : vector<1x128xf32>
    %c41_174 = arith.constant 41 : index
    %1271 = memref.load %arg4[%c41_174] : memref<72xf32, #tpu.memory_space<smem>>
    %1272 = vector.broadcast %1271 : f32 to vector<1x128xf32>
    %1273 = arith.mulf %618, %1272 : vector<1x128xf32>
    %1274 = arith.addf %1270, %1273 : vector<1x128xf32>
    %c42_175 = arith.constant 42 : index
    %1275 = memref.load %arg4[%c42_175] : memref<72xf32, #tpu.memory_space<smem>>
    %1276 = vector.broadcast %1275 : f32 to vector<1x128xf32>
    %1277 = arith.mulf %629, %1276 : vector<1x128xf32>
    %1278 = arith.addf %1274, %1277 : vector<1x128xf32>
    %c43_176 = arith.constant 43 : index
    %1279 = memref.load %arg4[%c43_176] : memref<72xf32, #tpu.memory_space<smem>>
    %1280 = vector.broadcast %1279 : f32 to vector<1x128xf32>
    %1281 = arith.mulf %632, %1280 : vector<1x128xf32>
    %1282 = arith.addf %1278, %1281 : vector<1x128xf32>
    %c44_177 = arith.constant 44 : index
    %1283 = memref.load %arg4[%c44_177] : memref<72xf32, #tpu.memory_space<smem>>
    %1284 = vector.broadcast %1283 : f32 to vector<1x128xf32>
    %1285 = arith.mulf %657, %1284 : vector<1x128xf32>
    %1286 = arith.addf %1282, %1285 : vector<1x128xf32>
    %c45_178 = arith.constant 45 : index
    %1287 = memref.load %arg4[%c45_178] : memref<72xf32, #tpu.memory_space<smem>>
    %1288 = vector.broadcast %1287 : f32 to vector<1x128xf32>
    %1289 = arith.mulf %660, %1288 : vector<1x128xf32>
    %1290 = arith.addf %1286, %1289 : vector<1x128xf32>
    %c46_179 = arith.constant 46 : index
    %1291 = memref.load %arg4[%c46_179] : memref<72xf32, #tpu.memory_space<smem>>
    %1292 = vector.broadcast %1291 : f32 to vector<1x128xf32>
    %1293 = arith.mulf %671, %1292 : vector<1x128xf32>
    %1294 = arith.addf %1290, %1293 : vector<1x128xf32>
    %c47_180 = arith.constant 47 : index
    %1295 = memref.load %arg4[%c47_180] : memref<72xf32, #tpu.memory_space<smem>>
    %1296 = vector.broadcast %1295 : f32 to vector<1x128xf32>
    %1297 = arith.mulf %674, %1296 : vector<1x128xf32>
    %1298 = arith.addf %1294, %1297 : vector<1x128xf32>
    %cst_181 = arith.constant 0.000000e+00 : f32
    %1299 = vector.broadcast %cst_181 : f32 to vector<1x128xf32>
    %1300 = arith.maximumf %1298, %1299 : vector<1x128xf32>
    %cst_182 = arith.constant 0.000000e+00 : f32
    %1301 = vector.broadcast %cst_182 : f32 to vector<1x128xf32>
    %c1_183 = arith.constant 1 : index
    %1302 = memref.load %arg5[%c1_183] : memref<3xf32, #tpu.memory_space<smem>>
    %1303 = vector.broadcast %1302 : f32 to vector<1x128xf32>
    %1304 = arith.addf %1301, %1303 : vector<1x128xf32>
    %c24_184 = arith.constant 24 : index
    %1305 = memref.load %arg4[%c24_184] : memref<72xf32, #tpu.memory_space<smem>>
    %1306 = vector.broadcast %1305 : f32 to vector<1x128xf32>
    %1307 = arith.mulf %458, %1306 : vector<1x128xf32>
    %1308 = arith.addf %1304, %1307 : vector<1x128xf32>
    %c25_185 = arith.constant 25 : index
    %1309 = memref.load %arg4[%c25_185] : memref<72xf32, #tpu.memory_space<smem>>
    %1310 = vector.broadcast %1309 : f32 to vector<1x128xf32>
    %1311 = arith.mulf %461, %1310 : vector<1x128xf32>
    %1312 = arith.addf %1308, %1311 : vector<1x128xf32>
    %c26_186 = arith.constant 26 : index
    %1313 = memref.load %arg4[%c26_186] : memref<72xf32, #tpu.memory_space<smem>>
    %1314 = vector.broadcast %1313 : f32 to vector<1x128xf32>
    %1315 = arith.mulf %472, %1314 : vector<1x128xf32>
    %1316 = arith.addf %1312, %1315 : vector<1x128xf32>
    %c27_187 = arith.constant 27 : index
    %1317 = memref.load %arg4[%c27_187] : memref<72xf32, #tpu.memory_space<smem>>
    %1318 = vector.broadcast %1317 : f32 to vector<1x128xf32>
    %1319 = arith.mulf %475, %1318 : vector<1x128xf32>
    %1320 = arith.addf %1316, %1319 : vector<1x128xf32>
    %c28_188 = arith.constant 28 : index
    %1321 = memref.load %arg4[%c28_188] : memref<72xf32, #tpu.memory_space<smem>>
    %1322 = vector.broadcast %1321 : f32 to vector<1x128xf32>
    %1323 = arith.mulf %500, %1322 : vector<1x128xf32>
    %1324 = arith.addf %1320, %1323 : vector<1x128xf32>
    %c29_189 = arith.constant 29 : index
    %1325 = memref.load %arg4[%c29_189] : memref<72xf32, #tpu.memory_space<smem>>
    %1326 = vector.broadcast %1325 : f32 to vector<1x128xf32>
    %1327 = arith.mulf %503, %1326 : vector<1x128xf32>
    %1328 = arith.addf %1324, %1327 : vector<1x128xf32>
    %c30_190 = arith.constant 30 : index
    %1329 = memref.load %arg4[%c30_190] : memref<72xf32, #tpu.memory_space<smem>>
    %1330 = vector.broadcast %1329 : f32 to vector<1x128xf32>
    %1331 = arith.mulf %514, %1330 : vector<1x128xf32>
    %1332 = arith.addf %1328, %1331 : vector<1x128xf32>
    %c31_191 = arith.constant 31 : index
    %1333 = memref.load %arg4[%c31_191] : memref<72xf32, #tpu.memory_space<smem>>
    %1334 = vector.broadcast %1333 : f32 to vector<1x128xf32>
    %1335 = arith.mulf %517, %1334 : vector<1x128xf32>
    %1336 = arith.addf %1332, %1335 : vector<1x128xf32>
    %c32_192 = arith.constant 32 : index
    %1337 = memref.load %arg4[%c32_192] : memref<72xf32, #tpu.memory_space<smem>>
    %1338 = vector.broadcast %1337 : f32 to vector<1x128xf32>
    %1339 = arith.mulf %542, %1338 : vector<1x128xf32>
    %1340 = arith.addf %1336, %1339 : vector<1x128xf32>
    %c33_193 = arith.constant 33 : index
    %1341 = memref.load %arg4[%c33_193] : memref<72xf32, #tpu.memory_space<smem>>
    %1342 = vector.broadcast %1341 : f32 to vector<1x128xf32>
    %1343 = arith.mulf %545, %1342 : vector<1x128xf32>
    %1344 = arith.addf %1340, %1343 : vector<1x128xf32>
    %c34_194 = arith.constant 34 : index
    %1345 = memref.load %arg4[%c34_194] : memref<72xf32, #tpu.memory_space<smem>>
    %1346 = vector.broadcast %1345 : f32 to vector<1x128xf32>
    %1347 = arith.mulf %556, %1346 : vector<1x128xf32>
    %1348 = arith.addf %1344, %1347 : vector<1x128xf32>
    %c35_195 = arith.constant 35 : index
    %1349 = memref.load %arg4[%c35_195] : memref<72xf32, #tpu.memory_space<smem>>
    %1350 = vector.broadcast %1349 : f32 to vector<1x128xf32>
    %1351 = arith.mulf %559, %1350 : vector<1x128xf32>
    %1352 = arith.addf %1348, %1351 : vector<1x128xf32>
    %c36_196 = arith.constant 36 : index
    %1353 = memref.load %arg4[%c36_196] : memref<72xf32, #tpu.memory_space<smem>>
    %1354 = vector.broadcast %1353 : f32 to vector<1x128xf32>
    %1355 = arith.mulf %584, %1354 : vector<1x128xf32>
    %1356 = arith.addf %1352, %1355 : vector<1x128xf32>
    %c37_197 = arith.constant 37 : index
    %1357 = memref.load %arg4[%c37_197] : memref<72xf32, #tpu.memory_space<smem>>
    %1358 = vector.broadcast %1357 : f32 to vector<1x128xf32>
    %1359 = arith.mulf %587, %1358 : vector<1x128xf32>
    %1360 = arith.addf %1356, %1359 : vector<1x128xf32>
    %c38_198 = arith.constant 38 : index
    %1361 = memref.load %arg4[%c38_198] : memref<72xf32, #tpu.memory_space<smem>>
    %1362 = vector.broadcast %1361 : f32 to vector<1x128xf32>
    %1363 = arith.mulf %598, %1362 : vector<1x128xf32>
    %1364 = arith.addf %1360, %1363 : vector<1x128xf32>
    %c39_199 = arith.constant 39 : index
    %1365 = memref.load %arg4[%c39_199] : memref<72xf32, #tpu.memory_space<smem>>
    %1366 = vector.broadcast %1365 : f32 to vector<1x128xf32>
    %1367 = arith.mulf %601, %1366 : vector<1x128xf32>
    %1368 = arith.addf %1364, %1367 : vector<1x128xf32>
    %c40_200 = arith.constant 40 : index
    %1369 = memref.load %arg4[%c40_200] : memref<72xf32, #tpu.memory_space<smem>>
    %1370 = vector.broadcast %1369 : f32 to vector<1x128xf32>
    %1371 = arith.mulf %626, %1370 : vector<1x128xf32>
    %1372 = arith.addf %1368, %1371 : vector<1x128xf32>
    %c41_201 = arith.constant 41 : index
    %1373 = memref.load %arg4[%c41_201] : memref<72xf32, #tpu.memory_space<smem>>
    %1374 = vector.broadcast %1373 : f32 to vector<1x128xf32>
    %1375 = arith.mulf %629, %1374 : vector<1x128xf32>
    %1376 = arith.addf %1372, %1375 : vector<1x128xf32>
    %c42_202 = arith.constant 42 : index
    %1377 = memref.load %arg4[%c42_202] : memref<72xf32, #tpu.memory_space<smem>>
    %1378 = vector.broadcast %1377 : f32 to vector<1x128xf32>
    %1379 = arith.mulf %640, %1378 : vector<1x128xf32>
    %1380 = arith.addf %1376, %1379 : vector<1x128xf32>
    %c43_203 = arith.constant 43 : index
    %1381 = memref.load %arg4[%c43_203] : memref<72xf32, #tpu.memory_space<smem>>
    %1382 = vector.broadcast %1381 : f32 to vector<1x128xf32>
    %1383 = arith.mulf %643, %1382 : vector<1x128xf32>
    %1384 = arith.addf %1380, %1383 : vector<1x128xf32>
    %c44_204 = arith.constant 44 : index
    %1385 = memref.load %arg4[%c44_204] : memref<72xf32, #tpu.memory_space<smem>>
    %1386 = vector.broadcast %1385 : f32 to vector<1x128xf32>
    %1387 = arith.mulf %668, %1386 : vector<1x128xf32>
    %1388 = arith.addf %1384, %1387 : vector<1x128xf32>
    %c45_205 = arith.constant 45 : index
    %1389 = memref.load %arg4[%c45_205] : memref<72xf32, #tpu.memory_space<smem>>
    %1390 = vector.broadcast %1389 : f32 to vector<1x128xf32>
    %1391 = arith.mulf %671, %1390 : vector<1x128xf32>
    %1392 = arith.addf %1388, %1391 : vector<1x128xf32>
    %c46_206 = arith.constant 46 : index
    %1393 = memref.load %arg4[%c46_206] : memref<72xf32, #tpu.memory_space<smem>>
    %1394 = vector.broadcast %1393 : f32 to vector<1x128xf32>
    %1395 = arith.mulf %682, %1394 : vector<1x128xf32>
    %1396 = arith.addf %1392, %1395 : vector<1x128xf32>
    %c47_207 = arith.constant 47 : index
    %1397 = memref.load %arg4[%c47_207] : memref<72xf32, #tpu.memory_space<smem>>
    %1398 = vector.broadcast %1397 : f32 to vector<1x128xf32>
    %1399 = arith.mulf %685, %1398 : vector<1x128xf32>
    %1400 = arith.addf %1396, %1399 : vector<1x128xf32>
    %cst_208 = arith.constant 0.000000e+00 : f32
    %1401 = vector.broadcast %cst_208 : f32 to vector<1x128xf32>
    %1402 = arith.maximumf %1400, %1401 : vector<1x128xf32>
    %cst_209 = arith.constant 0.000000e+00 : f32
    %1403 = vector.broadcast %cst_209 : f32 to vector<1x128xf32>
    %c1_210 = arith.constant 1 : index
    %1404 = memref.load %arg5[%c1_210] : memref<3xf32, #tpu.memory_space<smem>>
    %1405 = vector.broadcast %1404 : f32 to vector<1x128xf32>
    %1406 = arith.addf %1403, %1405 : vector<1x128xf32>
    %c24_211 = arith.constant 24 : index
    %1407 = memref.load %arg4[%c24_211] : memref<72xf32, #tpu.memory_space<smem>>
    %1408 = vector.broadcast %1407 : f32 to vector<1x128xf32>
    %1409 = arith.mulf %461, %1408 : vector<1x128xf32>
    %1410 = arith.addf %1406, %1409 : vector<1x128xf32>
    %c25_212 = arith.constant 25 : index
    %1411 = memref.load %arg4[%c25_212] : memref<72xf32, #tpu.memory_space<smem>>
    %1412 = vector.broadcast %1411 : f32 to vector<1x128xf32>
    %1413 = arith.mulf %464, %1412 : vector<1x128xf32>
    %1414 = arith.addf %1410, %1413 : vector<1x128xf32>
    %c26_213 = arith.constant 26 : index
    %1415 = memref.load %arg4[%c26_213] : memref<72xf32, #tpu.memory_space<smem>>
    %1416 = vector.broadcast %1415 : f32 to vector<1x128xf32>
    %1417 = arith.mulf %475, %1416 : vector<1x128xf32>
    %1418 = arith.addf %1414, %1417 : vector<1x128xf32>
    %c27_214 = arith.constant 27 : index
    %1419 = memref.load %arg4[%c27_214] : memref<72xf32, #tpu.memory_space<smem>>
    %1420 = vector.broadcast %1419 : f32 to vector<1x128xf32>
    %1421 = arith.mulf %478, %1420 : vector<1x128xf32>
    %1422 = arith.addf %1418, %1421 : vector<1x128xf32>
    %c28_215 = arith.constant 28 : index
    %1423 = memref.load %arg4[%c28_215] : memref<72xf32, #tpu.memory_space<smem>>
    %1424 = vector.broadcast %1423 : f32 to vector<1x128xf32>
    %1425 = arith.mulf %503, %1424 : vector<1x128xf32>
    %1426 = arith.addf %1422, %1425 : vector<1x128xf32>
    %c29_216 = arith.constant 29 : index
    %1427 = memref.load %arg4[%c29_216] : memref<72xf32, #tpu.memory_space<smem>>
    %1428 = vector.broadcast %1427 : f32 to vector<1x128xf32>
    %1429 = arith.mulf %506, %1428 : vector<1x128xf32>
    %1430 = arith.addf %1426, %1429 : vector<1x128xf32>
    %c30_217 = arith.constant 30 : index
    %1431 = memref.load %arg4[%c30_217] : memref<72xf32, #tpu.memory_space<smem>>
    %1432 = vector.broadcast %1431 : f32 to vector<1x128xf32>
    %1433 = arith.mulf %517, %1432 : vector<1x128xf32>
    %1434 = arith.addf %1430, %1433 : vector<1x128xf32>
    %c31_218 = arith.constant 31 : index
    %1435 = memref.load %arg4[%c31_218] : memref<72xf32, #tpu.memory_space<smem>>
    %1436 = vector.broadcast %1435 : f32 to vector<1x128xf32>
    %1437 = arith.mulf %520, %1436 : vector<1x128xf32>
    %1438 = arith.addf %1434, %1437 : vector<1x128xf32>
    %c32_219 = arith.constant 32 : index
    %1439 = memref.load %arg4[%c32_219] : memref<72xf32, #tpu.memory_space<smem>>
    %1440 = vector.broadcast %1439 : f32 to vector<1x128xf32>
    %1441 = arith.mulf %545, %1440 : vector<1x128xf32>
    %1442 = arith.addf %1438, %1441 : vector<1x128xf32>
    %c33_220 = arith.constant 33 : index
    %1443 = memref.load %arg4[%c33_220] : memref<72xf32, #tpu.memory_space<smem>>
    %1444 = vector.broadcast %1443 : f32 to vector<1x128xf32>
    %1445 = arith.mulf %548, %1444 : vector<1x128xf32>
    %1446 = arith.addf %1442, %1445 : vector<1x128xf32>
    %c34_221 = arith.constant 34 : index
    %1447 = memref.load %arg4[%c34_221] : memref<72xf32, #tpu.memory_space<smem>>
    %1448 = vector.broadcast %1447 : f32 to vector<1x128xf32>
    %1449 = arith.mulf %559, %1448 : vector<1x128xf32>
    %1450 = arith.addf %1446, %1449 : vector<1x128xf32>
    %c35_222 = arith.constant 35 : index
    %1451 = memref.load %arg4[%c35_222] : memref<72xf32, #tpu.memory_space<smem>>
    %1452 = vector.broadcast %1451 : f32 to vector<1x128xf32>
    %1453 = arith.mulf %562, %1452 : vector<1x128xf32>
    %1454 = arith.addf %1450, %1453 : vector<1x128xf32>
    %c36_223 = arith.constant 36 : index
    %1455 = memref.load %arg4[%c36_223] : memref<72xf32, #tpu.memory_space<smem>>
    %1456 = vector.broadcast %1455 : f32 to vector<1x128xf32>
    %1457 = arith.mulf %587, %1456 : vector<1x128xf32>
    %1458 = arith.addf %1454, %1457 : vector<1x128xf32>
    %c37_224 = arith.constant 37 : index
    %1459 = memref.load %arg4[%c37_224] : memref<72xf32, #tpu.memory_space<smem>>
    %1460 = vector.broadcast %1459 : f32 to vector<1x128xf32>
    %1461 = arith.mulf %590, %1460 : vector<1x128xf32>
    %1462 = arith.addf %1458, %1461 : vector<1x128xf32>
    %c38_225 = arith.constant 38 : index
    %1463 = memref.load %arg4[%c38_225] : memref<72xf32, #tpu.memory_space<smem>>
    %1464 = vector.broadcast %1463 : f32 to vector<1x128xf32>
    %1465 = arith.mulf %601, %1464 : vector<1x128xf32>
    %1466 = arith.addf %1462, %1465 : vector<1x128xf32>
    %c39_226 = arith.constant 39 : index
    %1467 = memref.load %arg4[%c39_226] : memref<72xf32, #tpu.memory_space<smem>>
    %1468 = vector.broadcast %1467 : f32 to vector<1x128xf32>
    %1469 = arith.mulf %604, %1468 : vector<1x128xf32>
    %1470 = arith.addf %1466, %1469 : vector<1x128xf32>
    %c40_227 = arith.constant 40 : index
    %1471 = memref.load %arg4[%c40_227] : memref<72xf32, #tpu.memory_space<smem>>
    %1472 = vector.broadcast %1471 : f32 to vector<1x128xf32>
    %1473 = arith.mulf %629, %1472 : vector<1x128xf32>
    %1474 = arith.addf %1470, %1473 : vector<1x128xf32>
    %c41_228 = arith.constant 41 : index
    %1475 = memref.load %arg4[%c41_228] : memref<72xf32, #tpu.memory_space<smem>>
    %1476 = vector.broadcast %1475 : f32 to vector<1x128xf32>
    %1477 = arith.mulf %632, %1476 : vector<1x128xf32>
    %1478 = arith.addf %1474, %1477 : vector<1x128xf32>
    %c42_229 = arith.constant 42 : index
    %1479 = memref.load %arg4[%c42_229] : memref<72xf32, #tpu.memory_space<smem>>
    %1480 = vector.broadcast %1479 : f32 to vector<1x128xf32>
    %1481 = arith.mulf %643, %1480 : vector<1x128xf32>
    %1482 = arith.addf %1478, %1481 : vector<1x128xf32>
    %c43_230 = arith.constant 43 : index
    %1483 = memref.load %arg4[%c43_230] : memref<72xf32, #tpu.memory_space<smem>>
    %1484 = vector.broadcast %1483 : f32 to vector<1x128xf32>
    %1485 = arith.mulf %646, %1484 : vector<1x128xf32>
    %1486 = arith.addf %1482, %1485 : vector<1x128xf32>
    %c44_231 = arith.constant 44 : index
    %1487 = memref.load %arg4[%c44_231] : memref<72xf32, #tpu.memory_space<smem>>
    %1488 = vector.broadcast %1487 : f32 to vector<1x128xf32>
    %1489 = arith.mulf %671, %1488 : vector<1x128xf32>
    %1490 = arith.addf %1486, %1489 : vector<1x128xf32>
    %c45_232 = arith.constant 45 : index
    %1491 = memref.load %arg4[%c45_232] : memref<72xf32, #tpu.memory_space<smem>>
    %1492 = vector.broadcast %1491 : f32 to vector<1x128xf32>
    %1493 = arith.mulf %674, %1492 : vector<1x128xf32>
    %1494 = arith.addf %1490, %1493 : vector<1x128xf32>
    %c46_233 = arith.constant 46 : index
    %1495 = memref.load %arg4[%c46_233] : memref<72xf32, #tpu.memory_space<smem>>
    %1496 = vector.broadcast %1495 : f32 to vector<1x128xf32>
    %1497 = arith.mulf %685, %1496 : vector<1x128xf32>
    %1498 = arith.addf %1494, %1497 : vector<1x128xf32>
    %c47_234 = arith.constant 47 : index
    %1499 = memref.load %arg4[%c47_234] : memref<72xf32, #tpu.memory_space<smem>>
    %1500 = vector.broadcast %1499 : f32 to vector<1x128xf32>
    %1501 = arith.mulf %688, %1500 : vector<1x128xf32>
    %1502 = arith.addf %1498, %1501 : vector<1x128xf32>
    %cst_235 = arith.constant 0.000000e+00 : f32
    %1503 = vector.broadcast %cst_235 : f32 to vector<1x128xf32>
    %1504 = arith.maximumf %1502, %1503 : vector<1x128xf32>
    %cst_236 = arith.constant 0.000000e+00 : f32
    %1505 = vector.broadcast %cst_236 : f32 to vector<1x128xf32>
    %c2_237 = arith.constant 2 : index
    %1506 = memref.load %arg5[%c2_237] : memref<3xf32, #tpu.memory_space<smem>>
    %1507 = vector.broadcast %1506 : f32 to vector<1x128xf32>
    %1508 = arith.addf %1505, %1507 : vector<1x128xf32>
    %c48_238 = arith.constant 48 : index
    %1509 = memref.load %arg4[%c48_238] : memref<72xf32, #tpu.memory_space<smem>>
    %1510 = vector.broadcast %1509 : f32 to vector<1x128xf32>
    %1511 = arith.mulf %444, %1510 : vector<1x128xf32>
    %1512 = arith.addf %1508, %1511 : vector<1x128xf32>
    %c49_239 = arith.constant 49 : index
    %1513 = memref.load %arg4[%c49_239] : memref<72xf32, #tpu.memory_space<smem>>
    %1514 = vector.broadcast %1513 : f32 to vector<1x128xf32>
    %1515 = arith.mulf %447, %1514 : vector<1x128xf32>
    %1516 = arith.addf %1512, %1515 : vector<1x128xf32>
    %c50_240 = arith.constant 50 : index
    %1517 = memref.load %arg4[%c50_240] : memref<72xf32, #tpu.memory_space<smem>>
    %1518 = vector.broadcast %1517 : f32 to vector<1x128xf32>
    %1519 = arith.mulf %458, %1518 : vector<1x128xf32>
    %1520 = arith.addf %1516, %1519 : vector<1x128xf32>
    %c51_241 = arith.constant 51 : index
    %1521 = memref.load %arg4[%c51_241] : memref<72xf32, #tpu.memory_space<smem>>
    %1522 = vector.broadcast %1521 : f32 to vector<1x128xf32>
    %1523 = arith.mulf %461, %1522 : vector<1x128xf32>
    %1524 = arith.addf %1520, %1523 : vector<1x128xf32>
    %c52_242 = arith.constant 52 : index
    %1525 = memref.load %arg4[%c52_242] : memref<72xf32, #tpu.memory_space<smem>>
    %1526 = vector.broadcast %1525 : f32 to vector<1x128xf32>
    %1527 = arith.mulf %486, %1526 : vector<1x128xf32>
    %1528 = arith.addf %1524, %1527 : vector<1x128xf32>
    %c53_243 = arith.constant 53 : index
    %1529 = memref.load %arg4[%c53_243] : memref<72xf32, #tpu.memory_space<smem>>
    %1530 = vector.broadcast %1529 : f32 to vector<1x128xf32>
    %1531 = arith.mulf %489, %1530 : vector<1x128xf32>
    %1532 = arith.addf %1528, %1531 : vector<1x128xf32>
    %c54_244 = arith.constant 54 : index
    %1533 = memref.load %arg4[%c54_244] : memref<72xf32, #tpu.memory_space<smem>>
    %1534 = vector.broadcast %1533 : f32 to vector<1x128xf32>
    %1535 = arith.mulf %500, %1534 : vector<1x128xf32>
    %1536 = arith.addf %1532, %1535 : vector<1x128xf32>
    %c55_245 = arith.constant 55 : index
    %1537 = memref.load %arg4[%c55_245] : memref<72xf32, #tpu.memory_space<smem>>
    %1538 = vector.broadcast %1537 : f32 to vector<1x128xf32>
    %1539 = arith.mulf %503, %1538 : vector<1x128xf32>
    %1540 = arith.addf %1536, %1539 : vector<1x128xf32>
    %c56_246 = arith.constant 56 : index
    %1541 = memref.load %arg4[%c56_246] : memref<72xf32, #tpu.memory_space<smem>>
    %1542 = vector.broadcast %1541 : f32 to vector<1x128xf32>
    %1543 = arith.mulf %528, %1542 : vector<1x128xf32>
    %1544 = arith.addf %1540, %1543 : vector<1x128xf32>
    %c57_247 = arith.constant 57 : index
    %1545 = memref.load %arg4[%c57_247] : memref<72xf32, #tpu.memory_space<smem>>
    %1546 = vector.broadcast %1545 : f32 to vector<1x128xf32>
    %1547 = arith.mulf %531, %1546 : vector<1x128xf32>
    %1548 = arith.addf %1544, %1547 : vector<1x128xf32>
    %c58_248 = arith.constant 58 : index
    %1549 = memref.load %arg4[%c58_248] : memref<72xf32, #tpu.memory_space<smem>>
    %1550 = vector.broadcast %1549 : f32 to vector<1x128xf32>
    %1551 = arith.mulf %542, %1550 : vector<1x128xf32>
    %1552 = arith.addf %1548, %1551 : vector<1x128xf32>
    %c59_249 = arith.constant 59 : index
    %1553 = memref.load %arg4[%c59_249] : memref<72xf32, #tpu.memory_space<smem>>
    %1554 = vector.broadcast %1553 : f32 to vector<1x128xf32>
    %1555 = arith.mulf %545, %1554 : vector<1x128xf32>
    %1556 = arith.addf %1552, %1555 : vector<1x128xf32>
    %c60_250 = arith.constant 60 : index
    %1557 = memref.load %arg4[%c60_250] : memref<72xf32, #tpu.memory_space<smem>>
    %1558 = vector.broadcast %1557 : f32 to vector<1x128xf32>
    %1559 = arith.mulf %570, %1558 : vector<1x128xf32>
    %1560 = arith.addf %1556, %1559 : vector<1x128xf32>
    %c61_251 = arith.constant 61 : index
    %1561 = memref.load %arg4[%c61_251] : memref<72xf32, #tpu.memory_space<smem>>
    %1562 = vector.broadcast %1561 : f32 to vector<1x128xf32>
    %1563 = arith.mulf %573, %1562 : vector<1x128xf32>
    %1564 = arith.addf %1560, %1563 : vector<1x128xf32>
    %c62_252 = arith.constant 62 : index
    %1565 = memref.load %arg4[%c62_252] : memref<72xf32, #tpu.memory_space<smem>>
    %1566 = vector.broadcast %1565 : f32 to vector<1x128xf32>
    %1567 = arith.mulf %584, %1566 : vector<1x128xf32>
    %1568 = arith.addf %1564, %1567 : vector<1x128xf32>
    %c63_253 = arith.constant 63 : index
    %1569 = memref.load %arg4[%c63_253] : memref<72xf32, #tpu.memory_space<smem>>
    %1570 = vector.broadcast %1569 : f32 to vector<1x128xf32>
    %1571 = arith.mulf %587, %1570 : vector<1x128xf32>
    %1572 = arith.addf %1568, %1571 : vector<1x128xf32>
    %c64_254 = arith.constant 64 : index
    %1573 = memref.load %arg4[%c64_254] : memref<72xf32, #tpu.memory_space<smem>>
    %1574 = vector.broadcast %1573 : f32 to vector<1x128xf32>
    %1575 = arith.mulf %612, %1574 : vector<1x128xf32>
    %1576 = arith.addf %1572, %1575 : vector<1x128xf32>
    %c65_255 = arith.constant 65 : index
    %1577 = memref.load %arg4[%c65_255] : memref<72xf32, #tpu.memory_space<smem>>
    %1578 = vector.broadcast %1577 : f32 to vector<1x128xf32>
    %1579 = arith.mulf %615, %1578 : vector<1x128xf32>
    %1580 = arith.addf %1576, %1579 : vector<1x128xf32>
    %c66_256 = arith.constant 66 : index
    %1581 = memref.load %arg4[%c66_256] : memref<72xf32, #tpu.memory_space<smem>>
    %1582 = vector.broadcast %1581 : f32 to vector<1x128xf32>
    %1583 = arith.mulf %626, %1582 : vector<1x128xf32>
    %1584 = arith.addf %1580, %1583 : vector<1x128xf32>
    %c67_257 = arith.constant 67 : index
    %1585 = memref.load %arg4[%c67_257] : memref<72xf32, #tpu.memory_space<smem>>
    %1586 = vector.broadcast %1585 : f32 to vector<1x128xf32>
    %1587 = arith.mulf %629, %1586 : vector<1x128xf32>
    %1588 = arith.addf %1584, %1587 : vector<1x128xf32>
    %c68_258 = arith.constant 68 : index
    %1589 = memref.load %arg4[%c68_258] : memref<72xf32, #tpu.memory_space<smem>>
    %1590 = vector.broadcast %1589 : f32 to vector<1x128xf32>
    %1591 = arith.mulf %654, %1590 : vector<1x128xf32>
    %1592 = arith.addf %1588, %1591 : vector<1x128xf32>
    %c69_259 = arith.constant 69 : index
    %1593 = memref.load %arg4[%c69_259] : memref<72xf32, #tpu.memory_space<smem>>
    %1594 = vector.broadcast %1593 : f32 to vector<1x128xf32>
    %1595 = arith.mulf %657, %1594 : vector<1x128xf32>
    %1596 = arith.addf %1592, %1595 : vector<1x128xf32>
    %c70_260 = arith.constant 70 : index
    %1597 = memref.load %arg4[%c70_260] : memref<72xf32, #tpu.memory_space<smem>>
    %1598 = vector.broadcast %1597 : f32 to vector<1x128xf32>
    %1599 = arith.mulf %668, %1598 : vector<1x128xf32>
    %1600 = arith.addf %1596, %1599 : vector<1x128xf32>
    %c71_261 = arith.constant 71 : index
    %1601 = memref.load %arg4[%c71_261] : memref<72xf32, #tpu.memory_space<smem>>
    %1602 = vector.broadcast %1601 : f32 to vector<1x128xf32>
    %1603 = arith.mulf %671, %1602 : vector<1x128xf32>
    %1604 = arith.addf %1600, %1603 : vector<1x128xf32>
    %cst_262 = arith.constant 0.000000e+00 : f32
    %1605 = vector.broadcast %cst_262 : f32 to vector<1x128xf32>
    %1606 = arith.maximumf %1604, %1605 : vector<1x128xf32>
    %cst_263 = arith.constant 0.000000e+00 : f32
    %1607 = vector.broadcast %cst_263 : f32 to vector<1x128xf32>
    %c2_264 = arith.constant 2 : index
    %1608 = memref.load %arg5[%c2_264] : memref<3xf32, #tpu.memory_space<smem>>
    %1609 = vector.broadcast %1608 : f32 to vector<1x128xf32>
    %1610 = arith.addf %1607, %1609 : vector<1x128xf32>
    %c48_265 = arith.constant 48 : index
    %1611 = memref.load %arg4[%c48_265] : memref<72xf32, #tpu.memory_space<smem>>
    %1612 = vector.broadcast %1611 : f32 to vector<1x128xf32>
    %1613 = arith.mulf %447, %1612 : vector<1x128xf32>
    %1614 = arith.addf %1610, %1613 : vector<1x128xf32>
    %c49_266 = arith.constant 49 : index
    %1615 = memref.load %arg4[%c49_266] : memref<72xf32, #tpu.memory_space<smem>>
    %1616 = vector.broadcast %1615 : f32 to vector<1x128xf32>
    %1617 = arith.mulf %450, %1616 : vector<1x128xf32>
    %1618 = arith.addf %1614, %1617 : vector<1x128xf32>
    %c50_267 = arith.constant 50 : index
    %1619 = memref.load %arg4[%c50_267] : memref<72xf32, #tpu.memory_space<smem>>
    %1620 = vector.broadcast %1619 : f32 to vector<1x128xf32>
    %1621 = arith.mulf %461, %1620 : vector<1x128xf32>
    %1622 = arith.addf %1618, %1621 : vector<1x128xf32>
    %c51_268 = arith.constant 51 : index
    %1623 = memref.load %arg4[%c51_268] : memref<72xf32, #tpu.memory_space<smem>>
    %1624 = vector.broadcast %1623 : f32 to vector<1x128xf32>
    %1625 = arith.mulf %464, %1624 : vector<1x128xf32>
    %1626 = arith.addf %1622, %1625 : vector<1x128xf32>
    %c52_269 = arith.constant 52 : index
    %1627 = memref.load %arg4[%c52_269] : memref<72xf32, #tpu.memory_space<smem>>
    %1628 = vector.broadcast %1627 : f32 to vector<1x128xf32>
    %1629 = arith.mulf %489, %1628 : vector<1x128xf32>
    %1630 = arith.addf %1626, %1629 : vector<1x128xf32>
    %c53_270 = arith.constant 53 : index
    %1631 = memref.load %arg4[%c53_270] : memref<72xf32, #tpu.memory_space<smem>>
    %1632 = vector.broadcast %1631 : f32 to vector<1x128xf32>
    %1633 = arith.mulf %492, %1632 : vector<1x128xf32>
    %1634 = arith.addf %1630, %1633 : vector<1x128xf32>
    %c54_271 = arith.constant 54 : index
    %1635 = memref.load %arg4[%c54_271] : memref<72xf32, #tpu.memory_space<smem>>
    %1636 = vector.broadcast %1635 : f32 to vector<1x128xf32>
    %1637 = arith.mulf %503, %1636 : vector<1x128xf32>
    %1638 = arith.addf %1634, %1637 : vector<1x128xf32>
    %c55_272 = arith.constant 55 : index
    %1639 = memref.load %arg4[%c55_272] : memref<72xf32, #tpu.memory_space<smem>>
    %1640 = vector.broadcast %1639 : f32 to vector<1x128xf32>
    %1641 = arith.mulf %506, %1640 : vector<1x128xf32>
    %1642 = arith.addf %1638, %1641 : vector<1x128xf32>
    %c56_273 = arith.constant 56 : index
    %1643 = memref.load %arg4[%c56_273] : memref<72xf32, #tpu.memory_space<smem>>
    %1644 = vector.broadcast %1643 : f32 to vector<1x128xf32>
    %1645 = arith.mulf %531, %1644 : vector<1x128xf32>
    %1646 = arith.addf %1642, %1645 : vector<1x128xf32>
    %c57_274 = arith.constant 57 : index
    %1647 = memref.load %arg4[%c57_274] : memref<72xf32, #tpu.memory_space<smem>>
    %1648 = vector.broadcast %1647 : f32 to vector<1x128xf32>
    %1649 = arith.mulf %534, %1648 : vector<1x128xf32>
    %1650 = arith.addf %1646, %1649 : vector<1x128xf32>
    %c58_275 = arith.constant 58 : index
    %1651 = memref.load %arg4[%c58_275] : memref<72xf32, #tpu.memory_space<smem>>
    %1652 = vector.broadcast %1651 : f32 to vector<1x128xf32>
    %1653 = arith.mulf %545, %1652 : vector<1x128xf32>
    %1654 = arith.addf %1650, %1653 : vector<1x128xf32>
    %c59_276 = arith.constant 59 : index
    %1655 = memref.load %arg4[%c59_276] : memref<72xf32, #tpu.memory_space<smem>>
    %1656 = vector.broadcast %1655 : f32 to vector<1x128xf32>
    %1657 = arith.mulf %548, %1656 : vector<1x128xf32>
    %1658 = arith.addf %1654, %1657 : vector<1x128xf32>
    %c60_277 = arith.constant 60 : index
    %1659 = memref.load %arg4[%c60_277] : memref<72xf32, #tpu.memory_space<smem>>
    %1660 = vector.broadcast %1659 : f32 to vector<1x128xf32>
    %1661 = arith.mulf %573, %1660 : vector<1x128xf32>
    %1662 = arith.addf %1658, %1661 : vector<1x128xf32>
    %c61_278 = arith.constant 61 : index
    %1663 = memref.load %arg4[%c61_278] : memref<72xf32, #tpu.memory_space<smem>>
    %1664 = vector.broadcast %1663 : f32 to vector<1x128xf32>
    %1665 = arith.mulf %576, %1664 : vector<1x128xf32>
    %1666 = arith.addf %1662, %1665 : vector<1x128xf32>
    %c62_279 = arith.constant 62 : index
    %1667 = memref.load %arg4[%c62_279] : memref<72xf32, #tpu.memory_space<smem>>
    %1668 = vector.broadcast %1667 : f32 to vector<1x128xf32>
    %1669 = arith.mulf %587, %1668 : vector<1x128xf32>
    %1670 = arith.addf %1666, %1669 : vector<1x128xf32>
    %c63_280 = arith.constant 63 : index
    %1671 = memref.load %arg4[%c63_280] : memref<72xf32, #tpu.memory_space<smem>>
    %1672 = vector.broadcast %1671 : f32 to vector<1x128xf32>
    %1673 = arith.mulf %590, %1672 : vector<1x128xf32>
    %1674 = arith.addf %1670, %1673 : vector<1x128xf32>
    %c64_281 = arith.constant 64 : index
    %1675 = memref.load %arg4[%c64_281] : memref<72xf32, #tpu.memory_space<smem>>
    %1676 = vector.broadcast %1675 : f32 to vector<1x128xf32>
    %1677 = arith.mulf %615, %1676 : vector<1x128xf32>
    %1678 = arith.addf %1674, %1677 : vector<1x128xf32>
    %c65_282 = arith.constant 65 : index
    %1679 = memref.load %arg4[%c65_282] : memref<72xf32, #tpu.memory_space<smem>>
    %1680 = vector.broadcast %1679 : f32 to vector<1x128xf32>
    %1681 = arith.mulf %618, %1680 : vector<1x128xf32>
    %1682 = arith.addf %1678, %1681 : vector<1x128xf32>
    %c66_283 = arith.constant 66 : index
    %1683 = memref.load %arg4[%c66_283] : memref<72xf32, #tpu.memory_space<smem>>
    %1684 = vector.broadcast %1683 : f32 to vector<1x128xf32>
    %1685 = arith.mulf %629, %1684 : vector<1x128xf32>
    %1686 = arith.addf %1682, %1685 : vector<1x128xf32>
    %c67_284 = arith.constant 67 : index
    %1687 = memref.load %arg4[%c67_284] : memref<72xf32, #tpu.memory_space<smem>>
    %1688 = vector.broadcast %1687 : f32 to vector<1x128xf32>
    %1689 = arith.mulf %632, %1688 : vector<1x128xf32>
    %1690 = arith.addf %1686, %1689 : vector<1x128xf32>
    %c68_285 = arith.constant 68 : index
    %1691 = memref.load %arg4[%c68_285] : memref<72xf32, #tpu.memory_space<smem>>
    %1692 = vector.broadcast %1691 : f32 to vector<1x128xf32>
    %1693 = arith.mulf %657, %1692 : vector<1x128xf32>
    %1694 = arith.addf %1690, %1693 : vector<1x128xf32>
    %c69_286 = arith.constant 69 : index
    %1695 = memref.load %arg4[%c69_286] : memref<72xf32, #tpu.memory_space<smem>>
    %1696 = vector.broadcast %1695 : f32 to vector<1x128xf32>
    %1697 = arith.mulf %660, %1696 : vector<1x128xf32>
    %1698 = arith.addf %1694, %1697 : vector<1x128xf32>
    %c70_287 = arith.constant 70 : index
    %1699 = memref.load %arg4[%c70_287] : memref<72xf32, #tpu.memory_space<smem>>
    %1700 = vector.broadcast %1699 : f32 to vector<1x128xf32>
    %1701 = arith.mulf %671, %1700 : vector<1x128xf32>
    %1702 = arith.addf %1698, %1701 : vector<1x128xf32>
    %c71_288 = arith.constant 71 : index
    %1703 = memref.load %arg4[%c71_288] : memref<72xf32, #tpu.memory_space<smem>>
    %1704 = vector.broadcast %1703 : f32 to vector<1x128xf32>
    %1705 = arith.mulf %674, %1704 : vector<1x128xf32>
    %1706 = arith.addf %1702, %1705 : vector<1x128xf32>
    %cst_289 = arith.constant 0.000000e+00 : f32
    %1707 = vector.broadcast %cst_289 : f32 to vector<1x128xf32>
    %1708 = arith.maximumf %1706, %1707 : vector<1x128xf32>
    %cst_290 = arith.constant 0.000000e+00 : f32
    %1709 = vector.broadcast %cst_290 : f32 to vector<1x128xf32>
    %c2_291 = arith.constant 2 : index
    %1710 = memref.load %arg5[%c2_291] : memref<3xf32, #tpu.memory_space<smem>>
    %1711 = vector.broadcast %1710 : f32 to vector<1x128xf32>
    %1712 = arith.addf %1709, %1711 : vector<1x128xf32>
    %c48_292 = arith.constant 48 : index
    %1713 = memref.load %arg4[%c48_292] : memref<72xf32, #tpu.memory_space<smem>>
    %1714 = vector.broadcast %1713 : f32 to vector<1x128xf32>
    %1715 = arith.mulf %458, %1714 : vector<1x128xf32>
    %1716 = arith.addf %1712, %1715 : vector<1x128xf32>
    %c49_293 = arith.constant 49 : index
    %1717 = memref.load %arg4[%c49_293] : memref<72xf32, #tpu.memory_space<smem>>
    %1718 = vector.broadcast %1717 : f32 to vector<1x128xf32>
    %1719 = arith.mulf %461, %1718 : vector<1x128xf32>
    %1720 = arith.addf %1716, %1719 : vector<1x128xf32>
    %c50_294 = arith.constant 50 : index
    %1721 = memref.load %arg4[%c50_294] : memref<72xf32, #tpu.memory_space<smem>>
    %1722 = vector.broadcast %1721 : f32 to vector<1x128xf32>
    %1723 = arith.mulf %472, %1722 : vector<1x128xf32>
    %1724 = arith.addf %1720, %1723 : vector<1x128xf32>
    %c51_295 = arith.constant 51 : index
    %1725 = memref.load %arg4[%c51_295] : memref<72xf32, #tpu.memory_space<smem>>
    %1726 = vector.broadcast %1725 : f32 to vector<1x128xf32>
    %1727 = arith.mulf %475, %1726 : vector<1x128xf32>
    %1728 = arith.addf %1724, %1727 : vector<1x128xf32>
    %c52_296 = arith.constant 52 : index
    %1729 = memref.load %arg4[%c52_296] : memref<72xf32, #tpu.memory_space<smem>>
    %1730 = vector.broadcast %1729 : f32 to vector<1x128xf32>
    %1731 = arith.mulf %500, %1730 : vector<1x128xf32>
    %1732 = arith.addf %1728, %1731 : vector<1x128xf32>
    %c53_297 = arith.constant 53 : index
    %1733 = memref.load %arg4[%c53_297] : memref<72xf32, #tpu.memory_space<smem>>
    %1734 = vector.broadcast %1733 : f32 to vector<1x128xf32>
    %1735 = arith.mulf %503, %1734 : vector<1x128xf32>
    %1736 = arith.addf %1732, %1735 : vector<1x128xf32>
    %c54_298 = arith.constant 54 : index
    %1737 = memref.load %arg4[%c54_298] : memref<72xf32, #tpu.memory_space<smem>>
    %1738 = vector.broadcast %1737 : f32 to vector<1x128xf32>
    %1739 = arith.mulf %514, %1738 : vector<1x128xf32>
    %1740 = arith.addf %1736, %1739 : vector<1x128xf32>
    %c55_299 = arith.constant 55 : index
    %1741 = memref.load %arg4[%c55_299] : memref<72xf32, #tpu.memory_space<smem>>
    %1742 = vector.broadcast %1741 : f32 to vector<1x128xf32>
    %1743 = arith.mulf %517, %1742 : vector<1x128xf32>
    %1744 = arith.addf %1740, %1743 : vector<1x128xf32>
    %c56_300 = arith.constant 56 : index
    %1745 = memref.load %arg4[%c56_300] : memref<72xf32, #tpu.memory_space<smem>>
    %1746 = vector.broadcast %1745 : f32 to vector<1x128xf32>
    %1747 = arith.mulf %542, %1746 : vector<1x128xf32>
    %1748 = arith.addf %1744, %1747 : vector<1x128xf32>
    %c57_301 = arith.constant 57 : index
    %1749 = memref.load %arg4[%c57_301] : memref<72xf32, #tpu.memory_space<smem>>
    %1750 = vector.broadcast %1749 : f32 to vector<1x128xf32>
    %1751 = arith.mulf %545, %1750 : vector<1x128xf32>
    %1752 = arith.addf %1748, %1751 : vector<1x128xf32>
    %c58_302 = arith.constant 58 : index
    %1753 = memref.load %arg4[%c58_302] : memref<72xf32, #tpu.memory_space<smem>>
    %1754 = vector.broadcast %1753 : f32 to vector<1x128xf32>
    %1755 = arith.mulf %556, %1754 : vector<1x128xf32>
    %1756 = arith.addf %1752, %1755 : vector<1x128xf32>
    %c59_303 = arith.constant 59 : index
    %1757 = memref.load %arg4[%c59_303] : memref<72xf32, #tpu.memory_space<smem>>
    %1758 = vector.broadcast %1757 : f32 to vector<1x128xf32>
    %1759 = arith.mulf %559, %1758 : vector<1x128xf32>
    %1760 = arith.addf %1756, %1759 : vector<1x128xf32>
    %c60_304 = arith.constant 60 : index
    %1761 = memref.load %arg4[%c60_304] : memref<72xf32, #tpu.memory_space<smem>>
    %1762 = vector.broadcast %1761 : f32 to vector<1x128xf32>
    %1763 = arith.mulf %584, %1762 : vector<1x128xf32>
    %1764 = arith.addf %1760, %1763 : vector<1x128xf32>
    %c61_305 = arith.constant 61 : index
    %1765 = memref.load %arg4[%c61_305] : memref<72xf32, #tpu.memory_space<smem>>
    %1766 = vector.broadcast %1765 : f32 to vector<1x128xf32>
    %1767 = arith.mulf %587, %1766 : vector<1x128xf32>
    %1768 = arith.addf %1764, %1767 : vector<1x128xf32>
    %c62_306 = arith.constant 62 : index
    %1769 = memref.load %arg4[%c62_306] : memref<72xf32, #tpu.memory_space<smem>>
    %1770 = vector.broadcast %1769 : f32 to vector<1x128xf32>
    %1771 = arith.mulf %598, %1770 : vector<1x128xf32>
    %1772 = arith.addf %1768, %1771 : vector<1x128xf32>
    %c63_307 = arith.constant 63 : index
    %1773 = memref.load %arg4[%c63_307] : memref<72xf32, #tpu.memory_space<smem>>
    %1774 = vector.broadcast %1773 : f32 to vector<1x128xf32>
    %1775 = arith.mulf %601, %1774 : vector<1x128xf32>
    %1776 = arith.addf %1772, %1775 : vector<1x128xf32>
    %c64_308 = arith.constant 64 : index
    %1777 = memref.load %arg4[%c64_308] : memref<72xf32, #tpu.memory_space<smem>>
    %1778 = vector.broadcast %1777 : f32 to vector<1x128xf32>
    %1779 = arith.mulf %626, %1778 : vector<1x128xf32>
    %1780 = arith.addf %1776, %1779 : vector<1x128xf32>
    %c65_309 = arith.constant 65 : index
    %1781 = memref.load %arg4[%c65_309] : memref<72xf32, #tpu.memory_space<smem>>
    %1782 = vector.broadcast %1781 : f32 to vector<1x128xf32>
    %1783 = arith.mulf %629, %1782 : vector<1x128xf32>
    %1784 = arith.addf %1780, %1783 : vector<1x128xf32>
    %c66_310 = arith.constant 66 : index
    %1785 = memref.load %arg4[%c66_310] : memref<72xf32, #tpu.memory_space<smem>>
    %1786 = vector.broadcast %1785 : f32 to vector<1x128xf32>
    %1787 = arith.mulf %640, %1786 : vector<1x128xf32>
    %1788 = arith.addf %1784, %1787 : vector<1x128xf32>
    %c67_311 = arith.constant 67 : index
    %1789 = memref.load %arg4[%c67_311] : memref<72xf32, #tpu.memory_space<smem>>
    %1790 = vector.broadcast %1789 : f32 to vector<1x128xf32>
    %1791 = arith.mulf %643, %1790 : vector<1x128xf32>
    %1792 = arith.addf %1788, %1791 : vector<1x128xf32>
    %c68_312 = arith.constant 68 : index
    %1793 = memref.load %arg4[%c68_312] : memref<72xf32, #tpu.memory_space<smem>>
    %1794 = vector.broadcast %1793 : f32 to vector<1x128xf32>
    %1795 = arith.mulf %668, %1794 : vector<1x128xf32>
    %1796 = arith.addf %1792, %1795 : vector<1x128xf32>
    %c69_313 = arith.constant 69 : index
    %1797 = memref.load %arg4[%c69_313] : memref<72xf32, #tpu.memory_space<smem>>
    %1798 = vector.broadcast %1797 : f32 to vector<1x128xf32>
    %1799 = arith.mulf %671, %1798 : vector<1x128xf32>
    %1800 = arith.addf %1796, %1799 : vector<1x128xf32>
    %c70_314 = arith.constant 70 : index
    %1801 = memref.load %arg4[%c70_314] : memref<72xf32, #tpu.memory_space<smem>>
    %1802 = vector.broadcast %1801 : f32 to vector<1x128xf32>
    %1803 = arith.mulf %682, %1802 : vector<1x128xf32>
    %1804 = arith.addf %1800, %1803 : vector<1x128xf32>
    %c71_315 = arith.constant 71 : index
    %1805 = memref.load %arg4[%c71_315] : memref<72xf32, #tpu.memory_space<smem>>
    %1806 = vector.broadcast %1805 : f32 to vector<1x128xf32>
    %1807 = arith.mulf %685, %1806 : vector<1x128xf32>
    %1808 = arith.addf %1804, %1807 : vector<1x128xf32>
    %cst_316 = arith.constant 0.000000e+00 : f32
    %1809 = vector.broadcast %cst_316 : f32 to vector<1x128xf32>
    %1810 = arith.maximumf %1808, %1809 : vector<1x128xf32>
    %cst_317 = arith.constant 0.000000e+00 : f32
    %1811 = vector.broadcast %cst_317 : f32 to vector<1x128xf32>
    %c2_318 = arith.constant 2 : index
    %1812 = memref.load %arg5[%c2_318] : memref<3xf32, #tpu.memory_space<smem>>
    %1813 = vector.broadcast %1812 : f32 to vector<1x128xf32>
    %1814 = arith.addf %1811, %1813 : vector<1x128xf32>
    %c48_319 = arith.constant 48 : index
    %1815 = memref.load %arg4[%c48_319] : memref<72xf32, #tpu.memory_space<smem>>
    %1816 = vector.broadcast %1815 : f32 to vector<1x128xf32>
    %1817 = arith.mulf %461, %1816 : vector<1x128xf32>
    %1818 = arith.addf %1814, %1817 : vector<1x128xf32>
    %c49_320 = arith.constant 49 : index
    %1819 = memref.load %arg4[%c49_320] : memref<72xf32, #tpu.memory_space<smem>>
    %1820 = vector.broadcast %1819 : f32 to vector<1x128xf32>
    %1821 = arith.mulf %464, %1820 : vector<1x128xf32>
    %1822 = arith.addf %1818, %1821 : vector<1x128xf32>
    %c50_321 = arith.constant 50 : index
    %1823 = memref.load %arg4[%c50_321] : memref<72xf32, #tpu.memory_space<smem>>
    %1824 = vector.broadcast %1823 : f32 to vector<1x128xf32>
    %1825 = arith.mulf %475, %1824 : vector<1x128xf32>
    %1826 = arith.addf %1822, %1825 : vector<1x128xf32>
    %c51_322 = arith.constant 51 : index
    %1827 = memref.load %arg4[%c51_322] : memref<72xf32, #tpu.memory_space<smem>>
    %1828 = vector.broadcast %1827 : f32 to vector<1x128xf32>
    %1829 = arith.mulf %478, %1828 : vector<1x128xf32>
    %1830 = arith.addf %1826, %1829 : vector<1x128xf32>
    %c52_323 = arith.constant 52 : index
    %1831 = memref.load %arg4[%c52_323] : memref<72xf32, #tpu.memory_space<smem>>
    %1832 = vector.broadcast %1831 : f32 to vector<1x128xf32>
    %1833 = arith.mulf %503, %1832 : vector<1x128xf32>
    %1834 = arith.addf %1830, %1833 : vector<1x128xf32>
    %c53_324 = arith.constant 53 : index
    %1835 = memref.load %arg4[%c53_324] : memref<72xf32, #tpu.memory_space<smem>>
    %1836 = vector.broadcast %1835 : f32 to vector<1x128xf32>
    %1837 = arith.mulf %506, %1836 : vector<1x128xf32>
    %1838 = arith.addf %1834, %1837 : vector<1x128xf32>
    %c54_325 = arith.constant 54 : index
    %1839 = memref.load %arg4[%c54_325] : memref<72xf32, #tpu.memory_space<smem>>
    %1840 = vector.broadcast %1839 : f32 to vector<1x128xf32>
    %1841 = arith.mulf %517, %1840 : vector<1x128xf32>
    %1842 = arith.addf %1838, %1841 : vector<1x128xf32>
    %c55_326 = arith.constant 55 : index
    %1843 = memref.load %arg4[%c55_326] : memref<72xf32, #tpu.memory_space<smem>>
    %1844 = vector.broadcast %1843 : f32 to vector<1x128xf32>
    %1845 = arith.mulf %520, %1844 : vector<1x128xf32>
    %1846 = arith.addf %1842, %1845 : vector<1x128xf32>
    %c56_327 = arith.constant 56 : index
    %1847 = memref.load %arg4[%c56_327] : memref<72xf32, #tpu.memory_space<smem>>
    %1848 = vector.broadcast %1847 : f32 to vector<1x128xf32>
    %1849 = arith.mulf %545, %1848 : vector<1x128xf32>
    %1850 = arith.addf %1846, %1849 : vector<1x128xf32>
    %c57_328 = arith.constant 57 : index
    %1851 = memref.load %arg4[%c57_328] : memref<72xf32, #tpu.memory_space<smem>>
    %1852 = vector.broadcast %1851 : f32 to vector<1x128xf32>
    %1853 = arith.mulf %548, %1852 : vector<1x128xf32>
    %1854 = arith.addf %1850, %1853 : vector<1x128xf32>
    %c58_329 = arith.constant 58 : index
    %1855 = memref.load %arg4[%c58_329] : memref<72xf32, #tpu.memory_space<smem>>
    %1856 = vector.broadcast %1855 : f32 to vector<1x128xf32>
    %1857 = arith.mulf %559, %1856 : vector<1x128xf32>
    %1858 = arith.addf %1854, %1857 : vector<1x128xf32>
    %c59_330 = arith.constant 59 : index
    %1859 = memref.load %arg4[%c59_330] : memref<72xf32, #tpu.memory_space<smem>>
    %1860 = vector.broadcast %1859 : f32 to vector<1x128xf32>
    %1861 = arith.mulf %562, %1860 : vector<1x128xf32>
    %1862 = arith.addf %1858, %1861 : vector<1x128xf32>
    %c60_331 = arith.constant 60 : index
    %1863 = memref.load %arg4[%c60_331] : memref<72xf32, #tpu.memory_space<smem>>
    %1864 = vector.broadcast %1863 : f32 to vector<1x128xf32>
    %1865 = arith.mulf %587, %1864 : vector<1x128xf32>
    %1866 = arith.addf %1862, %1865 : vector<1x128xf32>
    %c61_332 = arith.constant 61 : index
    %1867 = memref.load %arg4[%c61_332] : memref<72xf32, #tpu.memory_space<smem>>
    %1868 = vector.broadcast %1867 : f32 to vector<1x128xf32>
    %1869 = arith.mulf %590, %1868 : vector<1x128xf32>
    %1870 = arith.addf %1866, %1869 : vector<1x128xf32>
    %c62_333 = arith.constant 62 : index
    %1871 = memref.load %arg4[%c62_333] : memref<72xf32, #tpu.memory_space<smem>>
    %1872 = vector.broadcast %1871 : f32 to vector<1x128xf32>
    %1873 = arith.mulf %601, %1872 : vector<1x128xf32>
    %1874 = arith.addf %1870, %1873 : vector<1x128xf32>
    %c63_334 = arith.constant 63 : index
    %1875 = memref.load %arg4[%c63_334] : memref<72xf32, #tpu.memory_space<smem>>
    %1876 = vector.broadcast %1875 : f32 to vector<1x128xf32>
    %1877 = arith.mulf %604, %1876 : vector<1x128xf32>
    %1878 = arith.addf %1874, %1877 : vector<1x128xf32>
    %c64_335 = arith.constant 64 : index
    %1879 = memref.load %arg4[%c64_335] : memref<72xf32, #tpu.memory_space<smem>>
    %1880 = vector.broadcast %1879 : f32 to vector<1x128xf32>
    %1881 = arith.mulf %629, %1880 : vector<1x128xf32>
    %1882 = arith.addf %1878, %1881 : vector<1x128xf32>
    %c65_336 = arith.constant 65 : index
    %1883 = memref.load %arg4[%c65_336] : memref<72xf32, #tpu.memory_space<smem>>
    %1884 = vector.broadcast %1883 : f32 to vector<1x128xf32>
    %1885 = arith.mulf %632, %1884 : vector<1x128xf32>
    %1886 = arith.addf %1882, %1885 : vector<1x128xf32>
    %c66_337 = arith.constant 66 : index
    %1887 = memref.load %arg4[%c66_337] : memref<72xf32, #tpu.memory_space<smem>>
    %1888 = vector.broadcast %1887 : f32 to vector<1x128xf32>
    %1889 = arith.mulf %643, %1888 : vector<1x128xf32>
    %1890 = arith.addf %1886, %1889 : vector<1x128xf32>
    %c67_338 = arith.constant 67 : index
    %1891 = memref.load %arg4[%c67_338] : memref<72xf32, #tpu.memory_space<smem>>
    %1892 = vector.broadcast %1891 : f32 to vector<1x128xf32>
    %1893 = arith.mulf %646, %1892 : vector<1x128xf32>
    %1894 = arith.addf %1890, %1893 : vector<1x128xf32>
    %c68_339 = arith.constant 68 : index
    %1895 = memref.load %arg4[%c68_339] : memref<72xf32, #tpu.memory_space<smem>>
    %1896 = vector.broadcast %1895 : f32 to vector<1x128xf32>
    %1897 = arith.mulf %671, %1896 : vector<1x128xf32>
    %1898 = arith.addf %1894, %1897 : vector<1x128xf32>
    %c69_340 = arith.constant 69 : index
    %1899 = memref.load %arg4[%c69_340] : memref<72xf32, #tpu.memory_space<smem>>
    %1900 = vector.broadcast %1899 : f32 to vector<1x128xf32>
    %1901 = arith.mulf %674, %1900 : vector<1x128xf32>
    %1902 = arith.addf %1898, %1901 : vector<1x128xf32>
    %c70_341 = arith.constant 70 : index
    %1903 = memref.load %arg4[%c70_341] : memref<72xf32, #tpu.memory_space<smem>>
    %1904 = vector.broadcast %1903 : f32 to vector<1x128xf32>
    %1905 = arith.mulf %685, %1904 : vector<1x128xf32>
    %1906 = arith.addf %1902, %1905 : vector<1x128xf32>
    %c71_342 = arith.constant 71 : index
    %1907 = memref.load %arg4[%c71_342] : memref<72xf32, #tpu.memory_space<smem>>
    %1908 = vector.broadcast %1907 : f32 to vector<1x128xf32>
    %1909 = arith.mulf %688, %1908 : vector<1x128xf32>
    %1910 = arith.addf %1906, %1909 : vector<1x128xf32>
    %cst_343 = arith.constant 0.000000e+00 : f32
    %1911 = vector.broadcast %cst_343 : f32 to vector<1x128xf32>
    %1912 = arith.maximumf %1910, %1911 : vector<1x128xf32>
    %cst_344 = arith.constant 0.000000e+00 : f32
    %1913 = vector.broadcast %cst_344 : f32 to vector<1x128xf32>
    %c0_345 = arith.constant 0 : index
    %1914 = memref.load %arg7[%c0_345] : memref<2xf32, #tpu.memory_space<smem>>
    %1915 = vector.broadcast %1914 : f32 to vector<1x128xf32>
    %1916 = arith.addf %1913, %1915 : vector<1x128xf32>
    %c0_346 = arith.constant 0 : index
    %1917 = memref.load %arg6[%c0_346] : memref<24xf32, #tpu.memory_space<smem>>
    %1918 = vector.broadcast %1917 : f32 to vector<1x128xf32>
    %1919 = arith.mulf %790, %1918 : vector<1x128xf32>
    %1920 = arith.addf %1916, %1919 : vector<1x128xf32>
    %c1_347 = arith.constant 1 : index
    %1921 = memref.load %arg6[%c1_347] : memref<24xf32, #tpu.memory_space<smem>>
    %1922 = vector.broadcast %1921 : f32 to vector<1x128xf32>
    %1923 = arith.mulf %892, %1922 : vector<1x128xf32>
    %1924 = arith.addf %1920, %1923 : vector<1x128xf32>
    %c2_348 = arith.constant 2 : index
    %1925 = memref.load %arg6[%c2_348] : memref<24xf32, #tpu.memory_space<smem>>
    %1926 = vector.broadcast %1925 : f32 to vector<1x128xf32>
    %1927 = arith.mulf %994, %1926 : vector<1x128xf32>
    %1928 = arith.addf %1924, %1927 : vector<1x128xf32>
    %c3_349 = arith.constant 3 : index
    %1929 = memref.load %arg6[%c3_349] : memref<24xf32, #tpu.memory_space<smem>>
    %1930 = vector.broadcast %1929 : f32 to vector<1x128xf32>
    %1931 = arith.mulf %1096, %1930 : vector<1x128xf32>
    %1932 = arith.addf %1928, %1931 : vector<1x128xf32>
    %c4_350 = arith.constant 4 : index
    %1933 = memref.load %arg6[%c4_350] : memref<24xf32, #tpu.memory_space<smem>>
    %1934 = vector.broadcast %1933 : f32 to vector<1x128xf32>
    %1935 = arith.mulf %1198, %1934 : vector<1x128xf32>
    %1936 = arith.addf %1932, %1935 : vector<1x128xf32>
    %c5_351 = arith.constant 5 : index
    %1937 = memref.load %arg6[%c5_351] : memref<24xf32, #tpu.memory_space<smem>>
    %1938 = vector.broadcast %1937 : f32 to vector<1x128xf32>
    %1939 = arith.mulf %1300, %1938 : vector<1x128xf32>
    %1940 = arith.addf %1936, %1939 : vector<1x128xf32>
    %c6_352 = arith.constant 6 : index
    %1941 = memref.load %arg6[%c6_352] : memref<24xf32, #tpu.memory_space<smem>>
    %1942 = vector.broadcast %1941 : f32 to vector<1x128xf32>
    %1943 = arith.mulf %1402, %1942 : vector<1x128xf32>
    %1944 = arith.addf %1940, %1943 : vector<1x128xf32>
    %c7_353 = arith.constant 7 : index
    %1945 = memref.load %arg6[%c7_353] : memref<24xf32, #tpu.memory_space<smem>>
    %1946 = vector.broadcast %1945 : f32 to vector<1x128xf32>
    %1947 = arith.mulf %1504, %1946 : vector<1x128xf32>
    %1948 = arith.addf %1944, %1947 : vector<1x128xf32>
    %c8_354 = arith.constant 8 : index
    %1949 = memref.load %arg6[%c8_354] : memref<24xf32, #tpu.memory_space<smem>>
    %1950 = vector.broadcast %1949 : f32 to vector<1x128xf32>
    %1951 = arith.mulf %1606, %1950 : vector<1x128xf32>
    %1952 = arith.addf %1948, %1951 : vector<1x128xf32>
    %c9_355 = arith.constant 9 : index
    %1953 = memref.load %arg6[%c9_355] : memref<24xf32, #tpu.memory_space<smem>>
    %1954 = vector.broadcast %1953 : f32 to vector<1x128xf32>
    %1955 = arith.mulf %1708, %1954 : vector<1x128xf32>
    %1956 = arith.addf %1952, %1955 : vector<1x128xf32>
    %c10_356 = arith.constant 10 : index
    %1957 = memref.load %arg6[%c10_356] : memref<24xf32, #tpu.memory_space<smem>>
    %1958 = vector.broadcast %1957 : f32 to vector<1x128xf32>
    %1959 = arith.mulf %1810, %1958 : vector<1x128xf32>
    %1960 = arith.addf %1956, %1959 : vector<1x128xf32>
    %c11_357 = arith.constant 11 : index
    %1961 = memref.load %arg6[%c11_357] : memref<24xf32, #tpu.memory_space<smem>>
    %1962 = vector.broadcast %1961 : f32 to vector<1x128xf32>
    %1963 = arith.mulf %1912, %1962 : vector<1x128xf32>
    %1964 = arith.addf %1960, %1963 : vector<1x128xf32>
    %cst_358 = arith.constant 0.000000e+00 : f32
    %1965 = vector.broadcast %cst_358 : f32 to vector<1x128xf32>
    %c1_359 = arith.constant 1 : index
    %1966 = memref.load %arg7[%c1_359] : memref<2xf32, #tpu.memory_space<smem>>
    %1967 = vector.broadcast %1966 : f32 to vector<1x128xf32>
    %1968 = arith.addf %1965, %1967 : vector<1x128xf32>
    %c12_360 = arith.constant 12 : index
    %1969 = memref.load %arg6[%c12_360] : memref<24xf32, #tpu.memory_space<smem>>
    %1970 = vector.broadcast %1969 : f32 to vector<1x128xf32>
    %1971 = arith.mulf %790, %1970 : vector<1x128xf32>
    %1972 = arith.addf %1968, %1971 : vector<1x128xf32>
    %c13_361 = arith.constant 13 : index
    %1973 = memref.load %arg6[%c13_361] : memref<24xf32, #tpu.memory_space<smem>>
    %1974 = vector.broadcast %1973 : f32 to vector<1x128xf32>
    %1975 = arith.mulf %892, %1974 : vector<1x128xf32>
    %1976 = arith.addf %1972, %1975 : vector<1x128xf32>
    %c14_362 = arith.constant 14 : index
    %1977 = memref.load %arg6[%c14_362] : memref<24xf32, #tpu.memory_space<smem>>
    %1978 = vector.broadcast %1977 : f32 to vector<1x128xf32>
    %1979 = arith.mulf %994, %1978 : vector<1x128xf32>
    %1980 = arith.addf %1976, %1979 : vector<1x128xf32>
    %c15_363 = arith.constant 15 : index
    %1981 = memref.load %arg6[%c15_363] : memref<24xf32, #tpu.memory_space<smem>>
    %1982 = vector.broadcast %1981 : f32 to vector<1x128xf32>
    %1983 = arith.mulf %1096, %1982 : vector<1x128xf32>
    %1984 = arith.addf %1980, %1983 : vector<1x128xf32>
    %c16_364 = arith.constant 16 : index
    %1985 = memref.load %arg6[%c16_364] : memref<24xf32, #tpu.memory_space<smem>>
    %1986 = vector.broadcast %1985 : f32 to vector<1x128xf32>
    %1987 = arith.mulf %1198, %1986 : vector<1x128xf32>
    %1988 = arith.addf %1984, %1987 : vector<1x128xf32>
    %c17_365 = arith.constant 17 : index
    %1989 = memref.load %arg6[%c17_365] : memref<24xf32, #tpu.memory_space<smem>>
    %1990 = vector.broadcast %1989 : f32 to vector<1x128xf32>
    %1991 = arith.mulf %1300, %1990 : vector<1x128xf32>
    %1992 = arith.addf %1988, %1991 : vector<1x128xf32>
    %c18_366 = arith.constant 18 : index
    %1993 = memref.load %arg6[%c18_366] : memref<24xf32, #tpu.memory_space<smem>>
    %1994 = vector.broadcast %1993 : f32 to vector<1x128xf32>
    %1995 = arith.mulf %1402, %1994 : vector<1x128xf32>
    %1996 = arith.addf %1992, %1995 : vector<1x128xf32>
    %c19_367 = arith.constant 19 : index
    %1997 = memref.load %arg6[%c19_367] : memref<24xf32, #tpu.memory_space<smem>>
    %1998 = vector.broadcast %1997 : f32 to vector<1x128xf32>
    %1999 = arith.mulf %1504, %1998 : vector<1x128xf32>
    %2000 = arith.addf %1996, %1999 : vector<1x128xf32>
    %c20_368 = arith.constant 20 : index
    %2001 = memref.load %arg6[%c20_368] : memref<24xf32, #tpu.memory_space<smem>>
    %2002 = vector.broadcast %2001 : f32 to vector<1x128xf32>
    %2003 = arith.mulf %1606, %2002 : vector<1x128xf32>
    %2004 = arith.addf %2000, %2003 : vector<1x128xf32>
    %c21_369 = arith.constant 21 : index
    %2005 = memref.load %arg6[%c21_369] : memref<24xf32, #tpu.memory_space<smem>>
    %2006 = vector.broadcast %2005 : f32 to vector<1x128xf32>
    %2007 = arith.mulf %1708, %2006 : vector<1x128xf32>
    %2008 = arith.addf %2004, %2007 : vector<1x128xf32>
    %c22_370 = arith.constant 22 : index
    %2009 = memref.load %arg6[%c22_370] : memref<24xf32, #tpu.memory_space<smem>>
    %2010 = vector.broadcast %2009 : f32 to vector<1x128xf32>
    %2011 = arith.mulf %1810, %2010 : vector<1x128xf32>
    %2012 = arith.addf %2008, %2011 : vector<1x128xf32>
    %c23_371 = arith.constant 23 : index
    %2013 = memref.load %arg6[%c23_371] : memref<24xf32, #tpu.memory_space<smem>>
    %2014 = vector.broadcast %2013 : f32 to vector<1x128xf32>
    %2015 = arith.mulf %1912, %2014 : vector<1x128xf32>
    %2016 = arith.addf %2012, %2015 : vector<1x128xf32>
    %2017 = arith.maximumf %1964, %2016 : vector<1x128xf32>
    %2018 = arith.subf %1964, %2017 : vector<1x128xf32>
    %2019 = math.exp %2018 : vector<1x128xf32>
    %2020 = arith.subf %2016, %2017 : vector<1x128xf32>
    %2021 = math.exp %2020 : vector<1x128xf32>
    %2022 = arith.addf %2019, %2021 : vector<1x128xf32>
    %2023 = tpu.reciprocal %2022 {approx = true} : vector<1x128xf32> -> vector<1x128xf32>
    %2024 = arith.mulf %2019, %2023 : vector<1x128xf32>
    %c0_372 = arith.constant 0 : index
    %c0_373 = arith.constant 0 : index
    %2025 = vector.load %arg8[%c0_372, %c0_373] : memref<2x128xf32, #tpu.memory_space<vmem>>, vector<1x128xf32>
    tpu.vector_store %arg8[%c0_372, %c0_373], %2024 {strides = array<i32>} : memref<2x128xf32, #tpu.memory_space<vmem>>, vector<1x128xf32>,
    %2026 = arith.mulf %2021, %2023 : vector<1x128xf32>
    %c1_374 = arith.constant 1 : index
    %c0_375 = arith.constant 0 : index
    %2027 = vector.load %arg8[%c1_374, %c0_375] : memref<2x128xf32, #tpu.memory_space<vmem>>, vector<1x128xf32>
    tpu.vector_store %arg8[%c1_374, %c0_375], %2026 {strides = array<i32>} : memref<2x128xf32, #tpu.memory_space<vmem>>, vector<1x128xf32>,
    return
  }
  func.func @transform_0(%arg0: i32) -> (i32, i32, i32) {
    %c0_i32 = arith.constant 0 : i32
    %c0_i32_0 = arith.constant 0 : i32
    %c0_i32_1 = arith.constant 0 : i32
    return %c0_i32, %c0_i32_0, %arg0 : i32, i32, i32
  }
  func.func @transform_1(%arg0: i32) -> i32 {
    %c0_i32 = arith.constant 0 : i32
    %c0_i32_0 = arith.constant 0 : i32
    return %c0_i32 : i32
  }
  func.func @transform_2(%arg0: i32) -> i32 {
    %c0_i32 = arith.constant 0 : i32
    %c0_i32_0 = arith.constant 0 : i32
    return %c0_i32 : i32
  }
  func.func @transform_3(%arg0: i32) -> i32 {
    %c0_i32 = arith.constant 0 : i32
    %c0_i32_0 = arith.constant 0 : i32
    return %c0_i32 : i32
  }
  func.func @transform_4(%arg0: i32) -> i32 {
    %c0_i32 = arith.constant 0 : i32
    %c0_i32_0 = arith.constant 0 : i32
    return %c0_i32 : i32
  }
  func.func @transform_5(%arg0: i32) -> i32 {
    %c0_i32 = arith.constant 0 : i32
    %c0_i32_0 = arith.constant 0 : i32
    return %c0_i32 : i32
  }
  func.func @transform_6(%arg0: i32) -> i32 {
    %c0_i32 = arith.constant 0 : i32
    %c0_i32_0 = arith.constant 0 : i32
    return %c0_i32 : i32
  }
  func.func @transform_7(%arg0: i32) -> (i32, i32) {
    %c0_i32 = arith.constant 0 : i32
    %c0_i32_0 = arith.constant 0 : i32
    return %c0_i32, %arg0 : i32, i32
  }
}

</mosaic_0001>

<bundles_post_ra>
// kernel: classicnet_forward.1
= control target key start
LH: loop header
LB: loop body
LE: loop exit
PB: predicated region body
PF: predicated region fallthrough
CT: control target
= control target key end

     0   :  { %12 = vsyncpa [#allocation3], 0  ;;  %s8858_s0 = inlined_call_operand.vmem [shape: f32[9,9,128], index: 0, kind: input, shape index: {}]   ;;  %s8859_s1 = inlined_call_operand.vmem [shape: f32[96], index: 1, kind: input, shape index: {}]   ;;  %s8860_s2 = inlined_call_operand.vmem [shape: f32[6], index: 2, kind: input, shape index: {}]   ;;  %s8861_s3 = inlined_call_operand.vmem [shape: f32[72], index: 3, kind: input, shape index: {}]   ;;  %s8862_s4 = inlined_call_operand.vmem [shape: f32[3], index: 4, kind: input, shape index: {}]   ;;  %s8863_s5 = inlined_call_operand.vmem [shape: f32[24], index: 5, kind: input, shape index: {}]   ;;  %s8864_s6 = inlined_call_operand.vmem [shape: f32[2], index: 6, kind: input, shape index: {}]   ;;  %s8865_s7 = inlined_call_operand.vmem [shape: f32[2,128], index: 7, kind: output, shape index: {}]  }
   0x1   :  { %13 = vsyncpa [#allocation5], 0 }
   0x2   :  { %14 = vsyncpa [#allocation8], 0  ;;  %s34_s26 = sshll.u32 %s8860_s2, 4  ;;  %s35_s26 = int_to_ptr.vmem [resolvable:$true] %s34_s26 }
   0x3   :  { %15 = vsyncpa [#allocation11], 0  ;;  %s54_s29 = sshll.u32 %s8862_s4, 4  ;;  %s4570_s30 = scalar_lea.vmem %s35_s26, 16  ;;  %s55_s29 = int_to_ptr.vmem [resolvable:$true] %s54_s29 }
   0x4   :  { %p4571_p0 = scmp.ne.s32.totalorder %s35_s26, %s4570_s30  ;;  %p4575_p1 = scmp.lt.s32.totalorder %s35_s26, %s35_s26 }
   0x5   :  { %p4576_p2 = scmp.lt.s32.totalorder %s4570_s30, %s4570_s30 }
   0x7   :  { %p4577_p3 = por %p4576_p2, %p4575_p1 }
   0x9   :  { %p4578_p4 = pnand %p4577_p3, %p4571_p0 }
   0xb   :  { %4581 = shalt.err (!%p4578_p4)
}
   0xc   :  { %s4650_s8 = smov [#allocation4]   ;;  %s4582_s9 = scalar_lea.vmem %s55_s29, 16 }
   0xd   :  { %37 = dma.vmem_to_smem %s35_s26, 16, %s4650_s8, [#allocation5]  }
   0xe   :  { %p4583_p5 = scmp.ne.s32.totalorder %s55_s29, %s4582_s9  ;;  %p4587_p6 = scmp.lt.s32.totalorder %s55_s29, %s55_s29 }
   0xf   :  { %p4588_p7 = scmp.lt.s32.totalorder %s4582_s9, %s4582_s9 }
  0x11   :  { %p4589_p8 = por %p4588_p7, %p4587_p6 }
  0x13   :  { %p4590_p9 = pnand %p4589_p8, %p4583_p5 }
  0x15   :  { %4593 = shalt.err (!%p4590_p9)
}
  0x16   :  { %s4651_s2 = smov [#allocation7]   ;;  %s24_s11 = sshll.u32 %s8859_s1, 4  ;;  %s25_s11 = int_to_ptr.vmem [resolvable:$true] %s24_s11 }
  0x17   :  { %57 = dma.vmem_to_smem %s55_s29, 16, %s4651_s2, [#allocation8]  }
  0x18   :  { %s44_s14 = sshll.u32 %s8861_s3, 4  ;;  %s4594_s15 = scalar_lea.vmem %s25_s11, 16  ;;  %s45_s14 = int_to_ptr.vmem [resolvable:$true] %s44_s14 }
  0x19   :  { %p4595_p10 = scmp.ne.s32.totalorder %s25_s11, %s4594_s15  ;;  %p4599_p11 = scmp.lt.s32.totalorder %s25_s11, %s25_s11 }
  0x1a   :  { %p4600_p12 = scmp.lt.s32.totalorder %s4594_s15, %s4594_s15 }
  0x1c   :  { %p4601_p13 = por %p4600_p12, %p4599_p11 }
  0x1e   :  { %p4602_p0 = pnand %p4601_p13, %p4595_p10 }
  0x20   :  { %4605 = shalt.err (!%p4602_p0)
}
  0x21   :  { %s4652_s16 = smov [#allocation2]   ;;  %s4606_s17 = scalar_lea.vmem %s45_s14, 16 }
  0x22   :  { %27 = dma.vmem_to_smem %s25_s11, 16, %s4652_s16, [#allocation3]  }
  0x23   :  { %p4607_p1 = scmp.ne.s32.totalorder %s45_s14, %s4606_s17  ;;  %p4611_p2 = scmp.lt.s32.totalorder %s45_s14, %s45_s14 }
  0x24   :  { %p4612_p3 = scmp.lt.s32.totalorder %s4606_s17, %s4606_s17 }
  0x26   :  { %p4613_p4 = por %p4612_p3, %p4611_p2 }
  0x28   :  { %p4614_p5 = pnand %p4613_p4, %p4607_p1 }
  0x2a   :  { %4617 = shalt.err (!%p4614_p5)
}
  0x2b   :  { %s4653_s1 = smov [#allocation6]   ;;  %s64_s19 = sshll.u32 %s8863_s5, 4  ;;  %s65_s19 = int_to_ptr.vmem [resolvable:$true] %s64_s19 }
  0x2c   :  { %47 = dma.vmem_to_smem %s45_s14, 16, %s4653_s1, [#allocation5]  }
  0x2d   :  { %s74_s22 = sshll.u32 %s8864_s6, 4  ;;  %s4618_s23 = scalar_lea.vmem %s65_s19, 16  ;;  %s75_s22 = int_to_ptr.vmem [resolvable:$true] %s74_s22 }
  0x2e   :  { %p4619_p6 = scmp.ne.s32.totalorder %s65_s19, %s4618_s23  ;;  %p4623_p7 = scmp.lt.s32.totalorder %s65_s19, %s65_s19 }
  0x2f   :  { %p4624_p8 = scmp.lt.s32.totalorder %s4618_s23, %s4618_s23 }
  0x31   :  { %p4625_p9 = por %p4624_p8, %p4623_p7 }
  0x33   :  { %p4626_p10 = pnand %p4625_p9, %p4619_p6 }
  0x35   :  { %4629 = shalt.err (!%p4626_p10)
}
  0x36   :  { %s4654_s24 = smov [#allocation9]   ;;  %s4630_s25 = scalar_lea.vmem %s75_s22, 16 }
  0x37   :  { %67 = dma.vmem_to_smem %s65_s19, 16, %s4654_s24, [#allocation8]  }
  0x38   :  { %p4631_p11 = scmp.ne.s32.totalorder %s75_s22, %s4630_s25  ;;  %p4635_p12 = scmp.lt.s32.totalorder %s75_s22, %s75_s22 }
  0x39   :  { %p4636_p13 = scmp.lt.s32.totalorder %s4630_s25, %s4630_s25 }
  0x3b   :  { %p4637_p0 = por %p4636_p13, %p4635_p12 }
  0x3d   :  { %p4638_p1 = pnand %p4637_p0, %p4631_p11 }
  0x3f   :  { %4641 = shalt.err (!%p4638_p1)
}
  0x40   :  { %s4655_s5 = smov [#allocation10]  }
  0x41   :  { %77 = dma.vmem_to_smem %s75_s22, 16, %s4655_s5, [#allocation11]  }
  0x42   :  { %4642 = dma.done.wait [#allocation3], 16  }
  0x43   :  { %4643 = vsyncadd [#allocation3], 4294967280 }
  0x44   :  { %4644 = dma.done.wait [#allocation5], 32  }
  0x45   :  { %4645 = vsyncadd [#allocation5], 4294967264 }
  0x46   :  { %4646 = dma.done.wait [#allocation8], 32  }
  0x47   :  { %4647 = vsyncadd [#allocation8], 4294967264 }
  0x48   :  { %4648 = dma.done.wait [#allocation11], 16  }
  0x49   :  { %4649 = vsyncadd [#allocation11], 4294967280 }
  0x4a   :  { %96 = sfence }
  0x4b   :  { %s115_s6 = sld [smem:[#allocation2]]  ;;  %s4714_s29 = sld [smem:[#allocation2 + $0x1]]  ;;  %v4721_v2 = vld [vmem:[%s8858_s0] sm:$0xff]  ;;  %v4726_v3 = vld [vmem:[%s8858_s0 + $0x10] sm:$0xff]  ;;  %vm609_vm0 = vcmask 1044480  }
  0x4c   :  { %s4328_s26 = sld [smem:[#allocation2 + $0x10]]  ;;  %v4731_v4 = vld [vmem:[%s8858_s0 + $0x20] sm:$0xff]  ;;  %v4738_v5 = vld [vmem:[%s8858_s0 + $0x30] sm:$0xff]  ;;  %s4771_s3 = sld [smem:[#allocation2 + $0x11]] }
  0x4d   :  { %s4329_s27 = sld [smem:[#allocation2 + $0x20]]  ;;  %v4743_v6 = vld [vmem:[%s8858_s0 + $0x40] sm:$0xff]  ;;  %v4748_v7 = vld [vmem:[%s8858_s0 + $0x50] sm:$0xff]  ;;  %s4782_s18 = sld [smem:[#allocation2 + $0x21]] }
  0x4e   :  { %s4330_s28 = sld [smem:[#allocation2 + $0x30]]  ;;  %s4858_s19 = sld [smem:[#allocation2 + $0x31]] }
  0x4f   :  { %s4716_s30 = sld [smem:[#allocation2 + $0x40]]  ;;  %s4890_s20 = sld [smem:[#allocation2 + $0x41]] }
  0x50   :  { %s4733_s12 = sld [smem:[#allocation2 + $0x50]]  ;;  %s4911_s21 = sld [smem:[#allocation2 + $0x51]] }
  0x51   :  { %v116_v0 = vstv %s115_s6  ;;  %v200_v27 = vstv %s4714_s29  ;;  %s4942_s22 = sld [smem:[#allocation2 + $0x2]]  ;;  %s5184_s10 = sld [smem:[#allocation2 + $0x13]] }
  0x52   :  { %v130_v1 = vstv %s4328_s26  ;;  %v4751_v8 = vmul.f32 %v116_v0, %v4721_v2  ;;  %v4754_v9 = vmul.f32 %v116_v0, %v4726_v3  ;;  %v4757_v10 = vmul.f32 %v116_v0, %v4731_v4  ;;  %s4968_s23 = sld [smem:[#allocation2 + $0x12]]  ;;  %s5100_s26 = sld [smem:[#allocation2 + $0x3]] }
  0x53   :  { %v144_v11 = vstv %s4329_s27  ;;  %v4760_v12 = vmul.f32 %v116_v0, %v4738_v5  ;;  %v4763_v13 = vmul.f32 %v116_v0, %v4743_v6  ;;  %v4766_v14 = vmul.f32 %v116_v0, %v4748_v7  ;;  %s4998_s24 = sld [smem:[#allocation2 + $0x22]]  ;;  %s5228_s15 = sld [smem:[#allocation2 + $0x23]] }
  0x54   :  { %v4769_v15 = vmul.f32 %v130_v1, %v4721_v2  ;;  %v4774_v16 = vmul.f32 %v130_v1, %v4726_v3  ;;  %v4777_v17 = vmul.f32 %v130_v1, %v4731_v4  ;;  %v4780_v18 = vmul.f32 %v130_v1, %v4738_v5  ;;  %s5025_s25 = sld [smem:[#allocation2 + $0x32]]  ;;  %s5266_s16 = sld [smem:[#allocation2 + $0x33]] }
  0x55   :  { %v158_v19 = vstv %s4330_s28  ;;  %v4785_v20 = vmul.f32 %v130_v1, %v4743_v6  ;;  %v4788_v21 = vmul.f32 %v130_v1, %v4748_v7  ;;  %v4791_v22 = vmul.f32 %v144_v11, %v4721_v2  ;;  %s5036_s5 = sld [smem:[#allocation2 + $0x42]]  ;;  %s5270_s17 = sld [smem:[#allocation2 + $0x43]] }
  0x56   :  { %v4794_v23 = vmul.f32 %v144_v11, %v4726_v3  ;;  %v4797_v24 = vmul.f32 %v144_v11, %v4731_v4  ;;  %v4800_v25 = vmul.f32 %v144_v11, %v4738_v5  ;;  %v4803_v26 = vmul.f32 %v144_v11, %v4743_v6  ;;  %s5092_s6 = sld [smem:[#allocation2 + $0x52]]  ;;  %s5334_s1 = sld [smem:[#allocation2 + $0x53]] }
  0x57   :  { %v4807_v28 = vmul.f32 %v144_v11, %v4748_v7  ;;  %v4810_v29 = vmul.f32 %v158_v19, %v4721_v2  ;;  %v4813_v30 = vmul.f32 %v158_v19, %v4726_v3  ;;  %v172_v31 = vstv %s4716_s30  ;;  %s5487_s29 = sld [smem:[#allocation2 + $0x44]]  ;;  %s5544_s2 = sld [smem:[#allocation2 + $0x5]] }
  0x58   :  { %v4817_v32 = vmul.f32 %v158_v19, %v4731_v4  ;;  %v4820_v33 = vmul.f32 %v158_v19, %v4738_v5  ;;  %v4823_v34 = vmul.f32 %v158_v19, %v4743_v6  ;;  %v4826_v35 = vmul.f32 %v158_v19, %v4748_v7  ;;  %s5536_s9 = sld [smem:[#allocation2 + $0x54]]  ;;  %s5582_s4 = sld [smem:[#allocation2 + $0x15]] }
  0x59   :  { %v186_v36 = vstv %s4733_s12  ;;  %v201_v37 = vmul.f32 %v200_v27, %v4721_v2  ;;  %v202_v38 = vmul.f32 %v200_v27, %v4726_v3  ;;  %v203_v39 = vmul.f32 %v200_v27, %v4731_v4  ;;  %s5654_s11 = sld [smem:[#allocation2 + $0x35]]  ;;  %s5736_s14 = sld [smem:[#allocation2 + $0x6]] }
  0x5a   :  { %v4833_v40 = vmul.f32 %v172_v31, %v4721_v2  ;;  %v4836_v41 = vmul.f32 %v172_v31, %v4726_v3  ;;  %v4839_v42 = vmul.f32 %v172_v31, %v4731_v4  ;;  %v4842_v43 = vmul.f32 %v172_v31, %v4738_v5  ;;  %s5684_s12 = sld [smem:[#allocation2 + $0x45]]  ;;  %s6022_s30 = sld [smem:[#allocation2 + $0x27]] }
  0x5b   :  { %v4845_v44 = vmul.f32 %v172_v31, %v4743_v6  ;;  %v204_v45 = vmul.f32 %v200_v27, %v4738_v5  ;;  %v205_v46 = vmul.f32 %v200_v27, %v4743_v6  ;;  %v232_v47 = vstv %s4771_s3  ;;  %s5404_s3 = sld [smem:[#allocation2 + $0x4]]  ;;  %s5705_s13 = sld [smem:[#allocation2 + $0x55]] }
  0x5c   :  { %v4851_v48 = vmul.f32 %v172_v31, %v4748_v7  ;;  %v4854_v49 = vmul.f32 %v186_v36, %v4721_v2  ;;  %v206_v50 = vmul.f32 %v200_v27, %v4748_v7  ;;  %v264_v51 = vstv %s4782_s18  ;;  %s5412_s18 = sld [smem:[#allocation2 + $0x14]]  ;;  %s6060_s8 = sld [smem:[#allocation2 + $0x37]] }
  0x5d   :  { %v4861_v52 = vmul.f32 %v186_v36, %v4726_v3  ;;  %v213_v53 = vrot.slane %v201_v37, 1  ;;  %v214_v54 = vrot.slane %v202_v38, 1  ;;  %v215_v55 = vrot.slane %v203_v39, 1  ;;  %s6478_s27 = sld [smem:[#allocation2 + $0x49]] }
  0x5e   :  { %v4864_v56 = vmul.f32 %v186_v36, %v4731_v4  ;;  %v4867_v57 = vmul.f32 %v186_v36, %v4738_v5  ;;  %v4870_v58 = vmul.f32 %v186_v36, %v4743_v6  ;;  %v233_v59 = vmul.f32 %v232_v47, %v4721_v2  ;;  %s6499_s28 = sld [smem:[#allocation2 + $0x59]] }
  0x5f   :  { %v216_v60 = vrot.slane %v204_v45, 1  ;;  %v217_v61 = vrot.slane %v205_v46, 1  ;;  %v234_v62 = vmul.f32 %v232_v47, %v4726_v3  ;;  %v235_v63 = vmul.f32 %v232_v47, %v4731_v4 }
  0x60   :  { %v4876_v0 = vmul.f32 %v186_v36, %v4748_v7  ;;  %v218_v1 = vrot.slane %v206_v50, 1  ;;  %v236_v11 = vmul.f32 %v232_v47, %v4738_v5  ;;  %v237_v19 = vmul.f32 %v232_v47, %v4743_v6 }
  0x61   :  { %v4881_v27 = vadd.f32 %v213_v53, %v4751_v8  ;;  %v4884_v31 = vadd.f32 %v214_v54, %v4754_v9  ;;  %v4887_v37 = vadd.f32 %v215_v55, %v4757_v10  ;;  %v238_v38 = vmul.f32 %v232_v47, %v4748_v7 }
  0x62   :  { %v245_v36 = vrot.slane %v233_v59, 1  ;;  %v265_v39 = vmul.f32 %v264_v51, %v4721_v2  ;;  %v266_v45 = vmul.f32 %v264_v51, %v4726_v3  ;;  %v267_v46 = vmul.f32 %v264_v51, %v4731_v4 }
  0x63   :  { %8870 = vst [vmem:[#allocation16_spill] sm:$0xff] %v4881_v27  ;;  %8871 = vst [vmem:[#allocation17_spill] sm:$0xff] %v4884_v31  ;;  %v4896_v8 = vadd.f32 %v216_v60, %v4760_v12  ;;  %v4899_v9 = vadd.f32 %v217_v61, %v4763_v13  ;;  %v246_v50 = vrot.slane %v234_v62, 1  ;;  %v247_v10 = vrot.slane %v235_v63, 1 }
  0x64   :  { %8872 = vst [vmem:[#allocation18_spill] sm:$0xff] %v4887_v37  ;;  %v248_v53 = vrot.slane %v236_v11, 1  ;;  %v249_v54 = vrot.slane %v237_v19, 1  ;;  %v268_v47 = vmul.f32 %v264_v51, %v4738_v5  ;;  %v296_v55 = vstv %s4858_s19  ;;  %s5422_s19 = sld [smem:[#allocation2 + $0x24]] }
  0x65   :  { %v4904_v59 = vadd.f32 %v218_v1, %v4766_v14  ;;  %v250_v37 = vrot.slane %v238_v38, 1  ;;  %v269_v31 = vmul.f32 %v264_v51, %v4743_v6  ;;  %v270_v27 = vmul.f32 %v264_v51, %v4748_v7 }
  0x66   :  { %v4909_v12 = vadd.f32 %v245_v36, %v4769_v15  ;;  %v277_v13 = vrot.slane %v265_v39, 1  ;;  %v278_v60 = vrot.slane %v266_v45, 1  ;;  %v279_v61 = vrot.slane %v267_v46, 1 }
  0x67   :  { %v4914_v62 = vadd.f32 %v246_v50, %v4774_v16  ;;  %v4917_v14 = vadd.f32 %v247_v10, %v4777_v17  ;;  %v297_v63 = vmul.f32 %v296_v55, %v4721_v2  ;;  %v298_v1 = vmul.f32 %v296_v55, %v4726_v3 }
  0x68   :  { %v4922_v51 = vadd.f32 %v248_v53, %v4780_v18  ;;  %v4925_v15 = vadd.f32 %v249_v54, %v4785_v20  ;;  %v280_v11 = vrot.slane %v268_v47, 1  ;;  %v299_v19 = vmul.f32 %v296_v55, %v4731_v4 }
  0x69   :  { %v281_v38 = vrot.slane %v269_v31, 1  ;;  %v282_v36 = vrot.slane %v270_v27, 1  ;;  %v300_v16 = vmul.f32 %v296_v55, %v4738_v5  ;;  %v328_v39 = vstv %s4890_s20  ;;  %s7293_s20 = sld [smem:[#allocation2 + $0x5d]] }
  0x6a   :  { %v4931_v17 = vadd.f32 %v250_v37, %v4788_v21  ;;  %v4934_v45 = vadd.f32 %v277_v13, %v4791_v22  ;;  %v4937_v18 = vadd.f32 %v278_v60, %v4794_v23  ;;  %v4940_v20 = vadd.f32 %v279_v61, %v4797_v24 }
  0x6b   :  { %v301_v27 = vmul.f32 %v296_v55, %v4743_v6  ;;  %v302_v31 = vmul.f32 %v296_v55, %v4748_v7  ;;  %v309_v46 = vrot.slane %v297_v63, 1  ;;  %v310_v50 = vrot.slane %v298_v1, 1 }
  0x6c   :  { %v311_v21 = vrot.slane %v299_v19, 1  ;;  %v329_v37 = vmul.f32 %v328_v39, %v4721_v2  ;;  %v330_v22 = vmul.f32 %v328_v39, %v4726_v3  ;;  %v331_v23 = vmul.f32 %v328_v39, %v4731_v4 }
  0x6d   :  { %v4950_v10 = vadd.f32 %v280_v11, %v4800_v25  ;;  %v4953_v24 = vadd.f32 %v281_v38, %v4803_v26  ;;  %v4956_v53 = vadd.f32 %v282_v36, %v4807_v28  ;;  %v312_v54 = vrot.slane %v300_v16, 1 }
  0x6e   :  { %v332_v47 = vmul.f32 %v328_v39, %v4738_v5  ;;  %v333_v55 = vmul.f32 %v328_v39, %v4743_v6  ;;  %v334_v13 = vmul.f32 %v328_v39, %v4748_v7  ;;  %v360_v60 = vstv %s4911_s21  ;;  %s7324_s21 = sld [smem:[#allocation2 + $0xe]] }
  0x6f   :  { %v313_v61 = vrot.slane %v301_v27, 1  ;;  %v314_v63 = vrot.slane %v302_v31, 1  ;;  %v4963_v25 = vadd.f32 %v309_v46, %v4810_v29  ;;  %v4966_v26 = vadd.f32 %v310_v50, %v4813_v30 }
  0x70   :  { %v4971_v28 = vadd.f32 %v311_v21, %v4817_v32  ;;  %v341_v1 = vrot.slane %v329_v37, 1  ;;  %v342_v11 = vrot.slane %v330_v22, 1  ;;  %v343_v19 = vrot.slane %v331_v23, 1 }
  0x71   :  { %v4974_v38 = vadd.f32 %v312_v54, %v4820_v33  ;;  %v361_v36 = vmul.f32 %v360_v60, %v4721_v2  ;;  %v362_v16 = vmul.f32 %v360_v60, %v4726_v3  ;;  %v363_v29 = vmul.f32 %v360_v60, %v4731_v4 }
  0x72   :  { %v344_v39 = vrot.slane %v332_v47, 1  ;;  %v345_v30 = vrot.slane %v333_v55, 1  ;;  %v346_v27 = vrot.slane %v334_v13, 1  ;;  %v392_v31 = vstv %s4942_s22  ;;  %s5453_s22 = sld [smem:[#allocation2 + $0x34]] }
  0x73   :  { %v4981_v46 = vadd.f32 %v313_v61, %v4823_v34  ;;  %v4984_v32 = vadd.f32 %v314_v63, %v4826_v35  ;;  %v364_v50 = vmul.f32 %v360_v60, %v4738_v5  ;;  %v365_v33 = vmul.f32 %v360_v60, %v4743_v6 }
  0x74   :  { %v4989_v21 = vadd.f32 %v341_v1, %v4833_v40  ;;  %v4992_v37 = vadd.f32 %v342_v11, %v4836_v41  ;;  %v4995_v22 = vadd.f32 %v343_v19, %v4839_v42  ;;  %v366_v34 = vmul.f32 %v360_v60, %v4748_v7 }
  0x75   :  { %v373_v35 = vrot.slane %v361_v36, 1  ;;  %v374_v23 = vrot.slane %v362_v16, 1  ;;  %v375_v54 = vrot.slane %v363_v29, 1  ;;  %v393_v47 = vmul.f32 %v392_v31, %v4721_v2 }
  0x76   :  { %v5002_v55 = vadd.f32 %v344_v39, %v4842_v43  ;;  %v5005_v40 = vadd.f32 %v345_v30, %v4845_v44  ;;  %v5008_v41 = vadd.f32 %v346_v27, %v4851_v48  ;;  %v394_v42 = vmul.f32 %v392_v31, %v4726_v3 }
  0x77   :  { %v376_v13 = vrot.slane %v364_v50, 1  ;;  %v377_v60 = vrot.slane %v365_v33, 1  ;;  %v395_v61 = vmul.f32 %v392_v31, %v4731_v4  ;;  %v424_v63 = vstv %s4968_s23  ;;  %s6286_s23 = sld [smem:[#allocation2 + $0x48]] }
  0x78   :  { %v378_v1 = vrot.slane %v366_v34, 1  ;;  %v396_v11 = vmul.f32 %v392_v31, %v4738_v5  ;;  %v397_v19 = vmul.f32 %v392_v31, %v4743_v6  ;;  %v398_v43 = vmul.f32 %v392_v31, %v4748_v7 }
  0x79   :  { %v5017_v44 = vadd.f32 %v373_v35, %v4854_v49  ;;  %v5020_v48 = vadd.f32 %v374_v23, %v4861_v52  ;;  %v5023_v36 = vadd.f32 %v375_v54, %v4864_v56  ;;  %v405_v16 = vrot.slane %v393_v47, 2  ;;  %v8875_v47 = vld [vmem:[#allocation16_spill] sm:$0xff] }
  0x7a   :  { %v406_v29 = vrot.slane %v394_v42, 2  ;;  %v425_v39 = vmul.f32 %v424_v63, %v4721_v2  ;;  %v426_v30 = vmul.f32 %v424_v63, %v4726_v3  ;;  %v427_v27 = vmul.f32 %v424_v63, %v4731_v4 }
  0x7b   :  { %8873 = vst [vmem:[#allocation19_spill] sm:$0xff] %v5023_v36  ;;  %v5031_v49 = vadd.f32 %v376_v13, %v4867_v57  ;;  %v407_v31 = vrot.slane %v395_v61, 2  ;;  %v428_v52 = vmul.f32 %v424_v63, %v4738_v5  ;;  %v429_v50 = vmul.f32 %v424_v63, %v4743_v6  ;;  %v8876_v13 = vld [vmem:[#allocation17_spill] sm:$0xff] }
  0x7c   :  { %v408_v56 = vrot.slane %v396_v11, 2  ;;  %v409_v33 = vrot.slane %v397_v19, 2  ;;  %v410_v34 = vrot.slane %v398_v43, 2  ;;  %v456_v35 = vstv %s4998_s24  ;;  %s6330_s24 = sld [smem:[#allocation2 + $0x58]] }
  0x7d   :  { %8874 = vst [vmem:[#allocation20_spill] sm:$0xff] %v5031_v49  ;;  %v5039_v23 = vadd.f32 %v377_v60, %v4870_v58  ;;  %v5042_v54 = vadd.f32 %v378_v1, %v4876_v0  ;;  %v5045_v57 = vadd.f32 %v405_v16, %v8875_v47  ;;  %v430_v42 = vmul.f32 %v424_v63, %v4748_v7  ;;  %v8877_v49 = vld [vmem:[#allocation18_spill] sm:$0xff] }
  0x7e   :  { %v5049_v61 = vadd.f32 %v406_v29, %v8876_v13  ;;  %v437_v11 = vrot.slane %v425_v39, 2  ;;  %v438_v19 = vrot.slane %v426_v30, 2  ;;  %v439_v43 = vrot.slane %v427_v27, 2 }
  0x7f   :  { %v5052_v36 = vadd.f32 %v407_v31, %v8877_v49  ;;  %v440_v58 = vrot.slane %v428_v52, 2  ;;  %v441_v60 = vrot.slane %v429_v50, 2  ;;  %v457_v0 = vmul.f32 %v456_v35, %v4721_v2 }
  0x80   :  { %v5056_v1 = vadd.f32 %v408_v56, %v4896_v8  ;;  %v5059_v16 = vadd.f32 %v409_v33, %v4899_v9  ;;  %v5062_v63 = vadd.f32 %v410_v34, %v4904_v59  ;;  %v458_v29 = vmul.f32 %v456_v35, %v4726_v3 }
  0x81   :  { %v442_v39 = vrot.slane %v430_v42, 2  ;;  %v459_v30 = vmul.f32 %v456_v35, %v4731_v4  ;;  %v460_v27 = vmul.f32 %v456_v35, %v4738_v5  ;;  %v488_v49 = vstv %s5025_s25  ;;  %s6338_s25 = sld [smem:[#allocation2 + $0x9]] }
  0x82   :  { %v5069_v31 = vadd.f32 %v437_v11, %v4909_v12  ;;  %v5072_v8 = vadd.f32 %v438_v19, %v4914_v62  ;;  %v5075_v9 = vadd.f32 %v439_v43, %v4917_v14  ;;  %v461_v59 = vmul.f32 %v456_v35, %v4743_v6 }
  0x83   :  { %v5079_v52 = vadd.f32 %v440_v58, %v4922_v51  ;;  %v5082_v50 = vadd.f32 %v441_v60, %v4925_v15  ;;  %v462_v56 = vmul.f32 %v456_v35, %v4748_v7  ;;  %v469_v33 = vrot.slane %v457_v0, 2 }
  0x84   :  { %v470_v34 = vrot.slane %v458_v29, 2  ;;  %v489_v12 = vmul.f32 %v488_v49, %v4721_v2  ;;  %v490_v62 = vmul.f32 %v488_v49, %v4726_v3  ;;  %v520_v47 = vstv %s5036_s5  ;;  %s6376_s5 = sld [smem:[#allocation2 + $0x19]] }
  0x85   :  { %8878 = vst [vmem:[#allocation16_spill] sm:$0xff] %v5079_v52  ;;  %8879 = vst [vmem:[#allocation17_spill] sm:$0xff] %v5082_v50  ;;  %v5089_v14 = vadd.f32 %v442_v39, %v4931_v17  ;;  %v471_v42 = vrot.slane %v459_v30, 2  ;;  %v472_v13 = vrot.slane %v460_v27, 2  ;;  %v491_v51 = vmul.f32 %v488_v49, %v4731_v4 }
  0x86   :  { %v473_v15 = vrot.slane %v461_v59, 2  ;;  %v492_v11 = vmul.f32 %v488_v49, %v4738_v5  ;;  %v493_v35 = vmul.f32 %v488_v49, %v4743_v6  ;;  %v494_v19 = vmul.f32 %v488_v49, %v4748_v7 }
  0x87   :  { %8880 = vst [vmem:[#allocation18_spill] sm:$0xff] %v5089_v14  ;;  %v474_v43 = vrot.slane %v462_v56, 2  ;;  %v521_v58 = vmul.f32 %v520_v47, %v4721_v2  ;;  %v522_v60 = vmul.f32 %v520_v47, %v4726_v3  ;;  %v523_v17 = vmul.f32 %v520_v47, %v4731_v4 }
  0x88   :  { %v5103_v0 = vadd.f32 %v469_v33, %v4934_v45  ;;  %v5106_v29 = vadd.f32 %v470_v34, %v4937_v18  ;;  %v501_v39 = vrot.slane %v489_v12, 2  ;;  %v502_v30 = vrot.slane %v490_v62, 2 }
  0x89   :  { %v5109_v27 = vadd.f32 %v471_v42, %v4940_v20  ;;  %v503_v49 = vrot.slane %v491_v51, 2  ;;  %v524_v59 = vmul.f32 %v520_v47, %v4738_v5  ;;  %v525_v56 = vmul.f32 %v520_v47, %v4743_v6 }
  0x8a   :  { %v504_v14 = vrot.slane %v492_v11, 2  ;;  %v505_v50 = vrot.slane %v493_v35, 2  ;;  %v506_v52 = vrot.slane %v494_v19, 2  ;;  %v526_v45 = vmul.f32 %v520_v47, %v4748_v7 }
  0x8b   :  { %v5115_v33 = vadd.f32 %v472_v13, %v4950_v10  ;;  %v533_v18 = vrot.slane %v521_v58, 2  ;;  %v534_v34 = vrot.slane %v522_v60, 2  ;;  %v535_v12 = vrot.slane %v523_v17, 2  ;;  %v5189_v17 = vld [vmem:[%s8858_s0 + $0x48] sm:$0x1] }
  0x8c   :  { %v5118_v20 = vadd.f32 %v473_v15, %v4953_v24  ;;  %v5121_v62 = vadd.f32 %v474_v43, %v4956_v53  ;;  %v5124_v42 = vadd.f32 %v501_v39, %v4963_v25  ;;  %v5127_v51 = vadd.f32 %v502_v30, %v4966_v26  ;;  %v5145_v26 = vld [vmem:[%s8858_s0 + $0x8] sm:$0x1] }
  0x8d   :  { %v5130_v47 = vadd.f32 %v503_v49, %v4971_v28  ;;  %v536_v10 = vrot.slane %v524_v59, 2  ;;  %v537_v13 = vrot.slane %v525_v56, 2  ;;  %v552_v11 = vstv %s5092_s6  ;;  %v5150_v28 = vld [vmem:[%s8858_s0 + $0x18] sm:$0x1]  ;;  %s6412_s6 = sld [smem:[#allocation2 + $0x29]] }
  0x8e   :  { %v5134_v35 = vadd.f32 %v504_v14, %v4974_v38  ;;  %v5137_v24 = vadd.f32 %v505_v50, %v4981_v46  ;;  %v5140_v53 = vadd.f32 %v506_v52, %v4984_v32  ;;  %v538_v25 = vrot.slane %v526_v45, 2  ;;  %v5165_v50 = vld [vmem:[%s8858_s0 + $0x28] sm:$0x1]  ;;  %v5170_v14 = vld [vmem:[%s8858_s0 + $0x38] sm:$0x1] }
  0x8f   :  { %8881 = vst [vmem:[#allocation21_spill] sm:$0xff] %v5130_v47  ;;  %v5153_v38 = vadd.f32 %v533_v18, %v4989_v21  ;;  %v5156_v46 = vadd.f32 %v534_v34, %v4992_v37  ;;  %v5159_v32 = vadd.f32 %v535_v12, %v4995_v22  ;;  %v584_v52 = vstv %s5100_s26  ;;  %s6448_s26 = sld [smem:[#allocation2 + $0x39]] }
  0x90   :  { %8882 = vst [vmem:[#allocation22_spill] sm:$0xff] %v5134_v35  ;;  %8883 = vst [vmem:[#allocation23_spill] sm:$0xff] %v5137_v24  ;;  %v553_v21 = vmul.f32 %v552_v11, %v4721_v2  ;;  %v554_v37 = vmul.f32 %v552_v11, %v4726_v3  ;;  %v555_v15 = vmul.f32 %v552_v11, %v4731_v4 }
  0x91   :  { %8884 = vst [vmem:[#allocation24_spill] sm:$0xff] %v5140_v53  ;;  %8885 = vst [vmem:[#allocation25_spill] sm:$0xff] %v5153_v38  ;;  %v556_v22 = vmul.f32 %v552_v11, %v4738_v5  ;;  %v5177_v19 = vadd.f32 %v536_v10, %v5002_v55  ;;  %v5180_v43 = vadd.f32 %v537_v13, %v5005_v40 }
  0x92   :  { %8886 = vst [vmem:[#allocation26_spill] sm:$0xff] %v5156_v46  ;;  %8887 = vst [vmem:[#allocation27_spill] sm:$0xff] %v5159_v32  ;;  %v557_v58 = vmul.f32 %v552_v11, %v4743_v6  ;;  %v558_v60 = vmul.f32 %v552_v11, %v4748_v7  ;;  %v585_v39 = vmul.f32 %v584_v52, %v4721_v2  ;;  %v565_v18 = vrot.slane %v553_v21, 2  ;;  %v5204_v32 = vld [vmem:[%s8858_s0 + $0x58] sm:$0x1] }
  0x93   :  { %8888 = vst [vmem:[#allocation28_spill] sm:$0xff] %v5177_v19  ;;  %8889 = vst [vmem:[#allocation29_spill] sm:$0xff] %v5180_v43  ;;  %v586_v30 = vmul.f32 %v584_v52, %v5145_v26  ;;  %v587_v55 = vmul.f32 %v584_v52, %v4726_v3  ;;  %v588_v40 = vmul.f32 %v584_v52, %v5150_v28  ;;  %v566_v34 = vrot.slane %v554_v37, 2 }
  0x94   :  { %v589_v49 = vmul.f32 %v584_v52, %v4731_v4  ;;  %v590_v59 = vmul.f32 %v584_v52, %v5165_v50  ;;  %v591_v56 = vmul.f32 %v584_v52, %v4738_v5  ;;  %v592_v45 = vmul.f32 %v584_v52, %v5170_v14 }
  0x95   :  { %v567_v12 = vrot.slane %v555_v15, 2  ;;  %v568_v10 = vrot.slane %v556_v22, 2  ;;  %v569_v13 = vrot.slane %v557_v58, 2  ;;  %v570_v11 = vrot.slane %v558_v60, 2 }
  0x96   :  { %v593_v43 = vmul.f32 %v584_v52, %v4743_v6  ;;  %v594_v19 = vmul.f32 %v584_v52, %v5189_v17  ;;  %v610_v46 = vrot.slane %v585_v39, 3  ;;  %v611_v38 = vrot.slane %v586_v30, 3 }
  0x97   :  { %v613_v53 = vrot.slane %v587_v55, 3  ;;  %v614_v24 = vrot.slane %v588_v40, 3  ;;  %v616_v21 = vrot.slane %v589_v49, 3  ;;  %v617_v37 = vrot.slane %v590_v59, 3  ;;  %v8890_v49 = vld [vmem:[#allocation19_spill] sm:$0xff] }
  0x98   :  { %v619_v15 = vrot.slane %v591_v56, 3  ;;  %v620_v22 = vrot.slane %v592_v45, 3  ;;  %v5207_v58 = vadd.f32 %v538_v25, %v5008_v41  ;;  %v5210_v60 = vadd.f32 %v565_v18, %v5017_v44  ;;  %v8891_v56 = vld [vmem:[#allocation20_spill] sm:$0xff] }
  0x99   :  { %v5213_v35 = vadd.f32 %v566_v34, %v5020_v48  ;;  %v595_v47 = vmul.f32 %v584_v52, %v4748_v7  ;;  %v596_v39 = vmul.f32 %v584_v52, %v5204_v32  ;;  %v622_v30 = vrot.slane %v593_v43, 3 }
  0x9a   :  { %v623_v55 = vrot.slane %v594_v19, 3  ;;  %v641_v40 = vstv %s5184_s10  ;;  %v5219_v59 = vadd.f32 %v567_v12, %v8890_v49  ;;  %v5222_v45 = vadd.f32 %v568_v10, %v8891_v56  ;;  %s5618_s10 = sld [smem:[#allocation2 + $0x25]] }
  0x9b   :  { %v5225_v41 = vadd.f32 %v569_v13, %v5039_v23  ;;  %v612_v44 = vsel %vm609_vm0, %v610_v46, %v611_v38  ;;  %v5231_v48 = vadd.f32 %v570_v11, %v5042_v54  ;;  %v615_v25 = vsel %vm609_vm0, %v613_v53, %v614_v24 }
  0x9c   :  { %v618_v52 = vsel %vm609_vm0, %v616_v21, %v617_v37  ;;  %v621_v19 = vsel %vm609_vm0, %v619_v15, %v620_v22  ;;  %v642_v43 = vmul.f32 %v641_v40, %v4721_v2  ;;  %v643_v18 = vmul.f32 %v641_v40, %v5145_v26 }
  0x9d   :  { %8892 = vst [vmem:[#allocation19_spill] sm:$0xff] %v5231_v48  ;;  %v644_v23 = vmul.f32 %v641_v40, %v4726_v3  ;;  %v645_v34 = vmul.f32 %v641_v40, %v5150_v28  ;;  %v624_v38 = vsel %vm609_vm0, %v622_v30, %v623_v55  ;;  %v625_v46 = vrot.slane %v595_v47, 3 }
  0x9e   :  { %v626_v12 = vrot.slane %v596_v39, 3  ;;  %v5242_v54 = vadd.f32 %v612_v44, %v5045_v57  ;;  %v646_v24 = vmul.f32 %v641_v40, %v4731_v4  ;;  %v647_v53 = vmul.f32 %v641_v40, %v5165_v50 }
  0x9f   :  { %v648_v10 = vmul.f32 %v641_v40, %v4738_v5  ;;  %v649_v13 = vmul.f32 %v641_v40, %v5170_v14  ;;  %v650_v11 = vmul.f32 %v641_v40, %v4743_v6  ;;  %v651_v21 = vmul.f32 %v641_v40, %v5189_v17 }
  0xa0   :  { %8893 = vst [vmem:[#allocation20_spill] sm:$0xff] %v5242_v54  ;;  %v652_v37 = vmul.f32 %v641_v40, %v4748_v7  ;;  %v653_v47 = vmul.f32 %v641_v40, %v5204_v32  ;;  %v666_v15 = vrot.slane %v642_v43, 3  ;;  %v667_v57 = vrot.slane %v643_v18, 3 }
  0xa1   :  { %v669_v22 = vrot.slane %v644_v23, 3  ;;  %v670_v39 = vrot.slane %v645_v34, 3  ;;  %v627_v30 = vsel %vm609_vm0, %v625_v46, %v626_v12  ;;  %v5254_v55 = vadd.f32 %v615_v25, %v5049_v61 }
  0xa2   :  { %v5257_v49 = vadd.f32 %v618_v52, %v5052_v36  ;;  %v5260_v56 = vadd.f32 %v621_v19, %v5056_v1  ;;  %v5263_v44 = vadd.f32 %v624_v38, %v5059_v16  ;;  %v672_v54 = vrot.slane %v646_v24, 3 }
  0xa3   :  { %8894 = vst [vmem:[#allocation30_spill] sm:$0xff] %v5254_v55  ;;  %v673_v40 = vrot.slane %v647_v53, 3  ;;  %v697_v43 = vstv %s5228_s15  ;;  %v675_v18 = vrot.slane %v648_v10, 3  ;;  %v676_v23 = vrot.slane %v649_v13, 3  ;;  %s5762_s15 = sld [smem:[#allocation2 + $0x16]] }
  0xa4   :  { %8895 = vst [vmem:[#allocation31_spill] sm:$0xff] %v5257_v49  ;;  %8896 = vst [vmem:[#allocation32_spill] sm:$0xff] %v5260_v56  ;;  %v678_v34 = vrot.slane %v650_v11, 3  ;;  %v679_v48 = vrot.slane %v651_v21, 3  ;;  %v668_v61 = vsel %vm609_vm0, %v666_v15, %v667_v57  ;;  %v671_v36 = vsel %vm609_vm0, %v669_v22, %v670_v39 }
  0xa5   :  { %8897 = vst [vmem:[#allocation33_spill] sm:$0xff] %v5263_v44  ;;  %v681_v25 = vrot.slane %v652_v37, 3  ;;  %v682_v52 = vrot.slane %v653_v47, 3  ;;  %v698_v1 = vmul.f32 %v697_v43, %v4721_v2  ;;  %v699_v16 = vmul.f32 %v697_v43, %v5145_v26 }
  0xa6   :  { %v700_v19 = vmul.f32 %v697_v43, %v4726_v3  ;;  %v701_v38 = vmul.f32 %v697_v43, %v5150_v28  ;;  %v5277_v46 = vadd.f32 %v627_v30, %v5062_v63  ;;  %v674_v12 = vsel %vm609_vm0, %v672_v54, %v673_v40  ;;  %v8902_v40 = vld [vmem:[#allocation16_spill] sm:$0xff] }
  0xa7   :  { %v702_v24 = vmul.f32 %v697_v43, %v4731_v4  ;;  %v703_v53 = vmul.f32 %v697_v43, %v5165_v50  ;;  %v677_v10 = vsel %vm609_vm0, %v675_v18, %v676_v23  ;;  %v680_v13 = vsel %vm609_vm0, %v678_v34, %v679_v48 }
  0xa8   :  { %8898 = vst [vmem:[#allocation34_spill] sm:$0xff] %v5277_v46  ;;  %v5285_v11 = vadd.f32 %v668_v61, %v5069_v31  ;;  %v5288_v21 = vadd.f32 %v671_v36, %v5072_v8  ;;  %v683_v63 = vsel %vm609_vm0, %v681_v25, %v682_v52  ;;  %v704_v37 = vmul.f32 %v697_v43, %v4738_v5  ;;  %v8904_v36 = vld [vmem:[#allocation17_spill] sm:$0xff]  ;;  %v8906_v52 = vld [vmem:[#allocation18_spill] sm:$0xff] }
  0xa9   :  { %v705_v54 = vmul.f32 %v697_v43, %v5170_v14  ;;  %v706_v47 = vmul.f32 %v697_v43, %v4743_v6  ;;  %v722_v15 = vrot.slane %v698_v1, 3  ;;  %v723_v57 = vrot.slane %v699_v16, 3 }
  0xaa   :  { %8899 = vst [vmem:[#allocation35_spill] sm:$0xff] %v5285_v11  ;;  %8900 = vst [vmem:[#allocation36_spill] sm:$0xff] %v5288_v21  ;;  %v725_v22 = vrot.slane %v700_v19, 3  ;;  %v726_v48 = vrot.slane %v701_v38, 3  ;;  %v5295_v31 = vadd.f32 %v674_v12, %v5075_v9  ;;  %v707_v8 = vmul.f32 %v697_v43, %v5189_v17 }
  0xab   :  { %v728_v39 = vrot.slane %v702_v24, 3  ;;  %v729_v30 = vrot.slane %v703_v53, 3  ;;  %v5299_v18 = vadd.f32 %v677_v10, %v8902_v40  ;;  %v708_v23 = vmul.f32 %v697_v43, %v4748_v7 }
  0xac   :  { %8901 = vst [vmem:[#allocation37_spill] sm:$0xff] %v5295_v31  ;;  %v709_v34 = vmul.f32 %v697_v43, %v5204_v32  ;;  %v753_v61 = vstv %s5266_s16  ;;  %v5305_v25 = vadd.f32 %v680_v13, %v8904_v36  ;;  %v5308_v1 = vadd.f32 %v683_v63, %v8906_v52  ;;  %s5792_s16 = sld [smem:[#allocation2 + $0x26]] }
  0xad   :  { %8903 = vst [vmem:[#allocation16_spill] sm:$0xff] %v5299_v18  ;;  %v731_v9 = vrot.slane %v704_v37, 3  ;;  %v5311_v16 = vstv %s5270_s17  ;;  %v724_v19 = vsel %vm609_vm0, %v722_v15, %v723_v57  ;;  %v727_v38 = vsel %vm609_vm0, %v725_v22, %v726_v48  ;;  %s5819_s17 = sld [smem:[#allocation2 + $0x36]] }
  0xae   :  { %8905 = vst [vmem:[#allocation17_spill] sm:$0xff] %v5305_v25  ;;  %8907 = vst [vmem:[#allocation18_spill] sm:$0xff] %v5308_v1  ;;  %v732_v12 = vrot.slane %v705_v54, 3  ;;  %v734_v24 = vrot.slane %v706_v47, 3  ;;  %v730_v53 = vsel %vm609_vm0, %v728_v39, %v729_v30  ;;  %v735_v10 = vrot.slane %v707_v8, 3 }
  0xaf   :  { %v754_v43 = vmul.f32 %v753_v61, %v4721_v2  ;;  %v755_v13 = vmul.f32 %v753_v61, %v5145_v26  ;;  %v737_v40 = vrot.slane %v708_v23, 3  ;;  %v738_v36 = vrot.slane %v709_v34, 3 }
  0xb0   :  { %v756_v63 = vmul.f32 %v753_v61, %v4726_v3  ;;  %v757_v37 = vmul.f32 %v753_v61, %v5150_v28  ;;  %v758_v52 = vmul.f32 %v753_v61, %v4731_v4  ;;  %v759_v15 = vmul.f32 %v753_v61, %v5165_v50 }
  0xb1   :  { %v760_v54 = vmul.f32 %v753_v61, %v4738_v5  ;;  %v761_v47 = vmul.f32 %v753_v61, %v5170_v14  ;;  %v762_v57 = vmul.f32 %v753_v61, %v4743_v6  ;;  %v763_v22 = vmul.f32 %v753_v61, %v5189_v17 }
  0xb2   :  { %v764_v48 = vmul.f32 %v753_v61, %v4748_v7  ;;  %v765_v8 = vmul.f32 %v753_v61, %v5204_v32  ;;  %v733_v39 = vsel %vm609_vm0, %v731_v9, %v732_v12  ;;  %v736_v30 = vsel %vm609_vm0, %v734_v24, %v735_v10 }
  0xb3   :  { %v778_v23 = vrot.slane %v754_v43, 3  ;;  %v779_v34 = vrot.slane %v755_v13, 3  ;;  %v739_v1 = vsel %vm609_vm0, %v737_v40, %v738_v36  ;;  %v5332_v25 = vadd.f32 %v724_v19, %v5103_v0 }
  0xb4   :  { %v781_v18 = vrot.slane %v756_v63, 3  ;;  %v782_v31 = vrot.slane %v757_v37, 3  ;;  %v784_v21 = vrot.slane %v758_v52, 3  ;;  %v785_v11 = vrot.slane %v759_v15, 3  ;;  %v8909_v37 = vld [vmem:[#allocation22_spill] sm:$0xff] }
  0xb5   :  { %v787_v46 = vrot.slane %v760_v54, 3  ;;  %v788_v44 = vrot.slane %v761_v47, 3  ;;  %v790_v56 = vrot.slane %v762_v57, 3  ;;  %v791_v49 = vrot.slane %v763_v22, 3  ;;  %v8910_v47 = vld [vmem:[#allocation23_spill] sm:$0xff]  ;;  %v8911_v22 = vld [vmem:[#allocation24_spill] sm:$0xff] }
  0xb6   :  { %v793_v61 = vrot.slane %v764_v48, 3  ;;  %v794_v55 = vrot.slane %v765_v8, 3  ;;  %v5337_v9 = vadd.f32 %v727_v38, %v5106_v29  ;;  %v5340_v12 = vadd.f32 %v730_v53, %v5109_v27 }
  0xb7   :  { %v5343_v0 = vadd.f32 %v733_v39, %v5115_v33  ;;  %v780_v19 = vsel %vm609_vm0, %v778_v23, %v779_v34  ;;  %v810_v24 = vmul.f32 %v5311_v16, %v4721_v2  ;;  %v811_v10 = vmul.f32 %v5311_v16, %v5145_v26 }
  0xb8   :  { %v812_v43 = vmul.f32 %v5311_v16, %v4726_v3  ;;  %v813_v29 = vmul.f32 %v5311_v16, %v5150_v28  ;;  %v5355_v27 = vadd.f32 %v736_v30, %v5118_v20  ;;  %v5358_v33 = vadd.f32 %v739_v1, %v5121_v62 }
  0xb9   :  { %v783_v38 = vsel %vm609_vm0, %v781_v18, %v782_v31  ;;  %v786_v53 = vsel %vm609_vm0, %v784_v21, %v785_v11  ;;  %v789_v13 = vsel %vm609_vm0, %v787_v46, %v788_v44  ;;  %v792_v40 = vsel %vm609_vm0, %v790_v56, %v791_v49  ;;  %v8908_v11 = vld [vmem:[#allocation21_spill] sm:$0xff] }
  0xba   :  { %v795_v36 = vsel %vm609_vm0, %v793_v61, %v794_v55  ;;  %v5366_v63 = vadd.f32 %v780_v19, %v5124_v42  ;;  %v814_v20 = vmul.f32 %v5311_v16, %v4731_v4  ;;  %v815_v62 = vmul.f32 %v5311_v16, %v5165_v50 }
  0xbb   :  { %v816_v31 = vmul.f32 %v5311_v16, %v4738_v5  ;;  %v817_v44 = vmul.f32 %v5311_v16, %v5170_v14  ;;  %v834_v46 = vrot.slane %v810_v24, 3  ;;  %v835_v49 = vrot.slane %v811_v10, 3 }
  0xbc   :  { %v837_v56 = vrot.slane %v812_v43, 3  ;;  %v838_v55 = vrot.slane %v813_v29, 3  ;;  %v5377_v42 = vadd.f32 %v783_v38, %v5127_v51  ;;  %v5380_v21 = vadd.f32 %v786_v53, %v8908_v11 }
  0xbd   :  { %v818_v18 = vmul.f32 %v5311_v16, %v4743_v6  ;;  %v819_v1 = vmul.f32 %v5311_v16, %v5189_v17  ;;  %v5387_v52 = vadd.f32 %v789_v13, %v8909_v37  ;;  %v820_v15 = vmul.f32 %v5311_v16, %v4748_v7  ;;  %v8913_v37 = vld [vmem:[#allocation26_spill] sm:$0xff] }
  0xbe   :  { %v821_v54 = vmul.f32 %v5311_v16, %v5204_v32  ;;  %v865_v51 = vstv %s5334_s1  ;;  %v5395_v57 = vadd.f32 %v792_v40, %v8910_v47  ;;  %v5398_v48 = vadd.f32 %v795_v36, %v8911_v22  ;;  %v8914_v47 = vld [vmem:[#allocation27_spill] sm:$0xff]  ;;  %s5830_s1 = sld [smem:[#allocation2 + $0x46]] }
  0xbf   :  { %v840_v8 = vrot.slane %v814_v20, 3  ;;  %v841_v39 = vrot.slane %v815_v62, 3  ;;  %v836_v30 = vsel %vm609_vm0, %v834_v46, %v835_v49  ;;  %v839_v23 = vsel %vm609_vm0, %v837_v56, %v838_v55 }
  0xc0   :  { %v843_v34 = vrot.slane %v816_v31, 3  ;;  %v844_v61 = vrot.slane %v817_v44, 3  ;;  %v846_v19 = vrot.slane %v818_v18, 3  ;;  %v847_v24 = vrot.slane %v819_v1, 3  ;;  %v8912_v18 = vld [vmem:[#allocation25_spill] sm:$0xff] }
  0xc1   :  { %v866_v10 = vmul.f32 %v865_v51, %v4721_v2  ;;  %v867_v16 = vmul.f32 %v865_v51, %v5145_v26  ;;  %v849_v43 = vrot.slane %v820_v15, 3  ;;  %v850_v29 = vrot.slane %v821_v54, 3 }
  0xc2   :  { %v868_v38 = vmul.f32 %v865_v51, %v4726_v3  ;;  %v869_v53 = vmul.f32 %v865_v51, %v5150_v28  ;;  %v870_v13 = vmul.f32 %v865_v51, %v4731_v4  ;;  %v871_v40 = vmul.f32 %v865_v51, %v5165_v50 }
  0xc3   :  { %v872_v36 = vmul.f32 %v865_v51, %v4738_v5  ;;  %v873_v20 = vmul.f32 %v865_v51, %v5170_v14  ;;  %v874_v2 = vmul.f32 %v865_v51, %v4743_v6  ;;  %v875_v26 = vmul.f32 %v865_v51, %v5189_v17 }
  0xc4   :  { %v876_v62 = vmul.f32 %v865_v51, %v4748_v7  ;;  %v877_v3 = vmul.f32 %v865_v51, %v5204_v32  ;;  %v842_v28 = vsel %vm609_vm0, %v840_v8, %v841_v39  ;;  %v845_v4 = vsel %vm609_vm0, %v843_v34, %v844_v61  ;;  %v8915_v8 = vld [vmem:[#allocation28_spill] sm:$0xff]  ;;  %v8916_v34 = vld [vmem:[#allocation29_spill] sm:$0xff] }
  0xc5   :  { %v890_v31 = vrot.slane %v866_v10, 3  ;;  %v891_v50 = vrot.slane %v867_v16, 3  ;;  %v848_v5 = vsel %vm609_vm0, %v846_v19, %v847_v24  ;;  %v851_v14 = vsel %vm609_vm0, %v849_v43, %v850_v29 }
  0xc6   :  { %v893_v44 = vrot.slane %v868_v38, 3  ;;  %v894_v46 = vrot.slane %v869_v53, 3  ;;  %v896_v6 = vrot.slane %v870_v13, 3  ;;  %v897_v49 = vrot.slane %v871_v40, 3  ;;  %v5463_v53 = vld [vmem:[%s8858_s0 + $0x10] sm:$0xff]  ;;  %v5472_v40 = vld [vmem:[%s8858_s0 + $0x20] sm:$0xff] }
  0xc7   :  { %v899_v17 = vrot.slane %v872_v36, 3  ;;  %v900_v56 = vrot.slane %v873_v20, 3  ;;  %v902_v7 = vrot.slane %v874_v2, 3  ;;  %v903_v55 = vrot.slane %v875_v26, 3 }
  0xc8   :  { %v905_v32 = vrot.slane %v876_v62, 3  ;;  %v906_v11 = vrot.slane %v877_v3, 3  ;;  %v5425_v1 = vadd.f32 %v836_v30, %v8912_v18  ;;  %v5428_v15 = vadd.f32 %v839_v23, %v8913_v37  ;;  %v5445_v30 = vld [vmem:[%s8858_s0 + $0x60] sm:$0xff]  ;;  %v5495_v62 = vld [vmem:[%s8858_s0 + $0x50] sm:$0xff]  ;;  %v8922_v18 = vld [vmem:[#allocation33_spill] sm:$0xff] }
  0xc9   :  { %v892_v54 = vsel %vm609_vm0, %v890_v31, %v891_v50  ;;  %v921_v51 = vstv %s5404_s3  ;;  %v5433_v22 = vadd.f32 %v842_v28, %v8914_v47  ;;  %v5436_v39 = vadd.f32 %v845_v4, %v8915_v8  ;;  %v8924_v8 = vld [vmem:[#allocation35_spill] sm:$0xff]  ;;  %s5886_s3 = sld [smem:[#allocation2 + $0x56]] }
  0xca   :  { %v5439_v61 = vadd.f32 %v848_v5, %v8916_v34  ;;  %v895_v19 = vsel %vm609_vm0, %v893_v44, %v894_v46  ;;  %v5448_v23 = vadd.f32 %v851_v14, %v5207_v58  ;;  %v898_v24 = vsel %vm609_vm0, %v896_v6, %v897_v49  ;;  %v8917_v5 = vld [vmem:[#allocation19_spill] sm:$0xff]  ;;  %v8918_v44 = vld [vmem:[#allocation20_spill] sm:$0xff] }
  0xcb   :  { %v901_v10 = vsel %vm609_vm0, %v899_v17, %v900_v56  ;;  %v935_v16 = vstv %s5412_s18  ;;  %v904_v43 = vsel %vm609_vm0, %v902_v7, %v903_v55  ;;  %v907_v29 = vsel %vm609_vm0, %v905_v32, %v906_v11  ;;  %v8919_v56 = vld [vmem:[#allocation30_spill] sm:$0xff]  ;;  %v8920_v7 = vld [vmem:[#allocation31_spill] sm:$0xff]  ;;  %v8921_v55 = vld [vmem:[#allocation32_spill] sm:$0xff]  ;;  %s5894_s18 = sld [smem:[#allocation2 + $0x7]] }
  0xcc   :  { %v5458_v38 = vadd.f32 %v892_v54, %v5210_v60  ;;  %v922_v58 = vmul.f32 %v5463_v53, %v921_v51  ;;  %v5467_v13 = vadd.f32 %v895_v19, %v5213_v35  ;;  %v923_v36 = vmul.f32 %v5472_v40, %v921_v51  ;;  %v5478_v60 = vld [vmem:[%s8858_s0 + $0x30] sm:$0xff]  ;;  %v5484_v35 = vld [vmem:[%s8858_s0 + $0x40] sm:$0xff] }
  0xcd   :  { %v924_v20 = vmul.f32 %v5478_v60, %v921_v51  ;;  %v925_v2 = vmul.f32 %v5484_v35, %v921_v51  ;;  %v5490_v26 = vadd.f32 %v898_v24, %v5219_v59  ;;  %v926_v3 = vmul.f32 %v5495_v62, %v921_v51  ;;  %v8923_v54 = vld [vmem:[#allocation34_spill] sm:$0xff]  ;;  %v8925_v19 = vld [vmem:[#allocation36_spill] sm:$0xff] }
  0xce   :  { %v927_v28 = vmul.f32 %v921_v51, %v5445_v30  ;;  %v936_v4 = vmul.f32 %v5463_v53, %v935_v16  ;;  %v5501_v31 = vadd.f32 %v901_v10, %v5222_v45  ;;  %v5504_v50 = vadd.f32 %v904_v43, %v5225_v41 }
  0xcf   :  { %v5507_v59 = vadd.f32 %v907_v29, %v8917_v5  ;;  %v937_v14 = vmul.f32 %v5472_v40, %v935_v16  ;;  %v5511_v46 = vadd.f32 %v922_v58, %v8918_v44  ;;  %v938_v6 = vmul.f32 %v5478_v60, %v935_v16  ;;  %v8926_v58 = vld [vmem:[#allocation37_spill] sm:$0xff] }
  0xd0   :  { %v939_v49 = vmul.f32 %v5484_v35, %v935_v16  ;;  %v949_v17 = vstv %s5422_s19  ;;  %v5517_v45 = vadd.f32 %v923_v36, %v8919_v56  ;;  %v5520_v41 = vadd.f32 %v924_v20, %v8920_v7  ;;  %v8927_v20 = vld [vmem:[#allocation16_spill] sm:$0xff]  ;;  %v8929_v56 = vld [vmem:[#allocation18_spill] sm:$0xff]  ;;  %s5958_s19 = sld [smem:[#allocation2 + $0x17]] }
  0xd1   :  { %v5523_v32 = vadd.f32 %v925_v2, %v8921_v55  ;;  %v940_v11 = vmul.f32 %v5495_v62, %v935_v16  ;;  %v5527_v37 = vadd.f32 %v926_v3, %v8922_v18  ;;  %v5530_v51 = vadd.f32 %v927_v28, %v8923_v54  ;;  %v8928_v28 = vld [vmem:[#allocation17_spill] sm:$0xff] }
  0xd2   :  { %v941_v47 = vmul.f32 %v935_v16, %v5445_v30  ;;  %v5534_v34 = vadd.f32 %v936_v4, %v8924_v8  ;;  %v5539_v24 = vadd.f32 %v937_v14, %v8925_v19  ;;  %v950_v10 = vmul.f32 %v5463_v53, %v949_v17 }
  0xd3   :  { %v951_v43 = vmul.f32 %v5472_v40, %v949_v17  ;;  %v963_v29 = vstv %s5453_s22  ;;  %v5547_v36 = vadd.f32 %v938_v6, %v8926_v58  ;;  %v5550_v16 = vadd.f32 %v939_v49, %v8927_v20  ;;  %s6816_s22 = sld [smem:[#allocation2 + $0x2b]] }
  0xd4   :  { %v952_v2 = vmul.f32 %v5478_v60, %v949_v17  ;;  %v953_v3 = vmul.f32 %v5484_v35, %v949_v17  ;;  %v5555_v4 = vadd.f32 %v940_v11, %v8928_v28  ;;  %v954_v5 = vmul.f32 %v5495_v62, %v949_v17 }
  0xd5   :  { %v955_v14 = vmul.f32 %v949_v17, %v5445_v30  ;;  %v977_v44 = vstv %s5487_s29  ;;  %v5561_v7 = vadd.f32 %v941_v47, %v8929_v56  ;;  %v964_v6 = vmul.f32 %v5463_v53, %v963_v29  ;;  %s6530_s29 = sld [smem:[#allocation2 + $0xa]] }
  0xd6   :  { %v965_v49 = vmul.f32 %v5472_v40, %v963_v29  ;;  %v966_v55 = vmul.f32 %v5478_v60, %v963_v29  ;;  %v5567_v18 = vadd.f32 %v950_v10, %v5332_v25  ;;  %v5570_v11 = vadd.f32 %v951_v43, %v5337_v9 }
  0xd7   :  { %v967_v54 = vmul.f32 %v5484_v35, %v963_v29  ;;  %v968_v17 = vmul.f32 %v5495_v62, %v963_v29  ;;  %v5575_v47 = vadd.f32 %v952_v2, %v5340_v12  ;;  %v5578_v8 = vadd.f32 %v953_v3, %v5343_v0 }
  0xd8   :  { %v969_v19 = vmul.f32 %v963_v29, %v5445_v30  ;;  %v978_v25 = vmul.f32 %v5463_v53, %v977_v44  ;;  %v5585_v9 = vadd.f32 %v954_v5, %v5355_v27  ;;  %v5588_v10 = vadd.f32 %v955_v14, %v5358_v33 }
  0xd9   :  { %v979_v43 = vmul.f32 %v5472_v40, %v977_v44  ;;  %v980_v12 = vmul.f32 %v5478_v60, %v977_v44  ;;  %v5593_v58 = vadd.f32 %v964_v6, %v5366_v63  ;;  %v5596_v0 = vadd.f32 %v965_v49, %v5377_v42 }
  0xda   :  { %v5599_v29 = vadd.f32 %v966_v55, %v5380_v21  ;;  %v991_v20 = vstv %s5536_s9  ;;  %v5603_v27 = vadd.f32 %v967_v54, %v5387_v52  ;;  %v5606_v33 = vadd.f32 %v968_v17, %v5395_v57  ;;  %s6064_s9 = sld [smem:[#allocation2 + $0x47]] }
  0xdb   :  { %v981_v2 = vmul.f32 %v5484_v35, %v977_v44  ;;  %v1005_v3 = vstv %s5544_s2  ;;  %v5611_v28 = vadd.f32 %v969_v19, %v5398_v48  ;;  %v982_v63 = vmul.f32 %v5495_v62, %v977_v44  ;;  %s6128_s2 = sld [smem:[#allocation2 + $0x57]] }
  0xdc   :  { %v983_v42 = vmul.f32 %v977_v44, %v5445_v30  ;;  %v5616_v21 = vadd.f32 %v978_v25, %v5425_v1  ;;  %v5621_v52 = vadd.f32 %v979_v43, %v5428_v15  ;;  %v5624_v57 = vadd.f32 %v980_v12, %v5433_v22 }
  0xdd   :  { %v992_v5 = vmul.f32 %v5463_v53, %v991_v20  ;;  %v993_v48 = vmul.f32 %v5472_v40, %v991_v20  ;;  %v994_v14 = vmul.f32 %v5478_v60, %v991_v20  ;;  %v1006_v44 = vmul.f32 %v5463_v53, %v1005_v3 }
  0xde   :  { %v1007_v1 = vmul.f32 %v5472_v40, %v1005_v3  ;;  %v1008_v56 = vmul.f32 %v5478_v60, %v1005_v3  ;;  %v5633_v6 = vadd.f32 %v981_v2, %v5436_v39  ;;  %v995_v15 = vmul.f32 %v5484_v35, %v991_v20 }
  0xdf   :  { %v996_v22 = vmul.f32 %v5495_v62, %v991_v20  ;;  %v1009_v49 = vmul.f32 %v5484_v35, %v1005_v3  ;;  %v5639_v55 = vadd.f32 %v982_v63, %v5439_v61  ;;  %v5642_v54 = vadd.f32 %v983_v42, %v5448_v23 }
  0xe0   :  { %v1010_v17 = vmul.f32 %v5495_v62, %v1005_v3  ;;  %v1037_v19 = vstv %s5582_s4  ;;  %v997_v25 = vmul.f32 %v991_v20, %v5445_v30  ;;  %v5648_v39 = vadd.f32 %v992_v5, %v5458_v38  ;;  %s6198_s4 = sld [smem:[#allocation2 + $0x8]] }
  0xe1   :  { %v5651_v43 = vadd.f32 %v993_v48, %v5467_v13  ;;  %v1011_v12 = vmul.f32 %v1005_v3, %v5445_v30  ;;  %v5657_v61 = vadd.f32 %v994_v14, %v5490_v26  ;;  %v1018_v23 = vrot.slane %v1006_v44, 1 }
  0xe2   :  { %v1019_v2 = vrot.slane %v1007_v1, 1  ;;  %v1020_v63 = vrot.slane %v1008_v56, 1  ;;  %v5660_v42 = vadd.f32 %v995_v15, %v5501_v31  ;;  %v5663_v20 = vadd.f32 %v996_v22, %v5504_v50 }
  0xe3   :  { %8930 = vst [vmem:[#allocation21_spill] sm:$0xff] %v5651_v43  ;;  %v1021_v38 = vrot.slane %v1009_v49, 1  ;;  %v1038_v13 = vmul.f32 %v5463_v53, %v1037_v19  ;;  %v1022_v5 = vrot.slane %v1010_v17, 1  ;;  %v1039_v3 = vmul.f32 %v5472_v40, %v1037_v19 }
  0xe4   :  { %v1040_v48 = vmul.f32 %v5478_v60, %v1037_v19  ;;  %v1069_v43 = vstv %s5618_s10  ;;  %v5670_v26 = vadd.f32 %v997_v25, %v5507_v59  ;;  %v1023_v14 = vrot.slane %v1011_v12, 1  ;;  %s6206_s10 = sld [smem:[#allocation2 + $0x18]] }
  0xe5   :  { %v1041_v44 = vmul.f32 %v5484_v35, %v1037_v19  ;;  %v1042_v31 = vmul.f32 %v5495_v62, %v1037_v19  ;;  %v5675_v50 = vadd.f32 %v1018_v23, %v5511_v46  ;;  %v5678_v1 = vadd.f32 %v1019_v2, %v5517_v45 }
  0xe6   :  { %v5681_v56 = vadd.f32 %v1020_v63, %v5520_v41  ;;  %v1043_v15 = vmul.f32 %v1037_v19, %v5445_v30  ;;  %v1050_v59 = vrot.slane %v1038_v13, 1  ;;  %v1070_v22 = vmul.f32 %v5463_v53, %v1069_v43 }
  0xe7   :  { %8931 = vst [vmem:[#allocation22_spill] sm:$0xff] %v5678_v1  ;;  %v1071_v49 = vmul.f32 %v5472_v40, %v1069_v43  ;;  %v1072_v17 = vmul.f32 %v5478_v60, %v1069_v43  ;;  %v5690_v46 = vadd.f32 %v1021_v38, %v5523_v32  ;;  %v5693_v45 = vadd.f32 %v1022_v5, %v5527_v37 }
  0xe8   :  { %8932 = vst [vmem:[#allocation23_spill] sm:$0xff] %v5681_v56  ;;  %v1051_v25 = vrot.slane %v1039_v3, 1  ;;  %v1052_v41 = vrot.slane %v1040_v48, 1  ;;  %v1053_v12 = vrot.slane %v1041_v44, 1  ;;  %v1054_v23 = vrot.slane %v1042_v31, 1 }
  0xe9   :  { %v1073_v19 = vmul.f32 %v5484_v35, %v1069_v43  ;;  %v1101_v2 = vstv %s5654_s11  ;;  %v5698_v63 = vadd.f32 %v1023_v14, %v5530_v51  ;;  %v1055_v13 = vrot.slane %v1043_v15, 1  ;;  %s6752_s11 = sld [smem:[#allocation2 + $0x1b]] }
  0xea   :  { %v1074_v56 = vmul.f32 %v5495_v62, %v1069_v43  ;;  %v1075_v1 = vmul.f32 %v1069_v43, %v5445_v30  ;;  %v5703_v32 = vadd.f32 %v1050_v59, %v5534_v34  ;;  %v1082_v37 = vrot.slane %v1070_v22, 1 }
  0xeb   :  { %v1083_v38 = vrot.slane %v1071_v49, 1  ;;  %v1084_v5 = vrot.slane %v1072_v17, 1  ;;  %v5708_v3 = vadd.f32 %v1051_v25, %v5539_v24  ;;  %v5711_v51 = vadd.f32 %v1052_v41, %v5547_v36 }
  0xec   :  { %v1102_v48 = vmul.f32 %v5463_v53, %v1101_v2  ;;  %v1103_v14 = vmul.f32 %v5472_v40, %v1101_v2  ;;  %v5716_v43 = vadd.f32 %v1053_v12, %v5550_v16  ;;  %v5719_v34 = vadd.f32 %v1054_v23, %v5555_v4 }
  0xed   :  { %v1085_v44 = vrot.slane %v1073_v19, 1  ;;  %v1104_v31 = vmul.f32 %v5478_v60, %v1101_v2  ;;  %v1086_v15 = vrot.slane %v1074_v56, 1  ;;  %v1087_v59 = vrot.slane %v1075_v1, 1 }
  0xee   :  { %v1105_v24 = vmul.f32 %v5484_v35, %v1101_v2  ;;  %v1133_v22 = vstv %s5684_s12  ;;  %v5725_v36 = vadd.f32 %v1055_v13, %v5561_v7  ;;  %v5728_v49 = vadd.f32 %v1082_v37, %v5567_v18  ;;  %s8028_s12 = sld [smem:[#allocation6 + $0x8]] }
  0xef   :  { %v5731_v16 = vadd.f32 %v1083_v38, %v5570_v11  ;;  %v5734_v4 = vadd.f32 %v1084_v5, %v5575_v47  ;;  %v1106_v1 = vmul.f32 %v5495_v62, %v1101_v2  ;;  %v1107_v56 = vmul.f32 %v1101_v2, %v5445_v30 }
  0xf0   :  { %v1114_v17 = vrot.slane %v1102_v48, 1  ;;  %v1115_v25 = vrot.slane %v1103_v14, 1  ;;  %v1116_v7 = vrot.slane %v1104_v31, 1  ;;  %v1134_v41 = vmul.f32 %v5463_v53, %v1133_v22 }
  0xf1   :  { %v1135_v18 = vmul.f32 %v5472_v40, %v1133_v22  ;;  %v1136_v11 = vmul.f32 %v5478_v60, %v1133_v22  ;;  %v5744_v12 = vadd.f32 %v1085_v44, %v5578_v8  ;;  %v5747_v47 = vadd.f32 %v1086_v15, %v5585_v9 }
  0xf2   :  { %v5750_v23 = vadd.f32 %v1087_v59, %v5588_v10  ;;  %v1117_v19 = vrot.slane %v1105_v24, 1  ;;  %v1137_v2 = vmul.f32 %v5484_v35, %v1133_v22  ;;  %v1138_v13 = vmul.f32 %v5495_v62, %v1133_v22 }
  0xf3   :  { %v1139_v37 = vmul.f32 %v1133_v22, %v5445_v30  ;;  %v1165_v38 = vstv %s5705_s13  ;;  %v1118_v5 = vrot.slane %v1106_v1, 1  ;;  %v1119_v48 = vrot.slane %v1107_v56, 1  ;;  %s6221_s13 = sld [smem:[#allocation2 + $0x28]] }
  0xf4   :  { %v5757_v8 = vadd.f32 %v1114_v17, %v5593_v58  ;;  %v5760_v9 = vadd.f32 %v1115_v25, %v5596_v0  ;;  %v5765_v10 = vadd.f32 %v1116_v7, %v5599_v29  ;;  %v1146_v14 = vrot.slane %v1134_v41, 1 }
  0xf5   :  { %v1147_v44 = vrot.slane %v1135_v18, 1  ;;  %v1148_v31 = vrot.slane %v1136_v11, 1  ;;  %v5768_v15 = vadd.f32 %v1117_v19, %v5603_v27  ;;  %v1166_v59 = vmul.f32 %v5463_v53, %v1165_v38 }
  0xf6   :  { %v1167_v24 = vmul.f32 %v5472_v40, %v1165_v38  ;;  %v1168_v58 = vmul.f32 %v5478_v60, %v1165_v38  ;;  %v1149_v22 = vrot.slane %v1137_v2, 1  ;;  %v1150_v0 = vrot.slane %v1138_v13, 1 }
  0xf7   :  { %v1151_v1 = vrot.slane %v1139_v37, 1  ;;  %v1197_v56 = vstv %s5736_s14  ;;  %v5775_v17 = vadd.f32 %v1118_v5, %v5606_v33  ;;  %v5778_v29 = vadd.f32 %v1119_v48, %v5611_v28  ;;  %s7610_s14 = sld [smem:[#allocation2 + $0x2f]] }
  0xf8   :  { %v1169_v25 = vmul.f32 %v5484_v35, %v1165_v38  ;;  %v1170_v27 = vmul.f32 %v5495_v62, %v1165_v38  ;;  %v5783_v7 = vadd.f32 %v1146_v14, %v5616_v21  ;;  %v5786_v41 = vadd.f32 %v1147_v44, %v5621_v52 }
  0xf9   :  { %v5789_v18 = vadd.f32 %v1148_v31, %v5624_v57  ;;  %v1171_v33 = vmul.f32 %v1165_v38, %v5445_v30  ;;  %v1178_v28 = vrot.slane %v1166_v59, 1  ;;  %v1179_v11 = vrot.slane %v1167_v24, 1  ;;  %v8933_v59 = vld [vmem:[#allocation21_spill] sm:$0xff] }
  0xfa   :  { %v1180_v19 = vrot.slane %v1168_v58, 1  ;;  %v1198_v2 = vmul.f32 %v5463_v53, %v1197_v56  ;;  %v5796_v13 = vadd.f32 %v1149_v22, %v5633_v6  ;;  %v5799_v21 = vadd.f32 %v1150_v0, %v5639_v55 }
  0xfb   :  { %v5802_v52 = vadd.f32 %v1151_v1, %v5642_v54  ;;  %v1199_v57 = vmul.f32 %v5472_v40, %v1197_v56  ;;  %v1181_v37 = vrot.slane %v1169_v25, 1  ;;  %v1182_v38 = vrot.slane %v1170_v27, 1 }
  0xfc   :  { %v1200_v5 = vmul.f32 %v5478_v60, %v1197_v56  ;;  %v1229_v48 = vstv %s5762_s15  ;;  %v1183_v14 = vrot.slane %v1171_v33, 1  ;;  %v1201_v44 = vmul.f32 %v5484_v35, %v1197_v56  ;;  %s7080_s15 = sld [smem:[#allocation2 + $0x4c]] }
  0xfd   :  { %v1202_v31 = vmul.f32 %v5495_v62, %v1197_v56  ;;  %v1203_v6 = vmul.f32 %v1197_v56, %v5445_v30  ;;  %v5811_v55 = vadd.f32 %v1178_v28, %v5648_v39  ;;  %v5814_v54 = vadd.f32 %v1179_v11, %v8933_v59 }
  0xfe   :  { %v5817_v24 = vadd.f32 %v1180_v19, %v5657_v61  ;;  %v1210_v58 = vrot.slane %v1198_v2, 2  ;;  %v1211_v22 = vrot.slane %v1199_v57, 2  ;;  %v1230_v0 = vmul.f32 %v5463_v53, %v1229_v48 }
  0xff   :  { %v1231_v1 = vmul.f32 %v5472_v40, %v1229_v48  ;;  %v1232_v56 = vmul.f32 %v5478_v60, %v1229_v48  ;;  %v5825_v39 = vadd.f32 %v1181_v37, %v5660_v42  ;;  %v1212_v25 = vrot.slane %v1200_v5, 2  ;;  %v8936_v5 = vld [vmem:[#allocation22_spill] sm:$0xff] }
 0x100   :  { %8934 = vst [vmem:[#allocation24_spill] sm:$0xff] %v5817_v24  ;;  %v1233_v27 = vmul.f32 %v5484_v35, %v1229_v48  ;;  %v1234_v33 = vmul.f32 %v5495_v62, %v1229_v48  ;;  %v1213_v61 = vrot.slane %v1201_v44, 2  ;;  %v1214_v28 = vrot.slane %v1202_v31, 2 }
 0x101   :  { %8935 = vst [vmem:[#allocation25_spill] sm:$0xff] %v5825_v39  ;;  %v1215_v11 = vrot.slane %v1203_v6, 2  ;;  %v1261_v19 = vstv %s5792_s16  ;;  %v5833_v2 = vadd.f32 %v1182_v38, %v5663_v20  ;;  %v5836_v57 = vadd.f32 %v1183_v14, %v5670_v26  ;;  %v8937_v39 = vld [vmem:[#allocation23_spill] sm:$0xff]  ;;  %s6252_s16 = sld [smem:[#allocation2 + $0x38]] }
 0x102   :  { %v5839_v42 = vadd.f32 %v1210_v58, %v5675_v50  ;;  %v1235_v37 = vmul.f32 %v1229_v48, %v5445_v30  ;;  %v5843_v59 = vadd.f32 %v1211_v22, %v8936_v5  ;;  %v1242_v44 = vrot.slane %v1230_v0, 2 }
 0x103   :  { %v1243_v31 = vrot.slane %v1231_v1, 2  ;;  %v1244_v6 = vrot.slane %v1232_v56, 2  ;;  %v5846_v24 = vadd.f32 %v1212_v25, %v8937_v39  ;;  %v1245_v20 = vrot.slane %v1233_v27, 2 }
 0x104   :  { %v1246_v38 = vrot.slane %v1234_v33, 2  ;;  %v1262_v26 = vmul.f32 %v5463_v53, %v1261_v19  ;;  %v5850_v14 = vadd.f32 %v1213_v61, %v5690_v46  ;;  %v5853_v50 = vadd.f32 %v1214_v28, %v5693_v45 }
 0x105   :  { %v5856_v48 = vadd.f32 %v1215_v11, %v5698_v63  ;;  %v1263_v58 = vmul.f32 %v5472_v40, %v1261_v19  ;;  %v1247_v22 = vrot.slane %v1235_v37, 2  ;;  %v1264_v0 = vmul.f32 %v5478_v60, %v1261_v19 }
 0x106   :  { %v1265_v1 = vmul.f32 %v5484_v35, %v1261_v19  ;;  %v1293_v56 = vstv %s5819_s17  ;;  %v5863_v39 = vadd.f32 %v1242_v44, %v5703_v32  ;;  %v5866_v46 = vadd.f32 %v1243_v31, %v5708_v3  ;;  %s7132_s17 = sld [smem:[#allocation2 + $0xd]] }
 0x107   :  { %v5869_v45 = vadd.f32 %v1244_v6, %v5711_v51  ;;  %v1266_v63 = vmul.f32 %v5495_v62, %v1261_v19  ;;  %v5873_v25 = vadd.f32 %v1245_v20, %v5716_v43  ;;  %v5876_v27 = vadd.f32 %v1246_v38, %v5719_v34 }
 0x108   :  { %v1267_v33 = vmul.f32 %v1261_v19, %v5445_v30  ;;  %v1274_v61 = vrot.slane %v1262_v26, 2  ;;  %v1275_v28 = vrot.slane %v1263_v58, 2  ;;  %v1294_v32 = vmul.f32 %v5463_v53, %v1293_v56 }
 0x109   :  { %8938 = vst [vmem:[#allocation26_spill] sm:$0xff] %v5873_v25  ;;  %8939 = vst [vmem:[#allocation27_spill] sm:$0xff] %v5876_v27  ;;  %v1295_v3 = vmul.f32 %v5472_v40, %v1293_v56  ;;  %v1325_v11 = vstv %s5830_s1  ;;  %v5883_v51 = vadd.f32 %v1247_v22, %v5725_v36  ;;  %v1276_v37 = vrot.slane %v1264_v0, 2  ;;  %s7170_s1 = sld [smem:[#allocation2 + $0x1d]] }
 0x10a   :  { %v1277_v5 = vrot.slane %v1265_v1, 2  ;;  %v1296_v43 = vmul.f32 %v5478_v60, %v1293_v56  ;;  %v1278_v34 = vrot.slane %v1266_v63, 2  ;;  %v1297_v44 = vmul.f32 %v5484_v35, %v1293_v56 }
 0x10b   :  { %8940 = vst [vmem:[#allocation28_spill] sm:$0xff] %v5883_v51  ;;  %v1298_v19 = vmul.f32 %v5495_v62, %v1293_v56  ;;  %v1299_v31 = vmul.f32 %v1293_v56, %v5445_v30  ;;  %v1279_v6 = vrot.slane %v1267_v33, 2  ;;  %v1326_v20 = vmul.f32 %v5463_v53, %v1325_v11 }
 0x10c   :  { %v1327_v38 = vmul.f32 %v5472_v40, %v1325_v11  ;;  %v1328_v36 = vmul.f32 %v5478_v60, %v1325_v11  ;;  %v5897_v26 = vadd.f32 %v1274_v61, %v5728_v49  ;;  %v5900_v58 = vadd.f32 %v1275_v28, %v5731_v16 }
 0x10d   :  { %v1306_v22 = vrot.slane %v1294_v32, 2  ;;  %v1307_v0 = vrot.slane %v1295_v3, 2  ;;  %v5903_v1 = vadd.f32 %v1276_v37, %v5734_v4  ;;  %v1308_v56 = vrot.slane %v1296_v43, 2 }
 0x10e   :  { %v1329_v63 = vmul.f32 %v5484_v35, %v1325_v11  ;;  %v1330_v33 = vmul.f32 %v5495_v62, %v1325_v11  ;;  %v1309_v51 = vrot.slane %v1297_v44, 2  ;;  %v1310_v27 = vrot.slane %v1298_v19, 2 }
 0x10f   :  { %v1311_v25 = vrot.slane %v1299_v31, 2  ;;  %v1331_v49 = vmul.f32 %v1325_v11, %v5445_v30  ;;  %v5909_v61 = vadd.f32 %v1277_v5, %v5744_v12  ;;  %v1338_v16 = vrot.slane %v1326_v20, 2 }
 0x110   :  { %v1339_v28 = vrot.slane %v1327_v38, 2  ;;  %v1340_v32 = vrot.slane %v1328_v36, 2  ;;  %v5912_v4 = vadd.f32 %v1278_v34, %v5747_v47  ;;  %v5915_v3 = vadd.f32 %v1279_v6, %v5750_v23  ;;  %v5964_v6 = vld [vmem:[%s8858_s0 + $0x18] sm:$0x1] }
 0x111   :  { %v5918_v37 = vadd.f32 %v1306_v22, %v5757_v8  ;;  %v5921_v43 = vadd.f32 %v1307_v0, %v5760_v9  ;;  %v5924_v11 = vadd.f32 %v1308_v56, %v5765_v10  ;;  %v1341_v12 = vrot.slane %v1329_v63, 2  ;;  %v5978_v22 = vld [vmem:[%s8858_s0 + $0x38] sm:$0x1]  ;;  %v5985_v63 = vld [vmem:[%s8858_s0 + $0x48] sm:$0x1] }
 0x112   :  { %v1342_v5 = vrot.slane %v1330_v33, 2  ;;  %v1357_v44 = vstv %s5886_s3  ;;  %v5928_v19 = vadd.f32 %v1309_v51, %v5768_v15  ;;  %v5931_v47 = vadd.f32 %v1310_v27, %v5775_v17  ;;  %s7206_s3 = sld [smem:[#allocation2 + $0x2d]] }
 0x113   :  { %8941 = vst [vmem:[#allocation29_spill] sm:$0xff] %v5924_v11  ;;  %v5934_v23 = vadd.f32 %v1311_v25, %v5778_v29  ;;  %v1343_v8 = vrot.slane %v1331_v49, 2  ;;  %v5937_v34 = vadd.f32 %v1338_v16, %v5783_v7  ;;  %v5940_v9 = vadd.f32 %v1339_v28, %v5786_v41 }
 0x114   :  { %8942 = vst [vmem:[#allocation19_spill] sm:$0xff] %v5928_v19  ;;  %8943 = vst [vmem:[#allocation20_spill] sm:$0xff] %v5931_v47  ;;  %v5943_v10 = vadd.f32 %v1340_v32, %v5789_v18  ;;  %v1389_v31 = vstv %s5894_s18  ;;  %v1358_v15 = vmul.f32 %v5463_v53, %v1357_v44  ;;  %v1359_v51 = vmul.f32 %v5472_v40, %v1357_v44  ;;  %s7242_s18 = sld [smem:[#allocation2 + $0x3d]] }
 0x115   :  { %8944 = vst [vmem:[#allocation30_spill] sm:$0xff] %v5934_v23  ;;  %8945 = vst [vmem:[#allocation31_spill] sm:$0xff] %v5937_v34  ;;  %v1360_v17 = vmul.f32 %v5478_v60, %v1357_v44  ;;  %v1361_v29 = vmul.f32 %v5484_v35, %v1357_v44  ;;  %v5951_v25 = vadd.f32 %v1341_v12, %v5796_v13 }
 0x116   :  { %8946 = vst [vmem:[#allocation32_spill] sm:$0xff] %v5940_v9  ;;  %8947 = vst [vmem:[#allocation33_spill] sm:$0xff] %v5943_v10  ;;  %v5954_v7 = vadd.f32 %v1342_v5, %v5799_v21  ;;  %v1362_v41 = vmul.f32 %v5495_v62, %v1357_v44  ;;  %v1363_v18 = vmul.f32 %v1357_v44, %v5445_v30  ;;  %v5971_v21 = vld [vmem:[%s8858_s0 + $0x28] sm:$0x1]  ;;  %v1370_v49 = vrot.slane %v1358_v15, 2 }
 0x117   :  { %8948 = vst [vmem:[#allocation34_spill] sm:$0xff] %v5951_v25  ;;  %v1390_v27 = vmul.f32 %v5463_v53, %v1389_v31  ;;  %v1391_v20 = vmul.f32 %v5964_v6, %v1389_v31  ;;  %v1392_v13 = vmul.f32 %v5472_v40, %v1389_v31  ;;  %v1393_v38 = vmul.f32 %v5971_v21, %v1389_v31  ;;  %v5998_v10 = vld [vmem:[%s8858_s0 + $0x68] sm:$0x1] }
 0x118   :  { %8949 = vst [vmem:[#allocation35_spill] sm:$0xff] %v5954_v7  ;;  %v1394_v36 = vmul.f32 %v5478_v60, %v1389_v31  ;;  %v1395_v0 = vmul.f32 %v5978_v22, %v1389_v31  ;;  %v1396_v56 = vmul.f32 %v5484_v35, %v1389_v31  ;;  %v1397_v33 = vmul.f32 %v5985_v63, %v1389_v31  ;;  %v5992_v7 = vld [vmem:[%s8858_s0 + $0x58] sm:$0x1] }
 0x119   :  { %v1371_v16 = vrot.slane %v1359_v51, 2  ;;  %v1372_v28 = vrot.slane %v1360_v17, 2  ;;  %v1373_v32 = vrot.slane %v1361_v29, 2  ;;  %v1374_v12 = vrot.slane %v1362_v41, 2 }
 0x11a   :  { %v1375_v5 = vrot.slane %v1363_v18, 2  ;;  %v1398_v44 = vmul.f32 %v5495_v62, %v1389_v31  ;;  %v1399_v25 = vmul.f32 %v5992_v7, %v1389_v31  ;;  %v1414_v15 = vrot.slane %v1390_v27, 3 }
 0x11b   :  { %v1415_v51 = vrot.slane %v1391_v20, 3  ;;  %v1417_v17 = vrot.slane %v1392_v13, 3  ;;  %v1418_v29 = vrot.slane %v1393_v38, 3  ;;  %v1420_v41 = vrot.slane %v1394_v36, 3  ;;  %v8950_v36 = vld [vmem:[#allocation24_spill] sm:$0xff] }
 0x11c   :  { %v1421_v18 = vrot.slane %v1395_v0, 3  ;;  %v1423_v9 = vrot.slane %v1396_v56, 3  ;;  %v1424_v34 = vrot.slane %v1397_v33, 3  ;;  %v6001_v23 = vadd.f32 %v1343_v8, %v5802_v52  ;;  %v8951_v56 = vld [vmem:[#allocation25_spill] sm:$0xff] }
 0x11d   :  { %v6004_v47 = vadd.f32 %v1370_v49, %v5811_v55  ;;  %v6007_v19 = vadd.f32 %v1371_v16, %v5814_v54  ;;  %v1400_v11 = vmul.f32 %v1389_v31, %v5445_v30  ;;  %v1401_v27 = vmul.f32 %v1389_v31, %v5998_v10 }
 0x11e   :  { %v1426_v20 = vrot.slane %v1398_v44, 3  ;;  %v1427_v13 = vrot.slane %v1399_v25, 3  ;;  %v1445_v38 = vstv %s5958_s19  ;;  %v6013_v0 = vadd.f32 %v1372_v28, %v8950_v36  ;;  %s7272_s19 = sld [smem:[#allocation2 + $0x4d]] }
 0x11f   :  { %v6016_v33 = vadd.f32 %v1373_v32, %v8951_v56  ;;  %v6019_v52 = vadd.f32 %v1374_v12, %v5833_v2  ;;  %v1416_v55 = vsel %vm609_vm0, %v1414_v15, %v1415_v51  ;;  %v6025_v54 = vadd.f32 %v1375_v5, %v5836_v57 }
 0x120   :  { %v1419_v8 = vsel %vm609_vm0, %v1417_v17, %v1418_v29  ;;  %v1422_v31 = vsel %vm609_vm0, %v1420_v41, %v1421_v18  ;;  %v1425_v25 = vsel %vm609_vm0, %v1423_v9, %v1424_v34  ;;  %v1446_v49 = vmul.f32 %v5463_v53, %v1445_v38 }
 0x121   :  { %8952 = vst [vmem:[#allocation36_spill] sm:$0xff] %v6025_v54  ;;  %v1447_v16 = vmul.f32 %v5964_v6, %v1445_v38  ;;  %v1448_v2 = vmul.f32 %v5472_v40, %v1445_v38  ;;  %v1449_v28 = vmul.f32 %v5971_v21, %v1445_v38  ;;  %v1428_v32 = vsel %vm609_vm0, %v1426_v20, %v1427_v13 }
 0x122   :  { %v1429_v12 = vrot.slane %v1400_v11, 3  ;;  %v1430_v44 = vrot.slane %v1401_v27, 3  ;;  %v6036_v57 = vadd.f32 %v1416_v55, %v5839_v42  ;;  %v1450_v5 = vmul.f32 %v5478_v60, %v1445_v38 }
 0x123   :  { %v1451_v15 = vmul.f32 %v5978_v22, %v1445_v38  ;;  %v1452_v34 = vmul.f32 %v5484_v35, %v1445_v38  ;;  %v1453_v9 = vmul.f32 %v5985_v63, %v1445_v38  ;;  %v1454_v51 = vmul.f32 %v5495_v62, %v1445_v38 }
 0x124   :  { %8953 = vst [vmem:[#allocation37_spill] sm:$0xff] %v6036_v57  ;;  %v1455_v17 = vmul.f32 %v5992_v7, %v1445_v38  ;;  %v1456_v29 = vmul.f32 %v1445_v38, %v5445_v30  ;;  %v1457_v11 = vmul.f32 %v1445_v38, %v5998_v10  ;;  %v1470_v41 = vrot.slane %v1446_v49, 3 }
 0x125   :  { %v1471_v42 = vrot.slane %v1447_v16, 3  ;;  %v1473_v18 = vrot.slane %v1448_v2, 3  ;;  %v1474_v27 = vrot.slane %v1449_v28, 3  ;;  %v1431_v20 = vsel %vm609_vm0, %v1429_v12, %v1430_v44 }
 0x126   :  { %v6048_v13 = vadd.f32 %v1419_v8, %v5843_v59  ;;  %v6051_v36 = vadd.f32 %v1422_v31, %v5846_v24  ;;  %v6054_v56 = vadd.f32 %v1425_v25, %v5850_v14  ;;  %v6057_v55 = vadd.f32 %v1428_v32, %v5853_v50 }
 0x127   :  { %v1476_v57 = vrot.slane %v1450_v5, 3  ;;  %v1477_v38 = vrot.slane %v1451_v15, 3  ;;  %v1501_v49 = vstv %s6022_s30  ;;  %v1479_v16 = vrot.slane %v1452_v34, 3  ;;  %s6556_s30 = sld [smem:[#allocation2 + $0x1a]] }
 0x128   :  { %8954 = vst [vmem:[#allocation16_spill] sm:$0xff] %v6048_v13  ;;  %8955 = vst [vmem:[#allocation17_spill] sm:$0xff] %v6051_v36  ;;  %v1480_v2 = vrot.slane %v1453_v9, 3  ;;  %v1482_v28 = vrot.slane %v1454_v51, 3  ;;  %v1483_v54 = vrot.slane %v1455_v17, 3  ;;  %v1472_v59 = vsel %vm609_vm0, %v1470_v41, %v1471_v42 }
 0x129   :  { %8956 = vst [vmem:[#allocation18_spill] sm:$0xff] %v6054_v56  ;;  %8957 = vst [vmem:[#allocation21_spill] sm:$0xff] %v6057_v55  ;;  %v1475_v24 = vsel %vm609_vm0, %v1473_v18, %v1474_v27  ;;  %v1485_v8 = vrot.slane %v1456_v29, 3  ;;  %v1486_v31 = vrot.slane %v1457_v11, 3  ;;  %v1502_v14 = vmul.f32 %v5463_v53, %v1501_v49 }
 0x12a   :  { %v1503_v50 = vmul.f32 %v5964_v6, %v1501_v49  ;;  %v1504_v25 = vmul.f32 %v5472_v40, %v1501_v49  ;;  %v1505_v32 = vmul.f32 %v5971_v21, %v1501_v49  ;;  %v6071_v12 = vadd.f32 %v1431_v20, %v5856_v48 }
 0x12b   :  { %v1478_v44 = vsel %vm609_vm0, %v1476_v57, %v1477_v38  ;;  %v1506_v5 = vmul.f32 %v5478_v60, %v1501_v49  ;;  %v1507_v15 = vmul.f32 %v5978_v22, %v1501_v49  ;;  %v1481_v34 = vsel %vm609_vm0, %v1479_v16, %v1480_v2  ;;  %v8962_v38 = vld [vmem:[#allocation26_spill] sm:$0xff] }
 0x12c   :  { %8958 = vst [vmem:[#allocation22_spill] sm:$0xff] %v6071_v12  ;;  %v1484_v9 = vsel %vm609_vm0, %v1482_v28, %v1483_v54  ;;  %v6079_v51 = vadd.f32 %v1472_v59, %v5863_v39  ;;  %v6082_v17 = vadd.f32 %v1475_v24, %v5866_v46  ;;  %v1487_v48 = vsel %vm609_vm0, %v1485_v8, %v1486_v31  ;;  %v8964_v24 = vld [vmem:[#allocation27_spill] sm:$0xff]  ;;  %v8966_v31 = vld [vmem:[#allocation28_spill] sm:$0xff] }
 0x12d   :  { %v1508_v29 = vmul.f32 %v5484_v35, %v1501_v49  ;;  %v1509_v57 = vmul.f32 %v5985_v63, %v1501_v49  ;;  %v1510_v11 = vmul.f32 %v5495_v62, %v1501_v49  ;;  %v1526_v41 = vrot.slane %v1502_v14, 3 }
 0x12e   :  { %8959 = vst [vmem:[#allocation23_spill] sm:$0xff] %v6079_v51  ;;  %8960 = vst [vmem:[#allocation24_spill] sm:$0xff] %v6082_v17  ;;  %v1527_v42 = vrot.slane %v1503_v50, 3  ;;  %v1529_v18 = vrot.slane %v1504_v25, 3  ;;  %v1530_v54 = vrot.slane %v1505_v32, 3  ;;  %v6089_v39 = vadd.f32 %v1478_v44, %v5869_v45 }
 0x12f   :  { %v1511_v46 = vmul.f32 %v5992_v7, %v1501_v49  ;;  %v1532_v27 = vrot.slane %v1506_v5, 3  ;;  %v1533_v20 = vrot.slane %v1507_v15, 3  ;;  %v6093_v16 = vadd.f32 %v1481_v34, %v8962_v38 }
 0x130   :  { %8961 = vst [vmem:[#allocation25_spill] sm:$0xff] %v6089_v39  ;;  %v1512_v2 = vmul.f32 %v1501_v49, %v5445_v30  ;;  %v1513_v28 = vmul.f32 %v1501_v49, %v5998_v10  ;;  %v1557_v59 = vstv %s6060_s8  ;;  %v6099_v8 = vadd.f32 %v1484_v9, %v8964_v24  ;;  %s6586_s8 = sld [smem:[#allocation2 + $0x2a]] }
 0x131   :  { %8963 = vst [vmem:[#allocation26_spill] sm:$0xff] %v6093_v16  ;;  %v6102_v14 = vadd.f32 %v1487_v48, %v8966_v31  ;;  %v1535_v45 = vrot.slane %v1508_v29, 3  ;;  %v6105_v50 = vstv %s6064_s9  ;;  %v1528_v25 = vsel %vm609_vm0, %v1526_v41, %v1527_v42  ;;  %s6613_s9 = sld [smem:[#allocation2 + $0x3a]] }
 0x132   :  { %8965 = vst [vmem:[#allocation27_spill] sm:$0xff] %v6099_v8  ;;  %v1531_v32 = vsel %vm609_vm0, %v1529_v18, %v1530_v54  ;;  %v1536_v44 = vrot.slane %v1509_v57, 3  ;;  %v1538_v5 = vrot.slane %v1510_v11, 3  ;;  %v1534_v15 = vsel %vm609_vm0, %v1532_v27, %v1533_v20 }
 0x133   :  { %8967 = vst [vmem:[#allocation28_spill] sm:$0xff] %v6102_v14  ;;  %v1539_v34 = vrot.slane %v1511_v46, 3  ;;  %v1558_v49 = vmul.f32 %v5463_v53, %v1557_v59  ;;  %v1559_v9 = vmul.f32 %v5964_v6, %v1557_v59  ;;  %v1541_v38 = vrot.slane %v1512_v2, 3 }
 0x134   :  { %v1542_v24 = vrot.slane %v1513_v28, 3  ;;  %v1560_v48 = vmul.f32 %v5472_v40, %v1557_v59  ;;  %v1561_v29 = vmul.f32 %v5971_v21, %v1557_v59  ;;  %v1562_v31 = vmul.f32 %v5478_v60, %v1557_v59 }
 0x135   :  { %v1563_v41 = vmul.f32 %v5978_v22, %v1557_v59  ;;  %v1564_v57 = vmul.f32 %v5484_v35, %v1557_v59  ;;  %v1565_v11 = vmul.f32 %v5985_v63, %v1557_v59  ;;  %v1566_v42 = vmul.f32 %v5495_v62, %v1557_v59 }
 0x136   :  { %v1567_v18 = vmul.f32 %v5992_v7, %v1557_v59  ;;  %v1568_v54 = vmul.f32 %v1557_v59, %v5445_v30  ;;  %v1569_v46 = vmul.f32 %v1557_v59, %v5998_v10  ;;  %v1537_v27 = vsel %vm609_vm0, %v1535_v45, %v1536_v44 }
 0x137   :  { %v1540_v20 = vsel %vm609_vm0, %v1538_v5, %v1539_v34  ;;  %v1582_v2 = vrot.slane %v1558_v49, 3  ;;  %v1583_v28 = vrot.slane %v1559_v9, 3  ;;  %v1543_v14 = vsel %vm609_vm0, %v1541_v38, %v1542_v24 }
 0x138   :  { %v6126_v8 = vadd.f32 %v1528_v25, %v5897_v26  ;;  %v1585_v16 = vrot.slane %v1560_v48, 3  ;;  %v1586_v39 = vrot.slane %v1561_v29, 3  ;;  %v1588_v17 = vrot.slane %v1562_v31, 3  ;;  %v8969_v29 = vld [vmem:[#allocation19_spill] sm:$0xff] }
 0x139   :  { %v1589_v51 = vrot.slane %v1563_v41, 3  ;;  %v1591_v12 = vrot.slane %v1564_v57, 3  ;;  %v1592_v55 = vrot.slane %v1565_v11, 3  ;;  %v1594_v56 = vrot.slane %v1566_v42, 3  ;;  %v8970_v11 = vld [vmem:[#allocation20_spill] sm:$0xff] }
 0x13a   :  { %v1595_v36 = vrot.slane %v1567_v18, 3  ;;  %v1597_v59 = vrot.slane %v1568_v54, 3  ;;  %v1598_v13 = vrot.slane %v1569_v46, 3  ;;  %v6131_v45 = vadd.f32 %v1531_v32, %v5900_v58  ;;  %v8971_v18 = vld [vmem:[#allocation30_spill] sm:$0xff] }
 0x13b   :  { %v6134_v44 = vadd.f32 %v1534_v15, %v5903_v1  ;;  %v6137_v26 = vadd.f32 %v1537_v27, %v5909_v61  ;;  %v1584_v25 = vsel %vm609_vm0, %v1582_v2, %v1583_v28  ;;  %v1614_v5 = vmul.f32 %v5463_v53, %v6105_v50 }
 0x13c   :  { %v1615_v34 = vmul.f32 %v5964_v6, %v6105_v50  ;;  %v1616_v49 = vmul.f32 %v5472_v40, %v6105_v50  ;;  %v1617_v58 = vmul.f32 %v5971_v21, %v6105_v50  ;;  %v6149_v1 = vadd.f32 %v1540_v20, %v5912_v4 }
 0x13d   :  { %v6152_v61 = vadd.f32 %v1543_v14, %v5915_v3  ;;  %v1587_v32 = vsel %vm609_vm0, %v1585_v16, %v1586_v39  ;;  %v1590_v15 = vsel %vm609_vm0, %v1588_v17, %v1589_v51  ;;  %v1593_v9 = vsel %vm609_vm0, %v1591_v12, %v1592_v55  ;;  %v8968_v51 = vld [vmem:[#allocation29_spill] sm:$0xff] }
 0x13e   :  { %v1596_v38 = vsel %vm609_vm0, %v1594_v56, %v1595_v36  ;;  %v1599_v24 = vsel %vm609_vm0, %v1597_v59, %v1598_v13  ;;  %v6160_v48 = vadd.f32 %v1584_v25, %v5918_v37  ;;  %v1618_v4 = vmul.f32 %v5478_v60, %v6105_v50 }
 0x13f   :  { %v1619_v3 = vmul.f32 %v5978_v22, %v6105_v50  ;;  %v1620_v39 = vmul.f32 %v5484_v35, %v6105_v50  ;;  %v1621_v55 = vmul.f32 %v5985_v63, %v6105_v50  ;;  %v1638_v12 = vrot.slane %v1614_v5, 3 }
 0x140   :  { %v1639_v36 = vrot.slane %v1615_v34, 3  ;;  %v1641_v56 = vrot.slane %v1616_v49, 3  ;;  %v1642_v13 = vrot.slane %v1617_v58, 3  ;;  %v6171_v37 = vadd.f32 %v1587_v32, %v5921_v43 }
 0x141   :  { %v6174_v17 = vadd.f32 %v1590_v15, %v8968_v51  ;;  %v1622_v16 = vmul.f32 %v5495_v62, %v6105_v50  ;;  %v1623_v14 = vmul.f32 %v5992_v7, %v6105_v50  ;;  %v6181_v31 = vadd.f32 %v1593_v9, %v8969_v29 }
 0x142   :  { %v1624_v41 = vmul.f32 %v6105_v50, %v5445_v30  ;;  %v1625_v57 = vmul.f32 %v6105_v50, %v5998_v10  ;;  %v1669_v43 = vstv %s6128_s2  ;;  %v6189_v42 = vadd.f32 %v1596_v38, %v8970_v11  ;;  %s6624_s2 = sld [smem:[#allocation2 + $0x4a]] }
 0x143   :  { %v6192_v54 = vadd.f32 %v1599_v24, %v8971_v18  ;;  %v1644_v46 = vrot.slane %v1618_v4, 3  ;;  %v1645_v27 = vrot.slane %v1619_v3, 3  ;;  %v1640_v20 = vsel %vm609_vm0, %v1638_v12, %v1639_v36  ;;  %v8974_v18 = vld [vmem:[#allocation33_spill] sm:$0xff] }
 0x144   :  { %v1643_v2 = vsel %vm609_vm0, %v1641_v56, %v1642_v13  ;;  %v1647_v28 = vrot.slane %v1620_v39, 3  ;;  %v1648_v59 = vrot.slane %v1621_v55, 3  ;;  %v1650_v25 = vrot.slane %v1622_v16, 3 }
 0x145   :  { %v1651_v30 = vrot.slane %v1623_v14, 3  ;;  %v1670_v5 = vmul.f32 %v5463_v53, %v1669_v43  ;;  %v1671_v50 = vmul.f32 %v5964_v6, %v1669_v43  ;;  %v1653_v34 = vrot.slane %v1624_v41, 3  ;;  %v8972_v14 = vld [vmem:[#allocation31_spill] sm:$0xff]  ;;  %v8973_v41 = vld [vmem:[#allocation32_spill] sm:$0xff] }
 0x146   :  { %v1654_v49 = vrot.slane %v1625_v57, 3  ;;  %v1672_v58 = vmul.f32 %v5472_v40, %v1669_v43  ;;  %v1673_v32 = vmul.f32 %v5971_v21, %v1669_v43  ;;  %v1674_v15 = vmul.f32 %v5478_v60, %v1669_v43  ;;  %v6213_v40 = vld [vmem:[%s8858_s0 + $0x60] sm:$0xff] }
 0x147   :  { %v1675_v9 = vmul.f32 %v5978_v22, %v1669_v43  ;;  %v1676_v38 = vmul.f32 %v5484_v35, %v1669_v43  ;;  %v1677_v24 = vmul.f32 %v5985_v63, %v1669_v43  ;;  %v1678_v53 = vmul.f32 %v5495_v62, %v1669_v43 }
 0x148   :  { %v1679_v6 = vmul.f32 %v5992_v7, %v1669_v43  ;;  %v1680_v21 = vmul.f32 %v6213_v40, %v1669_v43  ;;  %v1681_v60 = vmul.f32 %v1669_v43, %v5998_v10  ;;  %v1646_v22 = vsel %vm609_vm0, %v1644_v46, %v1645_v27  ;;  %v8975_v27 = vld [vmem:[#allocation34_spill] sm:$0xff] }
 0x149   :  { %v1649_v35 = vsel %vm609_vm0, %v1647_v28, %v1648_v59  ;;  %v1694_v63 = vrot.slane %v1670_v5, 3  ;;  %v1695_v4 = vrot.slane %v1671_v50, 3  ;;  %v1652_v3 = vsel %vm609_vm0, %v1650_v25, %v1651_v30  ;;  %v8976_v59 = vld [vmem:[#allocation35_spill] sm:$0xff] }
 0x14a   :  { %v1655_v62 = vsel %vm609_vm0, %v1653_v34, %v1654_v49  ;;  %v1697_v7 = vrot.slane %v1672_v58, 3  ;;  %v1698_v39 = vrot.slane %v1673_v32, 3  ;;  %v1700_v55 = vrot.slane %v1674_v15, 3  ;;  %v6262_v15 = vld [vmem:[%s8858_s0 + $0x20] sm:$0xff] }
 0x14b   :  { %v1701_v12 = vrot.slane %v1675_v9, 3  ;;  %v1703_v36 = vrot.slane %v1676_v38, 3  ;;  %v1704_v56 = vrot.slane %v1677_v24, 3  ;;  %v1706_v13 = vrot.slane %v1678_v53, 3  ;;  %v6271_v38 = vld [vmem:[%s8858_s0 + $0x30] sm:$0xff] }
 0x14c   :  { %v1707_v51 = vrot.slane %v1679_v6, 3  ;;  %v1709_v10 = vrot.slane %v1680_v21, 3  ;;  %v1710_v16 = vrot.slane %v1681_v60, 3  ;;  %v6224_v29 = vadd.f32 %v1640_v20, %v8972_v14  ;;  %v6244_v20 = vld [vmem:[%s8858_s0 + $0x70] sm:$0xff]  ;;  %v8982_v14 = vld [vmem:[#allocation21_spill] sm:$0xff] }
 0x14d   :  { %v6227_v57 = vadd.f32 %v1643_v2, %v8973_v41  ;;  %v1696_v43 = vsel %vm609_vm0, %v1694_v63, %v1695_v4  ;;  %v1725_v11 = vstv %s6198_s4  ;;  %v6232_v46 = vadd.f32 %v1646_v22, %v8974_v18  ;;  %s6680_s4 = sld [smem:[#allocation2 + $0x5a]] }
 0x14e   :  { %v6235_v28 = vadd.f32 %v1649_v35, %v8975_v27  ;;  %v6238_v25 = vadd.f32 %v1652_v3, %v8976_v59  ;;  %v1699_v30 = vsel %vm609_vm0, %v1697_v7, %v1698_v39  ;;  %v6247_v2 = vadd.f32 %v1655_v62, %v6001_v23  ;;  %v8977_v3 = vld [vmem:[#allocation36_spill] sm:$0xff]  ;;  %v8978_v39 = vld [vmem:[#allocation37_spill] sm:$0xff]  ;;  %v8984_v27 = vld [vmem:[#allocation23_spill] sm:$0xff] }
 0x14f   :  { %v1702_v5 = vsel %vm609_vm0, %v1700_v55, %v1701_v12  ;;  %v1705_v50 = vsel %vm609_vm0, %v1703_v36, %v1704_v56  ;;  %v1739_v34 = vstv %s6206_s10  ;;  %v1708_v49 = vsel %vm609_vm0, %v1706_v13, %v1707_v51  ;;  %v8979_v56 = vld [vmem:[#allocation16_spill] sm:$0xff]  ;;  %v8980_v13 = vld [vmem:[#allocation17_spill] sm:$0xff]  ;;  %v8981_v51 = vld [vmem:[#allocation18_spill] sm:$0xff]  ;;  %s6688_s10 = sld [smem:[#allocation2 + $0xb]] }
 0x150   :  { %v1711_v58 = vsel %vm609_vm0, %v1709_v10, %v1710_v16  ;;  %v6257_v32 = vadd.f32 %v1696_v43, %v6004_v47  ;;  %v1726_v23 = vmul.f32 %v6262_v15, %v1725_v11  ;;  %v6266_v9 = vadd.f32 %v1699_v30, %v6007_v19  ;;  %v6277_v47 = vld [vmem:[%s8858_s0 + $0x40] sm:$0xff]  ;;  %v6283_v19 = vld [vmem:[%s8858_s0 + $0x50] sm:$0xff] }
 0x151   :  { %v1727_v24 = vmul.f32 %v6271_v38, %v1725_v11  ;;  %v1728_v53 = vmul.f32 %v6277_v47, %v1725_v11  ;;  %v1729_v6 = vmul.f32 %v6283_v19, %v1725_v11  ;;  %v6289_v21 = vadd.f32 %v1702_v5, %v6013_v0  ;;  %v8983_v43 = vld [vmem:[#allocation22_spill] sm:$0xff]  ;;  %v8985_v30 = vld [vmem:[#allocation24_spill] sm:$0xff] }
 0x152   :  { %v1730_v60 = vmul.f32 %v6213_v40, %v1725_v11  ;;  %v1731_v22 = vmul.f32 %v1725_v11, %v6244_v20  ;;  %v1740_v35 = vmul.f32 %v6262_v15, %v1739_v34  ;;  %v6295_v63 = vadd.f32 %v1705_v50, %v6016_v33 }
 0x153   :  { %v6298_v4 = vadd.f32 %v1708_v49, %v6019_v52  ;;  %v6301_v62 = vadd.f32 %v1711_v58, %v8977_v3  ;;  %v1741_v7 = vmul.f32 %v6271_v38, %v1739_v34  ;;  %v6305_v0 = vadd.f32 %v1726_v23, %v8978_v39  ;;  %v8986_v23 = vld [vmem:[#allocation25_spill] sm:$0xff] }
 0x154   :  { %v1742_v55 = vmul.f32 %v6277_v47, %v1739_v34  ;;  %v1743_v12 = vmul.f32 %v6283_v19, %v1739_v34  ;;  %v1753_v36 = vstv %s6221_s13  ;;  %v6311_v33 = vadd.f32 %v1727_v24, %v8979_v56  ;;  %v8989_v56 = vld [vmem:[#allocation28_spill] sm:$0xff]  ;;  %s8033_s13 = sld [smem:[#allocation6 + $0xa]] }
 0x155   :  { %v6314_v52 = vadd.f32 %v1728_v53, %v8980_v13  ;;  %v6317_v10 = vadd.f32 %v1729_v6, %v8981_v51  ;;  %v1744_v16 = vmul.f32 %v6213_v40, %v1739_v34  ;;  %v6321_v41 = vadd.f32 %v1730_v60, %v8982_v14  ;;  %v8987_v53 = vld [vmem:[#allocation26_spill] sm:$0xff] }
 0x156   :  { %v6324_v11 = vadd.f32 %v1731_v22, %v8983_v43  ;;  %v1745_v18 = vmul.f32 %v1739_v34, %v6244_v20  ;;  %v6328_v59 = vadd.f32 %v1740_v35, %v8984_v27  ;;  %v6333_v5 = vadd.f32 %v1741_v7, %v8985_v30  ;;  %v8988_v22 = vld [vmem:[#allocation27_spill] sm:$0xff] }
 0x157   :  { %v1754_v50 = vmul.f32 %v6262_v15, %v1753_v36  ;;  %v1755_v49 = vmul.f32 %v6271_v38, %v1753_v36  ;;  %v1767_v58 = vstv %s6252_s16  ;;  %v6341_v24 = vadd.f32 %v1742_v55, %v8986_v23  ;;  %s7124_s16 = sld [smem:[#allocation2 + $0x5c]] }
 0x158   :  { %v6344_v34 = vadd.f32 %v1743_v12, %v8987_v53  ;;  %v1756_v6 = vmul.f32 %v6277_v47, %v1753_v36  ;;  %v1757_v60 = vmul.f32 %v6283_v19, %v1753_v36  ;;  %v6349_v35 = vadd.f32 %v1744_v16, %v8988_v22 }
 0x159   :  { %v1758_v3 = vmul.f32 %v6213_v40, %v1753_v36  ;;  %v1759_v7 = vmul.f32 %v1753_v36, %v6244_v20  ;;  %v1781_v39 = vstv %s6286_s23  ;;  %v6355_v13 = vadd.f32 %v1745_v18, %v8989_v56  ;;  %s6854_s23 = sld [smem:[#allocation2 + $0x3b]] }
 0x15a   :  { %v1768_v55 = vmul.f32 %v6262_v15, %v1767_v58  ;;  %v1769_v12 = vmul.f32 %v6271_v38, %v1767_v58  ;;  %v1770_v51 = vmul.f32 %v6277_v47, %v1767_v58  ;;  %v6361_v14 = vadd.f32 %v1754_v50, %v6126_v8 }
 0x15b   :  { %v6364_v16 = vadd.f32 %v1755_v49, %v6131_v45  ;;  %v1771_v43 = vmul.f32 %v6283_v19, %v1767_v58  ;;  %v1772_v36 = vmul.f32 %v6213_v40, %v1767_v58  ;;  %v6369_v18 = vadd.f32 %v1756_v6, %v6134_v44 }
 0x15c   :  { %v6372_v27 = vadd.f32 %v1757_v60, %v6137_v26  ;;  %v1773_v30 = vmul.f32 %v1767_v58, %v6244_v20  ;;  %v1782_v8 = vmul.f32 %v6262_v15, %v1781_v39  ;;  %v6379_v45 = vadd.f32 %v1758_v3, %v6149_v1 }
 0x15d   :  { %v6382_v50 = vadd.f32 %v1759_v7, %v6152_v61  ;;  %v1783_v49 = vmul.f32 %v6271_v38, %v1781_v39  ;;  %v1784_v44 = vmul.f32 %v6277_v47, %v1781_v39  ;;  %v6387_v23 = vadd.f32 %v1768_v55, %v6160_v48 }
 0x15e   :  { %v6390_v26 = vadd.f32 %v1769_v12, %v6171_v37  ;;  %v6393_v58 = vadd.f32 %v1770_v51, %v6174_v17  ;;  %v1795_v53 = vstv %s6330_s24  ;;  %v6397_v1 = vadd.f32 %v1771_v43, %v6181_v31  ;;  %s6858_s24 = sld [smem:[#allocation2 + $0x4b]] }
 0x15f   :  { %v6400_v61 = vadd.f32 %v1772_v36, %v6189_v42  ;;  %v1785_v6 = vmul.f32 %v6283_v19, %v1781_v39  ;;  %v1809_v60 = vstv %s6338_s25  ;;  %v6405_v22 = vadd.f32 %v1773_v30, %v6192_v54  ;;  %s6922_s25 = sld [smem:[#allocation2 + $0x5b]] }
 0x160   :  { %v1786_v48 = vmul.f32 %v6213_v40, %v1781_v39  ;;  %v1787_v37 = vmul.f32 %v1781_v39, %v6244_v20  ;;  %v6410_v17 = vadd.f32 %v1782_v8, %v6224_v29  ;;  %v6415_v31 = vadd.f32 %v1783_v49, %v6227_v57 }
 0x161   :  { %v6418_v42 = vadd.f32 %v1784_v44, %v6232_v46  ;;  %v1796_v3 = vmul.f32 %v6262_v15, %v1795_v53  ;;  %v1797_v54 = vmul.f32 %v6271_v38, %v1795_v53  ;;  %v1798_v7 = vmul.f32 %v6277_v47, %v1795_v53 }
 0x162   :  { %v1810_v39 = vmul.f32 %v6262_v15, %v1809_v60  ;;  %v1811_v29 = vmul.f32 %v6271_v38, %v1809_v60  ;;  %v1812_v56 = vmul.f32 %v6277_v47, %v1809_v60  ;;  %v6427_v55 = vadd.f32 %v1785_v6, %v6235_v28 }
 0x163   :  { %v1799_v57 = vmul.f32 %v6283_v19, %v1795_v53  ;;  %v1800_v46 = vmul.f32 %v6213_v40, %v1795_v53  ;;  %v1813_v12 = vmul.f32 %v6283_v19, %v1809_v60  ;;  %v6433_v51 = vadd.f32 %v1786_v48, %v6238_v25 }
 0x164   :  { %v6436_v43 = vadd.f32 %v1787_v37, %v6247_v2  ;;  %v1814_v36 = vmul.f32 %v6213_v40, %v1809_v60  ;;  %v1841_v30 = vstv %s6376_s5  ;;  %v1801_v8 = vmul.f32 %v1795_v53, %v6244_v20  ;;  %s7474_s5 = sld [smem:[#allocation2 + $0x5e]] }
 0x165   :  { %v6442_v28 = vadd.f32 %v1796_v3, %v6257_v32  ;;  %v6445_v49 = vadd.f32 %v1797_v54, %v6266_v9  ;;  %v1815_v44 = vmul.f32 %v1809_v60, %v6244_v20  ;;  %v6451_v25 = vadd.f32 %v1798_v7, %v6289_v21 }
 0x166   :  { %v1822_v2 = vrot.slane %v1810_v39, 1  ;;  %v1823_v6 = vrot.slane %v1811_v29, 1  ;;  %v1824_v48 = vrot.slane %v1812_v56, 1  ;;  %v6454_v37 = vadd.f32 %v1799_v57, %v6295_v63 }
 0x167   :  { %8990 = vst [vmem:[#allocation29_spill] sm:$0xff] %v6445_v49  ;;  %v6457_v53 = vadd.f32 %v1800_v46, %v6298_v4  ;;  %v1825_v32 = vrot.slane %v1813_v12, 1  ;;  %v1842_v9 = vmul.f32 %v6262_v15, %v1841_v30  ;;  %v1826_v3 = vrot.slane %v1814_v36, 1 }
 0x168   :  { %v1843_v60 = vmul.f32 %v6271_v38, %v1841_v30  ;;  %v1844_v54 = vmul.f32 %v6277_v47, %v1841_v30  ;;  %v1873_v49 = vstv %s6412_s6  ;;  %v6464_v21 = vadd.f32 %v1801_v8, %v6301_v62  ;;  %s7482_s6 = sld [smem:[#allocation2 + $0xf]] }
 0x169   :  { %v1827_v7 = vrot.slane %v1815_v44, 1  ;;  %v1845_v39 = vmul.f32 %v6283_v19, %v1841_v30  ;;  %v1846_v63 = vmul.f32 %v6213_v40, %v1841_v30  ;;  %v6469_v4 = vadd.f32 %v1822_v2, %v6305_v0 }
 0x16a   :  { %v6472_v29 = vadd.f32 %v1823_v6, %v6311_v33  ;;  %v6475_v56 = vadd.f32 %v1824_v48, %v6314_v52  ;;  %v1847_v57 = vmul.f32 %v1841_v30, %v6244_v20  ;;  %v1854_v62 = vrot.slane %v1842_v9, 1 }
 0x16b   :  { %v1874_v46 = vmul.f32 %v6262_v15, %v1873_v49  ;;  %v1875_v12 = vmul.f32 %v6271_v38, %v1873_v49  ;;  %v1876_v36 = vmul.f32 %v6277_v47, %v1873_v49  ;;  %v6484_v0 = vadd.f32 %v1825_v32, %v6317_v10 }
 0x16c   :  { %8991 = vst [vmem:[#allocation19_spill] sm:$0xff] %v6472_v29  ;;  %8992 = vst [vmem:[#allocation20_spill] sm:$0xff] %v6475_v56  ;;  %v6487_v33 = vadd.f32 %v1826_v3, %v6321_v41  ;;  %v1855_v8 = vrot.slane %v1843_v60, 1  ;;  %v1856_v52 = vrot.slane %v1844_v54, 1  ;;  %v1857_v44 = vrot.slane %v1845_v39, 1 }
 0x16d   :  { %v1858_v2 = vrot.slane %v1846_v63, 1  ;;  %v1877_v30 = vmul.f32 %v6283_v19, %v1873_v49  ;;  %v1905_v6 = vstv %s6448_s26  ;;  %v6492_v48 = vadd.f32 %v1827_v7, %v6324_v11  ;;  %s6997_s26 = sld [smem:[#allocation2 + $0xc]] }
 0x16e   :  { %v1859_v9 = vrot.slane %v1847_v57, 1  ;;  %v1878_v56 = vmul.f32 %v6213_v40, %v1873_v49  ;;  %v1879_v29 = vmul.f32 %v1873_v49, %v6244_v20  ;;  %v6497_v10 = vadd.f32 %v1854_v62, %v6328_v59 }
 0x16f   :  { %v1886_v41 = vrot.slane %v1874_v46, 1  ;;  %v1887_v32 = vrot.slane %v1875_v12, 1  ;;  %v1888_v3 = vrot.slane %v1876_v36, 1  ;;  %v6502_v60 = vadd.f32 %v1855_v8, %v6333_v5 }
 0x170   :  { %v6505_v11 = vadd.f32 %v1856_v52, %v6341_v24  ;;  %v1906_v54 = vmul.f32 %v6262_v15, %v1905_v6  ;;  %v1907_v7 = vmul.f32 %v6271_v38, %v1905_v6  ;;  %v6510_v49 = vadd.f32 %v1857_v44, %v6344_v34 }
 0x171   :  { %v6513_v59 = vadd.f32 %v1858_v2, %v6349_v35  ;;  %v1889_v39 = vrot.slane %v1877_v30, 1  ;;  %v1908_v63 = vmul.f32 %v6277_v47, %v1905_v6  ;;  %v1890_v57 = vrot.slane %v1878_v56, 1 }
 0x172   :  { %v1891_v62 = vrot.slane %v1879_v29, 1  ;;  %v1909_v5 = vmul.f32 %v6283_v19, %v1905_v6  ;;  %v1937_v46 = vstv %s6478_s27  ;;  %v6519_v24 = vadd.f32 %v1859_v9, %v6355_v13  ;;  %s7005_s27 = sld [smem:[#allocation2 + $0x1c]] }
 0x173   :  { %v6522_v12 = vadd.f32 %v1886_v41, %v6361_v14  ;;  %v6525_v34 = vadd.f32 %v1887_v32, %v6364_v16  ;;  %v6528_v35 = vadd.f32 %v1888_v3, %v6369_v18  ;;  %v1910_v29 = vmul.f32 %v6213_v40, %v1905_v6 }
 0x174   :  { %v1911_v56 = vmul.f32 %v1905_v6, %v6244_v20  ;;  %v1918_v36 = vrot.slane %v1906_v54, 1  ;;  %v1919_v8 = vrot.slane %v1907_v7, 1  ;;  %v1920_v13 = vrot.slane %v1908_v63, 1 }
 0x175   :  { %v1938_v52 = vmul.f32 %v6262_v15, %v1937_v46  ;;  %v1939_v14 = vmul.f32 %v6271_v38, %v1937_v46  ;;  %v1940_v16 = vmul.f32 %v6277_v47, %v1937_v46  ;;  %v6538_v44 = vadd.f32 %v1889_v39, %v6372_v27 }
 0x176   :  { %v6541_v18 = vadd.f32 %v1890_v57, %v6379_v45  ;;  %v6544_v2 = vadd.f32 %v1891_v62, %v6382_v50  ;;  %v1921_v30 = vrot.slane %v1909_v5, 1  ;;  %v1941_v6 = vmul.f32 %v6283_v19, %v1937_v46 }
 0x177   :  { %v1942_v9 = vmul.f32 %v6213_v40, %v1937_v46  ;;  %v1943_v41 = vmul.f32 %v1937_v46, %v6244_v20  ;;  %v1969_v32 = vstv %s6499_s28  ;;  %v1922_v3 = vrot.slane %v1910_v29, 1  ;;  %s7970_s28 = sld [smem:[#allocation6 + $0x2]] }
 0x178   :  { %v1923_v54 = vrot.slane %v1911_v56, 1  ;;  %v6551_v27 = vadd.f32 %v1918_v36, %v6387_v23  ;;  %v6554_v45 = vadd.f32 %v1919_v8, %v6390_v26  ;;  %v6559_v50 = vadd.f32 %v1920_v13, %v6393_v58 }
 0x179   :  { %v1950_v7 = vrot.slane %v1938_v52, 1  ;;  %v1951_v39 = vrot.slane %v1939_v14, 1  ;;  %v1952_v63 = vrot.slane %v1940_v16, 1  ;;  %v6562_v57 = vadd.f32 %v1921_v30, %v6397_v1 }
 0x17a   :  { %v1970_v62 = vmul.f32 %v6262_v15, %v1969_v32  ;;  %v1971_v5 = vmul.f32 %v6271_v38, %v1969_v32  ;;  %v1972_v23 = vmul.f32 %v6277_v47, %v1969_v32  ;;  %v1953_v46 = vrot.slane %v1941_v6, 1 }
 0x17b   :  { %v1954_v26 = vrot.slane %v1942_v9, 1  ;;  %v1955_v29 = vrot.slane %v1943_v41, 1  ;;  %v2001_v56 = vstv %s6530_s29  ;;  %v6569_v36 = vadd.f32 %v1922_v3, %v6400_v61  ;;  %s7972_s29 = sld [smem:[#allocation6 + $0x3]] }
 0x17c   :  { %v6572_v58 = vadd.f32 %v1923_v54, %v6405_v22  ;;  %v1973_v8 = vmul.f32 %v6283_v19, %v1969_v32  ;;  %v1974_v1 = vmul.f32 %v6213_v40, %v1969_v32  ;;  %v6577_v13 = vadd.f32 %v1950_v7, %v6410_v17 }
 0x17d   :  { %v6580_v52 = vadd.f32 %v1951_v39, %v6415_v31  ;;  %v6583_v14 = vadd.f32 %v1952_v63, %v6418_v42  ;;  %v1975_v61 = vmul.f32 %v1969_v32, %v6244_v20  ;;  %v1982_v22 = vrot.slane %v1970_v62, 1  ;;  %v8993_v62 = vld [vmem:[#allocation29_spill] sm:$0xff] }
 0x17e   :  { %v1983_v16 = vrot.slane %v1971_v5, 1  ;;  %v1984_v30 = vrot.slane %v1972_v23, 1  ;;  %v2002_v6 = vmul.f32 %v6262_v15, %v2001_v56  ;;  %v6590_v9 = vadd.f32 %v1953_v46, %v6427_v55 }
 0x17f   :  { %v6593_v17 = vadd.f32 %v1954_v26, %v6433_v51  ;;  %v6596_v31 = vadd.f32 %v1955_v29, %v6436_v43  ;;  %v2003_v42 = vmul.f32 %v6271_v38, %v2001_v56  ;;  %v1985_v41 = vrot.slane %v1973_v8, 1 }
 0x180   :  { %v1986_v32 = vrot.slane %v1974_v1, 1  ;;  %v2004_v3 = vmul.f32 %v6277_v47, %v2001_v56  ;;  %v2033_v54 = vstv %s6556_s30  ;;  %v1987_v7 = vrot.slane %v1975_v61, 1  ;;  %s7020_s30 = sld [smem:[#allocation2 + $0x2c]] }
 0x181   :  { %v2005_v39 = vmul.f32 %v6283_v19, %v2001_v56  ;;  %v2006_v63 = vmul.f32 %v6213_v40, %v2001_v56  ;;  %v2007_v55 = vmul.f32 %v2001_v56, %v6244_v20  ;;  %v6605_v51 = vadd.f32 %v1982_v22, %v6442_v28 }
 0x182   :  { %v6608_v43 = vadd.f32 %v1983_v16, %v8993_v62  ;;  %v6611_v5 = vadd.f32 %v1984_v30, %v6451_v25  ;;  %v2014_v23 = vrot.slane %v2002_v6, 2  ;;  %v2015_v46 = vrot.slane %v2003_v42, 2 }
 0x183   :  { %v2034_v26 = vmul.f32 %v6262_v15, %v2033_v54  ;;  %v2035_v29 = vmul.f32 %v6271_v38, %v2033_v54  ;;  %v2036_v56 = vmul.f32 %v6277_v47, %v2033_v54  ;;  %v6619_v28 = vadd.f32 %v1985_v41, %v6454_v37 }
 0x184   :  { %8994 = vst [vmem:[#allocation30_spill] sm:$0xff] %v6611_v5  ;;  %v2016_v8 = vrot.slane %v2004_v3, 2  ;;  %v2037_v1 = vmul.f32 %v6283_v19, %v2033_v54  ;;  %v2038_v61 = vmul.f32 %v6213_v40, %v2033_v54  ;;  %v2017_v25 = vrot.slane %v2005_v39, 2  ;;  %v8996_v3 = vld [vmem:[#allocation19_spill] sm:$0xff] }
 0x185   :  { %8995 = vst [vmem:[#allocation31_spill] sm:$0xff] %v6619_v28  ;;  %v2018_v22 = vrot.slane %v2006_v63, 2  ;;  %v2019_v16 = vrot.slane %v2007_v55, 2  ;;  %v2065_v30 = vstv %s6586_s8  ;;  %v6627_v6 = vadd.f32 %v1986_v32, %v6457_v53  ;;  %v8997_v28 = vld [vmem:[#allocation20_spill] sm:$0xff]  ;;  %s7980_s8 = sld [smem:[#allocation6 + $0x4]] }
 0x186   :  { %v6630_v42 = vadd.f32 %v1987_v7, %v6464_v21  ;;  %v6633_v37 = vadd.f32 %v2014_v23, %v6469_v4  ;;  %v2039_v41 = vmul.f32 %v2033_v54, %v6244_v20  ;;  %v6637_v62 = vadd.f32 %v2015_v46, %v8996_v3 }
 0x187   :  { %v2046_v39 = vrot.slane %v2034_v26, 2  ;;  %v2047_v63 = vrot.slane %v2035_v29, 2  ;;  %v2048_v55 = vrot.slane %v2036_v56, 2  ;;  %v6640_v5 = vadd.f32 %v2016_v8, %v8997_v28 }
 0x188   :  { %v2049_v53 = vrot.slane %v2037_v1, 2  ;;  %v2050_v32 = vrot.slane %v2038_v61, 2  ;;  %v2066_v21 = vmul.f32 %v6262_v15, %v2065_v30  ;;  %v6644_v7 = vadd.f32 %v2017_v25, %v6484_v0 }
 0x189   :  { %v6647_v4 = vadd.f32 %v2018_v22, %v6487_v33  ;;  %v6650_v54 = vadd.f32 %v2019_v16, %v6492_v48  ;;  %v2067_v23 = vmul.f32 %v6271_v38, %v2065_v30  ;;  %v2051_v46 = vrot.slane %v2039_v41, 2 }
 0x18a   :  { %v2068_v26 = vmul.f32 %v6277_v47, %v2065_v30  ;;  %v2069_v29 = vmul.f32 %v6283_v19, %v2065_v30  ;;  %v2097_v56 = vstv %s6613_s9  ;;  %v6657_v28 = vadd.f32 %v2046_v39, %v6497_v10  ;;  %s7998_s9 = sld [smem:[#allocation6 + $0x7]] }
 0x18b   :  { %v6660_v0 = vadd.f32 %v2047_v63, %v6502_v60  ;;  %v6663_v33 = vadd.f32 %v2048_v55, %v6505_v11  ;;  %v2070_v48 = vmul.f32 %v6213_v40, %v2065_v30  ;;  %v6667_v8 = vadd.f32 %v2049_v53, %v6510_v49 }
 0x18c   :  { %v6670_v1 = vadd.f32 %v2050_v32, %v6513_v59  ;;  %v2071_v61 = vmul.f32 %v2065_v30, %v6244_v20  ;;  %v2078_v25 = vrot.slane %v2066_v21, 2  ;;  %v2079_v22 = vrot.slane %v2067_v23, 2 }
 0x18d   :  { %8998 = vst [vmem:[#allocation32_spill] sm:$0xff] %v6667_v8  ;;  %v2098_v10 = vmul.f32 %v6262_v15, %v2097_v56  ;;  %v2099_v60 = vmul.f32 %v6271_v38, %v2097_v56  ;;  %v2129_v16 = vstv %s6624_s2  ;;  %v6677_v11 = vadd.f32 %v2051_v46, %v6519_v24  ;;  %s7051_s2 = sld [smem:[#allocation2 + $0x3c]] }
 0x18e   :  { %8999 = vst [vmem:[#allocation33_spill] sm:$0xff] %v6670_v1  ;;  %v2080_v41 = vrot.slane %v2068_v26, 2  ;;  %v2081_v3 = vrot.slane %v2069_v29, 2  ;;  %v2100_v49 = vmul.f32 %v6277_v47, %v2097_v56  ;;  %v2082_v59 = vrot.slane %v2070_v48, 2 }
 0x18f   :  { %9000 = vst [vmem:[#allocation34_spill] sm:$0xff] %v6677_v11  ;;  %v2101_v39 = vmul.f32 %v6283_v19, %v2097_v56  ;;  %v2102_v30 = vmul.f32 %v6213_v40, %v2097_v56  ;;  %v2103_v63 = vmul.f32 %v2097_v56, %v6244_v20  ;;  %v2083_v55 = vrot.slane %v2071_v61, 2 }
 0x190   :  { %v2130_v53 = vmul.f32 %v6262_v15, %v2129_v16  ;;  %v2131_v32 = vmul.f32 %v6271_v38, %v2129_v16  ;;  %v2132_v24 = vmul.f32 %v6277_v47, %v2129_v16  ;;  %v6691_v21 = vadd.f32 %v2078_v25, %v6522_v12 }
 0x191   :  { %v6694_v23 = vadd.f32 %v2079_v22, %v6525_v34  ;;  %v2110_v46 = vrot.slane %v2098_v10, 2  ;;  %v2111_v26 = vrot.slane %v2099_v60, 2  ;;  %v6697_v29 = vadd.f32 %v2080_v41, %v6528_v35 }
 0x192   :  { %v2112_v56 = vrot.slane %v2100_v49, 2  ;;  %v2133_v48 = vmul.f32 %v6283_v19, %v2129_v16  ;;  %v2134_v61 = vmul.f32 %v6213_v40, %v2129_v16  ;;  %v2113_v11 = vrot.slane %v2101_v39, 2 }
 0x193   :  { %v2114_v1 = vrot.slane %v2102_v30, 2  ;;  %v2115_v8 = vrot.slane %v2103_v63, 2  ;;  %v2135_v12 = vmul.f32 %v2129_v16, %v6244_v20  ;;  %v6703_v25 = vadd.f32 %v2081_v3, %v6538_v44 }
 0x194   :  { %v2142_v34 = vrot.slane %v2130_v53, 2  ;;  %v2143_v22 = vrot.slane %v2131_v32, 2  ;;  %v2144_v10 = vrot.slane %v2132_v24, 2  ;;  %v6706_v35 = vadd.f32 %v2082_v59, %v6541_v18 }
 0x195   :  { %v6709_v60 = vadd.f32 %v2083_v55, %v6544_v2  ;;  %v6712_v41 = vadd.f32 %v2110_v46, %v6551_v27  ;;  %v6715_v49 = vadd.f32 %v2111_v26, %v6554_v45  ;;  %v6718_v16 = vadd.f32 %v2112_v56, %v6559_v50  ;;  %v6758_v55 = vld [vmem:[%s8858_s0 + $0x28] sm:$0x1] }
 0x196   :  { %v2145_v44 = vrot.slane %v2133_v48, 2  ;;  %v2146_v3 = vrot.slane %v2134_v61, 2  ;;  %v2161_v39 = vstv %s6680_s4  ;;  %v6722_v30 = vadd.f32 %v2113_v11, %v6562_v57  ;;  %v6772_v46 = vld [vmem:[%s8858_s0 + $0x48] sm:$0x1]  ;;  %v6779_v48 = vld [vmem:[%s8858_s0 + $0x58] sm:$0x1] }
 0x197   :  { %9001 = vst [vmem:[#allocation35_spill] sm:$0xff] %v6718_v16  ;;  %v6725_v18 = vadd.f32 %v2114_v1, %v6569_v36  ;;  %v6728_v2 = vadd.f32 %v2115_v8, %v6572_v58  ;;  %v2147_v27 = vrot.slane %v2135_v12, 2  ;;  %v6731_v59 = vadd.f32 %v2142_v34, %v6577_v13  ;;  %s8006_s4 = sld [smem:[#allocation6 + $0x9]] }
 0x198   :  { %9002 = vst [vmem:[#allocation36_spill] sm:$0xff] %v6722_v30  ;;  %v6734_v45 = vadd.f32 %v2143_v22, %v6580_v52  ;;  %v6737_v50 = vadd.f32 %v2144_v10, %v6583_v14  ;;  %v2193_v63 = vstv %s6688_s10  ;;  %v2162_v57 = vmul.f32 %v6262_v15, %v2161_v39  ;;  %s8014_s10 = sld [smem:[#allocation6 + $0xb]] }
 0x199   :  { %9003 = vst [vmem:[#allocation37_spill] sm:$0xff] %v6725_v18  ;;  %9004 = vst [vmem:[#allocation16_spill] sm:$0xff] %v6728_v2  ;;  %v2163_v11 = vmul.f32 %v6271_v38, %v2161_v39  ;;  %v2164_v36 = vmul.f32 %v6277_v47, %v2161_v39  ;;  %v2165_v58 = vmul.f32 %v6283_v19, %v2161_v39 }
 0x19a   :  { %9005 = vst [vmem:[#allocation17_spill] sm:$0xff] %v6731_v59  ;;  %9006 = vst [vmem:[#allocation18_spill] sm:$0xff] %v6734_v45  ;;  %v6745_v8 = vadd.f32 %v2145_v44, %v6590_v9  ;;  %v6748_v13 = vadd.f32 %v2146_v3, %v6593_v17  ;;  %v2166_v52 = vmul.f32 %v6213_v40, %v2161_v39  ;;  %v6765_v17 = vld [vmem:[%s8858_s0 + $0x38] sm:$0x1]  ;;  %v2174_v12 = vrot.slane %v2162_v57, 2 }
 0x19b   :  { %9007 = vst [vmem:[#allocation21_spill] sm:$0xff] %v6737_v50  ;;  %v2167_v14 = vmul.f32 %v2161_v39, %v6244_v20  ;;  %v2194_v1 = vmul.f32 %v6262_v15, %v2193_v63  ;;  %v2195_v53 = vmul.f32 %v6758_v55, %v2193_v63  ;;  %v2196_v9 = vmul.f32 %v6271_v38, %v2193_v63  ;;  %v6792_v50 = vld [vmem:[%s8858_s0 + $0x78] sm:$0x1] }
 0x19c   :  { %9008 = vst [vmem:[#allocation22_spill] sm:$0xff] %v6745_v8  ;;  %9009 = vst [vmem:[#allocation23_spill] sm:$0xff] %v6748_v13  ;;  %v2197_v32 = vmul.f32 %v6765_v17, %v2193_v63  ;;  %v2198_v24 = vmul.f32 %v6277_v47, %v2193_v63  ;;  %v2199_v26 = vmul.f32 %v6772_v46, %v2193_v63  ;;  %v2175_v34 = vrot.slane %v2163_v11, 2  ;;  %v6786_v13 = vld [vmem:[%s8858_s0 + $0x68] sm:$0x1] }
 0x19d   :  { %v2200_v56 = vmul.f32 %v6283_v19, %v2193_v63  ;;  %v2201_v61 = vmul.f32 %v6779_v48, %v2193_v63  ;;  %v2176_v22 = vrot.slane %v2164_v36, 2  ;;  %v2177_v10 = vrot.slane %v2165_v58, 2 }
 0x19e   :  { %v2178_v44 = vrot.slane %v2166_v52, 2  ;;  %v2179_v3 = vrot.slane %v2167_v14, 2  ;;  %v2202_v39 = vmul.f32 %v6213_v40, %v2193_v63  ;;  %v2203_v8 = vmul.f32 %v6786_v13, %v2193_v63 }
 0x19f   :  { %v2218_v57 = vrot.slane %v2194_v1, 3  ;;  %v2219_v11 = vrot.slane %v2195_v53, 3  ;;  %v2221_v36 = vrot.slane %v2196_v9, 3  ;;  %v2222_v58 = vrot.slane %v2197_v32, 3 }
 0x1a0   :  { %v2224_v52 = vrot.slane %v2198_v24, 3  ;;  %v2225_v14 = vrot.slane %v2199_v26, 3  ;;  %v2227_v45 = vrot.slane %v2200_v56, 3  ;;  %v2228_v59 = vrot.slane %v2201_v61, 3  ;;  %v9010_v24 = vld [vmem:[#allocation30_spill] sm:$0xff]  ;;  %v9011_v56 = vld [vmem:[#allocation31_spill] sm:$0xff] }
 0x1a1   :  { %v6795_v2 = vadd.f32 %v2147_v27, %v6596_v31  ;;  %v6798_v18 = vadd.f32 %v2174_v12, %v6605_v51  ;;  %v6801_v30 = vadd.f32 %v2175_v34, %v6608_v43  ;;  %v2204_v16 = vmul.f32 %v2193_v63, %v6244_v20 }
 0x1a2   :  { %v2205_v1 = vmul.f32 %v2193_v63, %v6792_v50  ;;  %v2230_v53 = vrot.slane %v2202_v39, 3  ;;  %v2231_v9 = vrot.slane %v2203_v8, 3  ;;  %v2249_v32 = vstv %s6752_s11  ;;  %s8018_s11 = sld [smem:[#allocation6 + $0xd]] }
 0x1a3   :  { %v6807_v26 = vadd.f32 %v2176_v22, %v9010_v24  ;;  %v6810_v61 = vadd.f32 %v2177_v10, %v9011_v56  ;;  %v6813_v31 = vadd.f32 %v2178_v44, %v6627_v6  ;;  %v2220_v51 = vsel %vm609_vm0, %v2218_v57, %v2219_v11 }
 0x1a4   :  { %v6819_v43 = vadd.f32 %v2179_v3, %v6630_v42  ;;  %v2223_v27 = vsel %vm609_vm0, %v2221_v36, %v2222_v58  ;;  %v2226_v63 = vsel %vm609_vm0, %v2224_v52, %v2225_v14  ;;  %v2229_v8 = vsel %vm609_vm0, %v2227_v45, %v2228_v59 }
 0x1a5   :  { %v2250_v12 = vmul.f32 %v6262_v15, %v2249_v32  ;;  %v2251_v34 = vmul.f32 %v6758_v55, %v2249_v32  ;;  %v2252_v6 = vmul.f32 %v6271_v38, %v2249_v32  ;;  %v2253_v22 = vmul.f32 %v6765_v17, %v2249_v32 }
 0x1a6   :  { %9012 = vst [vmem:[#allocation24_spill] sm:$0xff] %v6819_v43  ;;  %v2232_v10 = vsel %vm609_vm0, %v2230_v53, %v2231_v9  ;;  %v2233_v44 = vrot.slane %v2204_v16, 3  ;;  %v2234_v39 = vrot.slane %v2205_v1, 3  ;;  %v6830_v42 = vadd.f32 %v2220_v51, %v6633_v37 }
 0x1a7   :  { %v2254_v3 = vmul.f32 %v6277_v47, %v2249_v32  ;;  %v2255_v57 = vmul.f32 %v6772_v46, %v2249_v32  ;;  %v2256_v59 = vmul.f32 %v6283_v19, %v2249_v32  ;;  %v2257_v45 = vmul.f32 %v6779_v48, %v2249_v32 }
 0x1a8   :  { %9013 = vst [vmem:[#allocation25_spill] sm:$0xff] %v6830_v42  ;;  %v2258_v11 = vmul.f32 %v6213_v40, %v2249_v32  ;;  %v2259_v36 = vmul.f32 %v6786_v13, %v2249_v32  ;;  %v2260_v58 = vmul.f32 %v2249_v32, %v6244_v20  ;;  %v2261_v16 = vmul.f32 %v2249_v32, %v6792_v50 }
 0x1a9   :  { %v2274_v52 = vrot.slane %v2250_v12, 3  ;;  %v2275_v37 = vrot.slane %v2251_v34, 3  ;;  %v2277_v14 = vrot.slane %v2252_v6, 3  ;;  %v2278_v1 = vrot.slane %v2253_v22, 3 }
 0x1aa   :  { %v2235_v53 = vsel %vm609_vm0, %v2233_v44, %v2234_v39  ;;  %v6842_v9 = vadd.f32 %v2223_v27, %v6637_v62  ;;  %v6845_v24 = vadd.f32 %v2226_v63, %v6640_v5  ;;  %v6848_v56 = vadd.f32 %v2229_v8, %v6644_v7 }
 0x1ab   :  { %v6851_v51 = vadd.f32 %v2232_v10, %v6647_v4  ;;  %v2280_v42 = vrot.slane %v2254_v3, 3  ;;  %v2281_v32 = vrot.slane %v2255_v57, 3  ;;  %v2305_v12 = vstv %s6816_s22  ;;  %s7350_s22 = sld [smem:[#allocation2 + $0x1e]] }
 0x1ac   :  { %9014 = vst [vmem:[#allocation26_spill] sm:$0xff] %v6845_v24  ;;  %9015 = vst [vmem:[#allocation27_spill] sm:$0xff] %v6848_v56  ;;  %v2283_v34 = vrot.slane %v2256_v59, 3  ;;  %v2284_v6 = vrot.slane %v2257_v45, 3  ;;  %v2286_v22 = vrot.slane %v2258_v11, 3  ;;  %v2287_v43 = vrot.slane %v2259_v36, 3 }
 0x1ad   :  { %9016 = vst [vmem:[#allocation28_spill] sm:$0xff] %v6851_v51  ;;  %v2276_v62 = vsel %vm609_vm0, %v2274_v52, %v2275_v37  ;;  %v2279_v5 = vsel %vm609_vm0, %v2277_v14, %v2278_v1  ;;  %v2289_v27 = vrot.slane %v2260_v58, 3  ;;  %v2290_v63 = vrot.slane %v2261_v16, 3 }
 0x1ae   :  { %v2306_v7 = vmul.f32 %v6262_v15, %v2305_v12  ;;  %v2307_v4 = vmul.f32 %v6758_v55, %v2305_v12  ;;  %v2308_v8 = vmul.f32 %v6271_v38, %v2305_v12  ;;  %v2309_v10 = vmul.f32 %v6765_v17, %v2305_v12 }
 0x1af   :  { %v6865_v44 = vadd.f32 %v2235_v53, %v6650_v54  ;;  %v2282_v39 = vsel %vm609_vm0, %v2280_v42, %v2281_v32  ;;  %v2310_v3 = vmul.f32 %v6277_v47, %v2305_v12  ;;  %v2311_v57 = vmul.f32 %v6772_v46, %v2305_v12  ;;  %v9021_v32 = vld [vmem:[#allocation32_spill] sm:$0xff] }
 0x1b0   :  { %v2285_v59 = vsel %vm609_vm0, %v2283_v34, %v2284_v6  ;;  %v2288_v45 = vsel %vm609_vm0, %v2286_v22, %v2287_v43  ;;  %v6873_v11 = vadd.f32 %v2276_v62, %v6657_v28  ;;  %v6876_v36 = vadd.f32 %v2279_v5, %v6660_v0  ;;  %v9023_v5 = vld [vmem:[#allocation33_spill] sm:$0xff] }
 0x1b1   :  { %9017 = vst [vmem:[#allocation29_spill] sm:$0xff] %v6865_v44  ;;  %v2291_v54 = vsel %vm609_vm0, %v2289_v27, %v2290_v63  ;;  %v2312_v58 = vmul.f32 %v6283_v19, %v2305_v12  ;;  %v2313_v42 = vmul.f32 %v6779_v48, %v2305_v12  ;;  %v2314_v16 = vmul.f32 %v6213_v40, %v2305_v12  ;;  %v9025_v63 = vld [vmem:[#allocation34_spill] sm:$0xff] }
 0x1b2   :  { %9018 = vst [vmem:[#allocation19_spill] sm:$0xff] %v6873_v11  ;;  %9019 = vst [vmem:[#allocation20_spill] sm:$0xff] %v6876_v36  ;;  %v2330_v52 = vrot.slane %v2306_v7, 3  ;;  %v2331_v37 = vrot.slane %v2307_v4, 3  ;;  %v2333_v14 = vrot.slane %v2308_v8, 3  ;;  %v2334_v43 = vrot.slane %v2309_v10, 3 }
 0x1b3   :  { %v6883_v28 = vadd.f32 %v2282_v39, %v6663_v33  ;;  %v2315_v0 = vmul.f32 %v6786_v13, %v2305_v12  ;;  %v2336_v1 = vrot.slane %v2310_v3, 3  ;;  %v2337_v53 = vrot.slane %v2311_v57, 3 }
 0x1b4   :  { %v6887_v34 = vadd.f32 %v2285_v59, %v9021_v32  ;;  %v2316_v6 = vmul.f32 %v2305_v12, %v6244_v20  ;;  %v2317_v22 = vmul.f32 %v2305_v12, %v6792_v50  ;;  %v2361_v62 = vstv %s6854_s23  ;;  %s7380_s23 = sld [smem:[#allocation2 + $0x2e]] }
 0x1b5   :  { %9020 = vst [vmem:[#allocation30_spill] sm:$0xff] %v6883_v28  ;;  %v6893_v27 = vadd.f32 %v2288_v45, %v9023_v5  ;;  %v6896_v7 = vadd.f32 %v2291_v54, %v9025_v63  ;;  %v2339_v33 = vrot.slane %v2312_v58, 3  ;;  %v6899_v4 = vstv %s6858_s24  ;;  %s7407_s24 = sld [smem:[#allocation2 + $0x3e]] }
 0x1b6   :  { %9022 = vst [vmem:[#allocation31_spill] sm:$0xff] %v6887_v34  ;;  %v2332_v8 = vsel %vm609_vm0, %v2330_v52, %v2331_v37  ;;  %v2335_v10 = vsel %vm609_vm0, %v2333_v14, %v2334_v43  ;;  %v2340_v39 = vrot.slane %v2313_v42, 3  ;;  %v2342_v3 = vrot.slane %v2314_v16, 3 }
 0x1b7   :  { %9024 = vst [vmem:[#allocation32_spill] sm:$0xff] %v6893_v27  ;;  %9026 = vst [vmem:[#allocation33_spill] sm:$0xff] %v6896_v7  ;;  %v2338_v57 = vsel %vm609_vm0, %v2336_v1, %v2337_v53  ;;  %v2343_v59 = vrot.slane %v2315_v0, 3  ;;  %v2362_v12 = vmul.f32 %v6262_v15, %v2361_v62  ;;  %v2363_v45 = vmul.f32 %v6758_v55, %v2361_v62 }
 0x1b8   :  { %v2345_v32 = vrot.slane %v2316_v6, 3  ;;  %v2346_v5 = vrot.slane %v2317_v22, 3  ;;  %v2364_v54 = vmul.f32 %v6271_v38, %v2361_v62  ;;  %v2365_v58 = vmul.f32 %v6765_v17, %v2361_v62 }
 0x1b9   :  { %v2366_v63 = vmul.f32 %v6277_v47, %v2361_v62  ;;  %v2367_v52 = vmul.f32 %v6772_v46, %v2361_v62  ;;  %v2368_v42 = vmul.f32 %v6283_v19, %v2361_v62  ;;  %v2369_v16 = vmul.f32 %v6779_v48, %v2361_v62 }
 0x1ba   :  { %v2370_v37 = vmul.f32 %v6213_v40, %v2361_v62  ;;  %v2371_v14 = vmul.f32 %v6786_v13, %v2361_v62  ;;  %v2372_v43 = vmul.f32 %v2361_v62, %v6244_v20  ;;  %v2373_v0 = vmul.f32 %v2361_v62, %v6792_v50 }
 0x1bb   :  { %v2341_v1 = vsel %vm609_vm0, %v2339_v33, %v2340_v39  ;;  %v2344_v53 = vsel %vm609_vm0, %v2342_v3, %v2343_v59  ;;  %v2386_v6 = vrot.slane %v2362_v12, 3  ;;  %v2387_v22 = vrot.slane %v2363_v45, 3 }
 0x1bc   :  { %v2347_v7 = vsel %vm609_vm0, %v2345_v32, %v2346_v5  ;;  %v6920_v27 = vadd.f32 %v2332_v8, %v6691_v21  ;;  %v2389_v34 = vrot.slane %v2364_v54, 3  ;;  %v2390_v28 = vrot.slane %v2365_v58, 3 }
 0x1bd   :  { %v2392_v40 = vrot.slane %v2366_v63, 3  ;;  %v2393_v36 = vrot.slane %v2367_v52, 3  ;;  %v2395_v11 = vrot.slane %v2368_v42, 3  ;;  %v2396_v44 = vrot.slane %v2369_v16, 3  ;;  %v9028_v52 = vld [vmem:[#allocation36_spill] sm:$0xff] }
 0x1be   :  { %v2398_v51 = vrot.slane %v2370_v37, 3  ;;  %v2399_v56 = vrot.slane %v2371_v14, 3  ;;  %v2401_v62 = vrot.slane %v2372_v43, 3  ;;  %v2402_v24 = vrot.slane %v2373_v0, 3  ;;  %v9029_v14 = vld [vmem:[#allocation37_spill] sm:$0xff]  ;;  %v9030_v0 = vld [vmem:[#allocation16_spill] sm:$0xff] }
 0x1bf   :  { %v6925_v33 = vadd.f32 %v2335_v10, %v6694_v23  ;;  %v6928_v39 = vadd.f32 %v2338_v57, %v6697_v29  ;;  %v6931_v21 = vadd.f32 %v2341_v1, %v6703_v25  ;;  %v2388_v8 = vsel %vm609_vm0, %v2386_v6, %v2387_v22 }
 0x1c0   :  { %v2418_v3 = vmul.f32 %v6262_v15, %v6899_v4  ;;  %v2419_v59 = vmul.f32 %v6758_v55, %v6899_v4  ;;  %v2420_v12 = vmul.f32 %v6271_v38, %v6899_v4  ;;  %v2421_v23 = vmul.f32 %v6765_v17, %v6899_v4 }
 0x1c1   :  { %v6943_v29 = vadd.f32 %v2344_v53, %v6706_v35  ;;  %v6946_v25 = vadd.f32 %v2347_v7, %v6709_v60  ;;  %v2391_v10 = vsel %vm609_vm0, %v2389_v34, %v2390_v28  ;;  %v2394_v57 = vsel %vm609_vm0, %v2392_v40, %v2393_v36  ;;  %v9027_v36 = vld [vmem:[#allocation35_spill] sm:$0xff]  ;;  %v6973_v7 = vld [vmem:[%s8858_s0 + $0x60] sm:$0xff] }
 0x1c2   :  { %v2397_v45 = vsel %vm609_vm0, %v2395_v11, %v2396_v44  ;;  %v2400_v32 = vsel %vm609_vm0, %v2398_v51, %v2399_v56  ;;  %v2403_v5 = vsel %vm609_vm0, %v2401_v62, %v2402_v24  ;;  %v6954_v54 = vadd.f32 %v2388_v8, %v6712_v41 }
 0x1c3   :  { %v2422_v35 = vmul.f32 %v6277_v47, %v6899_v4  ;;  %v2423_v60 = vmul.f32 %v6772_v46, %v6899_v4  ;;  %v2424_v28 = vmul.f32 %v6283_v19, %v6899_v4  ;;  %v2425_v44 = vmul.f32 %v6779_v48, %v6899_v4 }
 0x1c4   :  { %v2442_v11 = vrot.slane %v2418_v3, 3  ;;  %v2443_v56 = vrot.slane %v2419_v59, 3  ;;  %v2445_v51 = vrot.slane %v2420_v12, 3  ;;  %v2446_v24 = vrot.slane %v2421_v23, 3 }
 0x1c5   :  { %v6965_v41 = vadd.f32 %v2391_v10, %v6715_v49  ;;  %v6968_v34 = vadd.f32 %v2394_v57, %v9027_v36  ;;  %v2426_v58 = vmul.f32 %v6973_v7, %v6899_v4  ;;  %v2427_v63 = vmul.f32 %v6786_v13, %v6899_v4 }
 0x1c6   :  { %v6980_v42 = vadd.f32 %v2397_v45, %v9028_v52  ;;  %v2428_v49 = vmul.f32 %v6899_v4, %v6244_v20  ;;  %v2429_v16 = vmul.f32 %v6899_v4, %v6792_v50  ;;  %v2473_v37 = vstv %s6922_s25  ;;  %s7418_s25 = sld [smem:[#allocation2 + $0x4e]] }
 0x1c7   :  { %v6988_v43 = vadd.f32 %v2400_v32, %v9029_v14  ;;  %v6991_v1 = vadd.f32 %v2403_v5, %v9030_v0  ;;  %v2448_v53 = vrot.slane %v2422_v35, 3  ;;  %v2449_v6 = vrot.slane %v2423_v60, 3 }
 0x1c8   :  { %v2444_v22 = vsel %vm609_vm0, %v2442_v11, %v2443_v56  ;;  %v2447_v40 = vsel %vm609_vm0, %v2445_v51, %v2446_v24  ;;  %v2451_v62 = vrot.slane %v2424_v28, 3  ;;  %v2452_v8 = vrot.slane %v2425_v44, 3 }
 0x1c9   :  { %v2454_v3 = vrot.slane %v2426_v58, 3  ;;  %v2455_v20 = vrot.slane %v2427_v63, 3  ;;  %v2474_v59 = vmul.f32 %v6262_v15, %v2473_v37  ;;  %v2475_v4 = vmul.f32 %v6758_v55, %v2473_v37 }
 0x1ca   :  { %v2457_v12 = vrot.slane %v2428_v49, 3  ;;  %v2458_v23 = vrot.slane %v2429_v16, 3  ;;  %v2476_v10 = vmul.f32 %v6271_v38, %v2473_v37  ;;  %v2477_v57 = vmul.f32 %v6765_v17, %v2473_v37  ;;  %v7012_v38 = vld [vmem:[%s8858_s0 + $0x70] sm:$0xff]  ;;  %v9031_v49 = vld [vmem:[#allocation17_spill] sm:$0xff] }
 0x1cb   :  { %v2478_v45 = vmul.f32 %v6277_v47, %v2473_v37  ;;  %v2479_v32 = vmul.f32 %v6772_v46, %v2473_v37  ;;  %v2480_v5 = vmul.f32 %v6283_v19, %v2473_v37  ;;  %v2481_v35 = vmul.f32 %v6779_v48, %v2473_v37 }
 0x1cc   :  { %v2482_v15 = vmul.f32 %v6973_v7, %v2473_v37  ;;  %v2483_v55 = vmul.f32 %v6786_v13, %v2473_v37  ;;  %v2484_v17 = vmul.f32 %v7012_v38, %v2473_v37  ;;  %v2485_v47 = vmul.f32 %v2473_v37, %v6792_v50  ;;  %v9032_v37 = vld [vmem:[#allocation18_spill] sm:$0xff] }
 0x1cd   :  { %v2450_v46 = vsel %vm609_vm0, %v2448_v53, %v2449_v6  ;;  %v2453_v19 = vsel %vm609_vm0, %v2451_v62, %v2452_v8  ;;  %v2498_v48 = vrot.slane %v2474_v59, 3  ;;  %v2499_v60 = vrot.slane %v2475_v4, 3  ;;  %v9033_v6 = vld [vmem:[#allocation21_spill] sm:$0xff]  ;;  %v9034_v8 = vld [vmem:[#allocation22_spill] sm:$0xff] }
 0x1ce   :  { %v2456_v28 = vsel %vm609_vm0, %v2454_v3, %v2455_v20  ;;  %v2459_v13 = vsel %vm609_vm0, %v2457_v12, %v2458_v23  ;;  %v2501_v44 = vrot.slane %v2476_v10, 3  ;;  %v2502_v11 = vrot.slane %v2477_v57, 3  ;;  %v9035_v20 = vld [vmem:[#allocation23_spill] sm:$0xff] }
 0x1cf   :  { %v2504_v56 = vrot.slane %v2478_v45, 3  ;;  %v2505_v51 = vrot.slane %v2479_v32, 3  ;;  %v2507_v24 = vrot.slane %v2480_v5, 3  ;;  %v2508_v36 = vrot.slane %v2481_v35, 3  ;;  %v7061_v5 = vld [vmem:[%s8858_s0 + $0x30] sm:$0xff] }
 0x1d0   :  { %v2510_v58 = vrot.slane %v2482_v15, 3  ;;  %v2511_v63 = vrot.slane %v2483_v55, 3  ;;  %v2513_v50 = vrot.slane %v2484_v17, 3  ;;  %v2514_v52 = vrot.slane %v2485_v47, 3  ;;  %v7070_v15 = vld [vmem:[%s8858_s0 + $0x40] sm:$0xff] }
 0x1d1   :  { %v7023_v16 = vadd.f32 %v2444_v22, %v9031_v49  ;;  %v7026_v14 = vadd.f32 %v2447_v40, %v9032_v37  ;;  %v2500_v0 = vsel %vm609_vm0, %v2498_v48, %v2499_v60  ;;  %v2529_v53 = vstv %s6997_s26  ;;  %v7043_v22 = vld [vmem:[%s8858_s0 + $0x80] sm:$0xff]  ;;  %s7546_s26 = sld [smem:[#allocation2 + $0x1f]] }
 0x1d2   :  { %v7031_v62 = vadd.f32 %v2450_v46, %v9033_v6  ;;  %v7034_v3 = vadd.f32 %v2453_v19, %v9034_v8  ;;  %v7037_v59 = vadd.f32 %v2456_v28, %v9035_v20  ;;  %v2503_v4 = vsel %vm609_vm0, %v2501_v44, %v2502_v11  ;;  %v9040_v49 = vld [vmem:[#allocation28_spill] sm:$0xff]  ;;  %v9042_v8 = vld [vmem:[#allocation19_spill] sm:$0xff] }
 0x1d3   :  { %v7046_v40 = vadd.f32 %v2459_v13, %v6795_v2  ;;  %v2506_v12 = vsel %vm609_vm0, %v2504_v56, %v2505_v51  ;;  %v2509_v23 = vsel %vm609_vm0, %v2507_v24, %v2508_v36  ;;  %v2543_v10 = vstv %s7005_s27  ;;  %v9036_v13 = vld [vmem:[#allocation24_spill] sm:$0xff]  ;;  %v9037_v56 = vld [vmem:[#allocation25_spill] sm:$0xff]  ;;  %s7968_s27 = sld [smem:[#allocation6 + $0x1]] }
 0x1d4   :  { %v2512_v57 = vsel %vm609_vm0, %v2510_v58, %v2511_v63  ;;  %v2515_v45 = vsel %vm609_vm0, %v2513_v50, %v2514_v52  ;;  %v7056_v32 = vadd.f32 %v2500_v0, %v6798_v18  ;;  %v2530_v2 = vmul.f32 %v7061_v5, %v2529_v53  ;;  %v7076_v18 = vld [vmem:[%s8858_s0 + $0x50] sm:$0xff]  ;;  %v9039_v63 = vld [vmem:[#allocation27_spill] sm:$0xff]  ;;  %v9041_v0 = vld [vmem:[#allocation29_spill] sm:$0xff] }
 0x1d5   :  { %v7065_v35 = vadd.f32 %v2503_v4, %v6801_v30  ;;  %v2531_v55 = vmul.f32 %v7070_v15, %v2529_v53  ;;  %v2532_v17 = vmul.f32 %v7076_v18, %v2529_v53  ;;  %v2533_v47 = vmul.f32 %v6973_v7, %v2529_v53  ;;  %v9038_v58 = vld [vmem:[#allocation26_spill] sm:$0xff]  ;;  %v9043_v20 = vld [vmem:[#allocation20_spill] sm:$0xff] }
 0x1d6   :  { %v7083_v30 = vadd.f32 %v2506_v12, %v6807_v26  ;;  %v2534_v46 = vmul.f32 %v7012_v38, %v2529_v53  ;;  %v2535_v19 = vmul.f32 %v2529_v53, %v7043_v22  ;;  %v2544_v48 = vmul.f32 %v7061_v5, %v2543_v10 }
 0x1d7   :  { %v7089_v60 = vadd.f32 %v2509_v23, %v6810_v61  ;;  %v7092_v28 = vadd.f32 %v2512_v57, %v6813_v31  ;;  %v7095_v44 = vadd.f32 %v2515_v45, %v9036_v13  ;;  %v2545_v11 = vmul.f32 %v7070_v15, %v2543_v10  ;;  %v9044_v45 = vld [vmem:[#allocation30_spill] sm:$0xff] }
 0x1d8   :  { %v7099_v26 = vadd.f32 %v2530_v2, %v9037_v56  ;;  %v2546_v51 = vmul.f32 %v7076_v18, %v2543_v10  ;;  %v2547_v24 = vmul.f32 %v6973_v7, %v2543_v10  ;;  %v2557_v36 = vstv %s7020_s30  ;;  %v9047_v56 = vld [vmem:[#allocation33_spill] sm:$0xff]  ;;  %s7974_s30 = sld [smem:[#allocation6 + $0x5]] }
 0x1d9   :  { %v7105_v61 = vadd.f32 %v2531_v55, %v6842_v9  ;;  %v7108_v31 = vadd.f32 %v2532_v17, %v9038_v58  ;;  %v7111_v50 = vadd.f32 %v2533_v47, %v9039_v63  ;;  %v2548_v52 = vmul.f32 %v7012_v38, %v2543_v10  ;;  %v9045_v55 = vld [vmem:[#allocation31_spill] sm:$0xff] }
 0x1da   :  { %v7115_v37 = vadd.f32 %v2534_v46, %v9040_v49  ;;  %v7118_v53 = vadd.f32 %v2535_v19, %v9041_v0  ;;  %v2549_v6 = vmul.f32 %v2543_v10, %v7043_v22  ;;  %v7122_v9 = vadd.f32 %v2544_v48, %v9042_v8  ;;  %v9046_v46 = vld [vmem:[#allocation32_spill] sm:$0xff] }
 0x1db   :  { %v7127_v4 = vadd.f32 %v2545_v11, %v9043_v20  ;;  %v2558_v12 = vmul.f32 %v7061_v5, %v2557_v36  ;;  %v2559_v23 = vmul.f32 %v7070_v15, %v2557_v36  ;;  %v2571_v57 = vstv %s7051_s2  ;;  %s8004_s2 = sld [smem:[#allocation6 + $0x6]] }
 0x1dc   :  { %v7135_v2 = vadd.f32 %v2546_v51, %v9044_v45  ;;  %v7138_v10 = vadd.f32 %v2547_v24, %v9045_v55  ;;  %v2560_v17 = vmul.f32 %v7076_v18, %v2557_v36  ;;  %v2561_v47 = vmul.f32 %v6973_v7, %v2557_v36 }
 0x1dd   :  { %v7143_v19 = vadd.f32 %v2548_v52, %v9046_v46  ;;  %v2562_v48 = vmul.f32 %v7012_v38, %v2557_v36  ;;  %v2563_v13 = vmul.f32 %v2557_v36, %v7043_v22  ;;  %v2585_v11 = vstv %s7080_s15  ;;  %s7648_s15 = sld [smem:[#allocation2 + $0x3f]] }
 0x1de   :  { %v7149_v58 = vadd.f32 %v2549_v6, %v9047_v56  ;;  %v2572_v51 = vmul.f32 %v7061_v5, %v2571_v57  ;;  %v2573_v24 = vmul.f32 %v7070_v15, %v2571_v57  ;;  %v2574_v63 = vmul.f32 %v7076_v18, %v2571_v57 }
 0x1df   :  { %v7155_v49 = vadd.f32 %v2558_v12, %v6920_v27  ;;  %v7158_v52 = vadd.f32 %v2559_v23, %v6925_v33  ;;  %v2575_v0 = vmul.f32 %v6973_v7, %v2571_v57  ;;  %v2576_v36 = vmul.f32 %v7012_v38, %v2571_v57 }
 0x1e0   :  { %v7163_v6 = vadd.f32 %v2560_v17, %v6928_v39  ;;  %v7166_v8 = vadd.f32 %v2561_v47, %v6931_v21  ;;  %v2577_v20 = vmul.f32 %v2571_v57, %v7043_v22  ;;  %v2586_v27 = vmul.f32 %v7061_v5, %v2585_v11 }
 0x1e1   :  { %v7173_v33 = vadd.f32 %v2562_v48, %v6943_v29  ;;  %v7176_v12 = vadd.f32 %v2563_v13, %v6946_v25  ;;  %v2587_v23 = vmul.f32 %v7070_v15, %v2585_v11  ;;  %v2588_v39 = vmul.f32 %v7076_v18, %v2585_v11 }
 0x1e2   :  { %v7181_v45 = vadd.f32 %v2572_v51, %v6954_v54  ;;  %v7184_v21 = vadd.f32 %v2573_v24, %v6965_v41  ;;  %v7187_v57 = vadd.f32 %v2574_v63, %v6968_v34  ;;  %v2599_v55 = vstv %s7124_s16  ;;  %s7652_s16 = sld [smem:[#allocation2 + $0x4f]] }
 0x1e3   :  { %v7191_v29 = vadd.f32 %v2575_v0, %v6980_v42  ;;  %v7194_v25 = vadd.f32 %v2576_v36, %v6988_v43  ;;  %v2589_v17 = vmul.f32 %v6973_v7, %v2585_v11  ;;  %v2613_v47 = vstv %s7132_s17  ;;  %s7716_s17 = sld [smem:[#allocation2 + $0x5f]] }
 0x1e4   :  { %v7199_v46 = vadd.f32 %v2577_v20, %v6991_v1  ;;  %v2590_v54 = vmul.f32 %v7012_v38, %v2585_v11  ;;  %v2591_v41 = vmul.f32 %v2585_v11, %v7043_v22  ;;  %v7204_v34 = vadd.f32 %v2586_v27, %v7023_v16 }
 0x1e5   :  { %v7209_v42 = vadd.f32 %v2587_v23, %v7026_v14  ;;  %v7212_v43 = vadd.f32 %v2588_v39, %v7031_v62  ;;  %v2600_v48 = vmul.f32 %v7061_v5, %v2599_v55  ;;  %v2601_v1 = vmul.f32 %v7070_v15, %v2599_v55 }
 0x1e6   :  { %v2602_v13 = vmul.f32 %v7076_v18, %v2599_v55  ;;  %v2614_v11 = vmul.f32 %v7061_v5, %v2613_v47  ;;  %v2615_v16 = vmul.f32 %v7070_v15, %v2613_v47  ;;  %v2616_v56 = vmul.f32 %v7076_v18, %v2613_v47 }
 0x1e7   :  { %v7221_v51 = vadd.f32 %v2589_v17, %v7034_v3  ;;  %v2603_v14 = vmul.f32 %v6973_v7, %v2599_v55  ;;  %v2604_v62 = vmul.f32 %v7012_v38, %v2599_v55  ;;  %v2617_v24 = vmul.f32 %v6973_v7, %v2613_v47 }
 0x1e8   :  { %v7227_v63 = vadd.f32 %v2590_v54, %v7037_v59  ;;  %v7230_v0 = vadd.f32 %v2591_v41, %v7046_v40  ;;  %v2618_v36 = vmul.f32 %v7012_v38, %v2613_v47  ;;  %v2645_v20 = vstv %s7170_s1  ;;  %s8072_s1 = sld [smem:[#allocation6 + $0x11]] }
 0x1e9   :  { %v2605_v27 = vmul.f32 %v2599_v55, %v7043_v22  ;;  %v7236_v3 = vadd.f32 %v2600_v48, %v7056_v32  ;;  %v7239_v23 = vadd.f32 %v2601_v1, %v7065_v35  ;;  %v2619_v39 = vmul.f32 %v2613_v47, %v7043_v22 }
 0x1ea   :  { %v7245_v59 = vadd.f32 %v2602_v13, %v7083_v30  ;;  %v2626_v40 = vrot.slane %v2614_v11, 1  ;;  %v2627_v17 = vrot.slane %v2615_v16, 1  ;;  %v2628_v54 = vrot.slane %v2616_v56, 1 }
 0x1eb   :  { %9048 = vst [vmem:[#allocation34_spill] sm:$0xff] %v7239_v23  ;;  %v7248_v41 = vadd.f32 %v2603_v14, %v7089_v60  ;;  %v7251_v55 = vadd.f32 %v2604_v62, %v7092_v28  ;;  %v2629_v32 = vrot.slane %v2617_v24, 1  ;;  %v2646_v35 = vmul.f32 %v7061_v5, %v2645_v20 }
 0x1ec   :  { %v2630_v48 = vrot.slane %v2618_v36, 1  ;;  %v2647_v47 = vmul.f32 %v7070_v15, %v2645_v20  ;;  %v2648_v1 = vmul.f32 %v7076_v18, %v2645_v20  ;;  %v2677_v23 = vstv %s7206_s3  ;;  %s8074_s3 = sld [smem:[#allocation6 + $0x13]] }
 0x1ed   :  { %v7258_v30 = vadd.f32 %v2605_v27, %v7095_v44  ;;  %v2631_v13 = vrot.slane %v2619_v39, 1  ;;  %v2649_v11 = vmul.f32 %v6973_v7, %v2645_v20  ;;  %v2650_v60 = vmul.f32 %v7012_v38, %v2645_v20 }
 0x1ee   :  { %v7263_v28 = vadd.f32 %v2626_v40, %v7099_v26  ;;  %v7266_v16 = vadd.f32 %v2627_v17, %v7105_v61  ;;  %v7269_v56 = vadd.f32 %v2628_v54, %v7108_v31  ;;  %v2651_v14 = vmul.f32 %v2645_v20, %v7043_v22 }
 0x1ef   :  { %v2658_v44 = vrot.slane %v2646_v35, 1  ;;  %v2678_v62 = vmul.f32 %v7061_v5, %v2677_v23  ;;  %v2679_v24 = vmul.f32 %v7070_v15, %v2677_v23  ;;  %v2680_v36 = vmul.f32 %v7076_v18, %v2677_v23 }
 0x1f0   :  { %9049 = vst [vmem:[#allocation35_spill] sm:$0xff] %v7266_v16  ;;  %9050 = vst [vmem:[#allocation36_spill] sm:$0xff] %v7269_v56  ;;  %v7278_v26 = vadd.f32 %v2629_v32, %v7111_v50  ;;  %v7281_v61 = vadd.f32 %v2630_v48, %v7115_v37  ;;  %v2659_v27 = vrot.slane %v2647_v47, 1  ;;  %v2660_v31 = vrot.slane %v2648_v1, 1 }
 0x1f1   :  { %v2661_v39 = vrot.slane %v2649_v11, 1  ;;  %v2662_v40 = vrot.slane %v2650_v60, 1  ;;  %v2681_v20 = vmul.f32 %v6973_v7, %v2677_v23  ;;  %v2709_v17 = vstv %s7242_s18  ;;  %s8083_s18 = sld [smem:[#allocation6 + $0x15]] }
 0x1f2   :  { %v7286_v54 = vadd.f32 %v2631_v13, %v7118_v53  ;;  %v2663_v35 = vrot.slane %v2651_v14, 1  ;;  %v2682_v56 = vmul.f32 %v7012_v38, %v2677_v23  ;;  %v2683_v16 = vmul.f32 %v2677_v23, %v7043_v22 }
 0x1f3   :  { %v7291_v50 = vadd.f32 %v2658_v44, %v7122_v9  ;;  %v2690_v37 = vrot.slane %v2678_v62, 1  ;;  %v2691_v32 = vrot.slane %v2679_v24, 1  ;;  %v2692_v48 = vrot.slane %v2680_v36, 1 }
 0x1f4   :  { %v7296_v47 = vadd.f32 %v2659_v27, %v7127_v4  ;;  %v7299_v53 = vadd.f32 %v2660_v31, %v7135_v2  ;;  %v2710_v1 = vmul.f32 %v7061_v5, %v2709_v17  ;;  %v2711_v13 = vmul.f32 %v7070_v15, %v2709_v17 }
 0x1f5   :  { %v7304_v23 = vadd.f32 %v2661_v39, %v7138_v10  ;;  %v7307_v9 = vadd.f32 %v2662_v40, %v7143_v19  ;;  %v2693_v11 = vrot.slane %v2681_v20, 1  ;;  %v2712_v60 = vmul.f32 %v7076_v18, %v2709_v17 }
 0x1f6   :  { %v2694_v14 = vrot.slane %v2682_v56, 1  ;;  %v2695_v44 = vrot.slane %v2683_v16, 1  ;;  %v2713_v4 = vmul.f32 %v6973_v7, %v2709_v17  ;;  %v2741_v62 = vstv %s7272_s19  ;;  %s8092_s19 = sld [smem:[#allocation6 + $0x12]] }
 0x1f7   :  { %v7313_v2 = vadd.f32 %v2663_v35, %v7149_v58  ;;  %v7316_v24 = vadd.f32 %v2690_v37, %v7155_v49  ;;  %v7319_v10 = vadd.f32 %v2691_v32, %v7158_v52  ;;  %v7322_v19 = vadd.f32 %v2692_v48, %v7163_v6 }
 0x1f8   :  { %v2714_v16 = vmul.f32 %v7012_v38, %v2709_v17  ;;  %v2715_v56 = vmul.f32 %v2709_v17, %v7043_v22  ;;  %v2722_v36 = vrot.slane %v2710_v1, 1  ;;  %v2723_v27 = vrot.slane %v2711_v13, 1 }
 0x1f9   :  { %v2724_v58 = vrot.slane %v2712_v60, 1  ;;  %v2742_v31 = vmul.f32 %v7061_v5, %v2741_v62  ;;  %v2743_v49 = vmul.f32 %v7070_v15, %v2741_v62  ;;  %v2744_v52 = vmul.f32 %v7076_v18, %v2741_v62 }
 0x1fa   :  { %v7332_v39 = vadd.f32 %v2693_v11, %v7166_v8  ;;  %v7335_v6 = vadd.f32 %v2694_v14, %v7173_v33  ;;  %v7338_v40 = vadd.f32 %v2695_v44, %v7176_v12  ;;  %v2725_v20 = vrot.slane %v2713_v4, 1 }
 0x1fb   :  { %v2745_v17 = vmul.f32 %v6973_v7, %v2741_v62  ;;  %v2746_v35 = vmul.f32 %v7012_v38, %v2741_v62  ;;  %v2747_v37 = vmul.f32 %v2741_v62, %v7043_v22  ;;  %v2773_v32 = vstv %s7293_s20  ;;  %s7794_s20 = sld [smem:[#allocation4]] }
 0x1fc   :  { %v2726_v48 = vrot.slane %v2714_v16, 1  ;;  %v2727_v1 = vrot.slane %v2715_v56, 1  ;;  %v7345_v8 = vadd.f32 %v2722_v36, %v7181_v45  ;;  %v7348_v33 = vadd.f32 %v2723_v27, %v7184_v21 }
 0x1fd   :  { %v7353_v12 = vadd.f32 %v2724_v58, %v7187_v57  ;;  %v2754_v13 = vrot.slane %v2742_v31, 1  ;;  %v2755_v11 = vrot.slane %v2743_v49, 1  ;;  %v2756_v60 = vrot.slane %v2744_v52, 1 }
 0x1fe   :  { %v7356_v14 = vadd.f32 %v2725_v20, %v7191_v29  ;;  %v2774_v44 = vmul.f32 %v7061_v5, %v2773_v32  ;;  %v2775_v4 = vmul.f32 %v7070_v15, %v2773_v32  ;;  %v2776_v45 = vmul.f32 %v7076_v18, %v2773_v32 }
 0x1ff   :  { %v2757_v62 = vrot.slane %v2745_v17, 1  ;;  %v2758_v21 = vrot.slane %v2746_v35, 1  ;;  %v2759_v16 = vrot.slane %v2747_v37, 1  ;;  %v2805_v56 = vstv %s7324_s21  ;;  %s8104_s21 = sld [smem:[#allocation6 + $0x14]] }
 0x200   :  { %v7363_v36 = vadd.f32 %v2726_v48, %v7194_v25  ;;  %v7366_v57 = vadd.f32 %v2727_v1, %v7199_v46  ;;  %v2777_v27 = vmul.f32 %v6973_v7, %v2773_v32  ;;  %v2778_v29 = vmul.f32 %v7012_v38, %v2773_v32 }
 0x201   :  { %v7371_v58 = vadd.f32 %v2754_v13, %v7204_v34  ;;  %v7374_v31 = vadd.f32 %v2755_v11, %v7209_v42  ;;  %v7377_v49 = vadd.f32 %v2756_v60, %v7212_v43  ;;  %v2779_v25 = vmul.f32 %v2773_v32, %v7043_v22 }
 0x202   :  { %v2786_v46 = vrot.slane %v2774_v44, 1  ;;  %v2787_v52 = vrot.slane %v2775_v4, 1  ;;  %v2788_v20 = vrot.slane %v2776_v45, 1  ;;  %v2806_v17 = vmul.f32 %v7061_v5, %v2805_v56  ;;  %v9051_v44 = vld [vmem:[#allocation34_spill] sm:$0xff] }
 0x203   :  { %v7384_v35 = vadd.f32 %v2757_v62, %v7221_v51  ;;  %v7387_v34 = vadd.f32 %v2758_v21, %v7227_v63  ;;  %v7390_v42 = vadd.f32 %v2759_v16, %v7230_v0  ;;  %v2807_v43 = vmul.f32 %v7070_v15, %v2805_v56 }
 0x204   :  { %v2789_v37 = vrot.slane %v2777_v27, 1  ;;  %v2790_v32 = vrot.slane %v2778_v29, 1  ;;  %v2808_v48 = vmul.f32 %v7076_v18, %v2805_v56  ;;  %v2837_v1 = vstv %s7350_s22  ;;  %s8112_s22 = sld [smem:[#allocation6 + $0x16]] }
 0x205   :  { %v2791_v13 = vrot.slane %v2779_v25, 1  ;;  %v2809_v11 = vmul.f32 %v6973_v7, %v2805_v56  ;;  %v2810_v60 = vmul.f32 %v7012_v38, %v2805_v56  ;;  %v2811_v51 = vmul.f32 %v2805_v56, %v7043_v22 }
 0x206   :  { %v7399_v63 = vadd.f32 %v2786_v46, %v7236_v3  ;;  %v7402_v0 = vadd.f32 %v2787_v52, %v9051_v44  ;;  %v7405_v4 = vadd.f32 %v2788_v20, %v7245_v59  ;;  %v2818_v45 = vrot.slane %v2806_v17, 2 }
 0x207   :  { %v2819_v62 = vrot.slane %v2807_v43, 2  ;;  %v2838_v21 = vmul.f32 %v7061_v5, %v2837_v1  ;;  %v2839_v16 = vmul.f32 %v7070_v15, %v2837_v1  ;;  %v2840_v56 = vmul.f32 %v7076_v18, %v2837_v1 }
 0x208   :  { %9052 = vst [vmem:[#allocation37_spill] sm:$0xff] %v7405_v4  ;;  %v7413_v3 = vadd.f32 %v2789_v37, %v7248_v41  ;;  %v2820_v27 = vrot.slane %v2808_v48, 2  ;;  %v2841_v29 = vmul.f32 %v6973_v7, %v2837_v1  ;;  %v2842_v25 = vmul.f32 %v7012_v38, %v2837_v1  ;;  %v9054_v48 = vld [vmem:[#allocation35_spill] sm:$0xff] }
 0x209   :  { %v2821_v59 = vrot.slane %v2809_v11, 2  ;;  %v2822_v46 = vrot.slane %v2810_v60, 2  ;;  %v2823_v52 = vrot.slane %v2811_v51, 2  ;;  %v2869_v20 = vstv %s7380_s23  ;;  %s7802_s23 = sld [smem:[#allocation4 + $0x1]] }
 0x20a   :  { %9053 = vst [vmem:[#allocation16_spill] sm:$0xff] %v7413_v3  ;;  %v7421_v17 = vadd.f32 %v2790_v32, %v7251_v55  ;;  %v7424_v43 = vadd.f32 %v2791_v13, %v7258_v30  ;;  %v7427_v41 = vadd.f32 %v2818_v45, %v7263_v28  ;;  %v2843_v37 = vmul.f32 %v2837_v1, %v7043_v22  ;;  %v9055_v3 = vld [vmem:[#allocation36_spill] sm:$0xff] }
 0x20b   :  { %v7431_v44 = vadd.f32 %v2819_v62, %v9054_v48  ;;  %v2850_v11 = vrot.slane %v2838_v21, 2  ;;  %v2851_v60 = vrot.slane %v2839_v16, 2  ;;  %v2852_v51 = vrot.slane %v2840_v56, 2 }
 0x20c   :  { %v7434_v4 = vadd.f32 %v2820_v27, %v9055_v3  ;;  %v2853_v55 = vrot.slane %v2841_v29, 2  ;;  %v2854_v32 = vrot.slane %v2842_v25, 2  ;;  %v2870_v30 = vmul.f32 %v7061_v5, %v2869_v20 }
 0x20d   :  { %v7438_v13 = vadd.f32 %v2821_v59, %v7278_v26  ;;  %v7441_v28 = vadd.f32 %v2822_v46, %v7281_v61  ;;  %v7444_v1 = vadd.f32 %v2823_v52, %v7286_v54  ;;  %v2871_v45 = vmul.f32 %v7070_v15, %v2869_v20 }
 0x20e   :  { %v2855_v62 = vrot.slane %v2843_v37, 2  ;;  %v2872_v21 = vmul.f32 %v7076_v18, %v2869_v20  ;;  %v2873_v16 = vmul.f32 %v6973_v7, %v2869_v20  ;;  %v2901_v56 = vstv %s7407_s24  ;;  %s7832_s24 = sld [smem:[#allocation4 + $0x3]] }
 0x20f   :  { %v7451_v3 = vadd.f32 %v2850_v11, %v7291_v50  ;;  %v7454_v26 = vadd.f32 %v2851_v60, %v7296_v47  ;;  %v7457_v61 = vadd.f32 %v2852_v51, %v7299_v53  ;;  %v2874_v54 = vmul.f32 %v7012_v38, %v2869_v20 }
 0x210   :  { %v7461_v27 = vadd.f32 %v2853_v55, %v7304_v23  ;;  %v7464_v29 = vadd.f32 %v2854_v32, %v7307_v9  ;;  %v2875_v25 = vmul.f32 %v2869_v20, %v7043_v22  ;;  %v2882_v59 = vrot.slane %v2870_v30, 2 }
 0x211   :  { %v2883_v46 = vrot.slane %v2871_v45, 2  ;;  %v2902_v50 = vmul.f32 %v7061_v5, %v2901_v56  ;;  %v2903_v47 = vmul.f32 %v7070_v15, %v2901_v56  ;;  %v2933_v52 = vstv %s7418_s25  ;;  %s7854_s25 = sld [smem:[#allocation4 + $0x4]] }
 0x212   :  { %9056 = vst [vmem:[#allocation17_spill] sm:$0xff] %v7461_v27  ;;  %9057 = vst [vmem:[#allocation18_spill] sm:$0xff] %v7464_v29  ;;  %v7471_v53 = vadd.f32 %v2855_v62, %v7313_v2  ;;  %v2884_v37 = vrot.slane %v2872_v21, 2  ;;  %v2885_v48 = vrot.slane %v2873_v16, 2  ;;  %v2904_v23 = vmul.f32 %v7076_v18, %v2901_v56 }
 0x213   :  { %v2886_v9 = vrot.slane %v2874_v54, 2  ;;  %v2905_v11 = vmul.f32 %v6973_v7, %v2901_v56  ;;  %v2906_v20 = vmul.f32 %v7012_v38, %v2901_v56  ;;  %v2907_v60 = vmul.f32 %v2901_v56, %v7043_v22 }
 0x214   :  { %9058 = vst [vmem:[#allocation21_spill] sm:$0xff] %v7471_v53  ;;  %v2887_v51 = vrot.slane %v2875_v25, 2  ;;  %v2934_v55 = vmul.f32 %v7061_v5, %v2933_v52  ;;  %v2935_v32 = vmul.f32 %v7070_v15, %v2933_v52  ;;  %v2936_v2 = vmul.f32 %v7076_v18, %v2933_v52 }
 0x215   :  { %v7485_v30 = vadd.f32 %v2882_v59, %v7316_v24  ;;  %v7488_v45 = vadd.f32 %v2883_v46, %v7319_v10  ;;  %v2914_v62 = vrot.slane %v2902_v50, 2  ;;  %v2915_v21 = vrot.slane %v2903_v47, 2 }
 0x216   :  { %v7491_v16 = vadd.f32 %v2884_v37, %v7322_v19  ;;  %v2916_v56 = vrot.slane %v2904_v23, 2  ;;  %v2937_v54 = vmul.f32 %v6973_v7, %v2933_v52  ;;  %v2938_v25 = vmul.f32 %v7012_v38, %v2933_v52 }
 0x217   :  { %v2917_v53 = vrot.slane %v2905_v11, 2  ;;  %v2918_v29 = vrot.slane %v2906_v20, 2  ;;  %v2919_v27 = vrot.slane %v2907_v60, 2  ;;  %v2939_v24 = vmul.f32 %v2933_v52, %v7043_v22 }
 0x218   :  { %v7497_v59 = vadd.f32 %v2885_v48, %v7332_v39  ;;  %v2946_v10 = vrot.slane %v2934_v55, 2  ;;  %v2947_v46 = vrot.slane %v2935_v32, 2  ;;  %v2948_v50 = vrot.slane %v2936_v2, 2 }
 0x219   :  { %v7500_v19 = vadd.f32 %v2886_v9, %v7335_v6  ;;  %v7503_v47 = vadd.f32 %v2887_v51, %v7338_v40  ;;  %v7506_v37 = vadd.f32 %v2914_v62, %v7345_v8  ;;  %v7509_v23 = vadd.f32 %v2915_v21, %v7348_v33  ;;  %v7552_v51 = vld [vmem:[%s8858_s0 + $0x38] sm:$0x1] }
 0x21a   :  { %v7512_v52 = vadd.f32 %v2916_v56, %v7353_v12  ;;  %v2949_v39 = vrot.slane %v2937_v54, 2  ;;  %v2950_v48 = vrot.slane %v2938_v25, 2  ;;  %v2965_v11 = vstv %s7474_s5  ;;  %v7566_v62 = vld [vmem:[%s8858_s0 + $0x58] sm:$0x1]  ;;  %v7573_v54 = vld [vmem:[%s8858_s0 + $0x68] sm:$0x1] }
 0x21b   :  { %v7516_v20 = vadd.f32 %v2917_v53, %v7356_v14  ;;  %v7519_v6 = vadd.f32 %v2918_v29, %v7363_v36  ;;  %v7522_v40 = vadd.f32 %v2919_v27, %v7366_v57  ;;  %v2951_v8 = vrot.slane %v2939_v24, 2  ;;  %s7900_s5 = sld [smem:[#allocation4 + $0x5]] }
 0x21c   :  { %9059 = vst [vmem:[#allocation22_spill] sm:$0xff] %v7512_v52  ;;  %v7525_v9 = vadd.f32 %v2946_v10, %v7371_v58  ;;  %v7528_v33 = vadd.f32 %v2947_v46, %v7374_v31  ;;  %v7531_v12 = vadd.f32 %v2948_v50, %v7377_v49  ;;  %v2997_v60 = vstv %s7482_s6  ;;  %s7957_s6 = sld [smem:[#allocation7]] }
 0x21d   :  { %9060 = vst [vmem:[#allocation23_spill] sm:$0xff] %v7516_v20  ;;  %9061 = vst [vmem:[#allocation24_spill] sm:$0xff] %v7519_v6  ;;  %v2966_v14 = vmul.f32 %v7061_v5, %v2965_v11  ;;  %v2967_v53 = vmul.f32 %v7070_v15, %v2965_v11  ;;  %v2968_v36 = vmul.f32 %v7076_v18, %v2965_v11 }
 0x21e   :  { %9062 = vst [vmem:[#allocation25_spill] sm:$0xff] %v7522_v40  ;;  %9063 = vst [vmem:[#allocation26_spill] sm:$0xff] %v7525_v9  ;;  %v2969_v57 = vmul.f32 %v6973_v7, %v2965_v11  ;;  %v7539_v27 = vadd.f32 %v2949_v39, %v7384_v35  ;;  %v7542_v58 = vadd.f32 %v2950_v48, %v7387_v34  ;;  %v7559_v34 = vld [vmem:[%s8858_s0 + $0x48] sm:$0x1] }
 0x21f   :  { %9064 = vst [vmem:[#allocation27_spill] sm:$0xff] %v7528_v33  ;;  %9065 = vst [vmem:[#allocation28_spill] sm:$0xff] %v7531_v12  ;;  %v2970_v31 = vmul.f32 %v7012_v38, %v2965_v11  ;;  %v2971_v49 = vmul.f32 %v2965_v11, %v7043_v22  ;;  %v2998_v29 = vmul.f32 %v7061_v5, %v2997_v60  ;;  %v2978_v24 = vrot.slane %v2966_v14, 2  ;;  %v7586_v12 = vld [vmem:[%s8858_s0 + $0x88] sm:$0x1] }
 0x220   :  { %9066 = vst [vmem:[#allocation29_spill] sm:$0xff] %v7539_v27  ;;  %9067 = vst [vmem:[#allocation19_spill] sm:$0xff] %v7542_v58  ;;  %v2999_v55 = vmul.f32 %v7552_v51, %v2997_v60  ;;  %v3000_v35 = vmul.f32 %v7070_v15, %v2997_v60  ;;  %v3001_v32 = vmul.f32 %v7559_v34, %v2997_v60  ;;  %v2979_v10 = vrot.slane %v2967_v53, 2  ;;  %v7580_v58 = vld [vmem:[%s8858_s0 + $0x78] sm:$0x1] }
 0x221   :  { %v3002_v2 = vmul.f32 %v7076_v18, %v2997_v60  ;;  %v3003_v21 = vmul.f32 %v7566_v62, %v2997_v60  ;;  %v3004_v56 = vmul.f32 %v6973_v7, %v2997_v60  ;;  %v3005_v25 = vmul.f32 %v7573_v54, %v2997_v60 }
 0x222   :  { %v2980_v46 = vrot.slane %v2968_v36, 2  ;;  %v2981_v50 = vrot.slane %v2969_v57, 2  ;;  %v2982_v39 = vrot.slane %v2970_v31, 2  ;;  %v2983_v48 = vrot.slane %v2971_v49, 2 }
 0x223   :  { %v3006_v11 = vmul.f32 %v7012_v38, %v2997_v60  ;;  %v3007_v27 = vmul.f32 %v7580_v58, %v2997_v60  ;;  %v3022_v14 = vrot.slane %v2998_v29, 3  ;;  %v3023_v53 = vrot.slane %v2999_v55, 3 }
 0x224   :  { %v3025_v36 = vrot.slane %v3000_v35, 3  ;;  %v3026_v57 = vrot.slane %v3001_v32, 3  ;;  %v3028_v31 = vrot.slane %v3002_v2, 3  ;;  %v3029_v49 = vrot.slane %v3003_v21, 3  ;;  %v9068_v2 = vld [vmem:[#allocation37_spill] sm:$0xff] }
 0x225   :  { %v3031_v33 = vrot.slane %v3004_v56, 3  ;;  %v3032_v9 = vrot.slane %v3005_v25, 3  ;;  %v7589_v40 = vadd.f32 %v2951_v8, %v7390_v42  ;;  %v7592_v6 = vadd.f32 %v2978_v24, %v7399_v63  ;;  %v9069_v56 = vld [vmem:[#allocation16_spill] sm:$0xff] }
 0x226   :  { %v7595_v20 = vadd.f32 %v2979_v10, %v7402_v0  ;;  %v3008_v52 = vmul.f32 %v2997_v60, %v7043_v22  ;;  %v3009_v29 = vmul.f32 %v2997_v60, %v7586_v12  ;;  %v3034_v55 = vrot.slane %v3006_v11, 3 }
 0x227   :  { %v3035_v35 = vrot.slane %v3007_v27, 3  ;;  %v3053_v32 = vstv %s7546_s26  ;;  %v7601_v21 = vadd.f32 %v2980_v46, %v9068_v2  ;;  %v7604_v25 = vadd.f32 %v2981_v50, %v9069_v56  ;;  %s7959_s26 = sld [smem:[#allocation6]] }
 0x228   :  { %v7607_v42 = vadd.f32 %v2982_v39, %v7421_v17  ;;  %v3024_v63 = vsel %vm609_vm0, %v3022_v14, %v3023_v53  ;;  %v7613_v0 = vadd.f32 %v2983_v48, %v7424_v43  ;;  %v3027_v8 = vsel %vm609_vm0, %v3025_v36, %v3026_v57 }
 0x229   :  { %v3030_v60 = vsel %vm609_vm0, %v3028_v31, %v3029_v49  ;;  %v3033_v27 = vsel %vm609_vm0, %v3031_v33, %v3032_v9  ;;  %v3054_v24 = vmul.f32 %v7061_v5, %v3053_v32  ;;  %v3055_v10 = vmul.f32 %v7552_v51, %v3053_v32 }
 0x22a   :  { %9070 = vst [vmem:[#allocation20_spill] sm:$0xff] %v7607_v42  ;;  %9071 = vst [vmem:[#allocation30_spill] sm:$0xff] %v7613_v0  ;;  %v3056_v17 = vmul.f32 %v7070_v15, %v3053_v32  ;;  %v3057_v46 = vmul.f32 %v7559_v34, %v3053_v32  ;;  %v3036_v50 = vsel %vm609_vm0, %v3034_v55, %v3035_v35  ;;  %v3037_v39 = vrot.slane %v3008_v52, 3 }
 0x22b   :  { %v3038_v11 = vrot.slane %v3009_v29, 3  ;;  %v7624_v43 = vadd.f32 %v3024_v63, %v7427_v41  ;;  %v3058_v48 = vmul.f32 %v7076_v18, %v3053_v32  ;;  %v3059_v14 = vmul.f32 %v7566_v62, %v3053_v32 }
 0x22c   :  { %v3060_v9 = vmul.f32 %v6973_v7, %v3053_v32  ;;  %v3061_v33 = vmul.f32 %v7573_v54, %v3053_v32  ;;  %v3062_v53 = vmul.f32 %v7012_v38, %v3053_v32  ;;  %v3063_v36 = vmul.f32 %v7580_v58, %v3053_v32 }
 0x22d   :  { %v3064_v57 = vmul.f32 %v3053_v32, %v7043_v22  ;;  %v3065_v52 = vmul.f32 %v3053_v32, %v7586_v12  ;;  %v3078_v31 = vrot.slane %v3054_v24, 3  ;;  %v3079_v41 = vrot.slane %v3055_v10, 3 }
 0x22e   :  { %v3081_v49 = vrot.slane %v3056_v17, 3  ;;  %v3082_v29 = vrot.slane %v3057_v46, 3  ;;  %v3039_v55 = vsel %vm609_vm0, %v3037_v39, %v3038_v11  ;;  %v7636_v35 = vadd.f32 %v3027_v8, %v7431_v44 }
 0x22f   :  { %v7639_v2 = vadd.f32 %v3030_v60, %v7434_v4  ;;  %v7642_v56 = vadd.f32 %v3033_v27, %v7438_v13  ;;  %v7645_v63 = vadd.f32 %v3036_v50, %v7441_v28  ;;  %v3084_v0 = vrot.slane %v3058_v48, 3 }
 0x230   :  { %v3085_v32 = vrot.slane %v3059_v14, 3  ;;  %v3109_v24 = vstv %s7610_s14  ;;  %v3087_v10 = vrot.slane %v3060_v9, 3  ;;  %v3088_v17 = vrot.slane %v3061_v33, 3  ;;  %s8035_s14 = sld [smem:[#allocation6 + $0xc]] }
 0x231   :  { %9072 = vst [vmem:[#allocation31_spill] sm:$0xff] %v7642_v56  ;;  %9073 = vst [vmem:[#allocation32_spill] sm:$0xff] %v7645_v63  ;;  %v3090_v46 = vrot.slane %v3062_v53, 3  ;;  %v3091_v42 = vrot.slane %v3063_v36, 3  ;;  %v3080_v44 = vsel %vm609_vm0, %v3078_v31, %v3079_v41  ;;  %v3083_v4 = vsel %vm609_vm0, %v3081_v49, %v3082_v29 }
 0x232   :  { %v3093_v8 = vrot.slane %v3064_v57, 3  ;;  %v3094_v60 = vrot.slane %v3065_v52, 3  ;;  %v3110_v13 = vmul.f32 %v7061_v5, %v3109_v24  ;;  %v3111_v28 = vmul.f32 %v7552_v51, %v3109_v24 }
 0x233   :  { %v3112_v27 = vmul.f32 %v7070_v15, %v3109_v24  ;;  %v3113_v50 = vmul.f32 %v7559_v34, %v3109_v24  ;;  %v7659_v39 = vadd.f32 %v3039_v55, %v7444_v1  ;;  %v3086_v11 = vsel %vm609_vm0, %v3084_v0, %v3085_v32  ;;  %v9078_v32 = vld [vmem:[#allocation17_spill] sm:$0xff] }
 0x234   :  { %v3114_v48 = vmul.f32 %v7076_v18, %v3109_v24  ;;  %v3115_v14 = vmul.f32 %v7566_v62, %v3109_v24  ;;  %v3089_v9 = vsel %vm609_vm0, %v3087_v10, %v3088_v17  ;;  %v3092_v33 = vsel %vm609_vm0, %v3090_v46, %v3091_v42 }
 0x235   :  { %9074 = vst [vmem:[#allocation33_spill] sm:$0xff] %v7659_v39  ;;  %v7667_v53 = vadd.f32 %v3080_v44, %v7451_v3  ;;  %v7670_v36 = vadd.f32 %v3083_v4, %v7454_v26  ;;  %v3095_v1 = vsel %vm609_vm0, %v3093_v8, %v3094_v60  ;;  %v3116_v57 = vmul.f32 %v6973_v7, %v3109_v24  ;;  %v9080_v4 = vld [vmem:[#allocation18_spill] sm:$0xff]  ;;  %v9082_v60 = vld [vmem:[#allocation21_spill] sm:$0xff] }
 0x236   :  { %v3117_v0 = vmul.f32 %v7573_v54, %v3109_v24  ;;  %v3118_v52 = vmul.f32 %v7012_v38, %v3109_v24  ;;  %v3134_v31 = vrot.slane %v3110_v13, 3  ;;  %v3135_v41 = vrot.slane %v3111_v28, 3 }
 0x237   :  { %9075 = vst [vmem:[#allocation34_spill] sm:$0xff] %v7667_v53  ;;  %9076 = vst [vmem:[#allocation35_spill] sm:$0xff] %v7670_v36  ;;  %v3137_v49 = vrot.slane %v3112_v27, 3  ;;  %v3138_v42 = vrot.slane %v3113_v50, 3  ;;  %v7677_v3 = vadd.f32 %v3086_v11, %v7457_v61  ;;  %v3119_v26 = vmul.f32 %v7580_v58, %v3109_v24 }
 0x238   :  { %v3140_v29 = vrot.slane %v3114_v48, 3  ;;  %v3141_v55 = vrot.slane %v3115_v14, 3  ;;  %v7681_v10 = vadd.f32 %v3089_v9, %v9078_v32  ;;  %v3120_v17 = vmul.f32 %v3109_v24, %v7043_v22 }
 0x239   :  { %9077 = vst [vmem:[#allocation36_spill] sm:$0xff] %v7677_v3  ;;  %v3121_v46 = vmul.f32 %v3109_v24, %v7586_v12  ;;  %v3165_v44 = vstv %s7648_s15  ;;  %v7687_v8 = vadd.f32 %v3092_v33, %v9080_v4  ;;  %v7690_v13 = vadd.f32 %v3095_v1, %v9082_v60  ;;  %s8041_s15 = sld [smem:[#allocation6 + $0xe]] }
 0x23a   :  { %9079 = vst [vmem:[#allocation37_spill] sm:$0xff] %v7681_v10  ;;  %v3143_v61 = vrot.slane %v3116_v57, 3  ;;  %v7693_v28 = vstv %s7652_s16  ;;  %v3136_v27 = vsel %vm609_vm0, %v3134_v31, %v3135_v41  ;;  %v3139_v50 = vsel %vm609_vm0, %v3137_v49, %v3138_v42  ;;  %s8052_s16 = sld [smem:[#allocation6 + $0xf]] }
 0x23b   :  { %9081 = vst [vmem:[#allocation16_spill] sm:$0xff] %v7687_v8  ;;  %9083 = vst [vmem:[#allocation17_spill] sm:$0xff] %v7690_v13  ;;  %v3144_v11 = vrot.slane %v3117_v0, 3  ;;  %v3146_v48 = vrot.slane %v3118_v52, 3  ;;  %v3142_v14 = vsel %vm609_vm0, %v3140_v29, %v3141_v55  ;;  %v3147_v9 = vrot.slane %v3119_v26, 3 }
 0x23c   :  { %v3166_v24 = vmul.f32 %v7061_v5, %v3165_v44  ;;  %v3167_v33 = vmul.f32 %v7552_v51, %v3165_v44  ;;  %v3149_v32 = vrot.slane %v3120_v17, 3  ;;  %v3150_v4 = vrot.slane %v3121_v46, 3 }
 0x23d   :  { %v3168_v1 = vmul.f32 %v7070_v15, %v3165_v44  ;;  %v3169_v57 = vmul.f32 %v7559_v34, %v3165_v44  ;;  %v3170_v60 = vmul.f32 %v7076_v18, %v3165_v44  ;;  %v3171_v31 = vmul.f32 %v7566_v62, %v3165_v44 }
 0x23e   :  { %v3172_v0 = vmul.f32 %v6973_v7, %v3165_v44  ;;  %v3173_v52 = vmul.f32 %v7573_v54, %v3165_v44  ;;  %v3174_v41 = vmul.f32 %v7012_v38, %v3165_v44  ;;  %v3175_v49 = vmul.f32 %v7580_v58, %v3165_v44 }
 0x23f   :  { %v3176_v42 = vmul.f32 %v3165_v44, %v7043_v22  ;;  %v3177_v26 = vmul.f32 %v3165_v44, %v7586_v12  ;;  %v3145_v29 = vsel %vm609_vm0, %v3143_v61, %v3144_v11  ;;  %v3148_v55 = vsel %vm609_vm0, %v3146_v48, %v3147_v9 }
 0x240   :  { %v3190_v17 = vrot.slane %v3166_v24, 3  ;;  %v3191_v46 = vrot.slane %v3167_v33, 3  ;;  %v3151_v13 = vsel %vm609_vm0, %v3149_v32, %v3150_v4  ;;  %v7714_v7 = vadd.f32 %v3136_v27, %v7485_v30 }
 0x241   :  { %v3193_v8 = vrot.slane %v3168_v1, 3  ;;  %v3194_v10 = vrot.slane %v3169_v57, 3  ;;  %v3196_v38 = vrot.slane %v3170_v60, 3  ;;  %v3197_v3 = vrot.slane %v3171_v31, 3  ;;  %v9085_v57 = vld [vmem:[#allocation23_spill] sm:$0xff]  ;;  %v9086_v31 = vld [vmem:[#allocation24_spill] sm:$0xff] }
 0x242   :  { %v3199_v36 = vrot.slane %v3172_v0, 3  ;;  %v3200_v53 = vrot.slane %v3173_v52, 3  ;;  %v3202_v39 = vrot.slane %v3174_v41, 3  ;;  %v3203_v63 = vrot.slane %v3175_v49, 3  ;;  %v9087_v52 = vld [vmem:[#allocation25_spill] sm:$0xff]  ;;  %v4568_v49 = vld [vmem:[%s8858_s0 + $0x70] sm:$0xff] }
 0x243   :  { %v3205_v44 = vrot.slane %v3176_v42, 3  ;;  %v3206_v56 = vrot.slane %v3177_v26, 3  ;;  %v7719_v61 = vadd.f32 %v3139_v50, %v7488_v45  ;;  %v7722_v11 = vadd.f32 %v3142_v14, %v7491_v16 }
 0x244   :  { %v7725_v30 = vadd.f32 %v3145_v29, %v7497_v59  ;;  %v3192_v27 = vsel %vm609_vm0, %v3190_v17, %v3191_v46  ;;  %v3222_v48 = vmul.f32 %v7061_v5, %v7693_v28  ;;  %v3223_v9 = vmul.f32 %v7552_v51, %v7693_v28 }
 0x245   :  { %v3224_v24 = vmul.f32 %v7070_v15, %v7693_v28  ;;  %v3225_v45 = vmul.f32 %v7559_v34, %v7693_v28  ;;  %v7737_v16 = vadd.f32 %v3148_v55, %v7500_v19  ;;  %v7740_v59 = vadd.f32 %v3151_v13, %v7503_v47 }
 0x246   :  { %v3195_v50 = vsel %vm609_vm0, %v3193_v8, %v3194_v10  ;;  %v3198_v14 = vsel %vm609_vm0, %v3196_v38, %v3197_v3  ;;  %v3201_v33 = vsel %vm609_vm0, %v3199_v36, %v3200_v53  ;;  %v3204_v32 = vsel %vm609_vm0, %v3202_v39, %v3203_v63  ;;  %v4567_v3 = vld [vmem:[%s8858_s0 + $0x60] sm:$0xff]  ;;  %v9084_v8 = vld [vmem:[#allocation22_spill] sm:$0xff] }
 0x247   :  { %v3207_v4 = vsel %vm609_vm0, %v3205_v44, %v3206_v56  ;;  %v7748_v1 = vadd.f32 %v3192_v27, %v7506_v37  ;;  %v3226_v19 = vmul.f32 %v7076_v18, %v7693_v28  ;;  %v3227_v47 = vmul.f32 %v7566_v62, %v7693_v28 }
 0x248   :  { %v3228_v53 = vmul.f32 %v4567_v3, %v7693_v28  ;;  %v3229_v63 = vmul.f32 %v7573_v54, %v7693_v28  ;;  %v3246_v56 = vrot.slane %v3222_v48, 3  ;;  %v3247_v39 = vrot.slane %v3223_v9, 3 }
 0x249   :  { %v3249_v37 = vrot.slane %v3224_v24, 3  ;;  %v3250_v36 = vrot.slane %v3225_v45, 3  ;;  %v7761_v10 = vadd.f32 %v3195_v50, %v7509_v23  ;;  %v7764_v13 = vadd.f32 %v3198_v14, %v9084_v8 }
 0x24a   :  { %v7767_v60 = vadd.f32 %v3201_v33, %v9085_v57  ;;  %v7770_v0 = vadd.f32 %v3204_v32, %v9086_v31  ;;  %v7773_v41 = vadd.f32 %v3207_v4, %v9087_v52  ;;  %v3230_v42 = vmul.f32 %v4568_v49, %v7693_v28 }
 0x24b   :  { %v3231_v23 = vmul.f32 %v7580_v58, %v7693_v28  ;;  %v3277_v26 = vstv %s7716_s17  ;;  %v3232_v29 = vmul.f32 %v7693_v28, %v7043_v22  ;;  %v3233_v55 = vmul.f32 %v7693_v28, %v7586_v12  ;;  %s8058_s17 = sld [smem:[#allocation6 + $0x10]] }
 0x24c   :  { %v3252_v17 = vrot.slane %v3226_v19, 3  ;;  %v3253_v46 = vrot.slane %v3227_v47, 3  ;;  %v3248_v38 = vsel %vm609_vm0, %v3246_v56, %v3247_v39  ;;  %v3251_v44 = vsel %vm609_vm0, %v3249_v37, %v3250_v36 }
 0x24d   :  { %v3255_v27 = vrot.slane %v3228_v53, 3  ;;  %v3256_v48 = vrot.slane %v3229_v63, 3  ;;  %v3278_v9 = vmul.f32 %v7061_v5, %v3277_v26  ;;  %v3279_v24 = vmul.f32 %v7552_v51, %v3277_v26 }
 0x24e   :  { %v3280_v45 = vmul.f32 %v7070_v15, %v3277_v26  ;;  %v3281_v50 = vmul.f32 %v7559_v34, %v3277_v26  ;;  %v3258_v22 = vrot.slane %v3230_v42, 3  ;;  %v3259_v14 = vrot.slane %v3231_v23, 3  ;;  %v4569_v15 = vld [vmem:[%s8858_s0 + $0x80] sm:$0xff]  ;;  %s7806_s0 = sld [smem:[#allocation4 + $0x2]]  ;;  %v9088_v42 = vld [vmem:[#allocation26_spill] sm:$0xff] }
 0x24f   :  { %v3282_v28 = vmul.f32 %v7076_v18, %v3277_v26  ;;  %v3283_v33 = vmul.f32 %v7566_v62, %v3277_v26  ;;  %v3284_v32 = vmul.f32 %v4567_v3, %v3277_v26  ;;  %v3285_v4 = vmul.f32 %v7573_v54, %v3277_v26 }
 0x250   :  { %v3286_v19 = vmul.f32 %v4568_v49, %v3277_v26  ;;  %v3287_v5 = vmul.f32 %v7580_v58, %v3277_v26  ;;  %v3261_v47 = vrot.slane %v3232_v29, 3  ;;  %v3262_v51 = vrot.slane %v3233_v55, 3 }
 0x251   :  { %v3288_v34 = vmul.f32 %v4569_v15, %v3277_v26  ;;  %v3289_v53 = vmul.f32 %v3277_v26, %v7586_v12  ;;  %v3302_v18 = vrot.slane %v3278_v9, 3  ;;  %v3303_v62 = vrot.slane %v3279_v24, 3  ;;  %v9089_v26 = vld [vmem:[#allocation27_spill] sm:$0xff]  ;;  %v9094_v15 = vld [vmem:[#allocation32_spill] sm:$0xff] }
 0x252   :  { %v3305_v63 = vrot.slane %v3280_v45, 3  ;;  %v3306_v3 = vrot.slane %v3281_v50, 3  ;;  %v3254_v54 = vsel %vm609_vm0, %v3252_v17, %v3253_v46  ;;  %v3257_v56 = vsel %vm609_vm0, %v3255_v27, %v3256_v48  ;;  %v9090_v46 = vld [vmem:[#allocation28_spill] sm:$0xff]  ;;  %v9091_v48 = vld [vmem:[#allocation29_spill] sm:$0xff]  ;;  %v9092_v50 = vld [vmem:[#allocation19_spill] sm:$0xff] }
 0x253   :  { %v3308_v58 = vrot.slane %v3282_v28, 3  ;;  %v3309_v39 = vrot.slane %v3283_v33, 3  ;;  %v3311_v37 = vrot.slane %v3284_v32, 3  ;;  %v3312_v36 = vrot.slane %v3285_v4, 3 }
 0x254   :  { %v3314_v8 = vrot.slane %v3286_v19, 3  ;;  %v3315_v57 = vrot.slane %v3287_v5, 3  ;;  %v3260_v12 = vsel %vm609_vm0, %v3258_v22, %v3259_v14  ;;  %v3263_v31 = vsel %vm609_vm0, %v3261_v47, %v3262_v51 }
 0x255   :  { %v3317_v52 = vrot.slane %v3288_v34, 3  ;;  %v3318_v49 = vrot.slane %v3289_v53, 3  ;;  %v7811_v23 = vadd.f32 %v3248_v38, %v9088_v42  ;;  %v7814_v29 = vadd.f32 %v3251_v44, %v9089_v26  ;;  %v9095_v34 = vld [vmem:[#allocation33_spill] sm:$0xff]  ;;  %v9096_v53 = vld [vmem:[#allocation34_spill] sm:$0xff] }
 0x256   :  { %v3304_v55 = vsel %vm609_vm0, %v3302_v18, %v3303_v62  ;;  %v3307_v17 = vsel %vm609_vm0, %v3305_v63, %v3306_v3  ;;  %v7819_v27 = vadd.f32 %v3254_v54, %v9090_v46  ;;  %v7822_v9 = vadd.f32 %v3257_v56, %v9091_v48  ;;  %v9097_v18 = vld [vmem:[#allocation35_spill] sm:$0xff]  ;;  %v9098_v62 = vld [vmem:[#allocation36_spill] sm:$0xff]  ;;  %v9100_v56 = vld [vmem:[#allocation30_spill] sm:$0xff] }
 0x257   :  { %v3310_v24 = vsel %vm609_vm0, %v3308_v58, %v3309_v39  ;;  %v3333_v45 = vstv %s7794_s20  ;;  %v3274_v38 = vadd.f32 %v3260_v12, %v9092_v50  ;;  %v7828_v22 = vadd.f32 %v3263_v31, %v7589_v40  ;;  %v9099_v3 = vld [vmem:[#allocation20_spill] sm:$0xff]  ;;  %v9101_v39 = vld [vmem:[#allocation37_spill] sm:$0xff]  ;;  %s8094_s20 = sld [smem:[#allocation6 + $0x17]] }
 0x258   :  { %v3313_v44 = vsel %vm609_vm0, %v3311_v37, %v3312_v36  ;;  %v3316_v14 = vsel %vm609_vm0, %v3314_v8, %v3315_v57  ;;  %v3319_v28 = vsel %vm609_vm0, %v3317_v52, %v3318_v49  ;;  %v7836_v33 = vadd.f32 %v3304_v55, %v7592_v6  ;;  %v9102_v36 = vld [vmem:[#allocation16_spill] sm:$0xff]  ;;  %v9103_v52 = vld [vmem:[#allocation17_spill] sm:$0xff] }
 0x259   :  { %v7839_v32 = vadd.f32 %v3307_v17, %v7595_v20  ;;  %v3347_v4 = vstv %s7802_s23  ;;  %v7843_v19 = vadd.f32 %v3310_v24, %v7601_v21  ;;  %v7846_v40 = vadd.f32 %v3333_v45, %v7624_v43  ;;  %v9093_v20 = vld [vmem:[#allocation31_spill] sm:$0xff]  ;;  %s8147_s23 = sld [smem:[#allocation7 + $0x1]] }
 0x25a   :  { %v7849_v5 = vadd.f32 %v3333_v45, %v7636_v35  ;;  %v7852_v47 = vadd.f32 %v3333_v45, %v7639_v2  ;;  %v7857_v6 = vadd.f32 %v3313_v44, %v7604_v25  ;;  %v7860_v51 = vadd.f32 %v3333_v45, %v9093_v20 }
 0x25b   :  { %v7863_v21 = vadd.f32 %v3333_v45, %v9094_v15  ;;  %v7866_v43 = vadd.f32 %v3333_v45, %v9095_v34  ;;  %v7869_v35 = vadd.f32 %v3347_v4, %v9096_v53  ;;  %v7872_v2 = vadd.f32 %v3347_v4, %v9097_v18 }
 0x25c   :  { %v7875_v63 = vadd.f32 %v3347_v4, %v9098_v62  ;;  %v3361_v25 = vstv %s7806_s0  ;;  %v7879_v54 = vadd.f32 %v3316_v14, %v9099_v3  ;;  %v7882_v58 = vadd.f32 %v3319_v28, %v9100_v56  ;;  %s8156_s0 = sld [smem:[#allocation6 + $0x18]] }
 0x25d   :  { %v3351_v37 = vadd.f32 %v3347_v4, %v9101_v39  ;;  %v3352_v8 = vadd.f32 %v3347_v4, %v9102_v36  ;;  %v3340_v57 = vmax.f32 %v7846_v40, 0.0  ;;  %v3341_v12 = vmax.f32 %v7849_v5, 0.0 }
 0x25e   :  { %v3342_v31 = vmax.f32 %v7852_v47, 0.0  ;;  %v3353_v49 = vadd.f32 %v3347_v4, %v9103_v52  ;;  %v3343_v42 = vmax.f32 %v7860_v51, 0.0  ;;  %v3344_v26 = vmax.f32 %v7863_v21, 0.0 }
 0x25f   :  { %v3345_v55 = vmax.f32 %v7866_v43, 0.0  ;;  %v3362_v17 = vadd.f32 %v3361_v25, %v7714_v7  ;;  %v3354_v46 = vmax.f32 %v7869_v35, 0.0  ;;  %v3355_v48 = vmax.f32 %v7872_v2, 0.0 }
 0x260   :  { %v3356_v24 = vmax.f32 %v7875_v63, 0.0  ;;  %v3375_v45 = vstv %s7832_s24  ;;  %v3357_v50 = vmax.f32 %v3351_v37, 0.0  ;;  %v3358_v44 = vmax.f32 %v3352_v8, 0.0  ;;  %s8158_s24 = sld [smem:[#allocation6 + $0x19]] }
 0x261   :  { %v3363_v14 = vadd.f32 %v3361_v25, %v7719_v61  ;;  %v3364_v28 = vadd.f32 %v3361_v25, %v7722_v11  ;;  %v3359_v4 = vmax.f32 %v3353_v49, 0.0  ;;  %v3365_v40 = vadd.f32 %v3361_v25, %v7725_v30 }
 0x262   :  { %v3366_v7 = vadd.f32 %v3361_v25, %v7737_v16  ;;  %v3389_v5 = vstv %s7854_s25  ;;  %v3367_v47 = vadd.f32 %v3361_v25, %v7740_v59  ;;  %v3368_v20 = vmax.f32 %v3362_v17, 0.0  ;;  %s8180_s25 = sld [smem:[#allocation6 + $0x1a]] }
 0x263   :  { %v7907_v51 = vadd.f32 %v3375_v45, %v7748_v1  ;;  %v7910_v15 = vadd.f32 %v3375_v45, %v7761_v10  ;;  %v7913_v61 = vadd.f32 %v3375_v45, %v7764_v13  ;;  %v7916_v11 = vadd.f32 %v3375_v45, %v7767_v60 }
 0x264   :  { %v7919_v30 = vadd.f32 %v3375_v45, %v7770_v0  ;;  %v7922_v16 = vadd.f32 %v3375_v45, %v7773_v41  ;;  %v3369_v59 = vmax.f32 %v3363_v14, 0.0  ;;  %v3370_v21 = vmax.f32 %v3364_v28, 0.0 }
 0x265   :  { %v7925_v1 = vadd.f32 %v3389_v5, %v7811_v23  ;;  %v7928_v10 = vadd.f32 %v3389_v5, %v7814_v29  ;;  %v3371_v13 = vmax.f32 %v3365_v40, 0.0  ;;  %v7931_v34 = vadd.f32 %v3389_v5, %v7819_v27 }
 0x266   :  { %v7934_v60 = vadd.f32 %v3389_v5, %v7822_v9  ;;  %v7936_v0 = vadd.f32 %v3389_v5, %v3274_v38  ;;  %v3372_v41 = vmax.f32 %v3366_v7, 0.0  ;;  %v3373_v43 = vmax.f32 %v3367_v47, 0.0 }
 0x267   :  { %v3382_v53 = vmax.f32 %v7907_v51, 0.0  ;;  %v3383_v23 = vmax.f32 %v7910_v15, 0.0  ;;  %v3384_v35 = vmax.f32 %v7913_v61, 0.0  ;;  %v3385_v29 = vmax.f32 %v7916_v11, 0.0 }
 0x268   :  { %v3386_v18 = vmax.f32 %v7919_v30, 0.0  ;;  %v3387_v27 = vmax.f32 %v7922_v16, 0.0  ;;  %v7945_v2 = vadd.f32 %v3389_v5, %v7828_v22  ;;  %v3396_v9 = vmax.f32 %v7925_v1, 0.0 }
 0x269   :  { %v3397_v38 = vmax.f32 %v7928_v10, 0.0  ;;  %v3403_v62 = vstv %s7900_s5  ;;  %v3398_v63 = vmax.f32 %v7931_v34, 0.0  ;;  %v3399_v25 = vmax.f32 %v7934_v60, 0.0  ;;  %s8182_s5 = sld [smem:[#allocation6 + $0x1b]] }
 0x26a   :  { %v3400_v3 = vmax.f32 %v7936_v0, 0.0  ;;  %v3416_v56 = vmax.f32 %v3340_v57, %v3341_v12  ;;  %v3421_v39 = vmax.f32 %v3342_v31, %v3343_v42  ;;  %v3426_v37 = vmax.f32 %v3344_v26, %v3345_v55 }
 0x26b   :  { %v3431_v36 = vmax.f32 %v3354_v46, %v3355_v48  ;;  %v3436_v8 = vmax.f32 %v3356_v24, %v3357_v50  ;;  %v3441_v52 = vmax.f32 %v3358_v44, %v3359_v4  ;;  %v3446_v49 = vmax.f32 %v3368_v20, %v3369_v59 }
 0x26c   :  { %v3451_v22 = vmax.f32 %v3370_v21, %v3371_v13  ;;  %v3456_v17 = vmax.f32 %v3372_v41, %v3373_v43  ;;  %v3401_v45 = vmax.f32 %v7945_v2, 0.0  ;;  %v3404_v14 = vadd.f32 %v3403_v62, %v7836_v33 }
 0x26d   :  { %v3405_v28 = vadd.f32 %v3403_v62, %v7839_v32  ;;  %v3406_v40 = vadd.f32 %v3403_v62, %v7843_v19  ;;  %v3407_v57 = vadd.f32 %v3403_v62, %v7857_v6  ;;  %v7963_v12 = vadd.f32 %v3403_v62, %v7879_v54 }
 0x26e   :  { %v7966_v31 = vadd.f32 %v3403_v62, %v7882_v58  ;;  %v3418_v42 = vrot.slane %v3416_v56, 1  ;;  %v3423_v33 = vrot.slane %v3421_v39, 1  ;;  %v3428_v32 = vrot.slane %v3426_v37, 1 }
 0x26f   :  { %v3433_v19 = vrot.slane %v3431_v36, 1  ;;  %v3438_v26 = vrot.slane %v3436_v8, 1  ;;  %v3443_v55 = vrot.slane %v3441_v52, 1  ;;  %v3448_v46 = vrot.slane %v3446_v49, 1 }
 0x270   :  { %v3453_v6 = vrot.slane %v3451_v22, 1  ;;  %v3458_v48 = vrot.slane %v3456_v17, 1  ;;  %v3410_v54 = vmax.f32 %v3404_v14, 0.0  ;;  %v3411_v58 = vmax.f32 %v3405_v28, 0.0 }
 0x271   :  { %v3412_v24 = vmax.f32 %v3406_v40, 0.0  ;;  %v3461_v50 = vmax.f32 %v3382_v53, %v3383_v23  ;;  %v3413_v44 = vmax.f32 %v3407_v57, 0.0  ;;  %v3414_v4 = vmax.f32 %v7963_v12, 0.0 }
 0x272   :  { %v3415_v7 = vmax.f32 %v7966_v31, 0.0  ;;  %v7978_v5 = vmax.f32 %v3416_v56, %v3418_v42  ;;  %v7982_v47 = vmax.f32 %v3421_v39, %v3423_v33  ;;  %v7984_v20 = vmax.f32 %v3426_v37, %v3428_v32 }
 0x273   :  { %v7986_v51 = vmax.f32 %v3431_v36, %v3433_v19  ;;  %v7988_v15 = vmax.f32 %v3436_v8, %v3438_v26  ;;  %v7990_v61 = vmax.f32 %v3441_v52, %v3443_v55  ;;  %v7992_v11 = vmax.f32 %v3446_v49, %v3448_v46 }
 0x274   :  { %v7994_v30 = vmax.f32 %v3451_v22, %v3453_v6  ;;  %v7996_v16 = vmax.f32 %v3456_v17, %v3458_v48  ;;  %v3463_v59 = vrot.slane %v3461_v50, 1  ;;  %v3466_v21 = vmax.f32 %v3384_v35, %v3385_v29 }
 0x275   :  { %v3471_v1 = vmax.f32 %v3386_v18, %v3387_v27  ;;  %v3476_v10 = vmax.f32 %v3396_v9, %v3397_v38  ;;  %v3507_v13 = vstv %s7957_s6  ;;  %v3510_v34 = vstv %s7959_s26  ;;  %s8203_s6 = sld [smem:[#allocation6 + $0x1c]]  ;;  %s8205_s26 = sld [smem:[#allocation6 + $0x1d]] }
 0x276   :  { %v3514_v60 = vstv %s7968_s27  ;;  %v3521_v0 = vstv %s7970_s28  ;;  %v3481_v41 = vmax.f32 %v3398_v63, %v3399_v25  ;;  %v3486_v43 = vmax.f32 %v3400_v3, %v3401_v45  ;;  %s8221_s27 = sld [smem:[#allocation6 + $0x1f]]  ;;  %s8230_s28 = sld [smem:[#allocation6 + $0x1e]] }
 0x277   :  { %v3511_v53 = vmul.f32 %v3510_v34, %v7978_v5  ;;  %v3515_v23 = vmul.f32 %v3514_v60, %v7978_v5  ;;  %v3491_v35 = vmax.f32 %v3410_v54, %v3411_v58  ;;  %v3496_v29 = vmax.f32 %v3412_v24, %v3413_v44 }
 0x278   :  { %v3525_v18 = vstv %s7972_s29  ;;  %v3536_v27 = vstv %s7974_s30  ;;  %v3522_v38 = vmul.f32 %v3521_v0, %v7982_v47  ;;  %v8030_v63 = vmax.f32 %v3461_v50, %v3463_v59  ;;  %s8241_s29 = sld [smem:[#allocation6 + $0x21]]  ;;  %s8256_s30 = sld [smem:[#allocation6 + $0x20]] }
 0x279   :  { %v3512_v2 = vadd.f32 %v3511_v53, %v3507_v13  ;;  %v3517_v9 = vrot.slane %v3515_v23, 2  ;;  %v3526_v62 = vmul.f32 %v3525_v18, %v7982_v47  ;;  %v3468_v25 = vrot.slane %v3466_v21, 1 }
 0x27a   :  { %v3473_v3 = vrot.slane %v3471_v1, 1  ;;  %v3532_v56 = vstv %s7980_s8  ;;  %v3478_v39 = vrot.slane %v3476_v10, 1  ;;  %v3537_v8 = vmul.f32 %v3536_v27, %v7986_v51  ;;  %s8264_s8 = sld [smem:[#allocation6 + $0x23]] }
 0x27b   :  { %v3519_v37 = vadd.f32 %v3517_v9, %v3512_v2  ;;  %v3528_v36 = vrot.slane %v3526_v62, 2  ;;  %v3483_v52 = vrot.slane %v3481_v41, 1  ;;  %v3488_v49 = vrot.slane %v3486_v43, 1 }
 0x27c   :  { %v3501_v22 = vmax.f32 %v3414_v4, %v3415_v7  ;;  %v3547_v17 = vstv %s7998_s9  ;;  %v3493_v45 = vrot.slane %v3491_v35, 1  ;;  %v3498_v14 = vrot.slane %v3496_v29, 1  ;;  %s8274_s9 = sld [smem:[#allocation6 + $0x25]] }
 0x27d   :  { %v3523_v28 = vadd.f32 %v3522_v38, %v3519_v37  ;;  %v3533_v40 = vmul.f32 %v3532_v56, %v7986_v51  ;;  %v8046_v57 = vmax.f32 %v3466_v21, %v3468_v25  ;;  %v8048_v12 = vmax.f32 %v3471_v1, %v3473_v3 }
 0x27e   :  { %v3543_v31 = vstv %s8004_s2  ;;  %v3558_v42 = vstv %s8006_s4  ;;  %v3539_v32 = vrot.slane %v3537_v8, 2  ;;  %v3548_v19 = vmul.f32 %v3547_v17, %v7988_v15  ;;  %s8283_s2 = sld [smem:[#allocation6 + $0x22]]  ;;  %s8299_s4 = sld [smem:[#allocation6 + $0x24]] }
 0x27f   :  { %v3530_v33 = vadd.f32 %v3528_v36, %v3523_v28  ;;  %v3569_v26 = vstv %s8014_s10  ;;  %v8060_v55 = vmax.f32 %v3476_v10, %v3478_v39  ;;  %v8062_v46 = vmax.f32 %v3481_v41, %v3483_v52  ;;  %s8308_s10 = sld [smem:[#allocation6 + $0x26]] }
 0x280   :  { %v3503_v6 = vrot.slane %v3501_v22, 1  ;;  %v3580_v48 = vstv %s8018_s11  ;;  %v3544_v58 = vmul.f32 %v3543_v31, %v7988_v15  ;;  %v3554_v24 = vstv %s8028_s12  ;;  %s8310_s11 = sld [smem:[#allocation6 + $0x27]]  ;;  %s8315_s12 = sld [smem:[#allocation6 + $0x28]] }
 0x281   :  { %v3534_v54 = vadd.f32 %v3533_v40, %v3530_v33  ;;  %v3559_v50 = vmul.f32 %v3558_v42, %v7992_v11  ;;  %v8076_v44 = vmax.f32 %v3486_v43, %v3488_v49  ;;  %v3565_v4 = vstv %s8033_s13  ;;  %s8330_s13 = sld [smem:[#allocation6 + $0x29]] }
 0x282   :  { %v3570_v7 = vmul.f32 %v3569_v26, %v7994_v30  ;;  %v3576_v59 = vstv %s8035_s14  ;;  %v8085_v21 = vmax.f32 %v3491_v35, %v3493_v45  ;;  %v3550_v10 = vrot.slane %v3548_v19, 2  ;;  %s8360_s14 = sld [smem:[#allocation6 + $0x2a]] }
 0x283   :  { %v3541_v1 = vadd.f32 %v3539_v32, %v3534_v54  ;;  %v8090_v41 = vmul.f32 %v3580_v48, %v8030_v63  ;;  %v8096_v43 = vmax.f32 %v3496_v29, %v3498_v14  ;;  %v8098_v53 = vmax.f32 %v3501_v22, %v3503_v6 }
 0x284   :  { %v3555_v23 = vmul.f32 %v3554_v24, %v7992_v11  ;;  %v3587_v35 = vstv %s8041_s15  ;;  %v3561_v9 = vrot.slane %v3559_v50, 2  ;;  %v3566_v38 = vmul.f32 %v3565_v4, %v7994_v30  ;;  %s8362_s15 = sld [smem:[#allocation6 + $0x2b]] }
 0x285   :  { %v3545_v2 = vadd.f32 %v3544_v58, %v3541_v1  ;;  %v3577_v29 = vmul.f32 %v3576_v59, %v8030_v63  ;;  %v3572_v62 = vrot.slane %v3570_v7, 2  ;;  %v3591_v25 = vstv %s8052_s16  ;;  %s8368_s16 = sld [smem:[#allocation6 + $0x2d]] }
 0x286   :  { %v3642_v3 = vmul.f32 %v3510_v34, %v7982_v47  ;;  %v3644_v39 = vmul.f32 %v3514_v60, %v7982_v47  ;;  %v3583_v36 = vrot.slane %v8090_v41, 2  ;;  %v8125_v8 = vmul.f32 %v3587_v35, %v8046_v57 }
 0x287   :  { %v3552_v37 = vadd.f32 %v3550_v10, %v3545_v2  ;;  %v3598_v52 = vstv %s8058_s17  ;;  %v3649_v34 = vmul.f32 %v3521_v0, %v7984_v20  ;;  %v3651_v60 = vmul.f32 %v3525_v18, %v7984_v20  ;;  %s8373_s17 = sld [smem:[#allocation6 + $0x2f]] }
 0x288   :  { %v3643_v49 = vadd.f32 %v3642_v3, %v3507_v13  ;;  %v3646_v22 = vrot.slane %v3644_v39, 2  ;;  %v8139_v14 = vmul.f32 %v3591_v25, %v8046_v57  ;;  %v3602_v28 = vstv %s8072_s1  ;;  %s8383_s1 = sld [smem:[#allocation6 + $0x2c]] }
 0x289   :  { %v3556_v45 = vadd.f32 %v3555_v23, %v3552_v37  ;;  %v3613_v40 = vstv %s8074_s3  ;;  %v3624_v33 = vstv %s8083_s18  ;;  %v3653_v32 = vrot.slane %v3651_v60, 2  ;;  %s8385_s3 = sld [smem:[#allocation6 + $0x2e]]  ;;  %s8429_s18 = sld [smem:[#allocation7 + $0x2]] }
 0x28a   :  { %v3648_v13 = vadd.f32 %v3646_v22, %v3643_v49  ;;  %v3658_v0 = vmul.f32 %v3536_v27, %v7988_v15  ;;  %v8152_v19 = vmul.f32 %v3598_v52, %v8060_v55  ;;  %v3609_v6 = vstv %s8092_s19  ;;  %s8436_s19 = sld [smem:[#allocation6 + $0x30]] }
 0x28b   :  { %v3563_v18 = vadd.f32 %v3561_v9, %v3556_v45  ;;  %v3635_v54 = vstv %s8094_s20  ;;  %v8163_v58 = vmul.f32 %v3602_v28, %v8060_v55  ;;  %v3620_v27 = vstv %s8104_s21  ;;  %s8438_s20 = sld [smem:[#allocation6 + $0x31]]  ;;  %s8453_s21 = sld [smem:[#allocation6 + $0x32]] }
 0x28c   :  { %v3650_v50 = vadd.f32 %v3649_v34, %v3648_v13  ;;  %v3656_v7 = vmul.f32 %v3532_v56, %v7988_v15  ;;  %v8172_v10 = vmul.f32 %v3613_v40, %v8062_v46  ;;  %v8177_v41 = vmul.f32 %v3624_v33, %v8085_v21 }
 0x28d   :  { %v3567_v1 = vadd.f32 %v3566_v38, %v3563_v18  ;;  %v3631_v23 = vstv %s8112_s22  ;;  %v8187_v2 = vmul.f32 %v3635_v54, %v8096_v43  ;;  %v3660_v9 = vrot.slane %v3658_v0, 2  ;;  %s8455_s22 = sld [smem:[#allocation6 + $0x33]] }
 0x28e   :  { %v3655_v56 = vadd.f32 %v3653_v32, %v3650_v50  ;;  %v3665_v38 = vmul.f32 %v3547_v17, %v7990_v61  ;;  %v3594_v39 = vrot.slane %v8139_v14, 2  ;;  %v8196_v37 = vmul.f32 %v3609_v6, %v8062_v46 }
 0x28f   :  { %v3574_v3 = vadd.f32 %v3572_v62, %v3567_v1  ;;  %v8201_v49 = vmul.f32 %v3620_v27, %v8085_v21  ;;  %v3605_v17 = vrot.slane %v8163_v58, 2  ;;  %v8211_v62 = vmul.f32 %v3631_v23, %v8096_v43 }
 0x290   :  { %v3657_v22 = vadd.f32 %v3656_v7, %v3655_v56  ;;  %v3663_v34 = vmul.f32 %v3543_v31, %v7990_v61  ;;  %v3616_v45 = vrot.slane %v8172_v10, 2  ;;  %v3627_v14 = vrot.slane %v8177_v41, 2 }
 0x291   :  { %v3578_v60 = vadd.f32 %v3577_v29, %v3574_v3  ;;  %v3672_v13 = vmul.f32 %v3558_v42, %v7994_v30  ;;  %v3667_v18 = vrot.slane %v3665_v38, 2  ;;  %v3670_v31 = vmul.f32 %v3554_v24, %v7994_v30 }
 0x292   :  { %v3662_v0 = vadd.f32 %v3660_v9, %v3657_v22  ;;  %v3728_v58 = vstv %s8147_s23  ;;  %v3731_v50 = vstv %s8156_s0  ;;  %v8866_v7 = vstv %s8158_s24  ;;  %s8473_s23 = sld [smem:[#allocation6 + $0x34]]  ;;  %s8475_s0 = sld [smem:[#allocation6 + $0x35]] }
 0x293   :  { %v3585_v29 = vadd.f32 %v3583_v36, %v3578_v60  ;;  %v3679_v1 = vmul.f32 %v3569_v26, %v7996_v16  ;;  %v3732_v56 = vmul.f32 %v3731_v50, %v7978_v5  ;;  %v3736_v24 = vmul.f32 %v8866_v7, %v7978_v5 }
 0x294   :  { %v3664_v42 = vadd.f32 %v3663_v34, %v3662_v0  ;;  %v3674_v9 = vrot.slane %v3672_v13, 2  ;;  %v3742_v38 = vstv %s8180_s25  ;;  %v3746_v3 = vstv %s8182_s5  ;;  %s8497_s25 = sld [smem:[#allocation6 + $0x36]]  ;;  %s8512_s5 = sld [smem:[#allocation6 + $0x39]] }
 0x295   :  { %v3589_v36 = vadd.f32 %v8125_v8, %v3585_v29  ;;  %v3733_v34 = vadd.f32 %v3732_v56, %v3728_v58  ;;  %v3738_v26 = vrot.slane %v3736_v24, 2  ;;  %v3743_v60 = vmul.f32 %v3742_v38, %v7982_v47 }
 0x296   :  { %v3669_v22 = vadd.f32 %v3667_v18, %v3664_v42  ;;  %v3747_v32 = vmul.f32 %v3746_v3, %v7982_v47  ;;  %v3753_v7 = vstv %s8203_s6  ;;  %v3757_v8 = vstv %s8205_s26  ;;  %s8524_s6 = sld [smem:[#allocation6 + $0x38]]  ;;  %s8533_s26 = sld [smem:[#allocation6 + $0x3b]] }
 0x297   :  { %v3596_v0 = vadd.f32 %v3594_v39, %v3589_v36  ;;  %v3677_v18 = vmul.f32 %v3565_v4, %v7996_v16  ;;  %v3740_v29 = vadd.f32 %v3738_v26, %v3733_v34  ;;  %v3758_v42 = vmul.f32 %v3757_v8, %v7986_v51 }
 0x298   :  { %v3671_v13 = vadd.f32 %v3670_v31, %v3669_v22  ;;  %v3686_v56 = vmul.f32 %v3580_v48, %v8046_v57  ;;  %v3749_v24 = vrot.slane %v3747_v32, 2  ;;  %v8867_v36 = vstv %s8221_s27 }
 0x299   :  { %v3600_v39 = vadd.f32 %v8152_v19, %v3596_v0  ;;  %v3681_v22 = vrot.slane %v3679_v1, 2  ;;  %v3744_v4 = vadd.f32 %v3743_v60, %v3740_v29  ;;  %v3754_v34 = vmul.f32 %v3753_v7, %v7986_v51 }
 0x29a   :  { %v3676_v31 = vadd.f32 %v3674_v9, %v3671_v13  ;;  %v3684_v19 = vmul.f32 %v3576_v59, %v8046_v57  ;;  %v3764_v48 = vstv %s8230_s28  ;;  %v3769_v32 = vmul.f32 %v8867_v36, %v7988_v15  ;;  %s8548_s28 = sld [smem:[#allocation6 + $0x3a]] }
 0x29b   :  { %v3607_v26 = vadd.f32 %v3605_v17, %v3600_v39  ;;  %v3751_v9 = vadd.f32 %v3749_v24, %v3744_v4  ;;  %v3760_v60 = vrot.slane %v3758_v42, 2  ;;  %v3779_v0 = vstv %s8241_s29  ;;  %s8558_s29 = sld [smem:[#allocation6 + $0x3c]] }
 0x29c   :  { %v3678_v1 = vadd.f32 %v3677_v18, %v3676_v31  ;;  %v3691_v17 = vmul.f32 %v3587_v35, %v8048_v12  ;;  %v3693_v59 = vmul.f32 %v3591_v25, %v8048_v12  ;;  %v3698_v29 = vmul.f32 %v3598_v52, %v8062_v46 }
 0x29d   :  { %v3611_v13 = vadd.f32 %v8196_v37, %v3607_v26  ;;  %v3688_v36 = vrot.slane %v3686_v56, 2  ;;  %v3755_v18 = vadd.f32 %v3754_v34, %v3751_v9  ;;  %v3765_v42 = vmul.f32 %v3764_v48, %v7988_v15 }
 0x29e   :  { %v3683_v39 = vadd.f32 %v3681_v22, %v3678_v1  ;;  %v3700_v35 = vmul.f32 %v3602_v28, %v8062_v46  ;;  %v3771_v37 = vrot.slane %v3769_v32, 2  ;;  %v3775_v25 = vstv %s8256_s30  ;;  %s8576_s30 = sld [smem:[#allocation6 + $0x3e]] }
 0x29f   :  { %v3780_v52 = vmul.f32 %v3779_v0, %v7992_v11  ;;  %v3618_v56 = vadd.f32 %v3616_v45, %v3611_v13  ;;  %v3762_v31 = vadd.f32 %v3760_v60, %v3755_v18  ;;  %v3790_v28 = vstv %s8264_s8  ;;  %s8578_s8 = sld [smem:[#allocation6 + $0x3f]] }
 0x2a0   :  { %v3685_v24 = vadd.f32 %v3684_v19, %v3683_v39  ;;  %v3695_v22 = vrot.slane %v3693_v59, 2  ;;  %v3705_v4 = vmul.f32 %v3609_v6, %v8076_v44  ;;  %v8323_v34 = vmul.f32 %v3613_v40, %v8076_v44 }
 0x2a1   :  { %v8328_v10 = vmul.f32 %v3620_v27, %v8096_v43  ;;  %v3766_v26 = vadd.f32 %v3765_v42, %v3762_v31  ;;  %v3776_v19 = vmul.f32 %v3775_v25, %v7992_v11  ;;  %v3801_v32 = vstv %s8274_s9  ;;  %s8584_s9 = sld [smem:[#allocation6 + $0x40]] }
 0x2a2   :  { %v3690_v45 = vadd.f32 %v3688_v36, %v3685_v24  ;;  %v3702_v6 = vrot.slane %v3700_v35, 2  ;;  %v8339_v40 = vmul.f32 %v3624_v33, %v8096_v43  ;;  %v3786_v1 = vstv %s8283_s2  ;;  %s8612_s2 = sld [smem:[#allocation6 + $0x41]] }
 0x2a3   :  { %v3791_v27 = vmul.f32 %v3790_v28, %v7994_v30  ;;  %v3622_v9 = vadd.f32 %v8201_v49, %v3618_v56  ;;  %v3773_v36 = vadd.f32 %v3771_v37, %v3766_v26  ;;  %v3782_v13 = vrot.slane %v3780_v52, 2 }
 0x2a4   :  { %v3692_v60 = vadd.f32 %v3691_v17, %v3690_v45  ;;  %v3709_v59 = vrot.slane %v8323_v34, 2  ;;  %v8350_v39 = vmul.f32 %v3631_v23, %v8098_v53  ;;  %v8355_v33 = vmul.f32 %v3635_v54, %v8098_v53 }
 0x2a5   :  { %v3802_v18 = vmul.f32 %v3801_v32, %v8030_v63  ;;  %v3777_v17 = vadd.f32 %v3776_v19, %v3773_v36  ;;  %v3787_v23 = vmul.f32 %v3786_v1, %v7994_v30  ;;  %v3797_v42 = vstv %s8299_s4  ;;  %s8614_s4 = sld [smem:[#allocation6 + $0x43]] }
 0x2a6   :  { %v3697_v49 = vadd.f32 %v3695_v22, %v3692_v60  ;;  %v3716_v54 = vrot.slane %v8339_v40, 2  ;;  %v3793_v35 = vrot.slane %v3791_v27, 2  ;;  %v3808_v37 = vstv %s8308_s10  ;;  %s8631_s10 = sld [smem:[#allocation6 + $0x42]] }
 0x2a7   :  { %v3812_v52 = vstv %s8310_s11  ;;  %v3629_v56 = vadd.f32 %v3627_v14, %v3622_v9  ;;  %v3784_v31 = vadd.f32 %v3782_v13, %v3777_v17  ;;  %v8869_v22 = vstv %s8315_s12  ;;  %s8633_s11 = sld [smem:[#allocation6 + $0x45]] }
 0x2a8   :  { %v3699_v24 = vadd.f32 %v3698_v29, %v3697_v49  ;;  %v3798_v45 = vmul.f32 %v3797_v42, %v8030_v63  ;;  %v3804_v26 = vrot.slane %v3802_v18, 2  ;;  %v8868_v19 = vstv %s8330_s13 }
 0x2a9   :  { %v3788_v14 = vadd.f32 %v3787_v23, %v3784_v31  ;;  %v3813_v29 = vmul.f32 %v3812_v52, %v8046_v57  ;;  %v3863_v27 = vmul.f32 %v3731_v50, %v7982_v47  ;;  %v3809_v9 = vmul.f32 %v3808_v37, %v8046_v57 }
 0x2aa   :  { %v3704_v41 = vadd.f32 %v3702_v6, %v3699_v24  ;;  %v3820_v60 = vmul.f32 %v8869_v22, %v8060_v55  ;;  %v9104_v36 = vstv %s8158_s24  ;;  %v3872_v6 = vmul.f32 %v3746_v3, %v7984_v20  ;;  %s8486_s24 = sld [smem:[#allocation6 + $0x37]] }
 0x2ab   :  { %v3865_v13 = vmul.f32 %v9104_v36, %v7982_v47  ;;  %v3633_v18 = vadd.f32 %v8211_v62, %v3629_v56  ;;  %v3795_v49 = vadd.f32 %v3793_v35, %v3788_v14  ;;  %v3824_v50 = vmul.f32 %v8868_v19, %v8060_v55 }
 0x2ac   :  { %v3864_v17 = vadd.f32 %v3863_v27, %v3728_v58  ;;  %v3830_v23 = vstv %s8360_s14  ;;  %v3834_v24 = vstv %s8362_s15  ;;  %v3870_v36 = vmul.f32 %v3742_v38, %v7984_v20  ;;  %s8659_s14 = sld [smem:[#allocation6 + $0x46]]  ;;  %s8683_s15 = sld [smem:[#allocation9]] }
 0x2ad   :  { %v3867_v31 = vrot.slane %v3865_v13, 2  ;;  %v3706_v3 = vadd.f32 %v3705_v4, %v3704_v41  ;;  %v3799_v34 = vadd.f32 %v3798_v45, %v3795_v49  ;;  %v3815_v62 = vrot.slane %v3813_v29, 2 }
 0x2ae   :  { %v3845_v35 = vstv %s8368_s16  ;;  %v3856_v56 = vstv %s8373_s17  ;;  %v3874_v19 = vrot.slane %v3872_v6, 2  ;;  %v3879_v58 = vmul.f32 %v3757_v8, %v7988_v15  ;;  %s8692_s16 = sld [smem:[#allocation10]]  ;;  %s8694_s17 = sld [smem:[#allocation9 + $0x1]] }
 0x2af   :  { %v3869_v14 = vadd.f32 %v3867_v31, %v3864_v17  ;;  %v9105_v27 = vrot.slane %v8187_v2, 2  ;;  %v3806_v22 = vadd.f32 %v3804_v26, %v3799_v34  ;;  %v3831_v38 = vmul.f32 %v3830_v23, %v8062_v46 }
 0x2b0   :  { %v3835_v4 = vmul.f32 %v3834_v24, %v8062_v46  ;;  %v3841_v45 = vstv %s8383_s1  ;;  %v3852_v41 = vstv %s8385_s3  ;;  %v3877_v8 = vmul.f32 %v3753_v7, %v7988_v15  ;;  %s8704_s1 = sld [smem:[#allocation9 + $0x2]]  ;;  %s8715_s3 = sld [smem:[#allocation9 + $0x3]] }
 0x2b1   :  { %v3640_v13 = vadd.f32 %v9105_v27, %v3633_v18  ;;  %v3871_v29 = vadd.f32 %v3870_v36, %v3869_v14  ;;  %v3711_v2 = vadd.f32 %v3709_v59, %v3706_v3  ;;  %v3810_v34 = vadd.f32 %v3809_v9, %v3806_v22 }
 0x2b2   :  { %v8443_v26 = vmul.f32 %v3845_v35, %v8085_v21  ;;  %v8448_v6 = vmul.f32 %v3856_v56, %v8096_v43  ;;  %v3826_v18 = vrot.slane %v3824_v50, 2  ;;  %v3881_v7 = vrot.slane %v3879_v58, 2 }
 0x2b3   :  { %v3876_v49 = vadd.f32 %v3874_v19, %v3871_v29  ;;  %v9106_v17 = vstv %s8221_s27  ;;  %v3817_v59 = vadd.f32 %v3815_v62, %v3810_v34  ;;  %v3837_v22 = vrot.slane %v3835_v4, 2  ;;  %s8544_s27 = sld [smem:[#allocation6 + $0x3d]] }
 0x2b4   :  { %v3886_v31 = vmul.f32 %v9106_v17, %v7990_v61  ;;  %v3842_v9 = vmul.f32 %v3841_v45, %v8085_v21  ;;  %v3893_v36 = vmul.f32 %v3779_v0, %v7994_v30  ;;  %v8463_v50 = vmax.f32 %v3640_v13, 0.0 }
 0x2b5   :  { %v8468_v19 = vmul.f32 %v3852_v41, %v8096_v43  ;;  %v3878_v3 = vadd.f32 %v3877_v8, %v3876_v49  ;;  %v3884_v62 = vmul.f32 %v3764_v48, %v7990_v61  ;;  %v3713_v0 = vadd.f32 %v8328_v10, %v3711_v2 }
 0x2b6   :  { %v3821_v14 = vadd.f32 %v3820_v60, %v3817_v59  ;;  %v3848_v58 = vrot.slane %v8443_v26, 2  ;;  %v3859_v27 = vrot.slane %v8448_v6, 2  ;;  %v3888_v4 = vrot.slane %v3886_v31, 2 }
 0x2b7   :  { %v3883_v13 = vadd.f32 %v3881_v7, %v3878_v3  ;;  %v3891_v48 = vmul.f32 %v3775_v25, %v7994_v30  ;;  %v3898_v29 = vmul.f32 %v3786_v1, %v7996_v16  ;;  %v3895_v60 = vrot.slane %v3893_v36, 2 }
 0x2b8   :  { %v3828_v10 = vadd.f32 %v3826_v18, %v3821_v14  ;;  %v3900_v8 = vmul.f32 %v3790_v28, %v7996_v16  ;;  %v3905_v2 = vmul.f32 %v3797_v42, %v8046_v57  ;;  %v3949_v26 = vstv %s8429_s18  ;;  %s8732_s18 = sld [smem:[#allocation9 + $0x5]] }
 0x2b9   :  { %v3885_v34 = vadd.f32 %v3884_v62, %v3883_v13  ;;  %v3952_v25 = vstv %s8436_s19  ;;  %v3956_v49 = vstv %s8438_s20  ;;  %v3718_v1 = vadd.f32 %v3716_v54, %v3713_v0  ;;  %s8741_s19 = sld [smem:[#allocation9 + $0x4]]  ;;  %s8753_s20 = sld [smem:[#allocation10 + $0x1]] }
 0x2ba   :  { %v3832_v18 = vadd.f32 %v3831_v38, %v3828_v10  ;;  %v3953_v28 = vmul.f32 %v3952_v25, %v7978_v5  ;;  %v3957_v42 = vmul.f32 %v3956_v49, %v7978_v5  ;;  %v3907_v17 = vmul.f32 %v3801_v32, %v8046_v57 }
 0x2bb   :  { %v3890_v7 = vadd.f32 %v3888_v4, %v3885_v34  ;;  %v3963_v31 = vstv %s8453_s21  ;;  %v3967_v59 = vstv %s8455_s22  ;;  %v3974_v3 = vstv %s8473_s23  ;;  %s8755_s21 = sld [smem:[#allocation9 + $0xc]]  ;;  %s8762_s22 = sld [smem:[#allocation9 + $0xd]] }
 0x2bc   :  { %v3839_v40 = vadd.f32 %v3837_v22, %v3832_v18  ;;  %v3954_v54 = vadd.f32 %v3953_v28, %v3949_v26  ;;  %v3959_v38 = vrot.slane %v3957_v42, 2  ;;  %v3964_v36 = vmul.f32 %v3963_v31, %v7982_v47  ;;  %s8764_s23 = sld [smem:[#allocation9 + $0xe]] }
 0x2bd   :  { %v3892_v5 = vadd.f32 %v3891_v48, %v3890_v7  ;;  %v3968_v32 = vmul.f32 %v3967_v59, %v7982_v47  ;;  %v3978_v62 = vstv %s8475_s0  ;;  %v3902_v22 = vrot.slane %v3900_v8, 2  ;;  %s8767_s0 = sld [smem:[#allocation9 + $0x6]] }
 0x2be   :  { %v3843_v0 = vadd.f32 %v3842_v9, %v3839_v40  ;;  %v3961_v14 = vadd.f32 %v3959_v38, %v3954_v54  ;;  %v3979_v13 = vmul.f32 %v3978_v62, %v7986_v51  ;;  %v3914_v48 = vmul.f32 %v3812_v52, %v8048_v12 }
 0x2bf   :  { %v3897_v4 = vadd.f32 %v3895_v60, %v3892_v5  ;;  %v3970_v10 = vrot.slane %v3968_v32, 2  ;;  %v3989_v34 = vstv %s8486_s24  ;;  %v3912_v18 = vmul.f32 %v3808_v37, %v8048_v12  ;;  %s8774_s24 = sld [smem:[#allocation9 + $0x7]] }
 0x2c0   :  { %v9107_v9 = vstv %s8315_s12  ;;  %v3965_v28 = vadd.f32 %v3964_v36, %v3961_v14  ;;  %v3975_v42 = vmul.f32 %v3974_v3, %v7986_v51  ;;  %v3720_v52 = vadd.f32 %v8350_v39, %v3718_v1  ;;  %s8640_s12 = sld [smem:[#allocation6 + $0x47]] }
 0x2c1   :  { %v3919_v8 = vmul.f32 %v9107_v9, %v8062_v46  ;;  %v3850_v60 = vadd.f32 %v3848_v58, %v3843_v0  ;;  %v3899_v7 = vadd.f32 %v3898_v29, %v3897_v4  ;;  %v3985_v40 = vstv %s8497_s25  ;;  %s8776_s25 = sld [smem:[#allocation9 + $0xf]] }
 0x2c2   :  { %v9108_v37 = vstv %s8330_s13  ;;  %v3972_v38 = vadd.f32 %v3970_v10, %v3965_v28  ;;  %v3981_v36 = vrot.slane %v3979_v13, 2  ;;  %v3990_v51 = vmul.f32 %v3989_v34, %v7988_v15  ;;  %s8645_s13 = sld [smem:[#allocation6 + $0x44]] }
 0x2c3   :  { %v8553_v54 = vmul.f32 %v9108_v37, %v8062_v46  ;;  %v3904_v5 = vadd.f32 %v3902_v22, %v3899_v7  ;;  %v3909_v39 = vrot.slane %v3907_v17, 2  ;;  %v3916_v58 = vrot.slane %v3914_v48, 2 }
 0x2c4   :  { %v4000_v29 = vstv %s8512_s5  ;;  %v3926_v1 = vmul.f32 %v3830_v23, %v8076_v44  ;;  %v8567_v32 = vmul.f32 %v3834_v24, %v8076_v44  ;;  %v3976_v0 = vadd.f32 %v3975_v42, %v3972_v38  ;;  %s8786_s5 = sld [smem:[#allocation9 + $0x10]] }
 0x2c5   :  { %v3986_v14 = vmul.f32 %v3985_v40, %v7988_v15  ;;  %v9109_v22 = vrot.slane %v8355_v33, 2  ;;  %v3854_v13 = vadd.f32 %v8468_v19, %v3850_v60  ;;  %v3906_v4 = vadd.f32 %v3905_v2, %v3904_v5 }
 0x2c6   :  { %v3996_v23 = vstv %s8524_s6  ;;  %v3923_v24 = vrot.slane %v8553_v54, 2  ;;  %v3983_v48 = vadd.f32 %v3981_v36, %v3976_v0  ;;  %v3992_v10 = vrot.slane %v3990_v51, 2  ;;  %s8788_s6 = sld [smem:[#allocation9 + $0x11]] }
 0x2c7   :  { %v3725_v17 = vadd.f32 %v9109_v22, %v3720_v52  ;;  %v4001_v33 = vmul.f32 %v4000_v29, %v7992_v11  ;;  %v3911_v19 = vadd.f32 %v3909_v39, %v3906_v4  ;;  %v3933_v2 = vmul.f32 %v3841_v45, %v8096_v43 }
 0x2c8   :  { %v8592_v9 = vmul.f32 %v3845_v35, %v8096_v43  ;;  %v4011_v28 = vstv %s8533_s26  ;;  %v8598_v42 = vmul.f32 %v3856_v56, %v8098_v53  ;;  %v3987_v52 = vadd.f32 %v3986_v14, %v3983_v48  ;;  %s8802_s26 = sld [smem:[#allocation9 + $0x12]] }
 0x2c9   :  { %v3997_v60 = vmul.f32 %v3996_v23, %v7992_v11  ;;  %v4022_v7 = vstv %s8544_s27  ;;  %v3861_v37 = vadd.f32 %v3859_v27, %v3854_v13  ;;  %v3913_v45 = vadd.f32 %v3912_v18, %v3911_v19  ;;  %s8804_s27 = sld [smem:[#allocation9 + $0x13]] }
 0x2ca   :  { %v3930_v35 = vrot.slane %v8567_v32, 2  ;;  %v4007_v54 = vstv %s8548_s28  ;;  %v3994_v38 = vadd.f32 %v3992_v10, %v3987_v52  ;;  %v4003_v36 = vrot.slane %v4001_v33, 2  ;;  %s8813_s28 = sld [smem:[#allocation9 + $0x8]] }
 0x2cb   :  { %v4012_v56 = vmul.f32 %v4011_v28, %v7994_v30  ;;  %v4018_v51 = vstv %s8558_s29  ;;  %v8616_v11 = vmax.f32 %v3725_v17, 0.0  ;;  %v3918_v6 = vadd.f32 %v3916_v58, %v3913_v45  ;;  %s8821_s29 = sld [smem:[#allocation9 + $0x9]] }
 0x2cc   :  { %v8621_v27 = vmul.f32 %v3852_v41, %v8098_v53  ;;  %v4023_v18 = vmul.f32 %v4022_v7, %v8030_v63  ;;  %v3937_v5 = vrot.slane %v8592_v9, 2  ;;  %v3944_v39 = vrot.slane %v8598_v42, 2 }
 0x2cd   :  { %v3998_v32 = vadd.f32 %v3997_v60, %v3994_v38  ;;  %v4008_v0 = vmul.f32 %v4007_v54, %v7994_v30  ;;  %v3920_v41 = vadd.f32 %v3919_v8, %v3918_v6  ;;  %v4019_v58 = vmul.f32 %v4018_v51, %v8030_v63 }
 0x2ce   :  { %v4029_v14 = vstv %s8576_s30  ;;  %v4033_v22 = vstv %s8578_s8  ;;  %v8642_v17 = vmax.f32 %v3861_v37, 0.0  ;;  %v4014_v4 = vrot.slane %v4012_v56, 2  ;;  %s8827_s30 = sld [smem:[#allocation9 + $0x14]]  ;;  %s8829_s8 = sld [smem:[#allocation9 + $0x15]] }
 0x2cf   :  { %v4005_v13 = vadd.f32 %v4003_v36, %v3998_v32  ;;  %v4040_v48 = vstv %s8584_s9  ;;  %v3925_v8 = vadd.f32 %v3923_v24, %v3920_v41  ;;  %v4025_v10 = vrot.slane %v4023_v18, 2  ;;  %s4510_s9 = sld [smem:[#allocation9 + $0xa]] }
 0x2d0   :  { %v4084_v63 = vmul.f32 %v3952_v25, %v7982_v47  ;;  %v4086_v33 = vmul.f32 %v3956_v49, %v7982_v47  ;;  %v4030_v9 = vmul.f32 %v4029_v14, %v8046_v57  ;;  %v4034_v52 = vmul.f32 %v4033_v22, %v8046_v57 }
 0x2d1   :  { %v4009_v19 = vadd.f32 %v4008_v0, %v4005_v13  ;;  %v4093_v24 = vmul.f32 %v3967_v59, %v7984_v20  ;;  %v3927_v60 = vadd.f32 %v3926_v1, %v3925_v8  ;;  %v4091_v49 = vmul.f32 %v3963_v31, %v7984_v20 }
 0x2d2   :  { %v4085_v25 = vadd.f32 %v4084_v63, %v3949_v26  ;;  %v4088_v47 = vrot.slane %v4086_v33, 2  ;;  %v4041_v45 = vmul.f32 %v4040_v48, %v8060_v55  ;;  %v4044_v38 = vstv %s8612_s2  ;;  %s4511_s2 = sld [smem:[#allocation9 + $0xb]] }
 0x2d3   :  { %v4016_v37 = vadd.f32 %v4014_v4, %v4009_v19  ;;  %v4055_v36 = vstv %s8614_s4  ;;  %v3932_v56 = vadd.f32 %v3930_v35, %v3927_v60  ;;  %v4095_v1 = vrot.slane %v4093_v24, 2  ;;  %s4523_s4 = sld [smem:[#allocation9 + $0x16]] }
 0x2d4   :  { %v4090_v59 = vadd.f32 %v4088_v47, %v4085_v25  ;;  %v4100_v26 = vmul.f32 %v3978_v62, %v7988_v15  ;;  %v4036_v18 = vrot.slane %v4034_v52, 2  ;;  %v4051_v20 = vstv %s8631_s10  ;;  %s4524_s10 = sld [smem:[#allocation9 + $0x17]] }
 0x2d5   :  { %v4020_v6 = vadd.f32 %v4019_v58, %v4016_v37  ;;  %v4066_v31 = vstv %s8633_s11  ;;  %v3934_v32 = vadd.f32 %v3933_v2, %v3932_v56  ;;  %v4077_v0 = vstv %s8640_s12 }
 0x2d6   :  { %v4092_v41 = vadd.f32 %v4091_v49, %v4090_v59  ;;  %v4098_v35 = vmul.f32 %v3974_v3, %v7988_v15  ;;  %v4045_v62 = vmul.f32 %v4044_v38, %v8060_v55  ;;  %v4056_v58 = vmul.f32 %v4055_v36, %v8062_v46 }
 0x2d7   :  { %v4027_v13 = vadd.f32 %v4025_v10, %v4020_v6  ;;  %v4062_v4 = vstv %s8645_s13  ;;  %v8699_v15 = vmul.f32 %v4066_v31, %v8085_v21  ;;  %v4102_v2 = vrot.slane %v4100_v26, 2 }
 0x2d8   :  { %v4097_v3 = vadd.f32 %v4095_v1, %v4092_v41  ;;  %v4107_v55 = vmul.f32 %v3989_v34, %v7990_v61  ;;  %v4052_v10 = vmul.f32 %v4051_v20, %v8062_v46  ;;  %v4073_v63 = vstv %s8659_s14 }
 0x2d9   :  { %v4031_v8 = vadd.f32 %v4030_v9, %v4027_v13  ;;  %v8713_v33 = vmul.f32 %v4077_v0, %v8096_v43  ;;  %v3939_v19 = vadd.f32 %v3937_v5, %v3934_v32  ;;  %v4105_v34 = vmul.f32 %v3985_v40, %v7990_v61 }
 0x2da   :  { %v4099_v52 = vadd.f32 %v4098_v35, %v4097_v3  ;;  %v4114_v9 = vmul.f32 %v4000_v29, %v7994_v30  ;;  %v4047_v60 = vrot.slane %v4045_v62, 2  ;;  %v4058_v25 = vrot.slane %v4056_v58, 2 }
 0x2db   :  { %v4038_v24 = vadd.f32 %v4036_v18, %v4031_v8  ;;  %v4063_v47 = vmul.f32 %v4062_v4, %v8085_v21  ;;  %v4069_v49 = vrot.slane %v8699_v15, 2  ;;  %v8730_v5 = vmul.f32 %v4073_v63, %v8096_v43 }
 0x2dc   :  { %v4104_v61 = vadd.f32 %v4102_v2, %v4099_v52  ;;  %v4109_v40 = vrot.slane %v4107_v55, 2  ;;  %v4080_v37 = vrot.slane %v8713_v33, 2  ;;  %v4112_v21 = vmul.f32 %v3996_v23, %v7994_v30 }
 0x2dd   :  { %v4042_v29 = vadd.f32 %v4041_v45, %v4038_v24  ;;  %v4119_v56 = vmul.f32 %v4007_v54, %v7996_v16  ;;  %v3941_v59 = vadd.f32 %v8621_v27, %v3939_v19  ;;  %v4116_v26 = vrot.slane %v4114_v9, 2 }
 0x2de   :  { %v4106_v1 = vadd.f32 %v4105_v34, %v4104_v61  ;;  %v4121_v45 = vmul.f32 %v4011_v28, %v7996_v16  ;;  %v4170_v18 = vstv %s8692_s16  ;;  %v4173_v32 = vstv %s8683_s15 }
 0x2df   :  { %v4049_v6 = vadd.f32 %v4047_v60, %v4042_v29  ;;  %v4177_v41 = vstv %s8694_s17  ;;  %v4174_v30 = vmul.f32 %v4173_v32, %v8463_v50  ;;  %v4184_v54 = vstv %s8704_s1 }
 0x2e0   :  { %v4111_v35 = vadd.f32 %v4109_v40, %v4106_v1  ;;  %v4178_v23 = vmul.f32 %v4177_v41, %v8463_v50  ;;  %v4128_v13 = vmul.f32 %v4022_v7, %v8046_v57  ;;  %v4185_v16 = vmul.f32 %v4184_v54, %v8616_v11 }
 0x2e1   :  { %v4053_v27 = vadd.f32 %v4052_v10, %v4049_v6  ;;  %v4188_v28 = vstv %s8715_s3  ;;  %v4175_v58 = vadd.f32 %v4174_v30, %v4170_v18  ;;  %v3946_v7 = vadd.f32 %v3944_v39, %v3941_v59 }
 0x2e2   :  { %v4113_v62 = vadd.f32 %v4112_v21, %v4111_v35  ;;  %v4180_v15 = vrot.slane %v4178_v23, 2  ;;  %v4189_v3 = vmul.f32 %v4188_v28, %v8616_v11  ;;  %v4123_v55 = vrot.slane %v4121_v45, 2 }
 0x2e3   :  { %v4060_v2 = vadd.f32 %v4058_v25, %v4053_v27  ;;  %v4135_v8 = vmul.f32 %v4033_v22, %v8048_v12  ;;  %v4199_v34 = vstv %s8732_s18  ;;  %v4126_v42 = vmul.f32 %v4018_v51, %v8046_v57 }
 0x2e4   :  { %v4118_v10 = vadd.f32 %v4116_v26, %v4113_v62  ;;  %v4182_v19 = vadd.f32 %v4180_v15, %v4175_v58  ;;  %v4191_v52 = vrot.slane %v4189_v3, 2  ;;  %v4133_v39 = vmul.f32 %v4029_v14, %v8048_v12 }
 0x2e5   :  { %v4064_v9 = vadd.f32 %v4063_v47, %v4060_v2  ;;  %v4195_v24 = vstv %s8741_s19  ;;  %v4130_v60 = vrot.slane %v4128_v13, 2  ;;  %v4140_v25 = vmul.f32 %v4040_v48, %v8062_v46 }
 0x2e6   :  { %v4120_v22 = vadd.f32 %v4119_v56, %v4118_v10  ;;  %v4186_v47 = vadd.f32 %v4185_v16, %v4182_v19  ;;  %v4137_v51 = vrot.slane %v4135_v8, 2  ;;  %v4142_v12 = vmul.f32 %v4044_v38, %v8062_v46 }
 0x2e7   :  { %v4071_v57 = vadd.f32 %v4069_v49, %v4064_v9  ;;  %v4200_v14 = vmul.f32 %v4199_v34, %v8642_v17  ;;  %v3947_v61 = vmax.f32 %v3946_v7, 0.0  ;;  %v4196_v21 = vmul.f32 %v4195_v24, %v8642_v17 }
 0x2e8   :  { %v4125_v40 = vadd.f32 %v4123_v55, %v4120_v22  ;;  %v4193_v29 = vadd.f32 %v4191_v52, %v4186_v47  ;;  %v4239_v56 = vstv %s8753_s20  ;;  %v4242_v59 = vstv %s8755_s21 }
 0x2e9   :  { %v4246_v1 = vstv %s8762_s22  ;;  %v4253_v48 = vstv %s8764_s23  ;;  %v4206_v46 = vstv %s8767_s0  ;;  %v4243_v38 = vmul.f32 %v4242_v59, %v8463_v50 }
 0x2ea   :  { %v4127_v49 = vadd.f32 %v4126_v42, %v4125_v40  ;;  %v4247_v26 = vmul.f32 %v4246_v1, %v8463_v50  ;;  %v4075_v45 = vadd.f32 %v8730_v5, %v4071_v57  ;;  %v4202_v6 = vrot.slane %v4200_v14, 2 }
 0x2eb   :  { %v4210_v18 = vstv %s8774_s24  ;;  %v4257_v32 = vstv %s8776_s25  ;;  %v4244_v35 = vadd.f32 %v4243_v38, %v4239_v56  ;;  %v4254_v23 = vmul.f32 %v4253_v48, %v8616_v11 }
 0x2ec   :  { %v4132_v41 = vadd.f32 %v4130_v60, %v4127_v49  ;;  %v4249_v30 = vrot.slane %v4247_v26, 2  ;;  %v4197_v54 = vadd.f32 %v4196_v21, %v4193_v29  ;;  %v4258_v27 = vmul.f32 %v4257_v32, %v8616_v11 }
 0x2ed   :  { %v4264_v13 = vstv %s8786_s5  ;;  %v4268_v16 = vstv %s8788_s6  ;;  %v4147_v50 = vmul.f32 %v4051_v20, %v8076_v44  ;;  %v4144_v58 = vrot.slane %v4142_v12, 2 }
 0x2ee   :  { %v4134_v28 = vadd.f32 %v4133_v39, %v4132_v41  ;;  %v4251_v5 = vadd.f32 %v4249_v30, %v4244_v35  ;;  %v4269_v62 = vmul.f32 %v4268_v16, %v8642_v17  ;;  %v4149_v15 = vmul.f32 %v4055_v36, %v8076_v44 }
 0x2ef   :  { %v4207_v3 = vmul.f32 %v4206_v46, %v3947_v61  ;;  %v4260_v11 = vrot.slane %v4258_v27, 2  ;;  %v4211_v7 = vmul.f32 %v4210_v18, %v3947_v61  ;;  %v4265_v55 = vmul.f32 %v4264_v13, %v8642_v17 }
 0x2f0   :  { %v4139_v20 = vadd.f32 %v4137_v51, %v4134_v28  ;;  %v4255_v2 = vadd.f32 %v4254_v23, %v4251_v5  ;;  %v4082_v8 = vadd.f32 %v4080_v37, %v4075_v45  ;;  %v4204_v10 = vadd.f32 %v4202_v6, %v4197_v54 }
 0x2f1   :  { %v4275_v19 = vstv %s8802_s26  ;;  %v4279_v44 = vstv %s8804_s27  ;;  %v4271_v34 = vrot.slane %v4269_v62, 2  ;;  %v4154_v42 = vmul.f32 %v4062_v4, %v8096_v43 }
 0x2f2   :  { %v4141_v36 = vadd.f32 %v4140_v25, %v4139_v20  ;;  %v4262_v52 = vadd.f32 %v4260_v11, %v4255_v2  ;;  %v4280_v9 = vmul.f32 %v4279_v44, %v3947_v61  ;;  %v4156_v17 = vmul.f32 %v4066_v31, %v8096_v43 }
 0x2f3   :  { %v4151_v33 = vrot.slane %v4149_v15, 2  ;;  %v4276_v24 = vmul.f32 %v4275_v19, %v3947_v61  ;;  %v4083_v22 = vmax.f32 %v4082_v8, 0.0  ;;  %v4208_v60 = vadd.f32 %v4207_v3, %v4204_v10 }
 0x2f4   :  { %v4146_v39 = vadd.f32 %v4144_v58, %v4141_v36  ;;  %v4266_v37 = vadd.f32 %v4265_v55, %v4262_v52  ;;  %v4213_v25 = vrot.slane %v4211_v7, 2  ;;  %v4217_v47 = vstv %s8813_s28 }
 0x2f5   :  { %v4221_v51 = vstv %s8821_s29  ;;  %v4282_v14 = vrot.slane %v4280_v9, 2  ;;  %v4286_v40 = vstv %s8827_s30  ;;  %v4290_v29 = vstv %s8829_s8 }
 0x2f6   :  { %v4148_v57 = vadd.f32 %v4147_v50, %v4146_v39  ;;  %v4273_v12 = vadd.f32 %v4271_v34, %v4266_v37  ;;  %v4158_v21 = vrot.slane %v4156_v17, 2  ;;  %v4163_v43 = vmul.f32 %v4077_v0, %v8098_v53 }
 0x2f7   :  { %v4161_v61 = vmul.f32 %v4073_v63, %v8098_v53  ;;  %v4215_v56 = vadd.f32 %v4213_v25, %v4208_v60  ;;  %v4218_v59 = vmul.f32 %v4217_v47, %v4083_v22  ;;  %v4222_v1 = vmul.f32 %v4221_v51, %v4083_v22 }
 0x2f8   :  { %v4153_v4 = vadd.f32 %v4151_v33, %v4148_v57  ;;  %v4277_v31 = vadd.f32 %v4276_v24, %v4273_v12  ;;  %v4287_v46 = vmul.f32 %v4286_v40, %v4083_v22  ;;  %v4291_v38 = vmul.f32 %v4290_v29, %v4083_v22 }
 0x2f9   :  { %v4165_v45 = vrot.slane %v4163_v43, 2  ;;  %v4224_v6 = vrot.slane %v4222_v1, 2  ;;  %v4219_v0 = vadd.f32 %v4218_v59, %v4215_v56  ;;  %v4228_v30 = vstv %s4510_s9 }
 0x2fa   :  { %v4155_v48 = vadd.f32 %v4154_v42, %v4153_v4  ;;  %v4284_v49 = vadd.f32 %v4282_v14, %v4277_v31  ;;  %v4293_v41 = vrot.slane %v4291_v38, 2  ;;  %v4232_v23 = vstv %s4511_s2 }
 0x2fb   :  { %v4297_v53 = vstv %s4523_s4  ;;  %v4301_v63 = vstv %s4524_s10  ;;  %v4226_v27 = vadd.f32 %v4224_v6, %v4219_v0 }
 0x2fc   :  { %v4160_v26 = vadd.f32 %v4158_v21, %v4155_v48  ;;  %v4288_v32 = vadd.f32 %v4287_v46, %v4284_v49 }
 0x2fe   :  { %v4162_v18 = vadd.f32 %v4161_v61, %v4160_v26  ;;  %v4295_v13 = vadd.f32 %v4293_v41, %v4288_v32 }
 0x300   :  { %v4167_v35 = vadd.f32 %v4165_v45, %v4162_v18 }
 0x302   :  { %v4168_v54 = vmax.f32 %v4167_v35, 0.0 }
 0x304   :  { %v4229_v16 = vmul.f32 %v4228_v30, %v4168_v54  ;;  %v4233_v28 = vmul.f32 %v4232_v23, %v4168_v54  ;;  %v4298_v50 = vmul.f32 %v4297_v53, %v4168_v54  ;;  %v4302_v5 = vmul.f32 %v4301_v63, %v4168_v54 }
 0x306   :  { %v4230_v62 = vadd.f32 %v4229_v16, %v4226_v27  ;;  %v4235_v58 = vrot.slane %v4233_v28, 2  ;;  %v4299_v15 = vadd.f32 %v4298_v50, %v4295_v13  ;;  %v4304_v3 = vrot.slane %v4302_v5, 2 }
 0x308   :  { %v4237_v11 = vadd.f32 %v4235_v58, %v4230_v62  ;;  %v4306_v20 = vadd.f32 %v4304_v3, %v4299_v15 }
 0x30a   :  { %v4307_v7 = vmax.f32 %v4237_v11, %v4306_v20 }
 0x30c   :  { %v4308_v2 = vsub.f32 %v4237_v11, %v4307_v7  ;;  %v4311_v55 = vsub.f32 %v4306_v20, %v4307_v7 }
 0x30e   :  { %v4309_v8 = vmul.f32 1.442695, %v4308_v2  ;;  %v4312_v10 = vmul.f32 1.442695, %v4311_v55 }
 0x310   :  { %4531 = vpow2.f32 %v4309_v8 }
 0x311   :  { %4533 = vpow2.f32 %v4312_v10 }
 0x31a   :  { %v4532_v19 = vpop.eup %4531 }
 0x31b   :  { %v4534_v44 = vpop.eup %4533 }
 0x31c   :  { %v4314_v36 = vadd.f32 %v4534_v44, %v4532_v19 }
 0x31e   :  { %4535 = vrcp.f32 %v4314_v36 }
 0x328   :  { %v4536_v52 = vpop.eup %4535 }
 0x329   :  { %v4316_v34 = vmul.f32 %v4536_v52, %v4532_v19  ;;  %v4318_v9 = vmul.f32 %v4536_v52, %v4534_v44 }
 0x32b   :  { %4317 = vst [vmem:[%s8865_s7] sm:$0x1] %v4316_v34  ;;  %4319 = vst [vmem:[%s8865_s7 + $0x1] sm:$0x1] %v4318_v9 }
 0x32c   :  { %4324 = vsyncpa [#allocation3], 1 }
 0x32d   :  { %4325 = vsyncpa [#allocation5], 1 }
 0x32e   :  { %4326 = vsyncpa [#allocation8], 1 }
 0x32f   :  { %4327 = vsyncpa [#allocation11], 1 }

</bundles_post_ra>
